<compile_context>
chip_gen: v5e
topology: v5e:2x2
jax: 0.10.0
libtpu: 0.0.40
codegen_flags: <defaults>
</compile_context>

<pallas_src>
import functools

import jax
import jax.numpy as jnp
import numpy as np
from jax import lax
from jax.experimental import pallas as pl
from jax.experimental.pallas import tpu as pltpu


# ----------------------------------------------------------------------------
# The fused whole-network Pallas kernel (one grid step == one batch element)
# ----------------------------------------------------------------------------
def _resnet_kernel(*refs, grid0, block_dims):
    f32 = jnp.float32
    bf16 = jnp.bfloat16

    h0, w0 = grid0                      # input-conv output grid (valid)
    ww0 = w0 + 2                        # "wide" grid row length (2 pad cols)
    r0 = h0 * ww0
    n_blocks = len(block_dims)
    n_sub = sum(1 for i, (_, _, s) in enumerate(block_dims)
                if s == 2 and i < n_blocks - 1)

    it = iter(refs)
    p0_ref = next(it)                   # (1, r0, kh*kw*cin) bf16 im2col patches
    w0_ref = next(it)                   # (kh*kw*cin, c0)    bf16
    b0_ref = next(it)                   # (1, c0)            f32
    m0_ref = next(it)                   # (r0, 1)            f32 column mask
    smp_ref = next(it)                  # (r1, r0)           bf16 pool subsample
    blocks = [tuple(next(it) for _ in range(9)) for _ in range(n_blocks)]
    subs = [next(it) for _ in range(n_sub)]
    o_ref = next(it)                    # (1, r_last, c_last) f32
    mp_ref = next(it)                   # max-pool padded-grid scratch (f32)
    pads = [next(it) for _ in range(n_blocks)]   # per-block 3x3 pad scratch

    def mxu(a, b):                      # bf16 x bf16 -> f32 accumulation (MXU)
        return jnp.dot(a.astype(bf16), b.astype(bf16),
                       preferred_element_type=f32)

    # ---- input block: 7x7/s2 conv (+folded BN +ReLU), then 3x3/s2 max-pool ----
    y0 = jnp.maximum(mxu(p0_ref[0], w0_ref[...]) + b0_ref[...], 0.0)
    y0 = y0 * m0_ref[...]               # zero wide-grid pad columns
    mp_ref[...] = jnp.zeros_like(mp_ref)   # zero-pad is exact for post-ReLU max
    mp_ref[pl.ds(1 + ww0, r0), :] = y0
    pooled = mp_ref[pl.ds(0, r0), :]
    for k in range(1, 9):
        off = (k // 3) * ww0 + (k % 3)
        pooled = jnp.maximum(pooled, mp_ref[pl.ds(off, r0), :])
    x = mxu(smp_ref[...], pooled)       # stride-2 subsample -> (r1, c0)

    # ---- bottleneck blocks (conv1 -> conv2 -> conv3 + projection shortcut) ----
    sub_i = 0
    for bi, (hb, wb, stride) in enumerate(block_dims):
        w1, b1, w2, b2, w3, b3, wd, bd, msk = blocks[bi]
        ww = wb + 2
        r = hb * ww
        pad = pads[bi]
        xb = x.astype(bf16)

        # conv1 (1x1) + ReLU; zero the wide-grid pad columns before the 3x3 conv.
        y1 = jnp.maximum(mxu(xb, w1[...]) + b1[...], 0.0) * msk[...]

        # conv2 (3x3, pad 1, computed at stride 1): 9 shifted contiguous windows
        # of the flattened zero-padded grid in VMEM scratch, MXU-accumulated.
        pad[...] = jnp.zeros_like(pad)
        pad[pl.ds(1 + ww, r), :] = y1
        acc = b2[...]
        for k in range(9):
            off = (k // 3) * ww + (k % 3)
            acc = acc + mxu(pad[pl.ds(off, r), :], w2[k])
        y2 = jnp.maximum(acc, 0.0)

        # conv3 (1x1) + projection shortcut + residual add + ReLU (all in f32).
        y3 = mxu(y2, w3[...]) + b3[...]
        idn = mxu(xb, wd[...]) + bd[...]
        x = jnp.maximum(y3 + idn, 0.0)

        # stride 2: subsample with a constant 0/1 selection matrix (MXU); the
        # last block's stride is applied by the wrapper on the kernel output.
        if stride == 2 and bi < n_blocks - 1:
            x = mxu(subs[sub_i][...], x)
            sub_i += 1

    o_ref[0] = x


# ----------------------------------------------------------------------------
# Host-side glue: BN folding, im2col for the 7x7 conv, constant matrices, specs
# ----------------------------------------------------------------------------
def _fold_bn_bf16(p):
    """Fold eval-mode BN scale into the conv weight; bf16 weight, f32 bias."""
    scale = p["scale"].reshape((1,) * (p["w"].ndim - 1) + (-1,))
    return (p["w"] * scale).astype(jnp.bfloat16), p["bias"].astype(jnp.float32)


def _im2col_nhwc(x, kh, kw, stride, pad):
    n, h, w, c = x.shape
    xp = jnp.pad(x, ((0, 0), (pad, pad), (pad, pad), (0, 0)))
    ho = (h + 2 * pad - kh) // stride + 1
    wo = (w + 2 * pad - kw) // stride + 1
    cols = [xp[:, i:i + stride * (ho - 1) + 1:stride,
               j:j + stride * (wo - 1) + 1:stride, :]
            for i in range(kh) for j in range(kw)]
    return jnp.concatenate(cols, axis=-1), ho, wo      # (N, Ho, Wo, kh*kw*C)


def _col_mask(h, w):
    """(h*(w+2), 1) mask: 1 on valid columns of the wide grid, 0 on pad cols."""
    ww = w + 2
    m = np.zeros((h * ww, 1), np.float32)
    for r in range(h):
        m[r * ww + 1:r * ww + 1 + w, 0] = 1.0
    return jnp.asarray(m)


def _stride2_select(h, w):
    """0/1 matrix: take stride-2 positions of a wide (h, w+2) grid and re-embed
    them into the wide grid of the (ceil(h/2), ceil(w/2)) output (its pad
    columns come out as exact zeros)."""
    ww = w + 2
    ho, wo = (h + 1) // 2, (w + 1) // 2
    wwo = wo + 2
    s = np.zeros((ho * wwo, h * ww), np.float32)
    for oh in range(ho):
        for c in range(1, wo + 1):
            s[oh * wwo + c, (2 * oh) * ww + (2 * c - 1)] = 1.0
    return jnp.asarray(s, jnp.bfloat16)


def _full_spec(a):
    shp = tuple(a.shape)
    return pl.BlockSpec(shp, lambda b, _n=len(shp): (0,) * _n)


def resnet_forward(x_nchw, params):
    n = x_nchw.shape[0]
    x = jnp.transpose(x_nchw, (0, 2, 3, 1)).astype(jnp.float32)  # NCHW -> NHWC

    # ---- input 7x7/s2/p3 conv: im2col in plain JAX, placed on the wide grid ----
    w0_4d, b0 = _fold_bn_bf16(params["input_conv"])
    c0 = w0_4d.shape[-1]
    patches, hc, wc = _im2col_nhwc(x, 7, 7, 2, 3)
    kdim = patches.shape[-1]
    patches = jnp.pad(patches, ((0, 0), (0, 0), (1, 1), (0, 0)))  # wide grid
    patches = patches.reshape(n, hc * (wc + 2), kdim).astype(jnp.bfloat16)
    w0m = w0_4d.reshape(kdim, c0)

    # ---- static spatial plan (per-block input grid + stride) ----
    hh, ww = (hc + 1) // 2, (wc + 1) // 2            # after 3x3/s2 max-pool
    block_dims = []
    for bp in params["blocks"]:
        block_dims.append((hh, ww, bp["stride"]))
        if bp["stride"] == 2:
            hh, ww = (hh + 1) // 2, (ww + 1) // 2
    block_dims = tuple(block_dims)

    # ---- constant helper tensors ----
    mask0 = _col_mask(hc, wc)
    smp = _stride2_select(hc, wc)
    subs = [_stride2_select(hb, wb)
            for i, (hb, wb, s) in enumerate(block_dims)
            if s == 2 and i < len(block_dims) - 1]

    # ---- prepared per-block weights (BN folded, bf16, matmul layout) ----
    blk_inputs = []
    scratch = [pltpu.VMEM(((hc + 2) * (wc + 2) + 2, c0), jnp.float32)]
    for (hb, wb, _s), bp in zip(block_dims, params["blocks"]):
        w1_, b1_ = _fold_bn_bf16(bp["conv1"])
        w2_, b2_ = _fold_bn_bf16(bp["conv2"])
        w3_, b3_ = _fold_bn_bf16(bp["conv3"])
        cin, pch = w1_.shape[2], w1_.shape[3]
        cout = w3_.shape[3]
        if "down" in bp:
            wd_, bd_ = _fold_bn_bf16(bp["down"])
            wd_ = wd_.reshape(cin, cout)
        else:
            # Identity shortcut (never used in this configuration): emulated with
            # an identity projection (shortcut then passes through the bf16 MXU).
            wd_ = jnp.eye(cin, cout, dtype=jnp.bfloat16)
            bd_ = jnp.zeros((1, cout), jnp.float32)
        blk_inputs += [w1_.reshape(cin, pch), b1_,
                       w2_.reshape(9, pch, pch), b2_,
                       w3_.reshape(pch, cout), b3_,
                       wd_, bd_, _col_mask(hb, wb)]
        scratch.append(pltpu.VMEM(((hb + 2) * (wb + 2) + 2, pch), jnp.float32))

    inputs = [patches, w0m, b0, mask0, smp] + blk_inputs + subs

    hl, wl, sl = block_dims[-1]
    r_last = hl * (wl + 2)
    c_last = params["blocks"][-1]["conv3"]["bias"].shape[-1]

    in_specs = [pl.BlockSpec((1,) + patches.shape[1:], lambda b: (b, 0, 0))]
    in_specs += [_full_spec(a) for a in inputs[1:]]

    kernel = functools.partial(_resnet_kernel, grid0=(hc, wc),
                               block_dims=block_dims)
    out_wide = pl.pallas_call(
        kernel,
        grid=(n,),
        in_specs=in_specs,
        out_specs=pl.BlockSpec((1, r_last, c_last), lambda b: (b, 0, 0)),
        out_shape=jax.ShapeDtypeStruct((n, r_last, c_last), jnp.float32),
        scratch_shapes=scratch,
        compiler_params=pltpu.CompilerParams(
            dimension_semantics=("parallel",)),
    )(*inputs)

    # ---- epilogue: drop wide-grid pad columns, apply the last block's stride ----
    ow = out_wide.reshape(n, hl, wl + 2, c_last)
    if sl == 2:
        wo = (wl + 1) // 2
        out = ow[:, ::2, 1:2 * wo:2, :]
    else:
        out = ow[:, :, 1:1 + wl, :]
    return jnp.transpose(out, (0, 3, 1, 2))             # NHWC -> NCHW


# ----------------------------------------------------------------------------
# Network parameters (Bottleneck ResNet, synthetic deterministic params)
# ----------------------------------------------------------------------------
def _conv_bn_params(key, kh, kw, cin, cout):
    k1, k2, k3, k4, k5 = jax.random.split(key, 5)
    w = jax.random.normal(k1, (kh, kw, cin, cout), jnp.float32) / jnp.sqrt(
        float(kh * kw * cin))
    gamma = 1.0 + 0.1 * jax.random.normal(k2, (cout,), jnp.float32)
    beta = 0.1 * jax.random.normal(k3, (cout,), jnp.float32)
    mean = 0.1 * jax.random.normal(k4, (cout,), jnp.float32)
    var = 0.5 + jnp.abs(jax.random.normal(k5, (cout,), jnp.float32))
    eps = 1e-5
    scale = gamma / jnp.sqrt(var + eps)        # fold eval-mode BN into affine
    bias = beta - mean * scale
    return {"w": w, "scale": scale.reshape(1, cout), "bias": bias.reshape(1, cout)}


def init_resnet_params(key, in_channels=3, base=8):
    keys = iter(jax.random.split(key, 64))
    params = {"input_conv": _conv_bn_params(next(keys), 7, 7, in_channels, base)}
    blocks = []
    inplanes = base
    # one Bottleneck per stage: block2 (stride 1), block3/4/5 (stride 2)
    for planes, stride in [(base, 1), (2 * base, 2), (4 * base, 2), (8 * base, 2)]:
        bp = {
            "stride": stride,
            "conv1": _conv_bn_params(next(keys), 1, 1, inplanes, planes),
            "conv2": _conv_bn_params(next(keys), 3, 3, planes, planes),
            "conv3": _conv_bn_params(next(keys), 1, 1, planes, planes * 4),
        }
        if stride != 1 or inplanes != planes * 4:
            bp["down"] = _conv_bn_params(next(keys), 1, 1, inplanes, planes * 4)
        blocks.append(bp)
        inplanes = planes * 4
    params["blocks"] = blocks
    return params


# ----------------------------------------------------------------------------
# Pure-JAX reference (correctness check: same folded bf16 weights / f32 accum)
# ----------------------------------------------------------------------------
def _ref_conv_bn(x, p, *, stride, pad, relu, residual=None):
    w, b = _fold_bn_bf16(p)
    y = lax.conv_general_dilated(
        x.astype(jnp.bfloat16), w, (stride, stride), [(pad, pad), (pad, pad)],
        dimension_numbers=("NHWC", "HWIO", "NHWC"),
        preferred_element_type=jnp.float32)
    y = y + b.reshape(1, 1, 1, -1)
    if residual is not None:
        y = y + residual
    if relu:
        y = jnp.maximum(y, 0.0)
    return y


def _ref_bottleneck(x, bp):
    s = bp["stride"]
    out = _ref_conv_bn(x, bp["conv1"], stride=1, pad=0, relu=True)
    out = _ref_conv_bn(out, bp["conv2"], stride=s, pad=1, relu=True)
    identity = x
    if "down" in bp:
        identity = _ref_conv_bn(x, bp["down"], stride=s, pad=0, relu=False)
    return _ref_conv_bn(out, bp["conv3"], stride=1, pad=0, relu=True,
                        residual=identity)


def ref_forward(x_nchw, params):
    x = jnp.transpose(x_nchw, (0, 2, 3, 1)).astype(jnp.float32)
    x = _ref_conv_bn(x, params["input_conv"], stride=2, pad=3, relu=True)
    x = lax.reduce_window(x, -jnp.inf, lax.max, (1, 3, 3, 1), (1, 2, 2, 1),
                          [(0, 0), (1, 1), (1, 1), (0, 0)])
    for bp in params["blocks"]:
        x = _ref_bottleneck(x, bp)
    return jnp.transpose(x, (0, 3, 1, 2))


# ----------------------------------------------------------------------------
if __name__ == "__main__":
    key = jax.random.PRNGKey(0)
    kx, kp = jax.random.split(key)
    x = jax.random.normal(kx, (2, 3, 32, 32), jnp.float32)   # NCHW, like PyTorch
    params = init_resnet_params(kp, in_channels=3, base=8)

    out = jax.block_until_ready(resnet_forward(x, params))
    assert out.shape == (2, 256, 1, 1), out.shape            # stride 32, 256 feats

    ref = jax.block_until_ready(ref_forward(x, params))
    err = float(jnp.max(jnp.abs(out - ref)))
    if not bool(jnp.allclose(out, ref, rtol=1e-2, atol=1e-2)):
        raise AssertionError(f"mismatch: max abs err {err}")
    print("KERNEL_OK")
</pallas_src>

<mosaic_0001>
module attributes {stable_mosaic.version = 11 : i64} {
  func.func @_resnet_kernel(%arg0: i32, %arg1: memref<1x288x147xbf16, #tpu.memory_space<vmem>>, %arg2: memref<147x8xbf16, #tpu.memory_space<vmem>>, %arg3: memref<1x8xf32, #tpu.memory_space<vmem>>, %arg4: memref<288x1xf32, #tpu.memory_space<vmem>>, %arg5: memref<80x288xbf16, #tpu.memory_space<vmem>>, %arg6: memref<8x8xbf16, #tpu.memory_space<vmem>>, %arg7: memref<1x8xf32, #tpu.memory_space<vmem>>, %arg8: memref<9x8x8xbf16, #tpu.memory_space<vmem>>, %arg9: memref<1x8xf32, #tpu.memory_space<vmem>>, %arg10: memref<8x32xbf16, #tpu.memory_space<vmem>>, %arg11: memref<1x32xf32, #tpu.memory_space<vmem>>, %arg12: memref<8x32xbf16, #tpu.memory_space<vmem>>, %arg13: memref<1x32xf32, #tpu.memory_space<vmem>>, %arg14: memref<80x1xf32, #tpu.memory_space<vmem>>, %arg15: memref<32x16xbf16, #tpu.memory_space<vmem>>, %arg16: memref<1x16xf32, #tpu.memory_space<vmem>>, %arg17: memref<9x16x16xbf16, #tpu.memory_space<vmem>>, %arg18: memref<1x16xf32, #tpu.memory_space<vmem>>, %arg19: memref<16x64xbf16, #tpu.memory_space<vmem>>, %arg20: memref<1x64xf32, #tpu.memory_space<vmem>>, %arg21: memref<32x64xbf16, #tpu.memory_space<vmem>>, %arg22: memref<1x64xf32, #tpu.memory_space<vmem>>, %arg23: memref<80x1xf32, #tpu.memory_space<vmem>>, %arg24: memref<64x32xbf16, #tpu.memory_space<vmem>>, %arg25: memref<1x32xf32, #tpu.memory_space<vmem>>, %arg26: memref<9x32x32xbf16, #tpu.memory_space<vmem>>, %arg27: memref<1x32xf32, #tpu.memory_space<vmem>>, %arg28: memref<32x128xbf16, #tpu.memory_space<vmem>>, %arg29: memref<1x128xf32, #tpu.memory_space<vmem>>, %arg30: memref<64x128xbf16, #tpu.memory_space<vmem>>, %arg31: memref<1x128xf32, #tpu.memory_space<vmem>>, %arg32: memref<24x1xf32, #tpu.memory_space<vmem>>, %arg33: memref<128x64xbf16, #tpu.memory_space<vmem>>, %arg34: memref<1x64xf32, #tpu.memory_space<vmem>>, %arg35: memref<9x64x64xbf16, #tpu.memory_space<vmem>>, %arg36: memref<1x64xf32, #tpu.memory_space<vmem>>, %arg37: memref<64x256xbf16, #tpu.memory_space<vmem>>, %arg38: memref<1x256xf32, #tpu.memory_space<vmem>>, %arg39: memref<128x256xbf16, #tpu.memory_space<vmem>>, %arg40: memref<1x256xf32, #tpu.memory_space<vmem>>, %arg41: memref<8x1xf32, #tpu.memory_space<vmem>>, %arg42: memref<24x80xbf16, #tpu.memory_space<vmem>>, %arg43: memref<8x24xbf16, #tpu.memory_space<vmem>>, %arg44: memref<1x8x256xf32, #tpu.memory_space<vmem>>, %arg45: memref<326x8xf32, #tpu.memory_space<vmem>>, %arg46: memref<102x8xf32, #tpu.memory_space<vmem>>, %arg47: memref<102x16xf32, #tpu.memory_space<vmem>>, %arg48: memref<38x32xf32, #tpu.memory_space<vmem>>, %arg49: memref<18x64xf32, #tpu.memory_space<vmem>>) attributes {dimension_semantics = [#tpu.dimension_semantics<parallel>], iteration_bounds = array<i64: 2>, scalar_prefetch = 0 : i64, scratch_operands = 5 : i64, tpu.core_type = #tpu.core_type<tc>, window_params = [{transform_indices = @transform_0, window_bounds = array<i64: 1, 288, 147>}, {pipeline_mode = #tpu.pipeline_mode<synchronous>, transform_indices = @transform_1, window_bounds = array<i64: 147, 8>}, {pipeline_mode = #tpu.pipeline_mode<synchronous>, transform_indices = @transform_2, window_bounds = array<i64: 1, 8>}, {pipeline_mode = #tpu.pipeline_mode<synchronous>, transform_indices = @transform_3, window_bounds = array<i64: 288, 1>}, {pipeline_mode = #tpu.pipeline_mode<synchronous>, transform_indices = @transform_4, window_bounds = array<i64: 80, 288>}, {pipeline_mode = #tpu.pipeline_mode<synchronous>, transform_indices = @transform_5, window_bounds = array<i64: 8, 8>}, {pipeline_mode = #tpu.pipeline_mode<synchronous>, transform_indices = @transform_6, window_bounds = array<i64: 1, 8>}, {pipeline_mode = #tpu.pipeline_mode<synchronous>, transform_indices = @transform_7, window_bounds = array<i64: 9, 8, 8>}, {pipeline_mode = #tpu.pipeline_mode<synchronous>, transform_indices = @transform_8, window_bounds = array<i64: 1, 8>}, {pipeline_mode = #tpu.pipeline_mode<synchronous>, transform_indices = @transform_9, window_bounds = array<i64: 8, 32>}, {pipeline_mode = #tpu.pipeline_mode<synchronous>, transform_indices = @transform_10, window_bounds = array<i64: 1, 32>}, {pipeline_mode = #tpu.pipeline_mode<synchronous>, transform_indices = @transform_11, window_bounds = array<i64: 8, 32>}, {pipeline_mode = #tpu.pipeline_mode<synchronous>, transform_indices = @transform_12, window_bounds = array<i64: 1, 32>}, {pipeline_mode = #tpu.pipeline_mode<synchronous>, transform_indices = @transform_13, window_bounds = array<i64: 80, 1>}, {pipeline_mode = #tpu.pipeline_mode<synchronous>, transform_indices = @transform_14, window_bounds = array<i64: 32, 16>}, {pipeline_mode = #tpu.pipeline_mode<synchronous>, transform_indices = @transform_15, window_bounds = array<i64: 1, 16>}, {pipeline_mode = #tpu.pipeline_mode<synchronous>, transform_indices = @transform_16, window_bounds = array<i64: 9, 16, 16>}, {pipeline_mode = #tpu.pipeline_mode<synchronous>, transform_indices = @transform_17, window_bounds = array<i64: 1, 16>}, {pipeline_mode = #tpu.pipeline_mode<synchronous>, transform_indices = @transform_18, window_bounds = array<i64: 16, 64>}, {pipeline_mode = #tpu.pipeline_mode<synchronous>, transform_indices = @transform_19, window_bounds = array<i64: 1, 64>}, {pipeline_mode = #tpu.pipeline_mode<synchronous>, transform_indices = @transform_20, window_bounds = array<i64: 32, 64>}, {pipeline_mode = #tpu.pipeline_mode<synchronous>, transform_indices = @transform_21, window_bounds = array<i64: 1, 64>}, {pipeline_mode = #tpu.pipeline_mode<synchronous>, transform_indices = @transform_22, window_bounds = array<i64: 80, 1>}, {pipeline_mode = #tpu.pipeline_mode<synchronous>, transform_indices = @transform_23, window_bounds = array<i64: 64, 32>}, {pipeline_mode = #tpu.pipeline_mode<synchronous>, transform_indices = @transform_24, window_bounds = array<i64: 1, 32>}, {pipeline_mode = #tpu.pipeline_mode<synchronous>, transform_indices = @transform_25, window_bounds = array<i64: 9, 32, 32>}, {pipeline_mode = #tpu.pipeline_mode<synchronous>, transform_indices = @transform_26, window_bounds = array<i64: 1, 32>}, {pipeline_mode = #tpu.pipeline_mode<synchronous>, transform_indices = @transform_27, window_bounds = array<i64: 32, 128>}, {pipeline_mode = #tpu.pipeline_mode<synchronous>, transform_indices = @transform_28, window_bounds = array<i64: 1, 128>}, {pipeline_mode = #tpu.pipeline_mode<synchronous>, transform_indices = @transform_29, window_bounds = array<i64: 64, 128>}, {pipeline_mode = #tpu.pipeline_mode<synchronous>, transform_indices = @transform_30, window_bounds = array<i64: 1, 128>}, {pipeline_mode = #tpu.pipeline_mode<synchronous>, transform_indices = @transform_31, window_bounds = array<i64: 24, 1>}, {pipeline_mode = #tpu.pipeline_mode<synchronous>, transform_indices = @transform_32, window_bounds = array<i64: 128, 64>}, {pipeline_mode = #tpu.pipeline_mode<synchronous>, transform_indices = @transform_33, window_bounds = array<i64: 1, 64>}, {pipeline_mode = #tpu.pipeline_mode<synchronous>, transform_indices = @transform_34, window_bounds = array<i64: 9, 64, 64>}, {pipeline_mode = #tpu.pipeline_mode<synchronous>, transform_indices = @transform_35, window_bounds = array<i64: 1, 64>}, {pipeline_mode = #tpu.pipeline_mode<synchronous>, transform_indices = @transform_36, window_bounds = array<i64: 64, 256>}, {pipeline_mode = #tpu.pipeline_mode<synchronous>, transform_indices = @transform_37, window_bounds = array<i64: 1, 256>}, {pipeline_mode = #tpu.pipeline_mode<synchronous>, transform_indices = @transform_38, window_bounds = array<i64: 128, 256>}, {pipeline_mode = #tpu.pipeline_mode<synchronous>, transform_indices = @transform_39, window_bounds = array<i64: 1, 256>}, {pipeline_mode = #tpu.pipeline_mode<synchronous>, transform_indices = @transform_40, window_bounds = array<i64: 8, 1>}, {pipeline_mode = #tpu.pipeline_mode<synchronous>, transform_indices = @transform_41, window_bounds = array<i64: 24, 80>}, {pipeline_mode = #tpu.pipeline_mode<synchronous>, transform_indices = @transform_42, window_bounds = array<i64: 8, 24>}, {transform_indices = @transform_43, window_bounds = array<i64: 1, 8, 256>}]} {
    %c0 = arith.constant 0 : index
    %c0_0 = arith.constant 0 : index
    %c0_1 = arith.constant 0 : index
    %0 = vector.load %arg1[%c0, %c0_0, %c0_1] : memref<1x288x147xbf16, #tpu.memory_space<vmem>>, vector<1x288x147xbf16>
    %1 = vector.shape_cast %0 : vector<1x288x147xbf16> to vector<288x147xbf16>
    %c0_2 = arith.constant 0 : index
    %c0_3 = arith.constant 0 : index
    %2 = vector.load %arg2[%c0_2, %c0_3] : memref<147x8xbf16, #tpu.memory_space<vmem>>, vector<147x8xbf16>
    %cst = arith.constant dense<0.000000e+00> : vector<288x8xf32>
    %3 = tpu.matmul %1, %2, %cst {dimension_numbers = #tpu.dot_dimension_numbers<[1], [0], [0], [1], [0, 0, 1, 1], [], []>} : vector<288x147xbf16>, vector<147x8xbf16>, vector<288x8xf32> -> vector<288x8xf32>
    %c0_4 = arith.constant 0 : index
    %c0_5 = arith.constant 0 : index
    %4 = vector.load %arg3[%c0_4, %c0_5] : memref<1x8xf32, #tpu.memory_space<vmem>>, vector<1x8xf32>
    %5 = vector.broadcast %4 : vector<1x8xf32> to vector<288x8xf32>
    %6 = arith.addf %3, %5 : vector<288x8xf32>
    %cst_6 = arith.constant 0.000000e+00 : f32
    %7 = vector.broadcast %cst_6 : f32 to vector<288x8xf32>
    %8 = arith.maximumf %6, %7 : vector<288x8xf32>
    %c0_7 = arith.constant 0 : index
    %c0_8 = arith.constant 0 : index
    %9 = vector.load %arg4[%c0_7, %c0_8] : memref<288x1xf32, #tpu.memory_space<vmem>>, vector<288x1xf32>
    %10 = vector.broadcast %9 : vector<288x1xf32> to vector<288x8xf32>
    %11 = arith.mulf %8, %10 : vector<288x8xf32>
    %cst_9 = arith.constant 0.000000e+00 : f32
    %12 = vector.broadcast %cst_9 : f32 to vector<326x8xf32>
    %c0_10 = arith.constant 0 : index
    %c0_11 = arith.constant 0 : index
    %13 = vector.load %arg45[%c0_10, %c0_11] : memref<326x8xf32, #tpu.memory_space<vmem>>, vector<326x8xf32>
    tpu.vector_store %arg45[%c0_10, %c0_11], %12 {strides = array<i32>} : memref<326x8xf32, #tpu.memory_space<vmem>>, vector<326x8xf32>,
    %c19 = arith.constant 19 : index
    %c0_12 = arith.constant 0 : index
    %14 = vector.load %arg45[%c19, %c0_12] : memref<326x8xf32, #tpu.memory_space<vmem>>, vector<288x8xf32>
    tpu.vector_store %arg45[%c19, %c0_12], %11 {strides = array<i32>} : memref<326x8xf32, #tpu.memory_space<vmem>>, vector<288x8xf32>,
    %c0_13 = arith.constant 0 : index
    %c0_14 = arith.constant 0 : index
    %15 = vector.load %arg45[%c0_13, %c0_14] : memref<326x8xf32, #tpu.memory_space<vmem>>, vector<288x8xf32>
    %c1 = arith.constant 1 : index
    %c0_15 = arith.constant 0 : index
    %16 = vector.load %arg45[%c1, %c0_15] : memref<326x8xf32, #tpu.memory_space<vmem>>, vector<288x8xf32>
    %17 = arith.maximumf %15, %16 : vector<288x8xf32>
    %c2 = arith.constant 2 : index
    %c0_16 = arith.constant 0 : index
    %18 = vector.load %arg45[%c2, %c0_16] : memref<326x8xf32, #tpu.memory_space<vmem>>, vector<288x8xf32>
    %19 = arith.maximumf %17, %18 : vector<288x8xf32>
    %c18 = arith.constant 18 : index
    %c0_17 = arith.constant 0 : index
    %20 = vector.load %arg45[%c18, %c0_17] : memref<326x8xf32, #tpu.memory_space<vmem>>, vector<288x8xf32>
    %21 = arith.maximumf %19, %20 : vector<288x8xf32>
    %c19_18 = arith.constant 19 : index
    %c0_19 = arith.constant 0 : index
    %22 = vector.load %arg45[%c19_18, %c0_19] : memref<326x8xf32, #tpu.memory_space<vmem>>, vector<288x8xf32>
    %23 = arith.maximumf %21, %22 : vector<288x8xf32>
    %c20 = arith.constant 20 : index
    %c0_20 = arith.constant 0 : index
    %24 = vector.load %arg45[%c20, %c0_20] : memref<326x8xf32, #tpu.memory_space<vmem>>, vector<288x8xf32>
    %25 = arith.maximumf %23, %24 : vector<288x8xf32>
    %c36 = arith.constant 36 : index
    %c0_21 = arith.constant 0 : index
    %26 = vector.load %arg45[%c36, %c0_21] : memref<326x8xf32, #tpu.memory_space<vmem>>, vector<288x8xf32>
    %27 = arith.maximumf %25, %26 : vector<288x8xf32>
    %c37 = arith.constant 37 : index
    %c0_22 = arith.constant 0 : index
    %28 = vector.load %arg45[%c37, %c0_22] : memref<326x8xf32, #tpu.memory_space<vmem>>, vector<288x8xf32>
    %29 = arith.maximumf %27, %28 : vector<288x8xf32>
    %c38 = arith.constant 38 : index
    %c0_23 = arith.constant 0 : index
    %30 = vector.load %arg45[%c38, %c0_23] : memref<326x8xf32, #tpu.memory_space<vmem>>, vector<288x8xf32>
    %31 = arith.maximumf %29, %30 : vector<288x8xf32>
    %c0_24 = arith.constant 0 : index
    %c0_25 = arith.constant 0 : index
    %32 = vector.load %arg5[%c0_24, %c0_25] : memref<80x288xbf16, #tpu.memory_space<vmem>>, vector<80x288xbf16>
    %33 = arith.truncf %31 : vector<288x8xf32> to vector<288x8xbf16>
    %cst_26 = arith.constant dense<0.000000e+00> : vector<80x8xf32>
    %34 = tpu.matmul %32, %33, %cst_26 {dimension_numbers = #tpu.dot_dimension_numbers<[1], [0], [0], [1], [0, 0, 1, 1], [], []>} : vector<80x288xbf16>, vector<288x8xbf16>, vector<80x8xf32> -> vector<80x8xf32>
    %35 = arith.truncf %34 : vector<80x8xf32> to vector<80x8xbf16>
    %c0_27 = arith.constant 0 : index
    %c0_28 = arith.constant 0 : index
    %36 = vector.load %arg6[%c0_27, %c0_28] : memref<8x8xbf16, #tpu.memory_space<vmem>>, vector<8x8xbf16>
    %cst_29 = arith.constant dense<0.000000e+00> : vector<80x8xf32>
    %37 = tpu.matmul %35, %36, %cst_29 {dimension_numbers = #tpu.dot_dimension_numbers<[1], [0], [0], [1], [0, 0, 1, 1], [], []>} : vector<80x8xbf16>, vector<8x8xbf16>, vector<80x8xf32> -> vector<80x8xf32>
    %c0_30 = arith.constant 0 : index
    %c0_31 = arith.constant 0 : index
    %38 = vector.load %arg7[%c0_30, %c0_31] : memref<1x8xf32, #tpu.memory_space<vmem>>, vector<1x8xf32>
    %39 = vector.broadcast %38 : vector<1x8xf32> to vector<80x8xf32>
    %40 = arith.addf %37, %39 : vector<80x8xf32>
    %cst_32 = arith.constant 0.000000e+00 : f32
    %41 = vector.broadcast %cst_32 : f32 to vector<80x8xf32>
    %42 = arith.maximumf %40, %41 : vector<80x8xf32>
    %c0_33 = arith.constant 0 : index
    %c0_34 = arith.constant 0 : index
    %43 = vector.load %arg14[%c0_33, %c0_34] : memref<80x1xf32, #tpu.memory_space<vmem>>, vector<80x1xf32>
    %44 = vector.broadcast %43 : vector<80x1xf32> to vector<80x8xf32>
    %45 = arith.mulf %42, %44 : vector<80x8xf32>
    %cst_35 = arith.constant 0.000000e+00 : f32
    %46 = vector.broadcast %cst_35 : f32 to vector<102x8xf32>
    %c0_36 = arith.constant 0 : index
    %c0_37 = arith.constant 0 : index
    %47 = vector.load %arg46[%c0_36, %c0_37] : memref<102x8xf32, #tpu.memory_space<vmem>>, vector<102x8xf32>
    tpu.vector_store %arg46[%c0_36, %c0_37], %46 {strides = array<i32>} : memref<102x8xf32, #tpu.memory_space<vmem>>, vector<102x8xf32>,
    %c11 = arith.constant 11 : index
    %c0_38 = arith.constant 0 : index
    %48 = vector.load %arg46[%c11, %c0_38] : memref<102x8xf32, #tpu.memory_space<vmem>>, vector<80x8xf32>
    tpu.vector_store %arg46[%c11, %c0_38], %45 {strides = array<i32>} : memref<102x8xf32, #tpu.memory_space<vmem>>, vector<80x8xf32>,
    %c0_39 = arith.constant 0 : index
    %c0_40 = arith.constant 0 : index
    %49 = vector.load %arg9[%c0_39, %c0_40] : memref<1x8xf32, #tpu.memory_space<vmem>>, vector<1x8xf32>
    %c0_41 = arith.constant 0 : index
    %c0_42 = arith.constant 0 : index
    %50 = vector.load %arg46[%c0_41, %c0_42] : memref<102x8xf32, #tpu.memory_space<vmem>>, vector<80x8xf32>
    %c0_43 = arith.constant 0 : index
    %c0_44 = arith.constant 0 : index
    %c0_45 = arith.constant 0 : index
    %51 = vector.load %arg8[%c0_43, %c0_44, %c0_45] : memref<9x8x8xbf16, #tpu.memory_space<vmem>>, vector<1x8x8xbf16>
    %52 = vector.shape_cast %51 : vector<1x8x8xbf16> to vector<8x8xbf16>
    %53 = arith.truncf %50 : vector<80x8xf32> to vector<80x8xbf16>
    %cst_46 = arith.constant dense<0.000000e+00> : vector<80x8xf32>
    %54 = tpu.matmul %53, %52, %cst_46 {dimension_numbers = #tpu.dot_dimension_numbers<[1], [0], [0], [1], [0, 0, 1, 1], [], []>} : vector<80x8xbf16>, vector<8x8xbf16>, vector<80x8xf32> -> vector<80x8xf32>
    %55 = vector.broadcast %49 : vector<1x8xf32> to vector<80x8xf32>
    %56 = arith.addf %55, %54 : vector<80x8xf32>
    %c1_47 = arith.constant 1 : index
    %c0_48 = arith.constant 0 : index
    %57 = vector.load %arg46[%c1_47, %c0_48] : memref<102x8xf32, #tpu.memory_space<vmem>>, vector<80x8xf32>
    %c1_49 = arith.constant 1 : index
    %c0_50 = arith.constant 0 : index
    %c0_51 = arith.constant 0 : index
    %58 = vector.load %arg8[%c1_49, %c0_50, %c0_51] : memref<9x8x8xbf16, #tpu.memory_space<vmem>>, vector<1x8x8xbf16>
    %59 = vector.shape_cast %58 : vector<1x8x8xbf16> to vector<8x8xbf16>
    %60 = arith.truncf %57 : vector<80x8xf32> to vector<80x8xbf16>
    %cst_52 = arith.constant dense<0.000000e+00> : vector<80x8xf32>
    %61 = tpu.matmul %60, %59, %cst_52 {dimension_numbers = #tpu.dot_dimension_numbers<[1], [0], [0], [1], [0, 0, 1, 1], [], []>} : vector<80x8xbf16>, vector<8x8xbf16>, vector<80x8xf32> -> vector<80x8xf32>
    %62 = arith.addf %56, %61 : vector<80x8xf32>
    %c2_53 = arith.constant 2 : index
    %c0_54 = arith.constant 0 : index
    %63 = vector.load %arg46[%c2_53, %c0_54] : memref<102x8xf32, #tpu.memory_space<vmem>>, vector<80x8xf32>
    %c2_55 = arith.constant 2 : index
    %c0_56 = arith.constant 0 : index
    %c0_57 = arith.constant 0 : index
    %64 = vector.load %arg8[%c2_55, %c0_56, %c0_57] : memref<9x8x8xbf16, #tpu.memory_space<vmem>>, vector<1x8x8xbf16>
    %65 = vector.shape_cast %64 : vector<1x8x8xbf16> to vector<8x8xbf16>
    %66 = arith.truncf %63 : vector<80x8xf32> to vector<80x8xbf16>
    %cst_58 = arith.constant dense<0.000000e+00> : vector<80x8xf32>
    %67 = tpu.matmul %66, %65, %cst_58 {dimension_numbers = #tpu.dot_dimension_numbers<[1], [0], [0], [1], [0, 0, 1, 1], [], []>} : vector<80x8xbf16>, vector<8x8xbf16>, vector<80x8xf32> -> vector<80x8xf32>
    %68 = arith.addf %62, %67 : vector<80x8xf32>
    %c10 = arith.constant 10 : index
    %c0_59 = arith.constant 0 : index
    %69 = vector.load %arg46[%c10, %c0_59] : memref<102x8xf32, #tpu.memory_space<vmem>>, vector<80x8xf32>
    %c3 = arith.constant 3 : index
    %c0_60 = arith.constant 0 : index
    %c0_61 = arith.constant 0 : index
    %70 = vector.load %arg8[%c3, %c0_60, %c0_61] : memref<9x8x8xbf16, #tpu.memory_space<vmem>>, vector<1x8x8xbf16>
    %71 = vector.shape_cast %70 : vector<1x8x8xbf16> to vector<8x8xbf16>
    %72 = arith.truncf %69 : vector<80x8xf32> to vector<80x8xbf16>
    %cst_62 = arith.constant dense<0.000000e+00> : vector<80x8xf32>
    %73 = tpu.matmul %72, %71, %cst_62 {dimension_numbers = #tpu.dot_dimension_numbers<[1], [0], [0], [1], [0, 0, 1, 1], [], []>} : vector<80x8xbf16>, vector<8x8xbf16>, vector<80x8xf32> -> vector<80x8xf32>
    %74 = arith.addf %68, %73 : vector<80x8xf32>
    %c11_63 = arith.constant 11 : index
    %c0_64 = arith.constant 0 : index
    %75 = vector.load %arg46[%c11_63, %c0_64] : memref<102x8xf32, #tpu.memory_space<vmem>>, vector<80x8xf32>
    %c4 = arith.constant 4 : index
    %c0_65 = arith.constant 0 : index
    %c0_66 = arith.constant 0 : index
    %76 = vector.load %arg8[%c4, %c0_65, %c0_66] : memref<9x8x8xbf16, #tpu.memory_space<vmem>>, vector<1x8x8xbf16>
    %77 = vector.shape_cast %76 : vector<1x8x8xbf16> to vector<8x8xbf16>
    %78 = arith.truncf %75 : vector<80x8xf32> to vector<80x8xbf16>
    %cst_67 = arith.constant dense<0.000000e+00> : vector<80x8xf32>
    %79 = tpu.matmul %78, %77, %cst_67 {dimension_numbers = #tpu.dot_dimension_numbers<[1], [0], [0], [1], [0, 0, 1, 1], [], []>} : vector<80x8xbf16>, vector<8x8xbf16>, vector<80x8xf32> -> vector<80x8xf32>
    %80 = arith.addf %74, %79 : vector<80x8xf32>
    %c12 = arith.constant 12 : index
    %c0_68 = arith.constant 0 : index
    %81 = vector.load %arg46[%c12, %c0_68] : memref<102x8xf32, #tpu.memory_space<vmem>>, vector<80x8xf32>
    %c5 = arith.constant 5 : index
    %c0_69 = arith.constant 0 : index
    %c0_70 = arith.constant 0 : index
    %82 = vector.load %arg8[%c5, %c0_69, %c0_70] : memref<9x8x8xbf16, #tpu.memory_space<vmem>>, vector<1x8x8xbf16>
    %83 = vector.shape_cast %82 : vector<1x8x8xbf16> to vector<8x8xbf16>
    %84 = arith.truncf %81 : vector<80x8xf32> to vector<80x8xbf16>
    %cst_71 = arith.constant dense<0.000000e+00> : vector<80x8xf32>
    %85 = tpu.matmul %84, %83, %cst_71 {dimension_numbers = #tpu.dot_dimension_numbers<[1], [0], [0], [1], [0, 0, 1, 1], [], []>} : vector<80x8xbf16>, vector<8x8xbf16>, vector<80x8xf32> -> vector<80x8xf32>
    %86 = arith.addf %80, %85 : vector<80x8xf32>
    %c20_72 = arith.constant 20 : index
    %c0_73 = arith.constant 0 : index
    %87 = vector.load %arg46[%c20_72, %c0_73] : memref<102x8xf32, #tpu.memory_space<vmem>>, vector<80x8xf32>
    %c6 = arith.constant 6 : index
    %c0_74 = arith.constant 0 : index
    %c0_75 = arith.constant 0 : index
    %88 = vector.load %arg8[%c6, %c0_74, %c0_75] : memref<9x8x8xbf16, #tpu.memory_space<vmem>>, vector<1x8x8xbf16>
    %89 = vector.shape_cast %88 : vector<1x8x8xbf16> to vector<8x8xbf16>
    %90 = arith.truncf %87 : vector<80x8xf32> to vector<80x8xbf16>
    %cst_76 = arith.constant dense<0.000000e+00> : vector<80x8xf32>
    %91 = tpu.matmul %90, %89, %cst_76 {dimension_numbers = #tpu.dot_dimension_numbers<[1], [0], [0], [1], [0, 0, 1, 1], [], []>} : vector<80x8xbf16>, vector<8x8xbf16>, vector<80x8xf32> -> vector<80x8xf32>
    %92 = arith.addf %86, %91 : vector<80x8xf32>
    %c21 = arith.constant 21 : index
    %c0_77 = arith.constant 0 : index
    %93 = vector.load %arg46[%c21, %c0_77] : memref<102x8xf32, #tpu.memory_space<vmem>>, vector<80x8xf32>
    %c7 = arith.constant 7 : index
    %c0_78 = arith.constant 0 : index
    %c0_79 = arith.constant 0 : index
    %94 = vector.load %arg8[%c7, %c0_78, %c0_79] : memref<9x8x8xbf16, #tpu.memory_space<vmem>>, vector<1x8x8xbf16>
    %95 = vector.shape_cast %94 : vector<1x8x8xbf16> to vector<8x8xbf16>
    %96 = arith.truncf %93 : vector<80x8xf32> to vector<80x8xbf16>
    %cst_80 = arith.constant dense<0.000000e+00> : vector<80x8xf32>
    %97 = tpu.matmul %96, %95, %cst_80 {dimension_numbers = #tpu.dot_dimension_numbers<[1], [0], [0], [1], [0, 0, 1, 1], [], []>} : vector<80x8xbf16>, vector<8x8xbf16>, vector<80x8xf32> -> vector<80x8xf32>
    %98 = arith.addf %92, %97 : vector<80x8xf32>
    %c22 = arith.constant 22 : index
    %c0_81 = arith.constant 0 : index
    %99 = vector.load %arg46[%c22, %c0_81] : memref<102x8xf32, #tpu.memory_space<vmem>>, vector<80x8xf32>
    %c8 = arith.constant 8 : index
    %c0_82 = arith.constant 0 : index
    %c0_83 = arith.constant 0 : index
    %100 = vector.load %arg8[%c8, %c0_82, %c0_83] : memref<9x8x8xbf16, #tpu.memory_space<vmem>>, vector<1x8x8xbf16>
    %101 = vector.shape_cast %100 : vector<1x8x8xbf16> to vector<8x8xbf16>
    %102 = arith.truncf %99 : vector<80x8xf32> to vector<80x8xbf16>
    %cst_84 = arith.constant dense<0.000000e+00> : vector<80x8xf32>
    %103 = tpu.matmul %102, %101, %cst_84 {dimension_numbers = #tpu.dot_dimension_numbers<[1], [0], [0], [1], [0, 0, 1, 1], [], []>} : vector<80x8xbf16>, vector<8x8xbf16>, vector<80x8xf32> -> vector<80x8xf32>
    %104 = arith.addf %98, %103 : vector<80x8xf32>
    %cst_85 = arith.constant 0.000000e+00 : f32
    %105 = vector.broadcast %cst_85 : f32 to vector<80x8xf32>
    %106 = arith.maximumf %104, %105 : vector<80x8xf32>
    %c0_86 = arith.constant 0 : index
    %c0_87 = arith.constant 0 : index
    %107 = vector.load %arg10[%c0_86, %c0_87] : memref<8x32xbf16, #tpu.memory_space<vmem>>, vector<8x32xbf16>
    %108 = arith.truncf %106 : vector<80x8xf32> to vector<80x8xbf16>
    %cst_88 = arith.constant dense<0.000000e+00> : vector<80x32xf32>
    %109 = tpu.matmul %108, %107, %cst_88 {dimension_numbers = #tpu.dot_dimension_numbers<[1], [0], [0], [1], [0, 0, 1, 1], [], []>} : vector<80x8xbf16>, vector<8x32xbf16>, vector<80x32xf32> -> vector<80x32xf32>
    %c0_89 = arith.constant 0 : index
    %c0_90 = arith.constant 0 : index
    %110 = vector.load %arg11[%c0_89, %c0_90] : memref<1x32xf32, #tpu.memory_space<vmem>>, vector<1x32xf32>
    %111 = vector.broadcast %110 : vector<1x32xf32> to vector<80x32xf32>
    %112 = arith.addf %109, %111 : vector<80x32xf32>
    %c0_91 = arith.constant 0 : index
    %c0_92 = arith.constant 0 : index
    %113 = vector.load %arg12[%c0_91, %c0_92] : memref<8x32xbf16, #tpu.memory_space<vmem>>, vector<8x32xbf16>
    %cst_93 = arith.constant dense<0.000000e+00> : vector<80x32xf32>
    %114 = tpu.matmul %35, %113, %cst_93 {dimension_numbers = #tpu.dot_dimension_numbers<[1], [0], [0], [1], [0, 0, 1, 1], [], []>} : vector<80x8xbf16>, vector<8x32xbf16>, vector<80x32xf32> -> vector<80x32xf32>
    %c0_94 = arith.constant 0 : index
    %c0_95 = arith.constant 0 : index
    %115 = vector.load %arg13[%c0_94, %c0_95] : memref<1x32xf32, #tpu.memory_space<vmem>>, vector<1x32xf32>
    %116 = vector.broadcast %115 : vector<1x32xf32> to vector<80x32xf32>
    %117 = arith.addf %114, %116 : vector<80x32xf32>
    %118 = arith.addf %112, %117 : vector<80x32xf32>
    %cst_96 = arith.constant 0.000000e+00 : f32
    %119 = vector.broadcast %cst_96 : f32 to vector<80x32xf32>
    %120 = arith.maximumf %118, %119 : vector<80x32xf32>
    %121 = arith.truncf %120 : vector<80x32xf32> to vector<80x32xbf16>
    %c0_97 = arith.constant 0 : index
    %c0_98 = arith.constant 0 : index
    %122 = vector.load %arg15[%c0_97, %c0_98] : memref<32x16xbf16, #tpu.memory_space<vmem>>, vector<32x16xbf16>
    %cst_99 = arith.constant dense<0.000000e+00> : vector<80x16xf32>
    %123 = tpu.matmul %121, %122, %cst_99 {dimension_numbers = #tpu.dot_dimension_numbers<[1], [0], [0], [1], [0, 0, 1, 1], [], []>} : vector<80x32xbf16>, vector<32x16xbf16>, vector<80x16xf32> -> vector<80x16xf32>
    %c0_100 = arith.constant 0 : index
    %c0_101 = arith.constant 0 : index
    %124 = vector.load %arg16[%c0_100, %c0_101] : memref<1x16xf32, #tpu.memory_space<vmem>>, vector<1x16xf32>
    %125 = vector.broadcast %124 : vector<1x16xf32> to vector<80x16xf32>
    %126 = arith.addf %123, %125 : vector<80x16xf32>
    %cst_102 = arith.constant 0.000000e+00 : f32
    %127 = vector.broadcast %cst_102 : f32 to vector<80x16xf32>
    %128 = arith.maximumf %126, %127 : vector<80x16xf32>
    %c0_103 = arith.constant 0 : index
    %c0_104 = arith.constant 0 : index
    %129 = vector.load %arg23[%c0_103, %c0_104] : memref<80x1xf32, #tpu.memory_space<vmem>>, vector<80x1xf32>
    %130 = vector.broadcast %129 : vector<80x1xf32> to vector<80x16xf32>
    %131 = arith.mulf %128, %130 : vector<80x16xf32>
    %cst_105 = arith.constant 0.000000e+00 : f32
    %132 = vector.broadcast %cst_105 : f32 to vector<102x16xf32>
    %c0_106 = arith.constant 0 : index
    %c0_107 = arith.constant 0 : index
    %133 = vector.load %arg47[%c0_106, %c0_107] : memref<102x16xf32, #tpu.memory_space<vmem>>, vector<102x16xf32>
    tpu.vector_store %arg47[%c0_106, %c0_107], %132 {strides = array<i32>} : memref<102x16xf32, #tpu.memory_space<vmem>>, vector<102x16xf32>,
    %c11_108 = arith.constant 11 : index
    %c0_109 = arith.constant 0 : index
    %134 = vector.load %arg47[%c11_108, %c0_109] : memref<102x16xf32, #tpu.memory_space<vmem>>, vector<80x16xf32>
    tpu.vector_store %arg47[%c11_108, %c0_109], %131 {strides = array<i32>} : memref<102x16xf32, #tpu.memory_space<vmem>>, vector<80x16xf32>,
    %c0_110 = arith.constant 0 : index
    %c0_111 = arith.constant 0 : index
    %135 = vector.load %arg18[%c0_110, %c0_111] : memref<1x16xf32, #tpu.memory_space<vmem>>, vector<1x16xf32>
    %c0_112 = arith.constant 0 : index
    %c0_113 = arith.constant 0 : index
    %136 = vector.load %arg47[%c0_112, %c0_113] : memref<102x16xf32, #tpu.memory_space<vmem>>, vector<80x16xf32>
    %c0_114 = arith.constant 0 : index
    %c0_115 = arith.constant 0 : index
    %c0_116 = arith.constant 0 : index
    %137 = vector.load %arg17[%c0_114, %c0_115, %c0_116] : memref<9x16x16xbf16, #tpu.memory_space<vmem>>, vector<1x16x16xbf16>
    %138 = vector.shape_cast %137 : vector<1x16x16xbf16> to vector<16x16xbf16>
    %139 = arith.truncf %136 : vector<80x16xf32> to vector<80x16xbf16>
    %cst_117 = arith.constant dense<0.000000e+00> : vector<80x16xf32>
    %140 = tpu.matmul %139, %138, %cst_117 {dimension_numbers = #tpu.dot_dimension_numbers<[1], [0], [0], [1], [0, 0, 1, 1], [], []>} : vector<80x16xbf16>, vector<16x16xbf16>, vector<80x16xf32> -> vector<80x16xf32>
    %141 = vector.broadcast %135 : vector<1x16xf32> to vector<80x16xf32>
    %142 = arith.addf %141, %140 : vector<80x16xf32>
    %c1_118 = arith.constant 1 : index
    %c0_119 = arith.constant 0 : index
    %143 = vector.load %arg47[%c1_118, %c0_119] : memref<102x16xf32, #tpu.memory_space<vmem>>, vector<80x16xf32>
    %c1_120 = arith.constant 1 : index
    %c0_121 = arith.constant 0 : index
    %c0_122 = arith.constant 0 : index
    %144 = vector.load %arg17[%c1_120, %c0_121, %c0_122] : memref<9x16x16xbf16, #tpu.memory_space<vmem>>, vector<1x16x16xbf16>
    %145 = vector.shape_cast %144 : vector<1x16x16xbf16> to vector<16x16xbf16>
    %146 = arith.truncf %143 : vector<80x16xf32> to vector<80x16xbf16>
    %cst_123 = arith.constant dense<0.000000e+00> : vector<80x16xf32>
    %147 = tpu.matmul %146, %145, %cst_123 {dimension_numbers = #tpu.dot_dimension_numbers<[1], [0], [0], [1], [0, 0, 1, 1], [], []>} : vector<80x16xbf16>, vector<16x16xbf16>, vector<80x16xf32> -> vector<80x16xf32>
    %148 = arith.addf %142, %147 : vector<80x16xf32>
    %c2_124 = arith.constant 2 : index
    %c0_125 = arith.constant 0 : index
    %149 = vector.load %arg47[%c2_124, %c0_125] : memref<102x16xf32, #tpu.memory_space<vmem>>, vector<80x16xf32>
    %c2_126 = arith.constant 2 : index
    %c0_127 = arith.constant 0 : index
    %c0_128 = arith.constant 0 : index
    %150 = vector.load %arg17[%c2_126, %c0_127, %c0_128] : memref<9x16x16xbf16, #tpu.memory_space<vmem>>, vector<1x16x16xbf16>
    %151 = vector.shape_cast %150 : vector<1x16x16xbf16> to vector<16x16xbf16>
    %152 = arith.truncf %149 : vector<80x16xf32> to vector<80x16xbf16>
    %cst_129 = arith.constant dense<0.000000e+00> : vector<80x16xf32>
    %153 = tpu.matmul %152, %151, %cst_129 {dimension_numbers = #tpu.dot_dimension_numbers<[1], [0], [0], [1], [0, 0, 1, 1], [], []>} : vector<80x16xbf16>, vector<16x16xbf16>, vector<80x16xf32> -> vector<80x16xf32>
    %154 = arith.addf %148, %153 : vector<80x16xf32>
    %c10_130 = arith.constant 10 : index
    %c0_131 = arith.constant 0 : index
    %155 = vector.load %arg47[%c10_130, %c0_131] : memref<102x16xf32, #tpu.memory_space<vmem>>, vector<80x16xf32>
    %c3_132 = arith.constant 3 : index
    %c0_133 = arith.constant 0 : index
    %c0_134 = arith.constant 0 : index
    %156 = vector.load %arg17[%c3_132, %c0_133, %c0_134] : memref<9x16x16xbf16, #tpu.memory_space<vmem>>, vector<1x16x16xbf16>
    %157 = vector.shape_cast %156 : vector<1x16x16xbf16> to vector<16x16xbf16>
    %158 = arith.truncf %155 : vector<80x16xf32> to vector<80x16xbf16>
    %cst_135 = arith.constant dense<0.000000e+00> : vector<80x16xf32>
    %159 = tpu.matmul %158, %157, %cst_135 {dimension_numbers = #tpu.dot_dimension_numbers<[1], [0], [0], [1], [0, 0, 1, 1], [], []>} : vector<80x16xbf16>, vector<16x16xbf16>, vector<80x16xf32> -> vector<80x16xf32>
    %160 = arith.addf %154, %159 : vector<80x16xf32>
    %c11_136 = arith.constant 11 : index
    %c0_137 = arith.constant 0 : index
    %161 = vector.load %arg47[%c11_136, %c0_137] : memref<102x16xf32, #tpu.memory_space<vmem>>, vector<80x16xf32>
    %c4_138 = arith.constant 4 : index
    %c0_139 = arith.constant 0 : index
    %c0_140 = arith.constant 0 : index
    %162 = vector.load %arg17[%c4_138, %c0_139, %c0_140] : memref<9x16x16xbf16, #tpu.memory_space<vmem>>, vector<1x16x16xbf16>
    %163 = vector.shape_cast %162 : vector<1x16x16xbf16> to vector<16x16xbf16>
    %164 = arith.truncf %161 : vector<80x16xf32> to vector<80x16xbf16>
    %cst_141 = arith.constant dense<0.000000e+00> : vector<80x16xf32>
    %165 = tpu.matmul %164, %163, %cst_141 {dimension_numbers = #tpu.dot_dimension_numbers<[1], [0], [0], [1], [0, 0, 1, 1], [], []>} : vector<80x16xbf16>, vector<16x16xbf16>, vector<80x16xf32> -> vector<80x16xf32>
    %166 = arith.addf %160, %165 : vector<80x16xf32>
    %c12_142 = arith.constant 12 : index
    %c0_143 = arith.constant 0 : index
    %167 = vector.load %arg47[%c12_142, %c0_143] : memref<102x16xf32, #tpu.memory_space<vmem>>, vector<80x16xf32>
    %c5_144 = arith.constant 5 : index
    %c0_145 = arith.constant 0 : index
    %c0_146 = arith.constant 0 : index
    %168 = vector.load %arg17[%c5_144, %c0_145, %c0_146] : memref<9x16x16xbf16, #tpu.memory_space<vmem>>, vector<1x16x16xbf16>
    %169 = vector.shape_cast %168 : vector<1x16x16xbf16> to vector<16x16xbf16>
    %170 = arith.truncf %167 : vector<80x16xf32> to vector<80x16xbf16>
    %cst_147 = arith.constant dense<0.000000e+00> : vector<80x16xf32>
    %171 = tpu.matmul %170, %169, %cst_147 {dimension_numbers = #tpu.dot_dimension_numbers<[1], [0], [0], [1], [0, 0, 1, 1], [], []>} : vector<80x16xbf16>, vector<16x16xbf16>, vector<80x16xf32> -> vector<80x16xf32>
    %172 = arith.addf %166, %171 : vector<80x16xf32>
    %c20_148 = arith.constant 20 : index
    %c0_149 = arith.constant 0 : index
    %173 = vector.load %arg47[%c20_148, %c0_149] : memref<102x16xf32, #tpu.memory_space<vmem>>, vector<80x16xf32>
    %c6_150 = arith.constant 6 : index
    %c0_151 = arith.constant 0 : index
    %c0_152 = arith.constant 0 : index
    %174 = vector.load %arg17[%c6_150, %c0_151, %c0_152] : memref<9x16x16xbf16, #tpu.memory_space<vmem>>, vector<1x16x16xbf16>
    %175 = vector.shape_cast %174 : vector<1x16x16xbf16> to vector<16x16xbf16>
    %176 = arith.truncf %173 : vector<80x16xf32> to vector<80x16xbf16>
    %cst_153 = arith.constant dense<0.000000e+00> : vector<80x16xf32>
    %177 = tpu.matmul %176, %175, %cst_153 {dimension_numbers = #tpu.dot_dimension_numbers<[1], [0], [0], [1], [0, 0, 1, 1], [], []>} : vector<80x16xbf16>, vector<16x16xbf16>, vector<80x16xf32> -> vector<80x16xf32>
    %178 = arith.addf %172, %177 : vector<80x16xf32>
    %c21_154 = arith.constant 21 : index
    %c0_155 = arith.constant 0 : index
    %179 = vector.load %arg47[%c21_154, %c0_155] : memref<102x16xf32, #tpu.memory_space<vmem>>, vector<80x16xf32>
    %c7_156 = arith.constant 7 : index
    %c0_157 = arith.constant 0 : index
    %c0_158 = arith.constant 0 : index
    %180 = vector.load %arg17[%c7_156, %c0_157, %c0_158] : memref<9x16x16xbf16, #tpu.memory_space<vmem>>, vector<1x16x16xbf16>
    %181 = vector.shape_cast %180 : vector<1x16x16xbf16> to vector<16x16xbf16>
    %182 = arith.truncf %179 : vector<80x16xf32> to vector<80x16xbf16>
    %cst_159 = arith.constant dense<0.000000e+00> : vector<80x16xf32>
    %183 = tpu.matmul %182, %181, %cst_159 {dimension_numbers = #tpu.dot_dimension_numbers<[1], [0], [0], [1], [0, 0, 1, 1], [], []>} : vector<80x16xbf16>, vector<16x16xbf16>, vector<80x16xf32> -> vector<80x16xf32>
    %184 = arith.addf %178, %183 : vector<80x16xf32>
    %c22_160 = arith.constant 22 : index
    %c0_161 = arith.constant 0 : index
    %185 = vector.load %arg47[%c22_160, %c0_161] : memref<102x16xf32, #tpu.memory_space<vmem>>, vector<80x16xf32>
    %c8_162 = arith.constant 8 : index
    %c0_163 = arith.constant 0 : index
    %c0_164 = arith.constant 0 : index
    %186 = vector.load %arg17[%c8_162, %c0_163, %c0_164] : memref<9x16x16xbf16, #tpu.memory_space<vmem>>, vector<1x16x16xbf16>
    %187 = vector.shape_cast %186 : vector<1x16x16xbf16> to vector<16x16xbf16>
    %188 = arith.truncf %185 : vector<80x16xf32> to vector<80x16xbf16>
    %cst_165 = arith.constant dense<0.000000e+00> : vector<80x16xf32>
    %189 = tpu.matmul %188, %187, %cst_165 {dimension_numbers = #tpu.dot_dimension_numbers<[1], [0], [0], [1], [0, 0, 1, 1], [], []>} : vector<80x16xbf16>, vector<16x16xbf16>, vector<80x16xf32> -> vector<80x16xf32>
    %190 = arith.addf %184, %189 : vector<80x16xf32>
    %cst_166 = arith.constant 0.000000e+00 : f32
    %191 = vector.broadcast %cst_166 : f32 to vector<80x16xf32>
    %192 = arith.maximumf %190, %191 : vector<80x16xf32>
    %c0_167 = arith.constant 0 : index
    %c0_168 = arith.constant 0 : index
    %193 = vector.load %arg19[%c0_167, %c0_168] : memref<16x64xbf16, #tpu.memory_space<vmem>>, vector<16x64xbf16>
    %194 = arith.truncf %192 : vector<80x16xf32> to vector<80x16xbf16>
    %cst_169 = arith.constant dense<0.000000e+00> : vector<80x64xf32>
    %195 = tpu.matmul %194, %193, %cst_169 {dimension_numbers = #tpu.dot_dimension_numbers<[1], [0], [0], [1], [0, 0, 1, 1], [], []>} : vector<80x16xbf16>, vector<16x64xbf16>, vector<80x64xf32> -> vector<80x64xf32>
    %c0_170 = arith.constant 0 : index
    %c0_171 = arith.constant 0 : index
    %196 = vector.load %arg20[%c0_170, %c0_171] : memref<1x64xf32, #tpu.memory_space<vmem>>, vector<1x64xf32>
    %197 = vector.broadcast %196 : vector<1x64xf32> to vector<80x64xf32>
    %198 = arith.addf %195, %197 : vector<80x64xf32>
    %c0_172 = arith.constant 0 : index
    %c0_173 = arith.constant 0 : index
    %199 = vector.load %arg21[%c0_172, %c0_173] : memref<32x64xbf16, #tpu.memory_space<vmem>>, vector<32x64xbf16>
    %cst_174 = arith.constant dense<0.000000e+00> : vector<80x64xf32>
    %200 = tpu.matmul %121, %199, %cst_174 {dimension_numbers = #tpu.dot_dimension_numbers<[1], [0], [0], [1], [0, 0, 1, 1], [], []>} : vector<80x32xbf16>, vector<32x64xbf16>, vector<80x64xf32> -> vector<80x64xf32>
    %c0_175 = arith.constant 0 : index
    %c0_176 = arith.constant 0 : index
    %201 = vector.load %arg22[%c0_175, %c0_176] : memref<1x64xf32, #tpu.memory_space<vmem>>, vector<1x64xf32>
    %202 = vector.broadcast %201 : vector<1x64xf32> to vector<80x64xf32>
    %203 = arith.addf %200, %202 : vector<80x64xf32>
    %204 = arith.addf %198, %203 : vector<80x64xf32>
    %cst_177 = arith.constant 0.000000e+00 : f32
    %205 = vector.broadcast %cst_177 : f32 to vector<80x64xf32>
    %206 = arith.maximumf %204, %205 : vector<80x64xf32>
    %c0_178 = arith.constant 0 : index
    %c0_179 = arith.constant 0 : index
    %207 = vector.load %arg42[%c0_178, %c0_179] : memref<24x80xbf16, #tpu.memory_space<vmem>>, vector<24x80xbf16>
    %208 = arith.truncf %206 : vector<80x64xf32> to vector<80x64xbf16>
    %cst_180 = arith.constant dense<0.000000e+00> : vector<24x64xf32>
    %209 = tpu.matmul %207, %208, %cst_180 {dimension_numbers = #tpu.dot_dimension_numbers<[1], [0], [0], [1], [0, 0, 1, 1], [], []>} : vector<24x80xbf16>, vector<80x64xbf16>, vector<24x64xf32> -> vector<24x64xf32>
    %210 = arith.truncf %209 : vector<24x64xf32> to vector<24x64xbf16>
    %c0_181 = arith.constant 0 : index
    %c0_182 = arith.constant 0 : index
    %211 = vector.load %arg24[%c0_181, %c0_182] : memref<64x32xbf16, #tpu.memory_space<vmem>>, vector<64x32xbf16>
    %cst_183 = arith.constant dense<0.000000e+00> : vector<24x32xf32>
    %212 = tpu.matmul %210, %211, %cst_183 {dimension_numbers = #tpu.dot_dimension_numbers<[1], [0], [0], [1], [0, 0, 1, 1], [], []>} : vector<24x64xbf16>, vector<64x32xbf16>, vector<24x32xf32> -> vector<24x32xf32>
    %c0_184 = arith.constant 0 : index
    %c0_185 = arith.constant 0 : index
    %213 = vector.load %arg25[%c0_184, %c0_185] : memref<1x32xf32, #tpu.memory_space<vmem>>, vector<1x32xf32>
    %214 = vector.broadcast %213 : vector<1x32xf32> to vector<24x32xf32>
    %215 = arith.addf %212, %214 : vector<24x32xf32>
    %cst_186 = arith.constant 0.000000e+00 : f32
    %216 = vector.broadcast %cst_186 : f32 to vector<24x32xf32>
    %217 = arith.maximumf %215, %216 : vector<24x32xf32>
    %c0_187 = arith.constant 0 : index
    %c0_188 = arith.constant 0 : index
    %218 = vector.load %arg32[%c0_187, %c0_188] : memref<24x1xf32, #tpu.memory_space<vmem>>, vector<24x1xf32>
    %219 = vector.broadcast %218 : vector<24x1xf32> to vector<24x32xf32>
    %220 = arith.mulf %217, %219 : vector<24x32xf32>
    %cst_189 = arith.constant 0.000000e+00 : f32
    %221 = vector.broadcast %cst_189 : f32 to vector<38x32xf32>
    %c0_190 = arith.constant 0 : index
    %c0_191 = arith.constant 0 : index
    %222 = vector.load %arg48[%c0_190, %c0_191] : memref<38x32xf32, #tpu.memory_space<vmem>>, vector<38x32xf32>
    tpu.vector_store %arg48[%c0_190, %c0_191], %221 {strides = array<i32>} : memref<38x32xf32, #tpu.memory_space<vmem>>, vector<38x32xf32>,
    %c7_192 = arith.constant 7 : index
    %c0_193 = arith.constant 0 : index
    %223 = vector.load %arg48[%c7_192, %c0_193] : memref<38x32xf32, #tpu.memory_space<vmem>>, vector<24x32xf32>
    tpu.vector_store %arg48[%c7_192, %c0_193], %220 {strides = array<i32>} : memref<38x32xf32, #tpu.memory_space<vmem>>, vector<24x32xf32>,
    %c0_194 = arith.constant 0 : index
    %c0_195 = arith.constant 0 : index
    %224 = vector.load %arg27[%c0_194, %c0_195] : memref<1x32xf32, #tpu.memory_space<vmem>>, vector<1x32xf32>
    %c0_196 = arith.constant 0 : index
    %c0_197 = arith.constant 0 : index
    %225 = vector.load %arg48[%c0_196, %c0_197] : memref<38x32xf32, #tpu.memory_space<vmem>>, vector<24x32xf32>
    %c0_198 = arith.constant 0 : index
    %c0_199 = arith.constant 0 : index
    %c0_200 = arith.constant 0 : index
    %226 = vector.load %arg26[%c0_198, %c0_199, %c0_200] : memref<9x32x32xbf16, #tpu.memory_space<vmem>>, vector<1x32x32xbf16>
    %227 = vector.shape_cast %226 : vector<1x32x32xbf16> to vector<32x32xbf16>
    %228 = arith.truncf %225 : vector<24x32xf32> to vector<24x32xbf16>
    %cst_201 = arith.constant dense<0.000000e+00> : vector<24x32xf32>
    %229 = tpu.matmul %228, %227, %cst_201 {dimension_numbers = #tpu.dot_dimension_numbers<[1], [0], [0], [1], [0, 0, 1, 1], [], []>} : vector<24x32xbf16>, vector<32x32xbf16>, vector<24x32xf32> -> vector<24x32xf32>
    %230 = vector.broadcast %224 : vector<1x32xf32> to vector<24x32xf32>
    %231 = arith.addf %230, %229 : vector<24x32xf32>
    %c1_202 = arith.constant 1 : index
    %c0_203 = arith.constant 0 : index
    %232 = vector.load %arg48[%c1_202, %c0_203] : memref<38x32xf32, #tpu.memory_space<vmem>>, vector<24x32xf32>
    %c1_204 = arith.constant 1 : index
    %c0_205 = arith.constant 0 : index
    %c0_206 = arith.constant 0 : index
    %233 = vector.load %arg26[%c1_204, %c0_205, %c0_206] : memref<9x32x32xbf16, #tpu.memory_space<vmem>>, vector<1x32x32xbf16>
    %234 = vector.shape_cast %233 : vector<1x32x32xbf16> to vector<32x32xbf16>
    %235 = arith.truncf %232 : vector<24x32xf32> to vector<24x32xbf16>
    %cst_207 = arith.constant dense<0.000000e+00> : vector<24x32xf32>
    %236 = tpu.matmul %235, %234, %cst_207 {dimension_numbers = #tpu.dot_dimension_numbers<[1], [0], [0], [1], [0, 0, 1, 1], [], []>} : vector<24x32xbf16>, vector<32x32xbf16>, vector<24x32xf32> -> vector<24x32xf32>
    %237 = arith.addf %231, %236 : vector<24x32xf32>
    %c2_208 = arith.constant 2 : index
    %c0_209 = arith.constant 0 : index
    %238 = vector.load %arg48[%c2_208, %c0_209] : memref<38x32xf32, #tpu.memory_space<vmem>>, vector<24x32xf32>
    %c2_210 = arith.constant 2 : index
    %c0_211 = arith.constant 0 : index
    %c0_212 = arith.constant 0 : index
    %239 = vector.load %arg26[%c2_210, %c0_211, %c0_212] : memref<9x32x32xbf16, #tpu.memory_space<vmem>>, vector<1x32x32xbf16>
    %240 = vector.shape_cast %239 : vector<1x32x32xbf16> to vector<32x32xbf16>
    %241 = arith.truncf %238 : vector<24x32xf32> to vector<24x32xbf16>
    %cst_213 = arith.constant dense<0.000000e+00> : vector<24x32xf32>
    %242 = tpu.matmul %241, %240, %cst_213 {dimension_numbers = #tpu.dot_dimension_numbers<[1], [0], [0], [1], [0, 0, 1, 1], [], []>} : vector<24x32xbf16>, vector<32x32xbf16>, vector<24x32xf32> -> vector<24x32xf32>
    %243 = arith.addf %237, %242 : vector<24x32xf32>
    %c6_214 = arith.constant 6 : index
    %c0_215 = arith.constant 0 : index
    %244 = vector.load %arg48[%c6_214, %c0_215] : memref<38x32xf32, #tpu.memory_space<vmem>>, vector<24x32xf32>
    %c3_216 = arith.constant 3 : index
    %c0_217 = arith.constant 0 : index
    %c0_218 = arith.constant 0 : index
    %245 = vector.load %arg26[%c3_216, %c0_217, %c0_218] : memref<9x32x32xbf16, #tpu.memory_space<vmem>>, vector<1x32x32xbf16>
    %246 = vector.shape_cast %245 : vector<1x32x32xbf16> to vector<32x32xbf16>
    %247 = arith.truncf %244 : vector<24x32xf32> to vector<24x32xbf16>
    %cst_219 = arith.constant dense<0.000000e+00> : vector<24x32xf32>
    %248 = tpu.matmul %247, %246, %cst_219 {dimension_numbers = #tpu.dot_dimension_numbers<[1], [0], [0], [1], [0, 0, 1, 1], [], []>} : vector<24x32xbf16>, vector<32x32xbf16>, vector<24x32xf32> -> vector<24x32xf32>
    %249 = arith.addf %243, %248 : vector<24x32xf32>
    %c7_220 = arith.constant 7 : index
    %c0_221 = arith.constant 0 : index
    %250 = vector.load %arg48[%c7_220, %c0_221] : memref<38x32xf32, #tpu.memory_space<vmem>>, vector<24x32xf32>
    %c4_222 = arith.constant 4 : index
    %c0_223 = arith.constant 0 : index
    %c0_224 = arith.constant 0 : index
    %251 = vector.load %arg26[%c4_222, %c0_223, %c0_224] : memref<9x32x32xbf16, #tpu.memory_space<vmem>>, vector<1x32x32xbf16>
    %252 = vector.shape_cast %251 : vector<1x32x32xbf16> to vector<32x32xbf16>
    %253 = arith.truncf %250 : vector<24x32xf32> to vector<24x32xbf16>
    %cst_225 = arith.constant dense<0.000000e+00> : vector<24x32xf32>
    %254 = tpu.matmul %253, %252, %cst_225 {dimension_numbers = #tpu.dot_dimension_numbers<[1], [0], [0], [1], [0, 0, 1, 1], [], []>} : vector<24x32xbf16>, vector<32x32xbf16>, vector<24x32xf32> -> vector<24x32xf32>
    %255 = arith.addf %249, %254 : vector<24x32xf32>
    %c8_226 = arith.constant 8 : index
    %c0_227 = arith.constant 0 : index
    %256 = vector.load %arg48[%c8_226, %c0_227] : memref<38x32xf32, #tpu.memory_space<vmem>>, vector<24x32xf32>
    %c5_228 = arith.constant 5 : index
    %c0_229 = arith.constant 0 : index
    %c0_230 = arith.constant 0 : index
    %257 = vector.load %arg26[%c5_228, %c0_229, %c0_230] : memref<9x32x32xbf16, #tpu.memory_space<vmem>>, vector<1x32x32xbf16>
    %258 = vector.shape_cast %257 : vector<1x32x32xbf16> to vector<32x32xbf16>
    %259 = arith.truncf %256 : vector<24x32xf32> to vector<24x32xbf16>
    %cst_231 = arith.constant dense<0.000000e+00> : vector<24x32xf32>
    %260 = tpu.matmul %259, %258, %cst_231 {dimension_numbers = #tpu.dot_dimension_numbers<[1], [0], [0], [1], [0, 0, 1, 1], [], []>} : vector<24x32xbf16>, vector<32x32xbf16>, vector<24x32xf32> -> vector<24x32xf32>
    %261 = arith.addf %255, %260 : vector<24x32xf32>
    %c12_232 = arith.constant 12 : index
    %c0_233 = arith.constant 0 : index
    %262 = vector.load %arg48[%c12_232, %c0_233] : memref<38x32xf32, #tpu.memory_space<vmem>>, vector<24x32xf32>
    %c6_234 = arith.constant 6 : index
    %c0_235 = arith.constant 0 : index
    %c0_236 = arith.constant 0 : index
    %263 = vector.load %arg26[%c6_234, %c0_235, %c0_236] : memref<9x32x32xbf16, #tpu.memory_space<vmem>>, vector<1x32x32xbf16>
    %264 = vector.shape_cast %263 : vector<1x32x32xbf16> to vector<32x32xbf16>
    %265 = arith.truncf %262 : vector<24x32xf32> to vector<24x32xbf16>
    %cst_237 = arith.constant dense<0.000000e+00> : vector<24x32xf32>
    %266 = tpu.matmul %265, %264, %cst_237 {dimension_numbers = #tpu.dot_dimension_numbers<[1], [0], [0], [1], [0, 0, 1, 1], [], []>} : vector<24x32xbf16>, vector<32x32xbf16>, vector<24x32xf32> -> vector<24x32xf32>
    %267 = arith.addf %261, %266 : vector<24x32xf32>
    %c13 = arith.constant 13 : index
    %c0_238 = arith.constant 0 : index
    %268 = vector.load %arg48[%c13, %c0_238] : memref<38x32xf32, #tpu.memory_space<vmem>>, vector<24x32xf32>
    %c7_239 = arith.constant 7 : index
    %c0_240 = arith.constant 0 : index
    %c0_241 = arith.constant 0 : index
    %269 = vector.load %arg26[%c7_239, %c0_240, %c0_241] : memref<9x32x32xbf16, #tpu.memory_space<vmem>>, vector<1x32x32xbf16>
    %270 = vector.shape_cast %269 : vector<1x32x32xbf16> to vector<32x32xbf16>
    %271 = arith.truncf %268 : vector<24x32xf32> to vector<24x32xbf16>
    %cst_242 = arith.constant dense<0.000000e+00> : vector<24x32xf32>
    %272 = tpu.matmul %271, %270, %cst_242 {dimension_numbers = #tpu.dot_dimension_numbers<[1], [0], [0], [1], [0, 0, 1, 1], [], []>} : vector<24x32xbf16>, vector<32x32xbf16>, vector<24x32xf32> -> vector<24x32xf32>
    %273 = arith.addf %267, %272 : vector<24x32xf32>
    %c14 = arith.constant 14 : index
    %c0_243 = arith.constant 0 : index
    %274 = vector.load %arg48[%c14, %c0_243] : memref<38x32xf32, #tpu.memory_space<vmem>>, vector<24x32xf32>
    %c8_244 = arith.constant 8 : index
    %c0_245 = arith.constant 0 : index
    %c0_246 = arith.constant 0 : index
    %275 = vector.load %arg26[%c8_244, %c0_245, %c0_246] : memref<9x32x32xbf16, #tpu.memory_space<vmem>>, vector<1x32x32xbf16>
    %276 = vector.shape_cast %275 : vector<1x32x32xbf16> to vector<32x32xbf16>
    %277 = arith.truncf %274 : vector<24x32xf32> to vector<24x32xbf16>
    %cst_247 = arith.constant dense<0.000000e+00> : vector<24x32xf32>
    %278 = tpu.matmul %277, %276, %cst_247 {dimension_numbers = #tpu.dot_dimension_numbers<[1], [0], [0], [1], [0, 0, 1, 1], [], []>} : vector<24x32xbf16>, vector<32x32xbf16>, vector<24x32xf32> -> vector<24x32xf32>
    %279 = arith.addf %273, %278 : vector<24x32xf32>
    %cst_248 = arith.constant 0.000000e+00 : f32
    %280 = vector.broadcast %cst_248 : f32 to vector<24x32xf32>
    %281 = arith.maximumf %279, %280 : vector<24x32xf32>
    %c0_249 = arith.constant 0 : index
    %c0_250 = arith.constant 0 : index
    %282 = vector.load %arg28[%c0_249, %c0_250] : memref<32x128xbf16, #tpu.memory_space<vmem>>, vector<32x128xbf16>
    %283 = arith.truncf %281 : vector<24x32xf32> to vector<24x32xbf16>
    %cst_251 = arith.constant dense<0.000000e+00> : vector<24x128xf32>
    %284 = tpu.matmul %283, %282, %cst_251 {dimension_numbers = #tpu.dot_dimension_numbers<[1], [0], [0], [1], [0, 0, 1, 1], [], []>} : vector<24x32xbf16>, vector<32x128xbf16>, vector<24x128xf32> -> vector<24x128xf32>
    %c0_252 = arith.constant 0 : index
    %c0_253 = arith.constant 0 : index
    %285 = vector.load %arg29[%c0_252, %c0_253] : memref<1x128xf32, #tpu.memory_space<vmem>>, vector<1x128xf32>
    %286 = vector.broadcast %285 : vector<1x128xf32> to vector<24x128xf32>
    %287 = arith.addf %284, %286 : vector<24x128xf32>
    %c0_254 = arith.constant 0 : index
    %c0_255 = arith.constant 0 : index
    %288 = vector.load %arg30[%c0_254, %c0_255] : memref<64x128xbf16, #tpu.memory_space<vmem>>, vector<64x128xbf16>
    %cst_256 = arith.constant dense<0.000000e+00> : vector<24x128xf32>
    %289 = tpu.matmul %210, %288, %cst_256 {dimension_numbers = #tpu.dot_dimension_numbers<[1], [0], [0], [1], [0, 0, 1, 1], [], []>} : vector<24x64xbf16>, vector<64x128xbf16>, vector<24x128xf32> -> vector<24x128xf32>
    %c0_257 = arith.constant 0 : index
    %c0_258 = arith.constant 0 : index
    %290 = vector.load %arg31[%c0_257, %c0_258] : memref<1x128xf32, #tpu.memory_space<vmem>>, vector<1x128xf32>
    %291 = vector.broadcast %290 : vector<1x128xf32> to vector<24x128xf32>
    %292 = arith.addf %289, %291 : vector<24x128xf32>
    %293 = arith.addf %287, %292 : vector<24x128xf32>
    %cst_259 = arith.constant 0.000000e+00 : f32
    %294 = vector.broadcast %cst_259 : f32 to vector<24x128xf32>
    %295 = arith.maximumf %293, %294 : vector<24x128xf32>
    %c0_260 = arith.constant 0 : index
    %c0_261 = arith.constant 0 : index
    %296 = vector.load %arg43[%c0_260, %c0_261] : memref<8x24xbf16, #tpu.memory_space<vmem>>, vector<8x24xbf16>
    %297 = arith.truncf %295 : vector<24x128xf32> to vector<24x128xbf16>
    %cst_262 = arith.constant dense<0.000000e+00> : vector<8x128xf32>
    %298 = tpu.matmul %296, %297, %cst_262 {dimension_numbers = #tpu.dot_dimension_numbers<[1], [0], [0], [1], [0, 0, 1, 1], [], []>} : vector<8x24xbf16>, vector<24x128xbf16>, vector<8x128xf32> -> vector<8x128xf32>
    %299 = arith.truncf %298 : vector<8x128xf32> to vector<8x128xbf16>
    %c0_263 = arith.constant 0 : index
    %c0_264 = arith.constant 0 : index
    %300 = vector.load %arg33[%c0_263, %c0_264] : memref<128x64xbf16, #tpu.memory_space<vmem>>, vector<128x64xbf16>
    %cst_265 = arith.constant dense<0.000000e+00> : vector<8x64xf32>
    %301 = tpu.matmul %299, %300, %cst_265 {dimension_numbers = #tpu.dot_dimension_numbers<[1], [0], [0], [1], [0, 0, 1, 1], [], []>} : vector<8x128xbf16>, vector<128x64xbf16>, vector<8x64xf32> -> vector<8x64xf32>
    %c0_266 = arith.constant 0 : index
    %c0_267 = arith.constant 0 : index
    %302 = vector.load %arg34[%c0_266, %c0_267] : memref<1x64xf32, #tpu.memory_space<vmem>>, vector<1x64xf32>
    %303 = vector.broadcast %302 : vector<1x64xf32> to vector<8x64xf32>
    %304 = arith.addf %301, %303 : vector<8x64xf32>
    %cst_268 = arith.constant 0.000000e+00 : f32
    %305 = vector.broadcast %cst_268 : f32 to vector<8x64xf32>
    %306 = arith.maximumf %304, %305 : vector<8x64xf32>
    %c0_269 = arith.constant 0 : index
    %c0_270 = arith.constant 0 : index
    %307 = vector.load %arg41[%c0_269, %c0_270] : memref<8x1xf32, #tpu.memory_space<vmem>>, vector<8x1xf32>
    %308 = vector.broadcast %307 : vector<8x1xf32> to vector<8x64xf32>
    %309 = arith.mulf %306, %308 : vector<8x64xf32>
    %cst_271 = arith.constant 0.000000e+00 : f32
    %310 = vector.broadcast %cst_271 : f32 to vector<18x64xf32>
    %c0_272 = arith.constant 0 : index
    %c0_273 = arith.constant 0 : index
    %311 = vector.load %arg49[%c0_272, %c0_273] : memref<18x64xf32, #tpu.memory_space<vmem>>, vector<18x64xf32>
    tpu.vector_store %arg49[%c0_272, %c0_273], %310 {strides = array<i32>} : memref<18x64xf32, #tpu.memory_space<vmem>>, vector<18x64xf32>,
    %c5_274 = arith.constant 5 : index
    %c0_275 = arith.constant 0 : index
    %312 = vector.load %arg49[%c5_274, %c0_275] : memref<18x64xf32, #tpu.memory_space<vmem>>, vector<8x64xf32>
    tpu.vector_store %arg49[%c5_274, %c0_275], %309 {strides = array<i32>} : memref<18x64xf32, #tpu.memory_space<vmem>>, vector<8x64xf32>,
    %c0_276 = arith.constant 0 : index
    %c0_277 = arith.constant 0 : index
    %313 = vector.load %arg36[%c0_276, %c0_277] : memref<1x64xf32, #tpu.memory_space<vmem>>, vector<1x64xf32>
    %c0_278 = arith.constant 0 : index
    %c0_279 = arith.constant 0 : index
    %314 = vector.load %arg49[%c0_278, %c0_279] : memref<18x64xf32, #tpu.memory_space<vmem>>, vector<8x64xf32>
    %c0_280 = arith.constant 0 : index
    %c0_281 = arith.constant 0 : index
    %c0_282 = arith.constant 0 : index
    %315 = vector.load %arg35[%c0_280, %c0_281, %c0_282] : memref<9x64x64xbf16, #tpu.memory_space<vmem>>, vector<1x64x64xbf16>
    %316 = vector.shape_cast %315 : vector<1x64x64xbf16> to vector<64x64xbf16>
    %317 = arith.truncf %314 : vector<8x64xf32> to vector<8x64xbf16>
    %cst_283 = arith.constant dense<0.000000e+00> : vector<8x64xf32>
    %318 = tpu.matmul %317, %316, %cst_283 {dimension_numbers = #tpu.dot_dimension_numbers<[1], [0], [0], [1], [0, 0, 1, 1], [], []>} : vector<8x64xbf16>, vector<64x64xbf16>, vector<8x64xf32> -> vector<8x64xf32>
    %319 = vector.broadcast %313 : vector<1x64xf32> to vector<8x64xf32>
    %320 = arith.addf %319, %318 : vector<8x64xf32>
    %c1_284 = arith.constant 1 : index
    %c0_285 = arith.constant 0 : index
    %321 = vector.load %arg49[%c1_284, %c0_285] : memref<18x64xf32, #tpu.memory_space<vmem>>, vector<8x64xf32>
    %c1_286 = arith.constant 1 : index
    %c0_287 = arith.constant 0 : index
    %c0_288 = arith.constant 0 : index
    %322 = vector.load %arg35[%c1_286, %c0_287, %c0_288] : memref<9x64x64xbf16, #tpu.memory_space<vmem>>, vector<1x64x64xbf16>
    %323 = vector.shape_cast %322 : vector<1x64x64xbf16> to vector<64x64xbf16>
    %324 = arith.truncf %321 : vector<8x64xf32> to vector<8x64xbf16>
    %cst_289 = arith.constant dense<0.000000e+00> : vector<8x64xf32>
    %325 = tpu.matmul %324, %323, %cst_289 {dimension_numbers = #tpu.dot_dimension_numbers<[1], [0], [0], [1], [0, 0, 1, 1], [], []>} : vector<8x64xbf16>, vector<64x64xbf16>, vector<8x64xf32> -> vector<8x64xf32>
    %326 = arith.addf %320, %325 : vector<8x64xf32>
    %c2_290 = arith.constant 2 : index
    %c0_291 = arith.constant 0 : index
    %327 = vector.load %arg49[%c2_290, %c0_291] : memref<18x64xf32, #tpu.memory_space<vmem>>, vector<8x64xf32>
    %c2_292 = arith.constant 2 : index
    %c0_293 = arith.constant 0 : index
    %c0_294 = arith.constant 0 : index
    %328 = vector.load %arg35[%c2_292, %c0_293, %c0_294] : memref<9x64x64xbf16, #tpu.memory_space<vmem>>, vector<1x64x64xbf16>
    %329 = vector.shape_cast %328 : vector<1x64x64xbf16> to vector<64x64xbf16>
    %330 = arith.truncf %327 : vector<8x64xf32> to vector<8x64xbf16>
    %cst_295 = arith.constant dense<0.000000e+00> : vector<8x64xf32>
    %331 = tpu.matmul %330, %329, %cst_295 {dimension_numbers = #tpu.dot_dimension_numbers<[1], [0], [0], [1], [0, 0, 1, 1], [], []>} : vector<8x64xbf16>, vector<64x64xbf16>, vector<8x64xf32> -> vector<8x64xf32>
    %332 = arith.addf %326, %331 : vector<8x64xf32>
    %c4_296 = arith.constant 4 : index
    %c0_297 = arith.constant 0 : index
    %333 = vector.load %arg49[%c4_296, %c0_297] : memref<18x64xf32, #tpu.memory_space<vmem>>, vector<8x64xf32>
    %c3_298 = arith.constant 3 : index
    %c0_299 = arith.constant 0 : index
    %c0_300 = arith.constant 0 : index
    %334 = vector.load %arg35[%c3_298, %c0_299, %c0_300] : memref<9x64x64xbf16, #tpu.memory_space<vmem>>, vector<1x64x64xbf16>
    %335 = vector.shape_cast %334 : vector<1x64x64xbf16> to vector<64x64xbf16>
    %336 = arith.truncf %333 : vector<8x64xf32> to vector<8x64xbf16>
    %cst_301 = arith.constant dense<0.000000e+00> : vector<8x64xf32>
    %337 = tpu.matmul %336, %335, %cst_301 {dimension_numbers = #tpu.dot_dimension_numbers<[1], [0], [0], [1], [0, 0, 1, 1], [], []>} : vector<8x64xbf16>, vector<64x64xbf16>, vector<8x64xf32> -> vector<8x64xf32>
    %338 = arith.addf %332, %337 : vector<8x64xf32>
    %c5_302 = arith.constant 5 : index
    %c0_303 = arith.constant 0 : index
    %339 = vector.load %arg49[%c5_302, %c0_303] : memref<18x64xf32, #tpu.memory_space<vmem>>, vector<8x64xf32>
    %c4_304 = arith.constant 4 : index
    %c0_305 = arith.constant 0 : index
    %c0_306 = arith.constant 0 : index
    %340 = vector.load %arg35[%c4_304, %c0_305, %c0_306] : memref<9x64x64xbf16, #tpu.memory_space<vmem>>, vector<1x64x64xbf16>
    %341 = vector.shape_cast %340 : vector<1x64x64xbf16> to vector<64x64xbf16>
    %342 = arith.truncf %339 : vector<8x64xf32> to vector<8x64xbf16>
    %cst_307 = arith.constant dense<0.000000e+00> : vector<8x64xf32>
    %343 = tpu.matmul %342, %341, %cst_307 {dimension_numbers = #tpu.dot_dimension_numbers<[1], [0], [0], [1], [0, 0, 1, 1], [], []>} : vector<8x64xbf16>, vector<64x64xbf16>, vector<8x64xf32> -> vector<8x64xf32>
    %344 = arith.addf %338, %343 : vector<8x64xf32>
    %c6_308 = arith.constant 6 : index
    %c0_309 = arith.constant 0 : index
    %345 = vector.load %arg49[%c6_308, %c0_309] : memref<18x64xf32, #tpu.memory_space<vmem>>, vector<8x64xf32>
    %c5_310 = arith.constant 5 : index
    %c0_311 = arith.constant 0 : index
    %c0_312 = arith.constant 0 : index
    %346 = vector.load %arg35[%c5_310, %c0_311, %c0_312] : memref<9x64x64xbf16, #tpu.memory_space<vmem>>, vector<1x64x64xbf16>
    %347 = vector.shape_cast %346 : vector<1x64x64xbf16> to vector<64x64xbf16>
    %348 = arith.truncf %345 : vector<8x64xf32> to vector<8x64xbf16>
    %cst_313 = arith.constant dense<0.000000e+00> : vector<8x64xf32>
    %349 = tpu.matmul %348, %347, %cst_313 {dimension_numbers = #tpu.dot_dimension_numbers<[1], [0], [0], [1], [0, 0, 1, 1], [], []>} : vector<8x64xbf16>, vector<64x64xbf16>, vector<8x64xf32> -> vector<8x64xf32>
    %350 = arith.addf %344, %349 : vector<8x64xf32>
    %c8_314 = arith.constant 8 : index
    %c0_315 = arith.constant 0 : index
    %351 = vector.load %arg49[%c8_314, %c0_315] : memref<18x64xf32, #tpu.memory_space<vmem>>, vector<8x64xf32>
    %c6_316 = arith.constant 6 : index
    %c0_317 = arith.constant 0 : index
    %c0_318 = arith.constant 0 : index
    %352 = vector.load %arg35[%c6_316, %c0_317, %c0_318] : memref<9x64x64xbf16, #tpu.memory_space<vmem>>, vector<1x64x64xbf16>
    %353 = vector.shape_cast %352 : vector<1x64x64xbf16> to vector<64x64xbf16>
    %354 = arith.truncf %351 : vector<8x64xf32> to vector<8x64xbf16>
    %cst_319 = arith.constant dense<0.000000e+00> : vector<8x64xf32>
    %355 = tpu.matmul %354, %353, %cst_319 {dimension_numbers = #tpu.dot_dimension_numbers<[1], [0], [0], [1], [0, 0, 1, 1], [], []>} : vector<8x64xbf16>, vector<64x64xbf16>, vector<8x64xf32> -> vector<8x64xf32>
    %356 = arith.addf %350, %355 : vector<8x64xf32>
    %c9 = arith.constant 9 : index
    %c0_320 = arith.constant 0 : index
    %357 = vector.load %arg49[%c9, %c0_320] : memref<18x64xf32, #tpu.memory_space<vmem>>, vector<8x64xf32>
    %c7_321 = arith.constant 7 : index
    %c0_322 = arith.constant 0 : index
    %c0_323 = arith.constant 0 : index
    %358 = vector.load %arg35[%c7_321, %c0_322, %c0_323] : memref<9x64x64xbf16, #tpu.memory_space<vmem>>, vector<1x64x64xbf16>
    %359 = vector.shape_cast %358 : vector<1x64x64xbf16> to vector<64x64xbf16>
    %360 = arith.truncf %357 : vector<8x64xf32> to vector<8x64xbf16>
    %cst_324 = arith.constant dense<0.000000e+00> : vector<8x64xf32>
    %361 = tpu.matmul %360, %359, %cst_324 {dimension_numbers = #tpu.dot_dimension_numbers<[1], [0], [0], [1], [0, 0, 1, 1], [], []>} : vector<8x64xbf16>, vector<64x64xbf16>, vector<8x64xf32> -> vector<8x64xf32>
    %362 = arith.addf %356, %361 : vector<8x64xf32>
    %c10_325 = arith.constant 10 : index
    %c0_326 = arith.constant 0 : index
    %363 = vector.load %arg49[%c10_325, %c0_326] : memref<18x64xf32, #tpu.memory_space<vmem>>, vector<8x64xf32>
    %c8_327 = arith.constant 8 : index
    %c0_328 = arith.constant 0 : index
    %c0_329 = arith.constant 0 : index
    %364 = vector.load %arg35[%c8_327, %c0_328, %c0_329] : memref<9x64x64xbf16, #tpu.memory_space<vmem>>, vector<1x64x64xbf16>
    %365 = vector.shape_cast %364 : vector<1x64x64xbf16> to vector<64x64xbf16>
    %366 = arith.truncf %363 : vector<8x64xf32> to vector<8x64xbf16>
    %cst_330 = arith.constant dense<0.000000e+00> : vector<8x64xf32>
    %367 = tpu.matmul %366, %365, %cst_330 {dimension_numbers = #tpu.dot_dimension_numbers<[1], [0], [0], [1], [0, 0, 1, 1], [], []>} : vector<8x64xbf16>, vector<64x64xbf16>, vector<8x64xf32> -> vector<8x64xf32>
    %368 = arith.addf %362, %367 : vector<8x64xf32>
    %cst_331 = arith.constant 0.000000e+00 : f32
    %369 = vector.broadcast %cst_331 : f32 to vector<8x64xf32>
    %370 = arith.maximumf %368, %369 : vector<8x64xf32>
    %c0_332 = arith.constant 0 : index
    %c0_333 = arith.constant 0 : index
    %371 = vector.load %arg37[%c0_332, %c0_333] : memref<64x256xbf16, #tpu.memory_space<vmem>>, vector<64x256xbf16>
    %372 = arith.truncf %370 : vector<8x64xf32> to vector<8x64xbf16>
    %cst_334 = arith.constant dense<0.000000e+00> : vector<8x256xf32>
    %373 = tpu.matmul %372, %371, %cst_334 {dimension_numbers = #tpu.dot_dimension_numbers<[1], [0], [0], [1], [0, 0, 1, 1], [], []>} : vector<8x64xbf16>, vector<64x256xbf16>, vector<8x256xf32> -> vector<8x256xf32>
    %c0_335 = arith.constant 0 : index
    %c0_336 = arith.constant 0 : index
    %374 = vector.load %arg38[%c0_335, %c0_336] : memref<1x256xf32, #tpu.memory_space<vmem>>, vector<1x256xf32>
    %375 = vector.broadcast %374 : vector<1x256xf32> to vector<8x256xf32>
    %376 = arith.addf %373, %375 : vector<8x256xf32>
    %c0_337 = arith.constant 0 : index
    %c0_338 = arith.constant 0 : index
    %377 = vector.load %arg39[%c0_337, %c0_338] : memref<128x256xbf16, #tpu.memory_space<vmem>>, vector<128x256xbf16>
    %cst_339 = arith.constant dense<0.000000e+00> : vector<8x256xf32>
    %378 = tpu.matmul %299, %377, %cst_339 {dimension_numbers = #tpu.dot_dimension_numbers<[1], [0], [0], [1], [0, 0, 1, 1], [], []>} : vector<8x128xbf16>, vector<128x256xbf16>, vector<8x256xf32> -> vector<8x256xf32>
    %c0_340 = arith.constant 0 : index
    %c0_341 = arith.constant 0 : index
    %379 = vector.load %arg40[%c0_340, %c0_341] : memref<1x256xf32, #tpu.memory_space<vmem>>, vector<1x256xf32>
    %380 = vector.broadcast %379 : vector<1x256xf32> to vector<8x256xf32>
    %381 = arith.addf %378, %380 : vector<8x256xf32>
    %382 = arith.addf %376, %381 : vector<8x256xf32>
    %cst_342 = arith.constant 0.000000e+00 : f32
    %383 = vector.broadcast %cst_342 : f32 to vector<8x256xf32>
    %384 = arith.maximumf %382, %383 : vector<8x256xf32>
    %c0_343 = arith.constant 0 : index
    %c0_344 = arith.constant 0 : index
    %c0_345 = arith.constant 0 : index
    %385 = vector.load %arg44[%c0_343, %c0_344, %c0_345] : memref<1x8x256xf32, #tpu.memory_space<vmem>>, vector<1x8x256xf32>
    %386 = vector.shape_cast %385 : vector<1x8x256xf32> to vector<8x256xf32>
    %387 = vector.shape_cast %384 : vector<8x256xf32> to vector<1x8x256xf32>
    tpu.vector_store %arg44[%c0_343, %c0_344, %c0_345], %387 {strides = array<i32>} : memref<1x8x256xf32, #tpu.memory_space<vmem>>, vector<1x8x256xf32>,
    return
  }
  func.func @transform_0(%arg0: i32) -> (i32, i32, i32) {
    %c0_i32 = arith.constant 0 : i32
    %c0_i32_0 = arith.constant 0 : i32
    %c0_i32_1 = arith.constant 0 : i32
    return %arg0, %c0_i32, %c0_i32_0 : i32, i32, i32
  }
  func.func @transform_1(%arg0: i32) -> (i32, i32) {
    %c0_i32 = arith.constant 0 : i32
    %c0_i32_0 = arith.constant 0 : i32
    %c0_i32_1 = arith.constant 0 : i32
    return %c0_i32, %c0_i32_0 : i32, i32
  }
  func.func @transform_2(%arg0: i32) -> (i32, i32) {
    %c0_i32 = arith.constant 0 : i32
    %c0_i32_0 = arith.constant 0 : i32
    %c0_i32_1 = arith.constant 0 : i32
    return %c0_i32, %c0_i32_0 : i32, i32
  }
  func.func @transform_3(%arg0: i32) -> (i32, i32) {
    %c0_i32 = arith.constant 0 : i32
    %c0_i32_0 = arith.constant 0 : i32
    %c0_i32_1 = arith.constant 0 : i32
    return %c0_i32, %c0_i32_0 : i32, i32
  }
  func.func @transform_4(%arg0: i32) -> (i32, i32) {
    %c0_i32 = arith.constant 0 : i32
    %c0_i32_0 = arith.constant 0 : i32
    %c0_i32_1 = arith.constant 0 : i32
    return %c0_i32, %c0_i32_0 : i32, i32
  }
  func.func @transform_5(%arg0: i32) -> (i32, i32) {
    %c0_i32 = arith.constant 0 : i32
    %c0_i32_0 = arith.constant 0 : i32
    %c0_i32_1 = arith.constant 0 : i32
    return %c0_i32, %c0_i32_0 : i32, i32
  }
  func.func @transform_6(%arg0: i32) -> (i32, i32) {
    %c0_i32 = arith.constant 0 : i32
    %c0_i32_0 = arith.constant 0 : i32
    %c0_i32_1 = arith.constant 0 : i32
    return %c0_i32, %c0_i32_0 : i32, i32
  }
  func.func @transform_7(%arg0: i32) -> (i32, i32, i32) {
    %c0_i32 = arith.constant 0 : i32
    %c0_i32_0 = arith.constant 0 : i32
    %c0_i32_1 = arith.constant 0 : i32
    %c0_i32_2 = arith.constant 0 : i32
    return %c0_i32, %c0_i32_0, %c0_i32_1 : i32, i32, i32
  }
  func.func @transform_8(%arg0: i32) -> (i32, i32) {
    %c0_i32 = arith.constant 0 : i32
    %c0_i32_0 = arith.constant 0 : i32
    %c0_i32_1 = arith.constant 0 : i32
    return %c0_i32, %c0_i32_0 : i32, i32
  }
  func.func @transform_9(%arg0: i32) -> (i32, i32) {
    %c0_i32 = arith.constant 0 : i32
    %c0_i32_0 = arith.constant 0 : i32
    %c0_i32_1 = arith.constant 0 : i32
    return %c0_i32, %c0_i32_0 : i32, i32
  }
  func.func @transform_10(%arg0: i32) -> (i32, i32) {
    %c0_i32 = arith.constant 0 : i32
    %c0_i32_0 = arith.constant 0 : i32
    %c0_i32_1 = arith.constant 0 : i32
    return %c0_i32, %c0_i32_0 : i32, i32
  }
  func.func @transform_11(%arg0: i32) -> (i32, i32) {
    %c0_i32 = arith.constant 0 : i32
    %c0_i32_0 = arith.constant 0 : i32
    %c0_i32_1 = arith.constant 0 : i32
    return %c0_i32, %c0_i32_0 : i32, i32
  }
  func.func @transform_12(%arg0: i32) -> (i32, i32) {
    %c0_i32 = arith.constant 0 : i32
    %c0_i32_0 = arith.constant 0 : i32
    %c0_i32_1 = arith.constant 0 : i32
    return %c0_i32, %c0_i32_0 : i32, i32
  }
  func.func @transform_13(%arg0: i32) -> (i32, i32) {
    %c0_i32 = arith.constant 0 : i32
    %c0_i32_0 = arith.constant 0 : i32
    %c0_i32_1 = arith.constant 0 : i32
    return %c0_i32, %c0_i32_0 : i32, i32
  }
  func.func @transform_14(%arg0: i32) -> (i32, i32) {
    %c0_i32 = arith.constant 0 : i32
    %c0_i32_0 = arith.constant 0 : i32
    %c0_i32_1 = arith.constant 0 : i32
    return %c0_i32, %c0_i32_0 : i32, i32
  }
  func.func @transform_15(%arg0: i32) -> (i32, i32) {
    %c0_i32 = arith.constant 0 : i32
    %c0_i32_0 = arith.constant 0 : i32
    %c0_i32_1 = arith.constant 0 : i32
    return %c0_i32, %c0_i32_0 : i32, i32
  }
  func.func @transform_16(%arg0: i32) -> (i32, i32, i32) {
    %c0_i32 = arith.constant 0 : i32
    %c0_i32_0 = arith.constant 0 : i32
    %c0_i32_1 = arith.constant 0 : i32
    %c0_i32_2 = arith.constant 0 : i32
    return %c0_i32, %c0_i32_0, %c0_i32_1 : i32, i32, i32
  }
  func.func @transform_17(%arg0: i32) -> (i32, i32) {
    %c0_i32 = arith.constant 0 : i32
    %c0_i32_0 = arith.constant 0 : i32
    %c0_i32_1 = arith.constant 0 : i32
    return %c0_i32, %c0_i32_0 : i32, i32
  }
  func.func @transform_18(%arg0: i32) -> (i32, i32) {
    %c0_i32 = arith.constant 0 : i32
    %c0_i32_0 = arith.constant 0 : i32
    %c0_i32_1 = arith.constant 0 : i32
    return %c0_i32, %c0_i32_0 : i32, i32
  }
  func.func @transform_19(%arg0: i32) -> (i32, i32) {
    %c0_i32 = arith.constant 0 : i32
    %c0_i32_0 = arith.constant 0 : i32
    %c0_i32_1 = arith.constant 0 : i32
    return %c0_i32, %c0_i32_0 : i32, i32
  }
  func.func @transform_20(%arg0: i32) -> (i32, i32) {
    %c0_i32 = arith.constant 0 : i32
    %c0_i32_0 = arith.constant 0 : i32
    %c0_i32_1 = arith.constant 0 : i32
    return %c0_i32, %c0_i32_0 : i32, i32
  }
  func.func @transform_21(%arg0: i32) -> (i32, i32) {
    %c0_i32 = arith.constant 0 : i32
    %c0_i32_0 = arith.constant 0 : i32
    %c0_i32_1 = arith.constant 0 : i32
    return %c0_i32, %c0_i32_0 : i32, i32
  }
  func.func @transform_22(%arg0: i32) -> (i32, i32) {
    %c0_i32 = arith.constant 0 : i32
    %c0_i32_0 = arith.constant 0 : i32
    %c0_i32_1 = arith.constant 0 : i32
    return %c0_i32, %c0_i32_0 : i32, i32
  }
  func.func @transform_23(%arg0: i32) -> (i32, i32) {
    %c0_i32 = arith.constant 0 : i32
    %c0_i32_0 = arith.constant 0 : i32
    %c0_i32_1 = arith.constant 0 : i32
    return %c0_i32, %c0_i32_0 : i32, i32
  }
  func.func @transform_24(%arg0: i32) -> (i32, i32) {
    %c0_i32 = arith.constant 0 : i32
    %c0_i32_0 = arith.constant 0 : i32
    %c0_i32_1 = arith.constant 0 : i32
    return %c0_i32, %c0_i32_0 : i32, i32
  }
  func.func @transform_25(%arg0: i32) -> (i32, i32, i32) {
    %c0_i32 = arith.constant 0 : i32
    %c0_i32_0 = arith.constant 0 : i32
    %c0_i32_1 = arith.constant 0 : i32
    %c0_i32_2 = arith.constant 0 : i32
    return %c0_i32, %c0_i32_0, %c0_i32_1 : i32, i32, i32
  }
  func.func @transform_26(%arg0: i32) -> (i32, i32) {
    %c0_i32 = arith.constant 0 : i32
    %c0_i32_0 = arith.constant 0 : i32
    %c0_i32_1 = arith.constant 0 : i32
    return %c0_i32, %c0_i32_0 : i32, i32
  }
  func.func @transform_27(%arg0: i32) -> (i32, i32) {
    %c0_i32 = arith.constant 0 : i32
    %c0_i32_0 = arith.constant 0 : i32
    %c0_i32_1 = arith.constant 0 : i32
    return %c0_i32, %c0_i32_0 : i32, i32
  }
  func.func @transform_28(%arg0: i32) -> (i32, i32) {
    %c0_i32 = arith.constant 0 : i32
    %c0_i32_0 = arith.constant 0 : i32
    %c0_i32_1 = arith.constant 0 : i32
    return %c0_i32, %c0_i32_0 : i32, i32
  }
  func.func @transform_29(%arg0: i32) -> (i32, i32) {
    %c0_i32 = arith.constant 0 : i32
    %c0_i32_0 = arith.constant 0 : i32
    %c0_i32_1 = arith.constant 0 : i32
    return %c0_i32, %c0_i32_0 : i32, i32
  }
  func.func @transform_30(%arg0: i32) -> (i32, i32) {
    %c0_i32 = arith.constant 0 : i32
    %c0_i32_0 = arith.constant 0 : i32
    %c0_i32_1 = arith.constant 0 : i32
    return %c0_i32, %c0_i32_0 : i32, i32
  }
  func.func @transform_31(%arg0: i32) -> (i32, i32) {
    %c0_i32 = arith.constant 0 : i32
    %c0_i32_0 = arith.constant 0 : i32
    %c0_i32_1 = arith.constant 0 : i32
    return %c0_i32, %c0_i32_0 : i32, i32
  }
  func.func @transform_32(%arg0: i32) -> (i32, i32) {
    %c0_i32 = arith.constant 0 : i32
    %c0_i32_0 = arith.constant 0 : i32
    %c0_i32_1 = arith.constant 0 : i32
    return %c0_i32, %c0_i32_0 : i32, i32
  }
  func.func @transform_33(%arg0: i32) -> (i32, i32) {
    %c0_i32 = arith.constant 0 : i32
    %c0_i32_0 = arith.constant 0 : i32
    %c0_i32_1 = arith.constant 0 : i32
    return %c0_i32, %c0_i32_0 : i32, i32
  }
  func.func @transform_34(%arg0: i32) -> (i32, i32, i32) {
    %c0_i32 = arith.constant 0 : i32
    %c0_i32_0 = arith.constant 0 : i32
    %c0_i32_1 = arith.constant 0 : i32
    %c0_i32_2 = arith.constant 0 : i32
    return %c0_i32, %c0_i32_0, %c0_i32_1 : i32, i32, i32
  }
  func.func @transform_35(%arg0: i32) -> (i32, i32) {
    %c0_i32 = arith.constant 0 : i32
    %c0_i32_0 = arith.constant 0 : i32
    %c0_i32_1 = arith.constant 0 : i32
    return %c0_i32, %c0_i32_0 : i32, i32
  }
  func.func @transform_36(%arg0: i32) -> (i32, i32) {
    %c0_i32 = arith.constant 0 : i32
    %c0_i32_0 = arith.constant 0 : i32
    %c0_i32_1 = arith.constant 0 : i32
    return %c0_i32, %c0_i32_0 : i32, i32
  }
  func.func @transform_37(%arg0: i32) -> (i32, i32) {
    %c0_i32 = arith.constant 0 : i32
    %c0_i32_0 = arith.constant 0 : i32
    %c0_i32_1 = arith.constant 0 : i32
    return %c0_i32, %c0_i32_0 : i32, i32
  }
  func.func @transform_38(%arg0: i32) -> (i32, i32) {
    %c0_i32 = arith.constant 0 : i32
    %c0_i32_0 = arith.constant 0 : i32
    %c0_i32_1 = arith.constant 0 : i32
    return %c0_i32, %c0_i32_0 : i32, i32
  }
  func.func @transform_39(%arg0: i32) -> (i32, i32) {
    %c0_i32 = arith.constant 0 : i32
    %c0_i32_0 = arith.constant 0 : i32
    %c0_i32_1 = arith.constant 0 : i32
    return %c0_i32, %c0_i32_0 : i32, i32
  }
  func.func @transform_40(%arg0: i32) -> (i32, i32) {
    %c0_i32 = arith.constant 0 : i32
    %c0_i32_0 = arith.constant 0 : i32
    %c0_i32_1 = arith.constant 0 : i32
    return %c0_i32, %c0_i32_0 : i32, i32
  }
  func.func @transform_41(%arg0: i32) -> (i32, i32) {
    %c0_i32 = arith.constant 0 : i32
    %c0_i32_0 = arith.constant 0 : i32
    %c0_i32_1 = arith.constant 0 : i32
    return %c0_i32, %c0_i32_0 : i32, i32
  }
  func.func @transform_42(%arg0: i32) -> (i32, i32) {
    %c0_i32 = arith.constant 0 : i32
    %c0_i32_0 = arith.constant 0 : i32
    %c0_i32_1 = arith.constant 0 : i32
    return %c0_i32, %c0_i32_0 : i32, i32
  }
  func.func @transform_43(%arg0: i32) -> (i32, i32, i32) {
    %c0_i32 = arith.constant 0 : i32
    %c0_i32_0 = arith.constant 0 : i32
    %c0_i32_1 = arith.constant 0 : i32
    return %arg0, %c0_i32, %c0_i32_0 : i32, i32, i32
  }
}

</mosaic_0001>

<bundles_post_ra>
// kernel: tpu_custom_call.1
= control target key start
LH: loop header
LB: loop body
LE: loop exit
PB: predicated region body
PF: predicated region fallthrough
CT: control target
= control target key end

     0   :  { %s8025_s6 = smov 1   ;;  %s8026_s10 = smov 2   ;;  %s9880_s0 = inlined_call_operand.smem [shape: u32[44], index: -1, kind: input, shape index: {}] }
   0x1   :  { %s8079_s5 = sld [smem:[%s9880_s0]]   ;;  %s8027_s14 = smov 3  }
   0x2   :  { %s8084_s9 = sld [smem:[%s9880_s0 + %s8025_s6]]   ;;  %s8028_s18 = smov 4  }
   0x3   :  { %s8089_s13 = sld [smem:[%s9880_s0 + %s8026_s10]]   ;;  %s8029_s22 = smov 5  }
   0x4   :  { %s8094_s17 = sld [smem:[%s9880_s0 + %s8027_s14]]   ;;  %s8030_s26 = smov 6  }
   0x5   :  { %s8099_s21 = sld [smem:[%s9880_s0 + %s8028_s18]]   ;;  %s8031_s30 = smov 7  }
   0x6   :  { %s8104_s25 = sld [smem:[%s9880_s0 + %s8029_s22]]   ;;  %s8032_s4 = smov 8  }
   0x7   :  { %9909 = sst [smem:[#allocation10_spill]] %s8079_s5  ;;  %s8033_s10 = smov 9  }
   0x8   :  { %9910 = sst [smem:[#allocation11_spill]] %s8084_s9  ;;  %s8034_s15 = smov 10  }
   0x9   :  { %s8109_s29 = sld [smem:[%s9880_s0 + %s8030_s26]]   ;;  %s8035_s20 = smov 11  }
   0xa   :  { %s8114_s3 = sld [smem:[%s9880_s0 + %s8031_s30]]   ;;  %s8036_s26 = smov 12  }
   0xb   :  { %s8119_s8 = sld [smem:[%s9880_s0 + %s8032_s4]]   ;;  %s8037_s1 = smov 13  }
   0xc   :  { %s8124_s14 = sld [smem:[%s9880_s0 + %s8033_s10]]   ;;  %s8038_s7 = smov 14  }
   0xd   :  { %s8129_s19 = sld [smem:[%s9880_s0 + %s8034_s15]]   ;;  %s8039_s15 = smov 15  }
   0xe   :  { %s8134_s24 = sld [smem:[%s9880_s0 + %s8035_s20]]   ;;  %s8040_s22 = smov 16  }
   0xf   :  { %s8139_s30 = sld [smem:[%s9880_s0 + %s8036_s26]]   ;;  %s8041_s28 = smov 17  }
  0x10   :  { %9911 = sst [smem:[#allocation12_spill]] %s8114_s3 }
  0x11   :  { %9912 = sst [smem:[#allocation13_spill]] %s8119_s8 }
  0x12   :  { %s8144_s6 = sld [smem:[%s9880_s0 + %s8037_s1]]  }
  0x13   :  { %9913 = sst [smem:[#allocation14_spill]] %s8129_s19 }
  0x14   :  { %s8149_s12 = sld [smem:[%s9880_s0 + %s8038_s7]]   ;;  %s8042_s7 = smov 18  }
  0x15   :  { %9914 = sst [smem:[#allocation15_spill]] %s8139_s30 }
  0x16   :  { %s8154_s20 = sld [smem:[%s9880_s0 + %s8039_s15]]   ;;  %s8043_s15 = smov 19  }
  0x17   :  { %s8159_s27 = sld [smem:[%s9880_s0 + %s8040_s22]]   ;;  %s8044_s22 = smov 20  }
  0x18   :  { %9915 = sst [smem:[#allocation16_spill]] %s8144_s6 }
  0x19   :  { %s8164_s4 = sld [smem:[%s9880_s0 + %s8041_s28]]   ;;  %s8045_s28 = smov 21  }
  0x1a   :  { %9916 = sst [smem:[#allocation17_spill]] %s8149_s12 }
  0x1b   :  { %s8169_s30 = sld [smem:[%s9880_s0 + %s8042_s7]]   ;;  %s8046_s7 = smov 22  }
  0x1c   :  { %9917 = sst [smem:[#allocation18_spill]] %s8154_s20 }
  0x1d   :  { %9918 = sst [smem:[#allocation19_spill]] %s8159_s27 }
  0x1e   :  { %s8174_s20 = sld [smem:[%s9880_s0 + %s8043_s15]]   ;;  %s8047_s15 = smov 23  }
  0x1f   :  { %9919 = sst [smem:[#allocation20_spill]] %s8164_s4 }
  0x20   :  { %s8179_s27 = sld [smem:[%s9880_s0 + %s8044_s22]]   ;;  %s8048_s22 = smov 24  }
  0x21   :  { %9920 = sst [smem:[#allocation21_spill]] %s8169_s30 }
  0x22   :  { %s8184_s4 = sld [smem:[%s9880_s0 + %s8045_s28]]   ;;  %s8049_s28 = smov 25  }
  0x23   :  { %s8189_s30 = sld [smem:[%s9880_s0 + %s8046_s7]]   ;;  %s8050_s7 = smov 26  }
  0x24   :  { %9921 = sst [smem:[#allocation22_spill]] %s8174_s20 }
  0x25   :  { %s8194_s20 = sld [smem:[%s9880_s0 + %s8047_s15]]   ;;  %s8051_s15 = smov 27  }
  0x26   :  { %9922 = sst [smem:[#allocation23_spill]] %s8179_s27 }
  0x27   :  { %s8199_s27 = sld [smem:[%s9880_s0 + %s8048_s22]]   ;;  %s8052_s22 = smov 28  }
  0x28   :  { %9923 = sst [smem:[#allocation24_spill]] %s8184_s4 }
  0x29   :  { %s8204_s4 = sld [smem:[%s9880_s0 + %s8049_s28]]   ;;  %s8053_s28 = smov 29  }
  0x2a   :  { %s8209_s19 = sld [smem:[%s9880_s0 + %s8050_s7]]   ;;  %s8054_s7 = smov 30  }
  0x2b   :  { %9924 = sst [smem:[#allocation25_spill]] %s8194_s20 }
  0x2c   :  { %s8214_s20 = sld [smem:[%s9880_s0 + %s8051_s15]]   ;;  %s8055_s15 = smov 31  }
  0x2d   :  { %9925 = sst [smem:[#allocation26_spill]] %s8199_s27 }
  0x2e   :  { %s8219_s27 = sld [smem:[%s9880_s0 + %s8052_s22]]   ;;  %s8056_s22 = smov 32  }
  0x2f   :  { %9926 = sst [smem:[#allocation27_spill]] %s8204_s4 }
  0x30   :  { %9927 = sst [smem:[#allocation28_spill]] %s8209_s19 }
  0x31   :  { %s8224_s4 = sld [smem:[%s9880_s0 + %s8053_s28]]   ;;  %s8057_s28 = smov 33  }
  0x32   :  { %9928 = sst [smem:[#allocation29_spill]] %s8214_s20 }
  0x33   :  { %s8229_s19 = sld [smem:[%s9880_s0 + %s8054_s7]]   ;;  %s8058_s7 = smov 34  }
  0x34   :  { %9929 = sst [smem:[#allocation30_spill]] %s8219_s27 }
  0x35   :  { %s8234_s20 = sld [smem:[%s9880_s0 + %s8055_s15]]   ;;  %s8059_s15 = smov 35  }
  0x36   :  { %s8239_s27 = sld [smem:[%s9880_s0 + %s8056_s22]]   ;;  %s8060_s22 = smov 36  }
  0x37   :  { %9930 = sst [smem:[#allocation31_spill]] %s8224_s4 }
  0x38   :  { %s8244_s4 = sld [smem:[%s9880_s0 + %s8057_s28]]   ;;  %s8061_s28 = smov 37  }
  0x39   :  { %9931 = sst [smem:[#allocation32_spill]] %s8229_s19 }
  0x3a   :  { %s8249_s19 = sld [smem:[%s9880_s0 + %s8058_s7]]   ;;  %s8062_s7 = smov 38  }
  0x3b   :  { %s8254_s12 = sld [smem:[%s9880_s0 + %s8059_s15]]   ;;  %s8063_s15 = smov 39  }
  0x3c   :  { %9932 = sst [smem:[#allocation33_spill]] %s8239_s27 }
  0x3d   :  { %s8259_s27 = sld [smem:[%s9880_s0 + %s8060_s22]]   ;;  %s8064_s22 = smov 40  }
  0x3e   :  { %9933 = sst [smem:[#allocation34_spill]] %s8244_s4 }
  0x3f   :  { %s8264_s4 = sld [smem:[%s9880_s0 + %s8061_s28]]   ;;  %s8065_s28 = smov 41  }
  0x40   :  { %9934 = sst [smem:[#allocation35_spill]] %s8249_s19 }
  0x41   :  { %9935 = sst [smem:[#allocation36_spill]] %s8254_s12 }
  0x42   :  { %s8269_s19 = sld [smem:[%s9880_s0 + %s8062_s7]]   ;;  %s8066_s7 = smov 42  }
  0x43   :  { %9936 = sst [smem:[#allocation37_spill]] %s8259_s27 }
  0x44   :  { %s8274_s12 = sld [smem:[%s9880_s0 + %s8063_s15]]   ;;  %s8067_s15 = smov 43  }
  0x45   :  { %9937 = sst [smem:[#allocation38_spill]] %s8264_s4 }
  0x46   :  { %s8279_s27 = sld [smem:[%s9880_s0 + %s8064_s22]]  }
  0x47   :  { %s8284_s4 = sld [smem:[%s9880_s0 + %s8065_s28]]  }
  0x48   :  { %9938 = sst [smem:[#allocation39_spill]] %s8269_s19 }
  0x49   :  { %s8289_s19 = sld [smem:[%s9880_s0 + %s8066_s7]]  }
  0x4a   :  { %9939 = sst [smem:[#allocation40_spill]] %s8274_s12 }
  0x4b   :  { %s8294_s12 = sld [smem:[%s9880_s0 + %s8067_s15]]  }
  0x4d   :  { %9940 = sst [smem:[#allocation41_spill]] %s8284_s4 }
  0x4e   :  { %92 = vsyncpa [#allocation8], 0 }
  0x4f   :  { %94 = vsyncpa [#allocation8 + $0x1], 0  ;;  %s8296_s22 = smov 0   ;;  %s8298_s23 = smov 0  }
  0x50   :  { %s8300_s26 = smov 0   ;;  %s8302_s28 = smov 0  }
  0x51 LB: > { %s9941_s9 = sld [smem:[#allocation11_spill]]  ;;  %s8317_s0 = sadd.s32 4294967295, %s8023_s28   ;;  %s8023_s28 = sphi %s8302_s28, %s9995_s28   ;;  %s8019_s26 = sphi %s8300_s26, %s9994_s26   ;;  %s8015_s23 = sphi %s8298_s23, %s9993_s23   ;;  %s8011_s22 = sphi %s8296_s22, %s9992_s22  }
  0x52   : > { %s9942_s6 = sld [smem:[#allocation16_spill]]  ;;  %s6684_s1 = sadd.s32 4294967294, %s8023_s28  }
  0x53   : > { %s9943_s4 = sld [smem:[#allocation41_spill]]  ;;  %s8321_s2 = sadd.s32 1, %s8023_s28  }
  0x54   : > { %s9944_s3 = sld [smem:[#allocation12_spill]]  ;;  %s1015_s7 = sadd.s32 1, %s8019_s26 }
  0x55   : > { %s1012_s10 = ssub.s32 %s8023_s28, %s8321_s2  ;;  %p1025_p0 = scmp.ne.s32.totalorder %s8019_s26, %s8015_s23 }
  0x56   : > { %p1013_p1 = scmp.eq.s32.totalorder %s1012_s10, 0  ;;  %p1026_p2 = scmp.eq.s32.totalorder %s8317_s0, 1 }
  0x57   : > { %p1031_p3 = scmp.ne.s32.totalorder %s8015_s23, %s8011_s22  ;;  %p1032_p4 = scmp.eq.s32.totalorder %s6684_s1, 1 }
  0x58   : > { %s8332_s11 = scalar_select %p1013_p1, %s8019_s26, %s1015_s7  }
  0x59   : > { %p8334_p5 = por %p1026_p2, %p1025_p0  ;;  %p8338_p6 = por %p1032_p4, %p1031_p3 }
  0x5a   : > { %p6687_p7 = scmp.ge.s32.totalorder %s8023_s28, 1  ;;  %p1184_p8 = scmp.lt.s32.totalorder %s8023_s28, 3 }
  0x5c   : > { %p1185_p9 = pnand %p6687_p7, %p1184_p8 }
  0x5e   : > { %1188 = sbr.rel (%p1185_p9) target bundleno = 3276 (0xccc), region = 192 }
  0x63   : > { %v1879_v0 = vld [vmem:[%s8094_s17 + $0x58] sm:$0xff]  ;;  %vm1627_vm0 = vcmask 1040384   ;;  %v8068_v2 = vmov 0   ;;  %p1288_p10 = scmp.lt.s32.totalorder %s8317_s0, 1  ;;  %v7722_v3 = vld [vmem:[%s9941_s9 + $0x30] sm:$0xff]  ;;  %s9947_s5 = sld [smem:[#allocation10_spill]] }
  0x64   : > { %v7723_v1 = vld [vmem:[%s9941_s9 + $0x38] sm:$0xff]  ;;  %7942 = vset.pattern.permute.xlu0 %v8068_v2  ;;  %7943 = vset.pattern.permute.xlu1 %v8068_v2  ;;  %v1881_v4 = vld [vmem:[%s8094_s17 + $0x68] sm:$0xff]  ;;  %vm1628_vm1 = vcmask 1041408   ;;  %v8069_v5 = vmov 65535   ;;  %v1880_v10 = vld [vmem:[%s8094_s17 + $0x60] sm:$0xff]  ;;  %vm1572_vm2 = vcmask 154624  }
  0x65   : > { %1961 = vperm.xlu0 %7942, %v1879_v0   ;;  %1634 = vmatpush.bf16.msra.mxu0 %v7723_v1  ;;  %v1629_v6 = vsel %vm1627_vm0, 4294967295, %v8069_v5  ;;  %v1348_v7 = vld [vmem:[%s9941_s9 + $0x48] sm:$0x3]  ;;  %s1289_s18 = scalar_select %p1288_p10, %s8317_s0, 1  ;;  %v7720_v15 = vld [vmem:[%s9941_s9 + $0x20] sm:$0xff]  ;;  %v7719_v19 = vld [vmem:[%s9941_s9 + $0x18] sm:$0xff] }
  0x66   : > { %1971 = vperm.xlu1 %7943, %v1881_v4   ;;  %7944 = vset.pattern.permute.xlu2 %v8068_v2  ;;  %v1552_v8 = vunpack.c.l.b16 %v1348_v7  ;;  %v1630_v9 = vsel %vm1628_vm1, %v1629_v6, 0  ;;  %v7721_v11 = vld [vmem:[%s9941_s9 + $0x28] sm:$0xff]  ;;  %v7724_v16 = vld [vmem:[%s9941_s9 + $0x40] sm:$0xff]  ;;  %v1883_v20 = vld [vmem:[%s8094_s17 + $0x78] sm:$0xff]  ;;  %vm2120_vm3 = vcmask 64512   ;;  %vm2161_vm4 = vcmask 62464  }
  0x67   : > { %s7856_s1 = smul.u32 288, %s1289_s18  ;;  %v1877_v14 = vld [vmem:[%s8094_s17 + $0x48] sm:$0xff]  ;;  %v1875_v22 = vld [vmem:[%s8094_s17 + $0x38] sm:$0xff]  ;;  %v1878_v23 = vld [vmem:[%s8094_s17 + $0x50] sm:$0xff]  ;;  %vm2856_vm5 = vcmask 261120   ;;  %vm2999_vm6 = vcmask 1043456  }
  0x68   : > { %v1562_v12 = vpack.c.b16 %v1552_v8, %v1552_v8  ;;  %v7718_v24 = vld [vmem:[%s9941_s9 + $0x10] sm:$0xff]  ;;  %1956 = vperm.xlu2 %7944, %v1878_v23   ;;  %v7717_v25 = vld [vmem:[%s9941_s9 + $0x8] sm:$0xff]  ;;  %v1884_v26 = vld [vmem:[%s8094_s17 + $0x80] sm:$0xff]  ;;  %s9965_s8 = sld [smem:[#allocation13_spill]]  ;;  %vm4142_vm7 = vcmask 130048   ;;  %vm4155_vm8 = vcmask 128000  }
  0x69   : > { %1635 = vmatpush.bf16.msra.mxu0 %v7722_v3  ;;  %s8354_s7 = scalar_lea.vmem %s9947_s5, %s7856_s1  ;;  %v1885_v27 = vld [vmem:[%s8094_s17 + $0x88] sm:$0xff]  ;;  %v1882_v28 = vld [vmem:[%s8094_s17 + $0x70] sm:$0xff]  ;;  %v7716_v29 = vld [vmem:[%s9941_s9] sm:$0xff]  ;;  %s9966_s10 = sld [smem:[#allocation17_spill]]  ;;  %vm5083_vm9 = vcmask 654336   ;;  %vm5146_vm10 = vcmask 523264  }
  0x6a   : > { %v1632_v13 = vand.u32 %v1630_v9, %v1562_v12  ;;  %v7680_v17 = vld [vmem:[%s8354_s7 + $0x4] sm:$0xf]  ;;  %v6694_v18 = vld [vmem:[%s8354_s7 + $0x8] sm:$0xf0]  ;;  %v6692_v30 = vld [vmem:[%s8354_s7] sm:$0xf] }
  0x6b   : > { %v6697_v21 = vor.u32 %v7680_v17, %v6694_v18  ;;  %v7681_v31 = vld [vmem:[%s8354_s7 + $0x4] sm:$0xf0]  ;;  %v7682_v32 = vld [vmem:[%s8354_s7 + $0x14] sm:$0xf]  ;;  %v6702_v33 = vld [vmem:[%s8354_s7 + $0x18] sm:$0xf0] }
  0x6c   : > { %1739 = vmatpush.bf16.msra.mxu1 %v1632_v13  ;;  %v6693_v34 = vor.u32 %v7681_v31, %v6692_v30  ;;  %v1873_v35 = vld [vmem:[%s8094_s17 + $0x28] sm:$0xff]  ;;  %v6705_v36 = vor.u32 %v7682_v32, %v6702_v33  ;;  %v1874_v37 = vld [vmem:[%s8094_s17 + $0x30] sm:$0xff]  ;;  %v1876_v38 = vld [vmem:[%s8094_s17 + $0x40] sm:$0xff]  ;;  %s9967_s18 = sld [smem:[#allocation14_spill]]  ;;  %vm5199_vm11 = vcmask 259072   ;;  %vm5760_vm12 = vcmask 195584  }
  0x6d   : > { %1966 = vperm.xlu0 %7942, %v1880_v10   ;;  %1636 = vmatpush.bf16.msra.mxu0 %v7721_v11  ;;  %v1872_v39 = vld [vmem:[%s8094_s17 + $0x20] sm:$0xff]  ;;  %v1869_v40 = vld [vmem:[%s8094_s17 + $0x8] sm:$0xff]  ;;  %v1886_v41 = vld [vmem:[%s8094_s17 + $0x90] sm:$0xff]  ;;  %s9968_s1 = sld [smem:[#allocation15_spill]]  ;;  %vm5872_vm13 = vcmask 517120  }
  0x6e   : > { %1951 = vperm.xlu1 %7943, %v1877_v14   ;;  %v6700_v42 = vld [vmem:[%s8354_s7 + $0x10] sm:$0xf]  ;;  %v7683_v43 = vld [vmem:[%s8354_s7 + $0x14] sm:$0xf0]  ;;  %v7684_v44 = vld [vmem:[%s8354_s7 + $0x24] sm:$0xf] }
  0x6f   : > { %v6710_v45 = vld [vmem:[%s8354_s7 + $0x28] sm:$0xf0]  ;;  %v6701_v46 = vor.u32 %v7683_v43, %v6700_v42  ;;  %v1868_v47 = vld [vmem:[%s8094_s17] sm:$0xff]  ;;  %v1871_v49 = vld [vmem:[%s8094_s17 + $0x18] sm:$0xff] }
  0x70   : > { %1740 = vmatpush.bf16.msra.mxu1 %v7724_v16  ;;  %1976 = vperm.xlu2 %7944, %v1882_v28   ;;  %v6713_v48 = vor.u32 %v7684_v44, %v6710_v45  ;;  %v1870_v50 = vld [vmem:[%s8094_s17 + $0x10] sm:$0xff]  ;;  %v6708_v51 = vld [vmem:[%s8354_s7 + $0x20] sm:$0xf]  ;;  %v7685_v52 = vld [vmem:[%s8354_s7 + $0x24] sm:$0xf0] }
  0x71   : > { %1637 = vmatpush.bf16.msra.mxu0 %v7720_v15  ;;  %v7686_v53 = vld [vmem:[%s8354_s7 + $0x34] sm:$0xf]  ;;  %v6718_v54 = vld [vmem:[%s8354_s7 + $0x38] sm:$0xf0]  ;;  %v6709_v55 = vor.u32 %v7685_v52, %v6708_v51  ;;  %v6716_v58 = vld [vmem:[%s8354_s7 + $0x30] sm:$0xf] }
  0x72   : > { %v6721_v56 = vor.u32 %v7686_v53, %v6718_v54  ;;  %v1895_v57 = vld [vmem:[%s8094_s17 + $0xd8] sm:$0xff]  ;;  %v7688_v60 = vld [vmem:[%s8354_s7 + $0x44] sm:$0xf]  ;;  %v6726_v61 = vld [vmem:[%s8354_s7 + $0x48] sm:$0xf0] }
  0x73   : > { %6870 = vmatmul.msk.bf16.vlgmr.msra.gmra.mxu1 %vm1572_vm2, %v6697_v21  ;;  %v7687_v59 = vld [vmem:[%s8354_s7 + $0x34] sm:$0xf0]  ;;  %v6729_v63 = vor.u32 %v7688_v60, %v6726_v61  ;;  %v1897_v0 = vld [vmem:[%s8094_s17 + $0xe8] sm:$0xff]  ;;  %v1898_v2 = vld [vmem:[%s8094_s17 + $0xf0] sm:$0xff] }
  0x74   : > { %v6717_v62 = vor.u32 %v7687_v59, %v6716_v58  ;;  %v1893_v1 = vld [vmem:[%s8094_s17 + $0xc8] sm:$0xff]  ;;  %v6724_v3 = vld [vmem:[%s8354_s7 + $0x40] sm:$0xf]  ;;  %v7690_v5 = vld [vmem:[%s8354_s7 + $0x54] sm:$0xf] }
  0x75   : > { %1981 = vperm.xlu0 %7942, %v1883_v20   ;;  %1638 = vmatpush.bf16.msra.mxu0 %v7719_v19  ;;  %v7689_v4 = vld [vmem:[%s8354_s7 + $0x44] sm:$0xf0]  ;;  %v6734_v6 = vld [vmem:[%s8354_s7 + $0x58] sm:$0xf0]  ;;  %v1892_v10 = vld [vmem:[%s8094_s17 + $0xc0] sm:$0xff] }
  0x76   : > { %1941 = vperm.xlu1 %7943, %v1875_v22   ;;  %v1899_v7 = vld [vmem:[%s8094_s17 + $0xf8] sm:$0xff]  ;;  %v6725_v8 = vor.u32 %v7689_v4, %v6724_v3  ;;  %v6737_v9 = vor.u32 %v7690_v5, %v6734_v6  ;;  %v1896_v11 = vld [vmem:[%s8094_s17 + $0xe0] sm:$0xff]  ;;  %v1902_v13 = vld [vmem:[%s8094_s17 + $0x110] sm:$0xff] }
  0x77   : > { %v1900_v12 = vld [vmem:[%s8094_s17 + $0x100] sm:$0xff]  ;;  %v6732_v14 = vld [vmem:[%s8354_s7 + $0x50] sm:$0xf]  ;;  %v7691_v15 = vld [vmem:[%s8354_s7 + $0x54] sm:$0xf0] }
  0x78   : > { %1946 = vperm.xlu2 %7944, %v1876_v38   ;;  %v7692_v16 = vld [vmem:[%s8354_s7 + $0x64] sm:$0xf]  ;;  %v6742_v17 = vld [vmem:[%s8354_s7 + $0x68] sm:$0xf0]  ;;  %v1894_v18 = vld [vmem:[%s8094_s17 + $0xd0] sm:$0xff]  ;;  %v6733_v20 = vor.u32 %v7691_v15, %v6732_v14 }
  0x79   : > { %1639 = vmatpush.bf16.msra.mxu0 %v7718_v24  ;;  %v1889_v19 = vld [vmem:[%s8094_s17 + $0xa8] sm:$0xff]  ;;  %v6745_v21 = vor.u32 %v7692_v16, %v6742_v17  ;;  %v1887_v22 = vld [vmem:[%s8094_s17 + $0x98] sm:$0xff]  ;;  %v3051_v42 = vld [vmem:[%s9942_s6 + $0x20] sm:$0xff] }
  0x7a   : > { %v1891_v24 = vld [vmem:[%s8094_s17 + $0xb8] sm:$0xff]  ;;  %v7693_v28 = vld [vmem:[%s8354_s7 + $0x64] sm:$0xf0]  ;;  %v3053_v44 = vld [vmem:[%s9942_s6 + $0x30] sm:$0xff] }
  0x7b   : > { %v6750_v31 = vld [vmem:[%s8354_s7 + $0x78] sm:$0xf0]  ;;  %v1901_v32 = vld [vmem:[%s8094_s17 + $0x108] sm:$0xff]  ;;  %v6748_v45 = vld [vmem:[%s8354_s7 + $0x70] sm:$0xf] }
  0x7c   : > { %v3048_v33 = vld [vmem:[%s9942_s6 + $0x8] sm:$0xff]  ;;  %v3050_v38 = vld [vmem:[%s9942_s6 + $0x18] sm:$0xff]  ;;  %v6756_v61 = vld [vmem:[%s8354_s7 + $0x80] sm:$0xf] }
  0x7d   : > { %1986 = vperm.xlu0 %7942, %v1884_v26   ;;  %1640 = vmatpush.bf16.msra.mxu0 %v7717_v25  ;;  %v1888_v25 = vld [vmem:[%s8094_s17 + $0xa0] sm:$0xff]  ;;  %v3054_v58 = vld [vmem:[%s9942_s6 + $0x38] sm:$0xff]  ;;  %v3056_v59 = vld [vmem:[%s9942_s6 + $0x48] sm:$0xff] }
  0x7e   : > { %1991 = vperm.xlu1 %7943, %v1885_v27   ;;  %v3047_v26 = vld [vmem:[%s9942_s6] sm:$0xff]  ;;  %v7698_v4 = vld [vmem:[%s8354_s7 + $0x94] sm:$0xf]  ;;  %v6766_v5 = vld [vmem:[%s8354_s7 + $0x98] sm:$0xf0] }
  0x7f   : > { %v6740_v27 = vld [vmem:[%s8354_s7 + $0x60] sm:$0xf]  ;;  %v3052_v15 = vld [vmem:[%s9942_s6 + $0x28] sm:$0xff]  ;;  %v4075_v16 = vld [vmem:[%s8189_s30 + $0x18] sm:$0xff] }
  0x80   : > { %1996 = vperm.xlu2 %7944, %v1886_v41   ;;  %v1890_v41 = vld [vmem:[%s8094_s17 + $0xb0] sm:$0xff] }
  0x81   : > { %1641 = vmatpush.bf16.msra.mxu0 %v7716_v29  ;;  %v7694_v29 = vld [vmem:[%s8354_s7 + $0x74] sm:$0xf] }
  0x83   : > { %6871 = vmatmul.msk.bf16.gmra.mxu1 %vm1572_vm2, %v6705_v36  ;;  %v6753_v36 = vor.u32 %v7694_v29, %v6750_v31  ;;  %v3055_v29 = vld [vmem:[%s9942_s6 + $0x40] sm:$0xff]  ;;  %v4078_v31 = vld [vmem:[%s8189_s30 + $0x30] sm:$0xff] }
  0x84   : > { %1642 = vmatmul.bf16.vlgmr.msra.gmra.mxu0 %v6693_v34  ;;  %v6741_v34 = vor.u32 %v7693_v28, %v6740_v27  ;;  %v7699_v27 = vld [vmem:[%s8354_s7 + $0x94] sm:$0xf0] }
  0x85   : > { %1931 = vperm.xlu0 %7942, %v1873_v35  }
  0x86   : > { %1936 = vperm.xlu1 %7943, %v1874_v37  }
  0x88   : > { %1921 = vperm.xlu2 %7944, %v1871_v49   ;;  %v7696_v49 = vld [vmem:[%s8354_s7 + $0x84] sm:$0xf] }
  0x8d   : > { %1926 = vperm.xlu0 %7942, %v1872_v39   ;;  %v9892_v39 = vmov 0.0  }
  0x8e   : > { %1911 = vperm.xlu1 %7943, %v1869_v40   ;;  %2123 = vst.msk [vmem:[#allocation2 + $0x10] sm:$0xff] %vm2120_vm3, %v9892_v39 }
  0x8f   : > { %2124 = vst.msk [vmem:[#allocation2 + $0x18] sm:$0xff] %vm2120_vm3, %v9892_v39 }
  0x90   : > { %1916 = vperm.xlu2 %7944, %v1870_v50   ;;  %2121 = vst.msk [vmem:[#allocation2] sm:$0xff] %vm2120_vm3, %v9892_v39  ;;  %v6758_v50 = vld [vmem:[%s8354_s7 + $0x88] sm:$0xf0] }
  0x91   : > { %2122 = vst.msk [vmem:[#allocation2 + $0x8] sm:$0xff] %vm2120_vm3, %v9892_v39  ;;  %v6761_v52 = vor.u32 %v7696_v49, %v6758_v50 }
  0x92   : > { %2125 = vst.msk [vmem:[#allocation2 + $0x20] sm:$0xff] %vm2120_vm3, %v9892_v39 }
  0x93   : > { %6872 = vmatmul.msk.bf16.gmra.mxu1 %vm1572_vm2, %v6713_v48  ;;  %2126 = vst.msk [vmem:[#allocation2 + $0x28] sm:$0xff] %vm2120_vm3, %v9892_v39 }
  0x94   : > { %1647 = vmatmul.bf16.gmra.mxu0 %v6701_v46  ;;  %2127 = vst.msk [vmem:[#allocation2 + $0x30] sm:$0xff] %vm2120_vm3, %v9892_v39  ;;  %v7695_v46 = vld [vmem:[%s8354_s7 + $0x74] sm:$0xf0] }
  0x95   : > { %1906 = vperm.xlu0 %7942, %v1868_v47   ;;  %2128 = vst.msk [vmem:[#allocation2 + $0x38] sm:$0xff] %vm2120_vm3, %v9892_v39  ;;  %v6749_v51 = vor.u32 %v7695_v46, %v6748_v45 }
  0x96   : > { %2041 = vperm.xlu1 %7943, %v1895_v57   ;;  %2129 = vst.msk [vmem:[#allocation2 + $0x40] sm:$0xff] %vm2120_vm3, %v9892_v39  ;;  %v1903_v57 = vld [vmem:[%s8094_s17 + $0x118] sm:$0xff] }
  0x97   : > { %2130 = vst.msk [vmem:[#allocation2 + $0x48] sm:$0xff] %vm2120_vm3, %v9892_v39 }
  0x98   : > { %2046 = vperm.xlu2 %7944, %v1896_v11   ;;  %2131 = vst.msk [vmem:[#allocation2 + $0x50] sm:$0xff] %vm2120_vm3, %v9892_v39  ;;  %v4074_v11 = vld [vmem:[%s8189_s30 + $0x10] sm:$0xff] }
  0x99   : > { %2132 = vst.msk [vmem:[#allocation2 + $0x58] sm:$0xff] %vm2120_vm3, %v9892_v39 }
  0x9a   : > { %2133 = vst.msk [vmem:[#allocation2 + $0x60] sm:$0xff] %vm2120_vm3, %v9892_v39 }
  0x9b   : > { %2134 = vst.msk [vmem:[#allocation2 + $0x68] sm:$0xff] %vm2120_vm3, %v9892_v39 }
  0x9c   : > { %2135 = vst.msk [vmem:[#allocation2 + $0x70] sm:$0xff] %vm2120_vm3, %v9892_v39 }
  0x9d   : > { %2051 = vperm.xlu0 %7942, %v1897_v0   ;;  %2136 = vst.msk [vmem:[#allocation2 + $0x78] sm:$0xff] %vm2120_vm3, %v9892_v39  ;;  %v3049_v0 = vld [vmem:[%s9942_s6 + $0x10] sm:$0xff]  ;;  %s7851_s6 = sshll.u32 %s8317_s0, 4 }
  0x9e   : > { %2031 = vperm.xlu1 %7943, %v1893_v1   ;;  %2137 = vst.msk [vmem:[#allocation2 + $0x80] sm:$0xff] %vm2120_vm3, %v9892_v39  ;;  %v4072_v1 = vld [vmem:[%s8189_s30] sm:$0xff] }
  0x9f   : > { %2138 = vst.msk [vmem:[#allocation2 + $0x88] sm:$0xff] %vm2120_vm3, %v9892_v39 }
  0xa0   : > { %2036 = vperm.xlu2 %7944, %v1894_v18   ;;  %2139 = vst.msk [vmem:[#allocation2 + $0x90] sm:$0xff] %vm2120_vm3, %v9892_v39 }
  0xa1   : > { %2140 = vst.msk [vmem:[#allocation2 + $0x98] sm:$0xff] %vm2120_vm3, %v9892_v39 }
  0xa2   : > { %2141 = vst.msk [vmem:[#allocation2 + $0xa0] sm:$0xff] %vm2120_vm3, %v9892_v39 }
  0xa3   : > { %6873 = vmatmul.msk.bf16.gmra.mxu1 %vm1572_vm2, %v6721_v56  ;;  %2142 = vst.msk [vmem:[#allocation2 + $0xa8] sm:$0xff] %vm2120_vm3, %v9892_v39 }
  0xa4   : > { %1652 = vmatmul.bf16.gmra.mxu0 %v6709_v55  ;;  %2143 = vst.msk [vmem:[#allocation2 + $0xb0] sm:$0xff] %vm2120_vm3, %v9892_v39 }
  0xa5   : > { %2056 = vperm.xlu0 %7942, %v1898_v2   ;;  %2144 = vst.msk [vmem:[#allocation2 + $0xb8] sm:$0xff] %vm2120_vm3, %v9892_v39 }
  0xa6   : > { %2061 = vperm.xlu1 %7943, %v1899_v7   ;;  %2145 = vst.msk [vmem:[#allocation2 + $0xc0] sm:$0xff] %vm2120_vm3, %v9892_v39 }
  0xa7   : > { %2146 = vst.msk [vmem:[#allocation2 + $0xc8] sm:$0xff] %vm2120_vm3, %v9892_v39 }
  0xa8   : > { %2021 = vperm.xlu2 %7944, %v1891_v24   ;;  %2147 = vst.msk [vmem:[#allocation2 + $0xd0] sm:$0xff] %vm2120_vm3, %v9892_v39 }
  0xa9   : > { %2148 = vst.msk [vmem:[#allocation2 + $0xd8] sm:$0xff] %vm2120_vm3, %v9892_v39 }
  0xaa   : > { %2149 = vst.msk [vmem:[#allocation2 + $0xe0] sm:$0xff] %vm2120_vm3, %v9892_v39 }
  0xab   : > { %2150 = vst.msk [vmem:[#allocation2 + $0xe8] sm:$0xff] %vm2120_vm3, %v9892_v39 }
  0xac   : > { %2151 = vst.msk [vmem:[#allocation2 + $0xf0] sm:$0xff] %vm2120_vm3, %v9892_v39 }
  0xad   : > { %2026 = vperm.xlu0 %7942, %v1892_v10   ;;  %v6769_v10 = vor.u32 %v7698_v4, %v6766_v5  ;;  %2152 = vst.msk [vmem:[#allocation2 + $0xf8] sm:$0xff] %vm2120_vm3, %v9892_v39  ;;  %v7701_v4 = vld [vmem:[%s8354_s7 + $0xa4] sm:$0xf0] }
  0xae   : > { %2066 = vperm.xlu1 %7943, %v1900_v12   ;;  %2153 = vst.msk [vmem:[#allocation2 + $0x100] sm:$0xff] %vm2120_vm3, %v9892_v39 }
  0xaf   : > { %2154 = vst.msk [vmem:[#allocation2 + $0x108] sm:$0xff] %vm2120_vm3, %v9892_v39 }
  0xb0   : > { %2071 = vperm.xlu2 %7944, %v1901_v32   ;;  %2155 = vst.msk [vmem:[#allocation2 + $0x110] sm:$0xff] %vm2120_vm3, %v9892_v39  ;;  %v7700_v32 = vld [vmem:[%s8354_s7 + $0xa4] sm:$0xf] }
  0xb1   : > { %2156 = vst.msk [vmem:[#allocation2 + $0x118] sm:$0xff] %vm2120_vm3, %v9892_v39 }
  0xb2   : > { %2157 = vst.msk [vmem:[#allocation2 + $0x120] sm:$0xff] %vm2120_vm3, %v9892_v39 }
  0xb3   : > { %6874 = vmatmul.msk.bf16.gmra.mxu1 %vm1572_vm2, %v6729_v63  ;;  %v8520_v63 = vld [vmem:[%s8089_s13] ss:$0 sm:$0xff]  ;;  %2158 = vst.msk [vmem:[#allocation2 + $0x128] sm:$0xff] %vm2120_vm3, %v9892_v39 }
  0xb4   : > { %1657 = vmatmul.bf16.gmra.mxu0 %v6717_v62  ;;  %v7697_v62 = vld [vmem:[%s8354_s7 + $0x84] sm:$0xf0]  ;;  %2159 = vst.msk [vmem:[#allocation2 + $0x130] sm:$0xff] %vm2120_vm3, %v9892_v39 }
  0xb5   : > { %2076 = vperm.xlu0 %7942, %v1902_v13   ;;  %v6757_v6 = vor.u32 %v7697_v62, %v6756_v61  ;;  %2160 = vst.msk [vmem:[#allocation2 + $0x138] sm:$0xff] %vm2120_vm3, %v9892_v39  ;;  %v5175_v61 = vld [vmem:[%s8234_s20 + $0x8] sm:$0xff] }
  0xb6   : > { %2011 = vperm.xlu1 %7943, %v1889_v19   ;;  %3117 = vst.msk [vmem:[#allocation3] sm:$0xff] %vm2120_vm3, %v9892_v39 }
  0xb7   : > { %3118 = vst.msk [vmem:[#allocation3 + $0x8] sm:$0xff] %vm2120_vm3, %v9892_v39 }
  0xb8   : > { %2016 = vperm.xlu2 %7944, %v1890_v41   ;;  %3119 = vst.msk [vmem:[#allocation3 + $0x10] sm:$0xff] %vm2120_vm3, %v9892_v39 }
  0xb9   : > { %3120 = vst.msk [vmem:[#allocation3 + $0x18] sm:$0xff] %vm2120_vm3, %v9892_v39 }
  0xba   : > { %3121 = vst.msk [vmem:[#allocation3 + $0x20] sm:$0xff] %vm2120_vm3, %v9892_v39 }
  0xbb   : > { %3122 = vst.msk [vmem:[#allocation3 + $0x28] sm:$0xff] %vm2120_vm3, %v9892_v39 }
  0xbc   : > { %3123 = vst.msk [vmem:[#allocation3 + $0x30] sm:$0xff] %vm2120_vm3, %v9892_v39 }
  0xbd   : > { %2001 = vperm.xlu0 %7942, %v1887_v22   ;;  %v4077_v22 = vld [vmem:[%s8189_s30 + $0x28] sm:$0xff]  ;;  %3124 = vst.msk [vmem:[#allocation3 + $0x38] sm:$0xff] %vm2120_vm3, %v9892_v39 }
  0xbe   : > { %2006 = vperm.xlu1 %7943, %v1888_v25   ;;  %3125 = vst.msk [vmem:[#allocation3 + $0x40] sm:$0xff] %vm2120_vm3, %v9892_v39 }
  0xbf   : > { %3126 = vst.msk [vmem:[#allocation3 + $0x48] sm:$0xff] %vm2120_vm3, %v9892_v39 }
  0xc0   : > { %2081 = vperm.xlu2 %7944, %v1903_v57   ;;  %v4081_v57 = vld [vmem:[%s8189_s30 + $0x48] sm:$0xff]  ;;  %3127 = vst.msk [vmem:[#allocation3 + $0x50] sm:$0xff] %vm2120_vm3, %v9892_v39 }
  0xc1   : > { %3128 = vst.msk [vmem:[#allocation3 + $0x58] sm:$0xff] %vm2120_vm3, %v9892_v39 }
  0xc2   : > { %v8438_v37 = vpop.permute.xlu2 %1956 }
  0xc3   : > { %6875 = vmatmul.msk.bf16.gmra.mxu1 %vm1572_vm2, %v6737_v9 }
  0xc4   : > { %1662 = vmatmul.bf16.gmra.mxu0 %v6725_v8 }
  0xc5   : > { %3059 = vperm.xlu0 %7942, %v3047_v26   ;;  %v6764_v26 = vld [vmem:[%s8354_s7 + $0x90] sm:$0xf] }
  0xc6   : > { %3064 = vperm.xlu1 %7943, %v3048_v33   ;;  %v6774_v33 = vld [vmem:[%s8354_s7 + $0xa8] sm:$0xf0] }
  0xc8   : > { %3069 = vperm.xlu2 %7944, %v3049_v0  }
  0xca   : > { %v8467_v47 = vpop.permute.xlu2 %1976 }
  0xcd   : > { %3074 = vperm.xlu0 %7942, %v3050_v38  }
  0xce   : > { %3079 = vperm.xlu1 %7943, %v3051_v42   ;;  %v6777_v42 = vor.u32 %v7700_v32, %v6774_v33  ;;  %v7704_v32 = vld [vmem:[%s8354_s7 + $0xc4] sm:$0xf]  ;;  %v6790_v33 = vld [vmem:[%s8354_s7 + $0xc8] sm:$0xf0] }
  0xd0   : > { %3084 = vperm.xlu2 %7944, %v3052_v15  }
  0xd2   : > { %v8498_v56 = vpop.permute.xlu2 %1946 }
  0xd3   : > { %6876 = vmatmul.msk.bf16.gmra.mxu1 %vm1572_vm2, %v6745_v21 }
  0xd4   : > { %1667 = vmatmul.bf16.gmra.mxu0 %v6733_v20 }
  0xd5   : > { %3089 = vperm.xlu0 %7942, %v3053_v44   ;;  %v4080_v44 = vld [vmem:[%s8189_s30 + $0x40] sm:$0xff] }
  0xd6   : > { %3094 = vperm.xlu1 %7943, %v3054_v58  }
  0xd7   : > { %v8423_v23 = vpop.permute.xlu0 %1961 }
  0xd8   : > { %v8436_v35 = vpop.permute.xlu1 %1971  ;;  %3099 = vperm.xlu2 %7944, %v3055_v29  }
  0xda   : > { %v8536_v8 = vpop.permute.xlu2 %1996 }
  0xdd   : > { %3104 = vperm.xlu0 %7942, %v3056_v59  }
  0xde   : > { %4084 = vperm.xlu1 %7943, %v4072_v1   ;;  %v6772_v1 = vld [vmem:[%s8354_s7 + $0xa0] sm:$0xf] }
  0xdf   : > { %v8431_v30 = vpop.permute.xlu0 %1966 }
  0xe0   : > { %v8458_v43 = vpop.permute.xlu1 %1951 }
  0xe2   : > { %v1922_v24 = vpop.permute.xlu2 %1921 }
  0xe3   : > { %6877 = vmatmul.msk.bf16.gmra.mxu1 %vm1572_vm2, %v6753_v36 }
  0xe4   : > { %1672 = vmatmul.bf16.gmra.mxu0 %v6741_v34  ;;  %v6765_v34 = vor.u32 %v7699_v27, %v6764_v26  ;;  %v6780_v27 = vld [vmem:[%s8354_s7 + $0xb0] sm:$0xf] }
  0xe5   : > { %4094 = vperm.xlu0 %7942, %v4074_v11  }
  0xe6   : > { %4099 = vperm.xlu1 %7943, %v4075_v16  }
  0xe7   : > { %v8446_v40 = vpop.permute.xlu0 %1981 }
  0xe8   : > { %v8489_v54 = vpop.permute.xlu1 %1941 }
  0xea   : > { %v1917_v50 = vpop.permute.xlu2 %1916 }
  0xed   : > { %4109 = vperm.xlu0 %7942, %v4077_v22  }
  0xee   : > { %4114 = vperm.xlu1 %7943, %v4078_v31   ;;  %v5174_v31 = vld [vmem:[%s8234_s20] sm:$0xff] }
  0xef   : > { %v8473_v48 = vpop.permute.xlu0 %1986 }
  0xf0   : > { %v1742_v53 = vpop.f32.mrf.mxu1  ;;  %v8526_v2 = vpop.permute.xlu1 %1991 }
  0xf3   : > { %6878 = vmatmul.msk.bf16.gmra.mxu1 %vm1572_vm2, %v6761_v52 }
  0xf4   : > { %1677 = vmatmul.bf16.gmra.mxu0 %v6749_v51 }
  0xf5   : > { %4124 = vperm.xlu0 %7942, %v4080_v44  }
  0xf6   : > { %4129 = vperm.xlu1 %7943, %v4081_v57   ;;  %v7705_v57 = vld [vmem:[%s8354_s7 + $0xc4] sm:$0xf0] }
  0xf7   : > { %v8496_v55 = vpop.permute.xlu0 %1931 }
  0xf8   : > { %v1744_v60 = vpop.f32.mrf.mxu1  ;;  %v8559_v19 = vpop.permute.xlu1 %1936 }
  0xfd   : > { %5184 = vperm.xlu0 %7942, %v5175_v61  }
  0xff   : > { %v8528_v3 = vpop.permute.xlu0 %1926 }
 0x100   : > { %v1747_v12 = vpop.f32.mrf.mxu1  ;;  %v1912_v45 = vpop.permute.xlu1 %1911 }
 0x101   : > { %v1643_v7 = vpop.f32.mrf.mxu0 }
 0x102   : > { %v1644_v9 = vadd.f32 %v8520_v63, %v1643_v7  ;;  %v5176_v7 = vld [vmem:[%s8234_s20 + $0x10] sm:$0xff] }
 0x103   : > { %6879 = vmatmul.msk.bf16.gmra.mxu1 %vm1572_vm2, %v6769_v10  ;;  %v6782_v10 = vld [vmem:[%s8354_s7 + $0xb8] sm:$0xf0]  ;;  %5189 = vperm.xlu1 %7943, %v5176_v7  }
 0x104   : > { %v1743_v13 = vadd.f32 %v1742_v53, %v1644_v9  ;;  %1682 = vmatmul.bf16.gmra.mxu0 %v6757_v6  ;;  %v4073_v53 = vld [vmem:[%s8189_s30 + $0x8] sm:$0xff]  ;;  %v4076_v6 = vld [vmem:[%s8189_s30 + $0x20] sm:$0xff]  ;;  %v7702_v9 = vld [vmem:[%s8354_s7 + $0xb4] sm:$0xf] }
 0x105   : > { %4089 = vperm.xlu2 %7944, %v4073_v53   ;;  %v6785_v15 = vor.u32 %v7702_v9, %v6782_v10  ;;  %v6788_v53 = vld [vmem:[%s8354_s7 + $0xc0] sm:$0xf] }
 0x106   : > { %v1832_v14 = vmax.f32 %v1743_v13, 0.0 }
 0x107   : > { %v1907_v17 = vpop.permute.xlu0 %1906 }
 0x108   : > { %v2084_v18 = vmul.f32 %v1907_v17, %v1832_v14  ;;  %v1749_v25 = vpop.f32.mrf.mxu1 }
 0x109   : > { %v1645_v20 = vpop.f32.mrf.mxu0 }
 0x10a   : > { %2163 = vst.msk [vmem:[#allocation2 + $0x13] sm:$0xff] %vm2120_vm3, %v2084_v18  ;;  %v1646_v21 = vadd.f32 %v8520_v63, %v1645_v20  ;;  %v4079_v20 = vld [vmem:[%s8189_s30 + $0x38] sm:$0xff] }
 0x10c   : > { %v1745_v28 = vadd.f32 %v1744_v60, %v1646_v21 }
 0x10d   : > { %4104 = vperm.xlu2 %7944, %v4076_v6  }
 0x10e   : > { %v1833_v38 = vmax.f32 %v1745_v28, 0.0  ;;  %v7703_v28 = vld [vmem:[%s8354_s7 + $0xb4] sm:$0xf0] }
 0x110   : > { %v1752_v46 = vpop.f32.mrf.mxu1  ;;  %v2085_v51 = vmul.f32 %v1912_v45, %v1833_v38 }
 0x111   : > { %v1648_v36 = vpop.f32.mrf.mxu0 }
 0x112   : > { %v1649_v41 = vadd.f32 %v8520_v63, %v1648_v36  ;;  %2164 = vst.msk [vmem:[#allocation2 + $0x1b] sm:$0xff] %vm2120_vm3, %v2085_v51  ;;  %v6781_v36 = vor.u32 %v7703_v28, %v6780_v27 }
 0x113   : > { %6880 = vmatmul.msk.bf16.gmra.mxu1 %vm1572_vm2, %v6777_v42 }
 0x114   : > { %v1748_v49 = vadd.f32 %v1747_v12, %v1649_v41  ;;  %1687 = vmatmul.bf16.gmra.mxu0 %v6765_v34  ;;  %v6773_v12 = vor.u32 %v7701_v4, %v6772_v1  ;;  %v6793_v41 = vor.u32 %v7704_v32, %v6790_v33  ;;  %v7709_v32 = vld [vmem:[%s8354_s7 + $0xe4] sm:$0xf0] }
 0x115   : > { %4119 = vperm.xlu2 %7944, %v4079_v20  }
 0x116   : > { %v1834_v52 = vmax.f32 %v1748_v49, 0.0 }
 0x118   : > { %v2086_v58 = vmul.f32 %v1917_v50, %v1834_v52  ;;  %v1754_v62 = vpop.f32.mrf.mxu1 }
 0x119   : > { %v1650_v59 = vpop.f32.mrf.mxu0 }
 0x11a   : > { %v1651_v60 = vadd.f32 %v8520_v63, %v1650_v59  ;;  %2165 = vst.msk [vmem:[#allocation2 + $0x23] sm:$0xff] %vm2120_vm3, %v2086_v58  ;;  %v7706_v59 = vld [vmem:[%s8354_s7 + $0xd4] sm:$0xf] }
 0x11c   : > { %v1750_v0 = vadd.f32 %v1749_v25, %v1651_v60  ;;  %v6798_v60 = vld [vmem:[%s8354_s7 + $0xd8] sm:$0xf0] }
 0x11d   : > { %5179 = vperm.xlu2 %7944, %v5174_v31   ;;  %v6801_v1 = vor.u32 %v7706_v59, %v6798_v60  ;;  %v6804_v31 = vld [vmem:[%s8354_s7 + $0xe0] sm:$0xf]  ;;  %v6822_v59 = vld [vmem:[%s8354_s7 + $0x108] sm:$0xf0] }
 0x11e   : > { %v1835_v5 = vmax.f32 %v1750_v0, 0.0 }
 0x120   : > { %v2087_v11 = vmul.f32 %v1922_v24, %v1835_v5  ;;  %v1757_v16 = vpop.f32.mrf.mxu1 }
 0x121   : > { %v1653_v13 = vpop.f32.mrf.mxu0 }
 0x122   : > { %2166 = vst.msk [vmem:[#allocation2 + $0x2b] sm:$0xff] %vm2120_vm3, %v2087_v11  ;;  %v1654_v14 = vadd.f32 %v8520_v63, %v1653_v13  ;;  %v7707_v13 = vld [vmem:[%s8354_s7 + $0xd4] sm:$0xf0] }
 0x123   : > { %6881 = vmatmul.msk.bf16.gmra.mxu1 %vm1572_vm2, %v6785_v15  ;;  %v7708_v15 = vld [vmem:[%s8354_s7 + $0xe4] sm:$0xf] }
 0x124   : > { %v1753_v17 = vadd.f32 %v1752_v46, %v1654_v14  ;;  %1692 = vmatmul.bf16.gmra.mxu0 %v6773_v12  ;;  %v5863_v46 = vld [vmem:[%s8279_s27] sm:$0xff]  ;;  %v6796_v12 = vld [vmem:[%s8354_s7 + $0xd0] sm:$0xf] }
 0x125   : > { %5866 = vperm.xlu2 %7944, %v5863_v46  }
 0x126   : > { %v1836_v18 = vmax.f32 %v1753_v17, 0.0 }
 0x128   : > { %v2088_v21 = vmul.f32 %v8528_v3, %v1836_v18  ;;  %v1759_v25 = vpop.f32.mrf.mxu1  ;;  %v6797_v18 = vor.u32 %v7707_v13, %v6796_v12  ;;  %v7713_v12 = vld [vmem:[%s8354_s7 + $0x104] sm:$0xf0] }
 0x129   : > { %v1655_v22 = vpop.f32.mrf.mxu0 }
 0x12a   : > { %2167 = vst.msk [vmem:[#allocation2 + $0x33] sm:$0xff] %vm2120_vm3, %v2088_v21  ;;  %v1656_v24 = vadd.f32 %v8520_v63, %v1655_v22 }
 0x12c   : > { %v1755_v26 = vadd.f32 %v1754_v62, %v1656_v24  ;;  %v6789_v62 = vor.u32 %v7705_v57, %v6788_v53  ;;  %v7711_v53 = vld [vmem:[%s8354_s7 + $0xf4] sm:$0xf0] }
 0x12e   : > { %v1837_v29 = vmax.f32 %v1755_v26, 0.0 }
 0x130   : > { %v2089_v34 = vmul.f32 %v8496_v55, %v1837_v29  ;;  %v1762_v42 = vpop.f32.mrf.mxu1 }
 0x131   : > { %v1658_v38 = vpop.f32.mrf.mxu0 }
 0x132   : > { %2168 = vst.msk [vmem:[#allocation2 + $0x3b] sm:$0xff] %vm2120_vm3, %v2089_v34  ;;  %v1659_v3 = vadd.f32 %v8520_v63, %v1658_v38  ;;  %v7710_v34 = vld [vmem:[%s8354_s7 + $0xf4] sm:$0xf] }
 0x133   : > { %6882 = vmatmul.msk.bf16.gmra.mxu1 %vm1572_vm2, %v6793_v41 }
 0x134   : > { %v1758_v44 = vadd.f32 %v1757_v16, %v1659_v3  ;;  %1697 = vmatmul.bf16.gmra.mxu0 %v6781_v36  ;;  %v6806_v16 = vld [vmem:[%s8354_s7 + $0xe8] sm:$0xf0]  ;;  %v6814_v36 = vld [vmem:[%s8354_s7 + $0xf8] sm:$0xf0]  ;;  %v6805_v3 = vor.u32 %v7709_v32, %v6804_v31  ;;  %v2307_v32 = vld [vmem:[#allocation2 + $0x2] sm:$0xff] }
 0x135   : > { %v6809_v21 = vor.u32 %v7708_v15, %v6806_v16  ;;  %v7714_v15 = vld [vmem:[%s8354_s7 + $0x114] sm:$0xf]  ;;  %v6830_v16 = vld [vmem:[%s8354_s7 + $0x118] sm:$0xf0]  ;;  %v2200_v31 = vld [vmem:[#allocation2 + $0x8] sm:$0xff] }
 0x136   : > { %v1838_v45 = vmax.f32 %v1758_v44, 0.0 }
 0x138   : > { %v2090_v55 = vmul.f32 %v8559_v19, %v1838_v45  ;;  %v1764_v51 = vpop.f32.mrf.mxu1 }
 0x139   : > { %v1660_v49 = vpop.f32.mrf.mxu0 }
 0x13a   : > { %2169 = vst.msk [vmem:[#allocation2 + $0x43] sm:$0xff] %vm2120_vm3, %v2090_v55  ;;  %v1661_v50 = vadd.f32 %v8520_v63, %v1660_v49 }
 0x13c   : > { %v1760_v52 = vadd.f32 %v1759_v25, %v1661_v50 }
 0x13e   : > { %v1839_v58 = vmax.f32 %v1760_v52, 0.0  ;;  %v6812_v52 = vld [vmem:[%s8354_s7 + $0xf0] sm:$0xf] }
 0x140   : > { %v2091_v61 = vmul.f32 %v8489_v54, %v1839_v58  ;;  %v1767_v4 = vpop.f32.mrf.mxu1  ;;  %v7712_v58 = vld [vmem:[%s8354_s7 + $0x104] sm:$0xf] }
 0x141   : > { %v1663_v0 = vpop.f32.mrf.mxu0 }
 0x142   : > { %2170 = vst.msk [vmem:[#allocation2 + $0x4b] sm:$0xff] %vm2120_vm3, %v2091_v61  ;;  %v1664_v19 = vadd.f32 %v8520_v63, %v1663_v0  ;;  %v6813_v61 = vor.u32 %v7711_v53, %v6812_v52  ;;  %v6825_v0 = vor.u32 %v7712_v58, %v6822_v59  ;;  %v2239_v52 = vld [vmem:[#allocation2 + $0x21] sm:$0xff]  ;;  %v2238_v53 = vld [vmem:[#allocation2 + $0x19] sm:$0xff]  ;;  %v8718_v59 = vpop.permute.xlu2 %2046 }
 0x143   : > { %6883 = vmatmul.msk.bf16.gmra.mxu1 %vm1572_vm2, %v6801_v1 }
 0x144   : > { %v1763_v5 = vadd.f32 %v1762_v42, %v1664_v19  ;;  %1702 = vmatmul.bf16.gmra.mxu0 %v6789_v62  ;;  %v6817_v42 = vor.u32 %v7710_v34, %v6814_v36  ;;  %v8708_v36 = vld [vmem:[#allocation2 + $0x10] sm:$0xff] }
 0x146   : > { %v1840_v6 = vmax.f32 %v1763_v5, 0.0 }
 0x148   : > { %v2092_v7 = vmul.f32 %v8498_v56, %v1840_v6  ;;  %v1769_v10 = vpop.f32.mrf.mxu1 }
 0x149   : > { %v1665_v54 = vpop.f32.mrf.mxu0 }
 0x14a   : > { %2171 = vst.msk [vmem:[#allocation2 + $0x53] sm:$0xff] %vm2120_vm3, %v2092_v7  ;;  %v1666_v9 = vadd.f32 %v8520_v63, %v1665_v54 }
 0x14c   : > { %v1765_v11 = vadd.f32 %v1764_v51, %v1666_v9 }
 0x14e   : > { %v1841_v14 = vmax.f32 %v1765_v11, 0.0  ;;  %v6820_v11 = vld [vmem:[%s8354_s7 + $0x100] sm:$0xf] }
 0x150   : > { %v2093_v17 = vmul.f32 %v8458_v43, %v1841_v14  ;;  %v1772_v22 = vpop.f32.mrf.mxu1 }
 0x151   : > { %v1668_v20 = vpop.f32.mrf.mxu0 }
 0x152   : > { %2172 = vst.msk [vmem:[#allocation2 + $0x5b] sm:$0xff] %vm2120_vm3, %v2093_v17  ;;  %v1669_v56 = vadd.f32 %v8520_v63, %v1668_v20 }
 0x153   : > { %6884 = vmatmul.msk.bf16.gmra.mxu1 %vm1572_vm2, %v6809_v21  ;;  %v6833_v21 = vor.u32 %v7714_v15, %v6830_v16 }
 0x154   : > { %v1768_v24 = vadd.f32 %v1767_v4, %v1669_v56  ;;  %1707 = vmatmul.bf16.gmra.mxu0 %v6797_v18  ;;  %v8677_v4 = vpop.permute.xlu1 %2041  ;;  %v6821_v18 = vor.u32 %v7713_v12, %v6820_v11 }
 0x156   : > { %v1842_v25 = vmax.f32 %v1768_v24, 0.0 }
 0x158   : > { %v2094_v26 = vmul.f32 %v8438_v37, %v1842_v25  ;;  %v1774_v28 = vpop.f32.mrf.mxu1 }
 0x159   : > { %v1670_v43 = vpop.f32.mrf.mxu0 }
 0x15a   : > { %2173 = vst.msk [vmem:[#allocation2 + $0x63] sm:$0xff] %vm2120_vm3, %v2094_v26  ;;  %v1671_v27 = vadd.f32 %v8520_v63, %v1670_v43  ;;  %v2199_v43 = vld [vmem:[#allocation2] sm:$0xff] }
 0x15c   : > { %v1770_v29 = vadd.f32 %v1769_v10, %v1671_v27  ;;  %v8687_v14 = vpop.permute.xlu1 %2031 }
 0x15e   : > { %v1843_v33 = vmax.f32 %v1770_v29, 0.0 }
 0x160   : > { %v2095_v38 = vmul.f32 %v8423_v23, %v1843_v33  ;;  %v1777_v44 = vpop.f32.mrf.mxu1 }
 0x161   : > { %v1673_v41 = vpop.f32.mrf.mxu0 }
 0x162   : > { %2174 = vst.msk [vmem:[#allocation2 + $0x6b] sm:$0xff] %vm2120_vm3, %v2095_v38  ;;  %v1674_v37 = vadd.f32 %v8520_v63, %v1673_v41  ;;  %v2236_v38 = vld [vmem:[#allocation2 + $0x9] sm:$0xff] }
 0x163   : > { %6885 = vmatmul.msk.bf16.gmra.mxu1 %vm1572_vm2, %v6817_v42  ;;  %v2272_v58 = vmax.f32 %v2200_v31, %v2236_v38 }
 0x164   : > { %v1773_v45 = vadd.f32 %v1772_v22, %v1674_v37  ;;  %1712 = vmatmul.bf16.gmra.mxu0 %v6805_v3  ;;  %v8700_v27 = vpop.permute.xlu1 %2061 }
 0x165   : > { %9949 = vst [vmem:[#allocation43_spill] sm:$0xff] %v8700_v27 }
 0x166   : > { %v1844_v46 = vmax.f32 %v1773_v45, 0.0  ;;  %v8712_v45 = vld [vmem:[#allocation2 + $0x18] sm:$0xff] }
 0x167   : > { %v2274_v16 = vmax.f32 %v8712_v45, %v2238_v53  ;;  %v2245_v45 = vld [vmem:[#allocation2 + $0x51] sm:$0xff]  ;;  %v2242_v53 = vld [vmem:[#allocation2 + $0x39] sm:$0xff] }
 0x168   : > { %v2096_v55 = vmul.f32 %v8431_v30, %v1844_v46  ;;  %v1779_v50 = vpop.f32.mrf.mxu1  ;;  %v6828_v46 = vld [vmem:[%s8354_s7 + $0x110] sm:$0xf] }
 0x169   : > { %v1675_v23 = vpop.f32.mrf.mxu0 }
 0x16a   : > { %2175 = vst.msk [vmem:[#allocation2 + $0x73] sm:$0xff] %vm2120_vm3, %v2096_v55  ;;  %v1676_v49 = vadd.f32 %v8520_v63, %v1675_v23  ;;  %v7715_v55 = vld [vmem:[%s8354_s7 + $0x114] sm:$0xf0]  ;;  %s9969_s7 = sld [smem:[#allocation19_spill]] }
 0x16c   : > { %v1775_v51 = vadd.f32 %v1774_v28, %v1676_v49  ;;  %v2308_v49 = vld [vmem:[#allocation2 + $0xa] sm:$0xff] }
 0x16e   : > { %v1845_v57 = vmax.f32 %v1775_v51, 0.0  ;;  %v2203_v51 = vld [vmem:[#allocation2 + $0x20] sm:$0xff] }
 0x16f   : > { %v2275_v15 = vmax.f32 %v2203_v51, %v2239_v52  ;;  %v8768_v52 = vld [vmem:[#allocation2 + $0x6a] sm:$0xff] }
 0x170   : > { %v2097_v60 = vmul.f32 %v8436_v35, %v1845_v57  ;;  %v1782_v19 = vpop.f32.mrf.mxu1  ;;  %v8680_v35 = vpop.permute.xlu0 %2051  ;;  %v8716_v57 = vld [vmem:[#allocation2 + $0x12] sm:$0xff] }
 0x171   : > { %v1678_v62 = vpop.f32.mrf.mxu0  ;;  %v2213_v37 = vld [vmem:[#allocation2 + $0x70] sm:$0xff] }
 0x172   : > { %2176 = vst.msk [vmem:[#allocation2 + $0x7b] sm:$0xff] %vm2120_vm3, %v2097_v60  ;;  %v1679_v30 = vadd.f32 %v8520_v63, %v1678_v62  ;;  %v2249_v23 = vld [vmem:[#allocation2 + $0x71] sm:$0xff]  ;;  %v2248_v62 = vld [vmem:[#allocation2 + $0x69] sm:$0xff] }
 0x173   : > { %6886 = vmatmul.msk.bf16.gmra.mxu1 %vm1572_vm2, %v6825_v0 }
 0x174   : > { %v1778_v1 = vadd.f32 %v1777_v44, %v1679_v30  ;;  %1717 = vmatmul.bf16.gmra.mxu0 %v6813_v61  ;;  %v2212_v61 = vld [vmem:[#allocation2 + $0x68] sm:$0xff] }
 0x175   : > { %v8720_v30 = vld [vmem:[#allocation2 + $0x28] sm:$0xff] }
 0x176   : > { %v1846_v5 = vmax.f32 %v1778_v1, 0.0  ;;  %v6829_v1 = vor.u32 %v7715_v55, %v6828_v46  ;;  %v8758_v46 = vld [vmem:[#allocation2 + $0x38] sm:$0xff]  ;;  %v8760_v55 = vld [vmem:[#allocation2 + $0x2a] sm:$0xff] }
 0x178   : > { %v2098_v6 = vmul.f32 %v8467_v47, %v1846_v5  ;;  %v1784_v9 = vpop.f32.mrf.mxu1  ;;  %v8692_v20 = vpop.permute.xlu0 %2056  ;;  %v2285_v5 = vmax.f32 %v2213_v37, %v2249_v23 }
 0x179   : > { %v1680_v7 = vpop.f32.mrf.mxu0  ;;  %9948 = vst [vmem:[#allocation42_spill] sm:$0xff] %v8692_v20  ;;  %v2214_v11 = vld [vmem:[#allocation2 + $0x78] sm:$0xff] }
 0x17a   : > { %2177 = vst.msk [vmem:[#allocation2 + $0x83] sm:$0xff] %vm2120_vm3, %v2098_v6  ;;  %v1681_v54 = vadd.f32 %v8520_v63, %v1680_v7  ;;  %v2211_v6 = vld [vmem:[#allocation2 + $0x60] sm:$0xff] }
 0x17b   : > { %v2247_v7 = vld [vmem:[#allocation2 + $0x61] sm:$0xff]  ;;  %v2250_v12 = vld [vmem:[#allocation2 + $0x79] sm:$0xff] }
 0x17c   : > { %v1780_v10 = vadd.f32 %v1779_v50, %v1681_v54  ;;  %v2240_v54 = vld [vmem:[#allocation2 + $0x29] sm:$0xff]  ;;  %v2286_v37 = vmax.f32 %v2214_v11, %v2250_v12 }
 0x17d   : > { %v2276_v38 = vmax.f32 %v8720_v30, %v2240_v54 }
 0x17e   : > { %v1847_v13 = vmax.f32 %v1780_v10, 0.0 }
 0x17f   : > { %v8785_v12 = vmax.f32 %v2276_v38, %v8760_v55 }
 0x180   : > { %v2099_v17 = vmul.f32 %v8446_v40, %v1847_v13  ;;  %v8696_v22 = vpop.f32.mrf.mxu1  ;;  %v2235_v40 = vld [vmem:[#allocation2 + $0x1] sm:$0xff]  ;;  %v8704_v33 = vpop.permute.xlu0 %2026  ;;  %v8727_v13 = vld [vmem:[#allocation2 + $0x58] sm:$0xff] }
 0x181   : > { %v1683_v47 = vpop.f32.mrf.mxu0  ;;  %v2271_v3 = vmax.f32 %v2199_v43, %v2235_v40  ;;  %v2215_v42 = vld [vmem:[#allocation2 + $0x80] sm:$0xff]  ;;  %v8744_v43 = vmax.f32 %v2272_v58, %v2308_v49  ;;  %v8746_v40 = vpop.permute.xlu1 %2066 }
 0x182   : > { %2178 = vst.msk [vmem:[#allocation2 + $0x8b] sm:$0xff] %vm2120_vm3, %v2099_v17  ;;  %v1684_v56 = vadd.f32 %v8520_v63, %v1683_v47  ;;  %v2251_v44 = vld [vmem:[#allocation2 + $0x81] sm:$0xff]  ;;  %v2284_v47 = vmax.f32 %v2212_v61, %v2248_v62 }
 0x183   : > { %6887 = vmatmul.msk.bf16.gmra.mxu1 %vm1572_vm2, %v6833_v21  ;;  %v2287_v60 = vmax.f32 %v2215_v42, %v2251_v44  ;;  %v8722_v0 = vmax.f32 %v2271_v3, %v2307_v32  ;;  %v8732_v17 = vld [vmem:[#allocation2 + $0x82] sm:$0xff]  ;;  %v8736_v21 = vld [vmem:[#allocation2 + $0x30] sm:$0xff]  ;;  %9951 = vst [vmem:[#allocation45_spill] sm:$0xff] %v8746_v40 }
 0x184   : > { %v1783_v24 = vadd.f32 %v1782_v19, %v1684_v56  ;;  %1722 = vmatmul.bf16.gmra.mxu0 %v6821_v18  ;;  %v2246_v56 = vld [vmem:[#allocation2 + $0x59] sm:$0xff]  ;;  %v2209_v44 = vld [vmem:[#allocation2 + $0x50] sm:$0xff] }
 0x185   : > { %v8750_v32 = vld [vmem:[#allocation2 + $0x72] sm:$0xff] }
 0x186   : > { %v1848_v25 = vmax.f32 %v1783_v24, 0.0  ;;  %v8738_v24 = vld [vmem:[#allocation2 + $0x31] sm:$0xff]  ;;  %v2357_v42 = vmax.f32 %v2285_v5, %v8750_v32  ;;  %v2208_v5 = vld [vmem:[#allocation2 + $0x48] sm:$0xff] }
 0x188   : > { %v2100_v26 = vmul.f32 %v8473_v48, %v1848_v25  ;;  %v8706_v34 = vpop.f32.mrf.mxu1  ;;  %v8710_v48 = vld [vmem:[#allocation2 + $0x11] sm:$0xff]  ;;  %v8740_v25 = vld [vmem:[#allocation2 + $0x22] sm:$0xff]  ;;  %v8765_v49 = vpop.permute.xlu0 %2076  ;;  %v2395_v30 = vmax.f32 %v2357_v42, %v8732_v17 }
 0x189   : > { %v1685_v28 = vpop.f32.mrf.mxu0  ;;  %v2252_v31 = vld [vmem:[#allocation2 + $0x89] sm:$0xff]  ;;  %9952 = vst [vmem:[#allocation46_spill] sm:$0xff] %v8765_v49  ;;  %v8772_v58 = vmax.f32 %v2275_v15, %v8740_v25  ;;  %v8819_v39 = vpop.permute.xlu1 %2011 }
 0x18a   : > { %2179 = vst.msk [vmem:[#allocation2 + $0x93] sm:$0xff] %vm2120_vm3, %v2100_v26  ;;  %v1686_v29 = vadd.f32 %v8520_v63, %v1685_v28  ;;  %v8742_v26 = vld [vmem:[#allocation2 + $0x1a] sm:$0xff]  ;;  %v2503_v38 = vld [vmem:[#allocation2 + $0x84] sm:$0xff] }
 0x18b   : > { %v2432_v3 = vld [vmem:[#allocation2 + $0x8b] sm:$0xff] }
 0x18c   : > { %v1785_v41 = vadd.f32 %v1784_v9, %v1686_v29  ;;  %v2273_v9 = vmax.f32 %v8708_v36, %v8710_v48  ;;  %v2216_v29 = vld [vmem:[#allocation2 + $0x88] sm:$0xff]  ;;  %v2359_v36 = vmax.f32 %v2287_v60, %v8732_v17  ;;  %v2283_v48 = vmax.f32 %v2211_v6, %v2247_v7  ;;  %v8788_v17 = vld [vmem:[#allocation2 + $0x5a] sm:$0xff] }
 0x18d   : > { %v8775_v60 = vmax.f32 %v2274_v16, %v8742_v26  ;;  %v2288_v62 = vmax.f32 %v2216_v29, %v2252_v31  ;;  %v2244_v6 = vld [vmem:[#allocation2 + $0x49] sm:$0xff]  ;;  %v8791_v29 = vpop.permute.xlu2 %2036 }
 0x18e   : > { %v1849_v50 = vmax.f32 %v1785_v41, 0.0  ;;  %v8763_v23 = vmax.f32 %v2273_v9, %v8716_v57  ;;  %v2324_v7 = vld [vmem:[#allocation2 + $0x8a] sm:$0xff]  ;;  %v2281_v9 = vmax.f32 %v2209_v44, %v2245_v45 }
 0x18f   : > { %v2360_v45 = vmax.f32 %v2288_v62, %v2324_v7  ;;  %v8813_v62 = vld [vmem:[#allocation2 + $0x3a] sm:$0xff] }
 0x190   : > { %v2101_v19 = vmul.f32 %v8526_v2, %v1849_v50  ;;  %v8748_v28 = vpop.f32.mrf.mxu1  ;;  %v2322_v50 = vld [vmem:[#allocation2 + $0x7a] sm:$0xff]  ;;  %v2002_v11 = vpop.permute.xlu0 %2001 }
 0x191   : > { %v1688_v10 = vpop.f32.mrf.mxu0  ;;  %v8734_v18 = vld [vmem:[#allocation2 + $0x92] sm:$0xff]  ;;  %v2358_v15 = vmax.f32 %v2286_v37, %v2322_v50  ;;  %v2280_v37 = vmax.f32 %v2208_v5, %v2244_v6 }
 0x192   : > { %2180 = vst.msk [vmem:[#allocation2 + $0x9b] sm:$0xff] %vm2120_vm3, %v2101_v19  ;;  %v1689_v2 = vadd.f32 %v8520_v63, %v1688_v10  ;;  %v2397_v51 = vmax.f32 %v2359_v36, %v8734_v18  ;;  %v8778_v19 = vld [vmem:[#allocation2 + $0x62] sm:$0xff]  ;;  %v2433_v16 = vld [vmem:[#allocation2 + $0x93] sm:$0xff] }
 0x193   : > { %9950 = vst [vmem:[#allocation44_spill] sm:$0xff] %v8734_v18  ;;  %v2355_v54 = vmax.f32 %v2283_v48, %v8778_v19  ;;  %v2207_v10 = vld [vmem:[#allocation2 + $0x40] sm:$0xff] }
 0x194   : > { %v1788_v41 = vadd.f32 %v8696_v22, %v1689_v2  ;;  %1727 = vmatmul.bf16.gmra.mxu0 %v6829_v1  ;;  %v2282_v22 = vmax.f32 %v8727_v13, %v2246_v56  ;;  %v2356_v1 = vmax.f32 %v2284_v47, %v8768_v52  ;;  %v2243_v47 = vld [vmem:[#allocation2 + $0x41] sm:$0xff]  ;;  %v2278_v56 = vmax.f32 %v8758_v46, %v2242_v53 }
 0x195   : > { %v2431_v48 = vld [vmem:[#allocation2 + $0x83] sm:$0xff]  ;;  %v2393_v42 = vmax.f32 %v2355_v54, %v8750_v32  ;;  %v2396_v46 = vmax.f32 %v2358_v15, %v2324_v7  ;;  %v2430_v32 = vld [vmem:[#allocation2 + $0x7b] sm:$0xff]  ;;  %v2279_v6 = vmax.f32 %v2207_v10, %v2243_v47  ;;  %v2429_v15 = vld [vmem:[#allocation2 + $0x73] sm:$0xff] }
 0x196   : > { %v1850_v61 = vmax.f32 %v1788_v41, 0.0  ;;  %v2394_v2 = vmax.f32 %v2356_v1, %v2322_v50  ;;  %v8795_v41 = vmax.f32 %v2397_v51, %v2433_v16  ;;  %v2467_v50 = vmax.f32 %v2395_v30, %v2431_v48  ;;  %v8809_v54 = vld [vmem:[#allocation2 + $0x7c] sm:$0xff]  ;;  %v8817_v48 = vld [vmem:[#allocation2 + $0x4a] sm:$0xff] }
 0x197   : > { %v2504_v51 = vld [vmem:[#allocation2 + $0x8c] sm:$0xff]  ;;  %v2352_v10 = vmax.f32 %v2280_v37, %v8817_v48  ;;  %v8824_v47 = vmax.f32 %v2278_v56, %v8813_v62 }
 0x198   : > { %v2102_v13 = vmul.f32 %v8536_v8, %v1850_v61  ;;  %v2354_v8 = vmax.f32 %v2282_v22, %v8788_v17  ;;  %v8803_v61 = vld [vmem:[#allocation2 + $0x52] sm:$0xff]  ;;  %v8805_v1 = vpop.f32.mrf.mxu1  ;;  %v2466_v16 = vmax.f32 %v2394_v2, %v2430_v32  ;;  %v8828_v32 = vld [vmem:[#allocation2 + $0x42] sm:$0xff] }
 0x199   : > { %v1690_v31 = vpop.f32.mrf.mxu0  ;;  %v8793_v36 = vld [vmem:[#allocation2 + $0x9a] sm:$0xff]  ;;  %v2353_v22 = vmax.f32 %v2281_v9, %v8803_v61  ;;  %v2465_v9 = vmax.f32 %v2393_v42, %v2429_v15  ;;  %v2390_v37 = vmax.f32 %v2352_v10, %v8788_v17  ;;  %v8844_v10 = vld [vmem:[#allocation2 + $0x32] sm:$0xff] }
 0x19a   : > { %9953 = vst [vmem:[#allocation47_spill] sm:$0xff] %v8793_v36  ;;  %v1691_v44 = vadd.f32 %v8520_v63, %v1690_v31  ;;  %v8801_v53 = vld [vmem:[#allocation2 + $0x94] sm:$0xff]  ;;  %v2392_v5 = vmax.f32 %v2354_v8, %v8768_v52  ;;  %v2398_v7 = vmax.f32 %v2360_v45, %v8793_v36  ;;  %v2468_v8 = vmax.f32 %v2396_v46, %v2432_v3  ;;  %v2428_v45 = vld [vmem:[#allocation2 + $0x6b] sm:$0xff] }
 0x19b   : > { %2181 = vst.msk [vmem:[#allocation2 + $0xa3] sm:$0xff] %vm2120_vm3, %v2102_v13  ;;  %v2539_v13 = vmax.f32 %v2467_v50, %v2503_v38  ;;  %v2501_v31 = vld [vmem:[#allocation2 + $0x74] sm:$0xff]  ;;  %v2391_v52 = vmax.f32 %v2353_v22, %v8778_v19  ;;  %v2538_v2 = vmax.f32 %v2466_v16, %v8809_v54  ;;  %v2500_v50 = vld [vmem:[#allocation2 + $0x6c] sm:$0xff]  ;;  %v2351_v19 = vmax.f32 %v2279_v6, %v8828_v32 }
 0x19c   : > { %v1790_v30 = vadd.f32 %v8706_v34, %v1691_v44  ;;  %v2434_v49 = vld [vmem:[#allocation2 + $0x9b] sm:$0xff]  ;;  %v2537_v42 = vmax.f32 %v2465_v9, %v2501_v31  ;;  %v2464_v15 = vmax.f32 %v2392_v5, %v2428_v45  ;;  %v2540_v3 = vmax.f32 %v2468_v8, %v2504_v51 }
 0x19d   : > { %v2577_v44 = vmax.f32 %v2539_v13, %v8801_v53  ;;  %v8832_v22 = vmax.f32 %v2398_v7, %v2434_v49  ;;  %v2576_v46 = vmax.f32 %v2538_v2, %v2504_v51  ;;  %v2499_v13 = vld [vmem:[#allocation2 + $0x64] sm:$0xff]  ;;  %v2613_v18 = vld [vmem:[#allocation2 + $0x95] sm:$0xff]  ;;  %v2389_v5 = vmax.f32 %v2351_v19, %v8803_v61  ;;  %v2612_v61 = vld [vmem:[#allocation2 + $0x8d] sm:$0xff] }
 0x19e   : > { %v1851_v34 = vmax.f32 %v1790_v30, 0.0  ;;  %v2427_v30 = vld [vmem:[#allocation2 + $0x63] sm:$0xff]  ;;  %v8836_v40 = vmax.f32 %v2537_v42, %v2503_v38  ;;  %v2536_v9 = vmax.f32 %v2464_v15, %v2500_v50  ;;  %v2426_v6 = vld [vmem:[#allocation2 + $0x5b] sm:$0xff]  ;;  %v8846_v38 = vpop.permute.xlu2 %2021  ;;  %v9954_v45 = vmax.f32 %v8736_v21, %v8738_v24 }
 0x19f   : > { %v2463_v27 = vmax.f32 %v2391_v52, %v2427_v30  ;;  %v2649_v51 = vmax.f32 %v2577_v44, %v2613_v18  ;;  %v2498_v7 = vld [vmem:[#allocation2 + $0x5c] sm:$0xff]  ;;  %v2462_v2 = vmax.f32 %v2390_v37, %v2426_v6  ;;  %v2388_v18 = vmax.f32 %v8824_v47, %v8817_v48  ;;  %v8858_v30 = vld [vmem:[#allocation2 + $0x54] sm:$0xff]  ;;  %v2611_v37 = vld [vmem:[#allocation2 + $0x85] sm:$0xff] }
 0x1a0   : > { %v2103_v56 = vmul.f32 %v2002_v11, %v1851_v34  ;;  %v8848_v34 = vpop.f32.mrf.mxu1  ;;  %v2349_v42 = vmax.f32 %v9954_v45, %v8844_v10  ;;  %v2648_v19 = vmax.f32 %v2576_v46, %v2612_v61  ;;  %v2424_v47 = vld [vmem:[#allocation2 + $0x4b] sm:$0xff] }
 0x1a1   : > { %v1693_v16 = vpop.f32.mrf.mxu0  ;;  %v2535_v8 = vmax.f32 %v2463_v27, %v2499_v13  ;;  %v2534_v20 = vmax.f32 %v2462_v2, %v2498_v7  ;;  %v2496_v46 = vld [vmem:[#allocation2 + $0x4c] sm:$0xff]  ;;  %v2460_v61 = vmax.f32 %v2388_v18, %v2424_v47  ;;  %v2494_v18 = vld [vmem:[#allocation2 + $0x3c] sm:$0xff] }
 0x1a2   : > { %v8834_v36 = vld [vmem:[#allocation2 + $0x9c] sm:$0xff]  ;;  %2182 = vst.msk [vmem:[#allocation2 + $0xab] sm:$0xff] %vm2120_vm3, %v2103_v56  ;;  %v1694_v11 = vadd.f32 %v8520_v63, %v1693_v16  ;;  %v2574_v56 = vmax.f32 %v2536_v9, %v8809_v54  ;;  %v2387_v21 = vmax.f32 %v2349_v42, %v8828_v32  ;;  %v2684_v54 = vld [vmem:[#allocation2 + $0x8e] sm:$0xff]  ;;  %v2495_v42 = vld [vmem:[#allocation2 + $0x44] sm:$0xff] }
 0x1a3   : > { %v2578_v17 = vmax.f32 %v2540_v3, %v8834_v36  ;;  %v2614_v52 = vld [vmem:[#allocation2 + $0x9d] sm:$0xff]  ;;  %v2425_v3 = vld [vmem:[#allocation2 + $0x53] sm:$0xff]  ;;  %v2573_v6 = vmax.f32 %v2535_v8, %v2501_v31  ;;  %v2386_v31 = vmax.f32 %v8785_v12, %v8813_v62  ;;  %v2720_v32 = vmax.f32 %v2648_v19, %v2684_v54 }
 0x1a4   : > { %v1793_v44 = vadd.f32 %v8748_v28, %v1694_v11  ;;  %v2685_v16 = vld [vmem:[#allocation2 + $0x96] sm:$0xff]  ;;  %v2686_v27 = vld [vmem:[#allocation2 + $0x9e] sm:$0xff]  ;;  %v2461_v49 = vmax.f32 %v2389_v5, %v2425_v3  ;;  %v2647_v28 = vmax.f32 %v8836_v40, %v2611_v37  ;;  %v2007_v11 = vpop.permute.xlu1 %2006  ;;  %v2683_v40 = vld [vmem:[#allocation2 + $0x86] sm:$0xff] }
 0x1a5   : > { %v2650_v15 = vmax.f32 %v2578_v17, %v2614_v52  ;;  %v2721_v45 = vmax.f32 %v2649_v51, %v2685_v16  ;;  %v2610_v9 = vld [vmem:[#allocation2 + $0x7d] sm:$0xff]  ;;  %v2572_v52 = vmax.f32 %v2534_v20, %v2500_v50  ;;  %v2385_v20 = vmax.f32 %v8772_v58, %v8844_v10  ;;  %v2608_v37 = vld [vmem:[#allocation2 + $0x6d] sm:$0xff] }
 0x1a6   : > { %v1852_v24 = vmax.f32 %v1793_v44, 0.0  ;;  %v2533_v17 = vmax.f32 %v2461_v49, %v8858_v30  ;;  %v2646_v2 = vmax.f32 %v2574_v56, %v2610_v9  ;;  %v2423_v51 = vld [vmem:[#allocation2 + $0x43] sm:$0xff]  ;;  %v2719_v62 = vmax.f32 %v2647_v28, %v2683_v40  ;;  %v2422_v49 = vld [vmem:[#allocation2 + $0x3b] sm:$0xff]  ;;  %v2421_v28 = vld [vmem:[#allocation2 + $0x33] sm:$0xff] }
 0x1a7   : > { %v2722_v48 = vmax.f32 %v2650_v15, %v2686_v27  ;;  %v2609_v15 = vld [vmem:[#allocation2 + $0x75] sm:$0xff]  ;;  %v2459_v16 = vmax.f32 %v2387_v21, %v2423_v51  ;;  %v2532_v27 = vmax.f32 %v2460_v61, %v2496_v46  ;;  %v2682_v19 = vld [vmem:[#allocation2 + $0x7e] sm:$0xff]  ;;  %v2458_v21 = vmax.f32 %v2386_v31, %v2422_v49 }
 0x1a8   : > { %v2104_v5 = vmul.f32 %v2007_v11, %v1852_v24  ;;  %v8865_v3 = vmax.f32 %v2533_v17, %v2499_v13  ;;  %v2645_v50 = vmax.f32 %v2573_v6, %v2609_v15  ;;  %v8871_v56 = vpop.f32.mrf.mxu1  ;;  %v2384_v58 = vmax.f32 %v8775_v60, %v8760_v55  ;;  %v8878_v6 = vld [vmem:[#allocation2 + $0x34] sm:$0xff]  ;;  %v8882_v11 = vpop.permute.xlu2 %2071  ;;  %v2607_v9 = vld [vmem:[#allocation2 + $0x65] sm:$0xff] }
 0x1a9   : > { %v2770_v8 = vpack.c.bf16 %v2722_v48, %v2721_v45  ;;  %v1695_v44 = vpop.f32.mrf.mxu0  ;;  %v2531_v13 = vmax.f32 %v2459_v16, %v2495_v42  ;;  %v8873_v24 = vmax.f32 %v2532_v27, %v2498_v7  ;;  %v2769_v45 = vpack.c.bf16 %v2720_v32, %v2719_v62  ;;  %v8880_v47 = vld [vmem:[#allocation2 + $0xa4] sm:$0xff]  ;;  %v2681_v54 = vld [vmem:[#allocation2 + $0x76] sm:$0xff]  ;;  %v2680_v32 = vld [vmem:[#allocation2 + $0x6e] sm:$0xff] }
 0x1aa   : > { %2183 = vst.msk [vmem:[#allocation2 + $0xb3] sm:$0xff] %vm2120_vm3, %v2104_v5  ;;  %v1696_v12 = vadd.f32 %v8520_v63, %v1695_v44  ;;  %v2718_v63 = vmax.f32 %v2646_v2, %v2682_v19  ;;  %v2644_v48 = vmax.f32 %v2572_v52, %v2608_v37  ;;  %v2457_v7 = vmax.f32 %v2385_v20, %v2421_v28  ;;  %v2420_v5 = vld [vmem:[#allocation2 + $0x2b] sm:$0xff]  ;;  %v2606_v2 = vld [vmem:[#allocation2 + $0x5d] sm:$0xff]  ;;  %v2605_v62 = vld [vmem:[#allocation2 + $0x55] sm:$0xff] }
 0x1ab   : > { %2872 = vmatpush.bf16.msra.mxu2 %v2770_v8  ;;  %v2530_v17 = vmax.f32 %v2458_v21, %v2494_v18  ;;  %v2383_v61 = vmax.f32 %v8763_v23, %v8740_v25  ;;  %v2382_v55 = vmax.f32 %v8744_v43, %v8742_v26  ;;  %v2643_v52 = vmax.f32 %v8865_v3, %v2607_v9  ;;  %v2492_v8 = vld [vmem:[#allocation2 + $0x2c] sm:$0xff]  ;;  %v2419_v3 = vld [vmem:[#allocation2 + $0x23] sm:$0xff]  ;;  %v2418_v27 = vld [vmem:[#allocation2 + $0x1b] sm:$0xff] }
 0x1ac   : > { %v1795_v10 = vadd.f32 %v8805_v1, %v1696_v12  ;;  %v2717_v1 = vmax.f32 %v2645_v50, %v2681_v54  ;;  %v2569_v31 = vmax.f32 %v2531_v13, %v8858_v30  ;;  %v2529_v51 = vmax.f32 %v2457_v7, %v8878_v6  ;;  %v2491_v16 = vld [vmem:[#allocation2 + $0x24] sm:$0xff]  ;;  %v2490_v13 = vld [vmem:[#allocation2 + $0x1c] sm:$0xff] }
 0x1ad   : > { %v2568_v44 = vmax.f32 %v2530_v17, %v2496_v46  ;;  %v2456_v40 = vmax.f32 %v2384_v58, %v2420_v5  ;;  %v9955_v25 = vmax.f32 %v8795_v41, %v8801_v53  ;;  %v2716_v15 = vmax.f32 %v2644_v48, %v2680_v32  ;;  %v2679_v12 = vld [vmem:[#allocation2 + $0x66] sm:$0xff]  ;;  %v8899_v41 = vld [vmem:[%s8089_s13] ss:$0 sm:$0xff] }
 0x1ae   : > { %v1853_v60 = vmax.f32 %v1795_v10, 0.0  ;;  %v2768_v23 = vpack.c.bf16 %v2718_v63, %v2717_v1  ;;  %v2642_v30 = vmax.f32 %v8873_v24, %v2606_v2  ;;  %v2567_v46 = vmax.f32 %v2529_v51, %v2495_v42  ;;  %v2615_v21 = vld [vmem:[#allocation2 + $0xa5] sm:$0xff]  ;;  %v2604_v42 = vld [vmem:[#allocation2 + $0x4d] sm:$0xff] }
 0x1af   : > { %2873 = vmatpush.bf16.msra.mxu2 %v2769_v45  ;;  %v2579_v26 = vmax.f32 %v9955_v25, %v8880_v47  ;;  %v2455_v50 = vmax.f32 %v2383_v61, %v2419_v3  ;;  %v2528_v49 = vmax.f32 %v2456_v40, %v2492_v8  ;;  %v2454_v19 = vmax.f32 %v2382_v55, %v2418_v27  ;;  %v2678_v58 = vld [vmem:[#allocation2 + $0x5e] sm:$0xff]  ;;  %v2417_v55 = vld [vmem:[#allocation2 + $0x13] sm:$0xff]  ;;  %v2687_v40 = vld [vmem:[#allocation2 + $0xa6] sm:$0xff] }
 0x1b0   : > { %v2105_v43 = vmul.f32 %v8819_v39, %v1853_v60  ;;  %v2715_v53 = vmax.f32 %v2643_v52, %v2679_v12  ;;  %v2641_v37 = vmax.f32 %v2569_v31, %v2605_v62  ;;  %v8904_v10 = vpop.f32.mrf.mxu1  ;;  %v9956_v48 = vmax.f32 %v8832_v22, %v8834_v36  ;;  %v2489_v60 = vld [vmem:[#allocation2 + $0x14] sm:$0xff]  ;;  %v2603_v31 = vld [vmem:[#allocation2 + $0x45] sm:$0xff] }
 0x1b1   : > { %v1698_v20 = vpop.f32.mrf.mxu0  ;;  %v8902_v24 = vld [vmem:[#allocation2 + $0xac] sm:$0xff]  ;;  %v2527_v45 = vmax.f32 %v2455_v50, %v2491_v16  ;;  %v2566_v63 = vmax.f32 %v2528_v49, %v2494_v18  ;;  %v2651_v54 = vmax.f32 %v2579_v26, %v2615_v21  ;;  %v2714_v17 = vmax.f32 %v2642_v30, %v2678_v58  ;;  %v2677_v52 = vld [vmem:[#allocation2 + $0x56] sm:$0xff] }
 0x1b2   : > { %2184 = vst.msk [vmem:[#allocation2 + $0xbb] sm:$0xff] %vm2120_vm3, %v2105_v43  ;;  %v1699_v39 = vadd.f32 %v8899_v41, %v1698_v20  ;;  %v2580_v28 = vmax.f32 %v9956_v48, %v8902_v24  ;;  %v2767_v7 = vpack.c.bf16 %v2716_v15, %v2715_v53  ;;  %v2640_v61 = vmax.f32 %v2568_v44, %v2604_v42  ;;  %v2616_v1 = vld [vmem:[#allocation2 + $0xad] sm:$0xff]  ;;  %v2017_v44 = vpop.permute.xlu2 %2016  ;;  %v2602_v43 = vld [vmem:[#allocation2 + $0x3d] sm:$0xff] }
 0x1b3   : > { %2874 = vmatpush.bf16.msra.mxu2 %v2768_v23  ;;  %v9957_v5 = vmax.f32 %v8722_v0, %v8716_v57  ;;  %v2526_v32 = vmax.f32 %v2454_v19, %v2490_v13  ;;  %v2713_v36 = vmax.f32 %v2641_v37, %v2677_v52  ;;  %v2639_v22 = vmax.f32 %v2567_v46, %v2603_v31  ;;  %v2688_v25 = vld [vmem:[#allocation2 + $0xae] sm:$0xff]  ;;  %v2675_v62 = vld [vmem:[#allocation2 + $0x46] sm:$0xff] }
 0x1b4   : > { %v1798_v9 = vadd.f32 %v8848_v34, %v1699_v39  ;;  %v2652_v2 = vmax.f32 %v2580_v28, %v2616_v1  ;;  %v2565_v34 = vmax.f32 %v2527_v45, %v8878_v6  ;;  %v2676_v26 = vld [vmem:[#allocation2 + $0x4e] sm:$0xff]  ;;  %v8915_v30 = vmax.f32 %v2651_v54, %v2687_v40  ;;  %v2674_v39 = vld [vmem:[#allocation2 + $0x3e] sm:$0xff]  ;;  %v2673_v45 = vld [vmem:[#allocation2 + $0x36] sm:$0xff] }
 0x1b5   : > { %v2453_v18 = vmax.f32 %v9957_v5, %v2417_v55  ;;  %v2564_v15 = vmax.f32 %v2526_v32, %v2492_v8  ;;  %v2766_v0 = vpack.c.bf16 %v2714_v17, %v2713_v36  ;;  %v2712_v27 = vmax.f32 %v2640_v61, %v2676_v26  ;;  %v2601_v46 = vld [vmem:[#allocation2 + $0x35] sm:$0xff]  ;;  %v2600_v37 = vld [vmem:[#allocation2 + $0x2d] sm:$0xff] }
 0x1b6   : > { %v1854_v51 = vmax.f32 %v1798_v9, 0.0  ;;  %v8917_v3 = vmax.f32 %v2652_v2, %v2688_v25  ;;  %v2638_v20 = vmax.f32 %v2566_v63, %v2602_v43  ;;  %v2711_v8 = vmax.f32 %v2639_v22, %v2675_v62  ;;  %v2672_v54 = vld [vmem:[#allocation2 + $0x2e] sm:$0xff]  ;;  %v2671_v55 = vld [vmem:[#allocation2 + $0x26] sm:$0xff] }
 0x1b7   : > { %2875 = vmatpush.bf16.msra.mxu2 %v2767_v7  ;;  %v2525_v23 = vmax.f32 %v2453_v18, %v2489_v60  ;;  %v2637_v19 = vmax.f32 %v2565_v34, %v2601_v46  ;;  %v2636_v42 = vmax.f32 %v2564_v15, %v2600_v37  ;;  %v7726_v15 = vld [vmem:[%s8099_s21 + $0x8] sm:$0xf0] }
 0x1b8   : > { %v2106_v57 = vmul.f32 %v2017_v44, %v1854_v51  ;;  %v2771_v6 = vpack.c.bf16 %v8917_v3, %v8915_v30  ;;  %v1804_v53 = vpop.f32.mrf.mxu1  ;;  %v2765_v21 = vpack.c.bf16 %v2712_v27, %v2711_v8  ;;  %v2710_v58 = vmax.f32 %v2638_v20, %v2674_v39  ;;  %v6902_v39 = vld [vmem:[%s8099_s21 + $0x18] sm:$0xf] }
 0x1b9   : > { %v1700_v12 = vpop.f32.mrf.mxu0  ;;  %v2563_v50 = vmax.f32 %v2525_v23, %v2491_v16  ;;  %v2599_v16 = vld [vmem:[#allocation2 + $0x25] sm:$0xff]  ;;  %v2709_v48 = vmax.f32 %v2637_v19, %v2673_v45  ;;  %v2708_v17 = vmax.f32 %v2636_v42, %v2672_v54  ;;  %v6890_v23 = vld [vmem:[%s8099_s21] sm:$0xf] }
 0x1ba   : > { %2185 = vst.msk [vmem:[#allocation2 + $0xc3] sm:$0xff] %vm2120_vm3, %v2106_v57  ;;  %v1701_v49 = vadd.f32 %v8899_v41, %v1700_v12  ;;  %v6891_v57 = vor.u32 %v7726_v15, %v6890_v23  ;;  %v2220_v23 = vld [vmem:[#allocation2 + $0xa8] sm:$0xff] }
 0x1bb   : > { %2876 = vmatpush.bf16.msra.mxu2 %v2766_v0  ;;  %v2635_v28 = vmax.f32 %v2563_v50, %v2599_v16  ;;  %v2764_v7 = vpack.c.bf16 %v2710_v58, %v2709_v48  ;;  %v2256_v15 = vld [vmem:[#allocation2 + $0xa9] sm:$0xff] }
 0x1bc   : > { %v1800_v13 = vadd.f32 %v8871_v56, %v1701_v49 }
 0x1bd   : > { %v2707_v60 = vmax.f32 %v2635_v28, %v2671_v55 }
 0x1be   : > { %v1855_v63 = vmax.f32 %v1800_v13, 0.0 }
 0x1bf   : > { %2877 = vmatpush.bf16.msra.mxu2 %v2765_v21  ;;  %v2763_v31 = vpack.c.bf16 %v2708_v17, %v2707_v60 }
 0x1c0   : > { %v2107_v9 = vmul.f32 %v8846_v38, %v1855_v63  ;;  %v1807_v1 = vpop.f32.mrf.mxu1  ;;  %v9958_v63 = vld [vmem:[#allocation42_spill] sm:$0xff] }
 0x1c1   : > { %v1703_v61 = vpop.f32.mrf.mxu0 }
 0x1c2   : > { %2186 = vst.msk [vmem:[#allocation2 + $0xcb] sm:$0xff] %vm2120_vm3, %v2107_v9  ;;  %v1704_v56 = vadd.f32 %v8899_v41, %v1703_v61  ;;  %v6914_v9 = vld [vmem:[%s8099_s21 + $0x30] sm:$0xf] }
 0x1c3   : > { %2878 = vmatpush.bf16.msra.mxu2 %v2764_v7  ;;  %v7732_v7 = vld [vmem:[%s8099_s21 + $0x38] sm:$0xf0] }
 0x1c4   : > { %v1803_v52 = vadd.f32 %v8904_v10, %v1704_v56  ;;  %v9959_v56 = vld [vmem:[#allocation43_spill] sm:$0xff] }
 0x1c6   : > { %v1856_v5 = vmax.f32 %v1803_v52, 0.0 }
 0x1c7   : > { %2879 = vmatpush.bf16.msra.mxu2 %v2763_v31 }
 0x1c8   : > { %v2108_v18 = vmul.f32 %v8704_v33, %v1856_v5  ;;  %v1809_v2 = vpop.f32.mrf.mxu1 }
 0x1c9   : > { %v1705_v32 = vpop.f32.mrf.mxu0 }
 0x1ca   : > { %2187 = vst.msk [vmem:[#allocation2 + $0xd3] sm:$0xff] %vm2120_vm3, %v2108_v18  ;;  %v1706_v38 = vadd.f32 %v8899_v41, %v1705_v32  ;;  %2880 = vmatmul.bf16.vlgmr.msra.gmra.mxu2 %v6891_v57  ;;  %v6926_v18 = vld [vmem:[%s8099_s21 + $0x48] sm:$0xf]  ;;  %v7735_v32 = vld [vmem:[%s8099_s21 + $0x50] sm:$0xf0] }
 0x1cc   : > { %v1805_v51 = vadd.f32 %v1804_v53, %v1706_v38  ;;  %v7729_v53 = vld [vmem:[%s8099_s21 + $0x20] sm:$0xf0] }
 0x1cd   : > { %v6903_v37 = vor.u32 %v7729_v53, %v6902_v39  ;;  %v2258_v39 = vld [vmem:[#allocation2 + $0xb9] sm:$0xff] }
 0x1ce   : > { %v1857_v36 = vmax.f32 %v1805_v51, 0.0  ;;  %v8967_v53 = vld [vmem:[#allocation2 + $0xb2] sm:$0xff] }
 0x1d0   : > { %v2109_v22 = vmul.f32 %v8687_v14, %v1857_v36  ;;  %v1812_v25 = vpop.f32.mrf.mxu1  ;;  %v2217_v36 = vld [vmem:[#allocation2 + $0x90] sm:$0xff] }
 0x1d1   : > { %v1708_v34 = vpop.f32.mrf.mxu0 }
 0x1d2   : > { %2188 = vst.msk [vmem:[#allocation2 + $0xdb] sm:$0xff] %vm2120_vm3, %v2109_v22  ;;  %v1709_v10 = vadd.f32 %v8899_v41, %v1708_v34  ;;  %v6927_v34 = vor.u32 %v7735_v32, %v6926_v18 }
 0x1d4   : > { %v1808_v40 = vadd.f32 %v1807_v1, %v1709_v10  ;;  %v2218_v10 = vld [vmem:[#allocation2 + $0x98] sm:$0xff] }
 0x1d6   : > { %v1858_v33 = vmax.f32 %v1808_v40, 0.0  ;;  %v2253_v40 = vld [vmem:[#allocation2 + $0x91] sm:$0xff] }
 0x1d7   : > { %v2289_v57 = vmax.f32 %v2217_v36, %v2253_v40 }
 0x1d8   : > { %v2110_v44 = vmul.f32 %v8791_v29, %v1858_v33  ;;  %v1814_v27 = vpop.f32.mrf.mxu1 }
 0x1d9   : > { %v1710_v26 = vpop.f32.mrf.mxu0 }
 0x1da   : > { %2189 = vst.msk [vmem:[#allocation2 + $0xe3] sm:$0xff] %vm2120_vm3, %v2110_v44  ;;  %v1711_v43 = vadd.f32 %v8899_v41, %v1710_v26  ;;  %2885 = vmatmul.bf16.gmra.mxu2 %v6903_v37  ;;  %v2219_v44 = vld [vmem:[#allocation2 + $0xa0] sm:$0xff]  ;;  %v2292_v37 = vmax.f32 %v2220_v23, %v2256_v15 }
 0x1db   : > { %v2255_v26 = vld [vmem:[#allocation2 + $0xa1] sm:$0xff] }
 0x1dc   : > { %v1810_v14 = vadd.f32 %v1809_v2, %v1711_v43  ;;  %v9960_v2 = vld [vmem:[#allocation45_spill] sm:$0xff]  ;;  %v2331_v15 = vld [vmem:[#allocation2 + $0xc2] sm:$0xff] }
 0x1de   : > { %v1859_v0 = vmax.f32 %v1810_v14, 0.0 }
 0x1e0   : > { %v2111_v20 = vmul.f32 %v8677_v4, %v1859_v0  ;;  %v1817_v8 = vpop.f32.mrf.mxu1 }
 0x1e1   : > { %v1713_v12 = vpop.f32.mrf.mxu0 }
 0x1e2   : > { %2190 = vst.msk [vmem:[#allocation2 + $0xeb] sm:$0xff] %vm2120_vm3, %v2111_v20  ;;  %v1714_v29 = vadd.f32 %v8899_v41, %v1713_v12  ;;  %v2221_v20 = vld [vmem:[#allocation2 + $0xb0] sm:$0xff] }
 0x1e4   : > { %v1813_v62 = vadd.f32 %v1812_v25, %v1714_v29  ;;  %v2254_v25 = vld [vmem:[#allocation2 + $0x99] sm:$0xff] }
 0x1e5   : > { %v2290_v14 = vmax.f32 %v2218_v10, %v2254_v25 }
 0x1e6   : > { %v1860_v46 = vmax.f32 %v1813_v62, 0.0 }
 0x1e8   : > { %v2112_v50 = vmul.f32 %v8718_v59, %v1860_v46  ;;  %v1819_v42 = vpop.f32.mrf.mxu1  ;;  %v2257_v46 = vld [vmem:[#allocation2 + $0xb1] sm:$0xff] }
 0x1e9   : > { %v1715_v49 = vpop.f32.mrf.mxu0  ;;  %v2228_v29 = vld [vmem:[#allocation2 + $0xe8] sm:$0xff] }
 0x1ea   : > { %2191 = vst.msk [vmem:[#allocation2 + $0xf3] sm:$0xff] %vm2120_vm3, %v2112_v50  ;;  %v1716_v19 = vadd.f32 %v8899_v41, %v1715_v49  ;;  %v2264_v62 = vld [vmem:[#allocation2 + $0xe9] sm:$0xff]  ;;  %v2291_v50 = vmax.f32 %v2219_v44, %v2255_v26  ;;  %v9963_v44 = vmov 0.0  }
 0x1eb   : > { %v8963_v49 = vld [vmem:[#allocation2 + $0xa2] sm:$0xff]  ;;  %v9001_v25 = vld [vmem:[#allocation2 + $0xea] sm:$0xff]  ;;  %2162 = vst.msk [vmem:[#allocation2 + $0x140] sm:$0x3f] %vm2161_vm4, %v9963_v44 }
 0x1ec   : > { %v1815_v4 = vadd.f32 %v1814_v27, %v1716_v19  ;;  %v2222_v19 = vld [vmem:[#allocation2 + $0xb8] sm:$0xff]  ;;  %3129 = vst.msk [vmem:[#allocation3 + $0x60] sm:$0x3f] %vm2161_vm4, %v9963_v44 }
 0x1ed   : > { %5195 = vst.msk [vmem:[#allocation5] sm:$0xff] %vm2856_vm5, %v9963_v44 }
 0x1ee   : > { %v1861_v13 = vmax.f32 %v1815_v4, 0.0  ;;  %5196 = vst.msk [vmem:[#allocation5 + $0x8] sm:$0xff] %vm2856_vm5, %v9963_v44 }
 0x1ef   : > { %5197 = vst.msk [vmem:[#allocation5 + $0x10] sm:$0xff] %vm2856_vm5, %v9963_v44 }
 0x1f0   : > { %v2113_v21 = vmul.f32 %v8680_v35, %v1861_v13  ;;  %v6915_v35 = vor.u32 %v7732_v7, %v6914_v9  ;;  %v1822_v61 = vpop.f32.mrf.mxu1  ;;  %v2300_v7 = vmax.f32 %v2228_v29, %v2264_v62  ;;  %v6938_v29 = vld [vmem:[%s8099_s21 + $0x60] sm:$0xf]  ;;  %v7738_v62 = vld [vmem:[%s8099_s21 + $0x68] sm:$0xf0]  ;;  %5198 = vst.msk [vmem:[#allocation5 + $0x18] sm:$0xff] %vm2856_vm5, %v9963_v44 }
 0x1f1   : > { %v1718_v58 = vpop.f32.mrf.mxu0  ;;  %v2229_v0 = vld [vmem:[#allocation2 + $0xf0] sm:$0xff]  ;;  %4144 = vst.msk [vmem:[#allocation4 + $0x8] sm:$0xff] %vm4142_vm7, %v9963_v44 }
 0x1f2   : > { %2192 = vst.msk [vmem:[#allocation2 + $0xfb] sm:$0xff] %vm2120_vm3, %v2113_v21  ;;  %v1719_v59 = vadd.f32 %v8899_v41, %v1718_v58  ;;  %2890 = vmatmul.bf16.gmra.mxu2 %v6915_v35  ;;  %v2265_v27 = vld [vmem:[#allocation2 + $0xf1] sm:$0xff]  ;;  %v2227_v21 = vld [vmem:[#allocation2 + $0xe0] sm:$0xff] }
 0x1f3   : > { %v2301_v13 = vmax.f32 %v2229_v0, %v2265_v27  ;;  %v2263_v58 = vld [vmem:[#allocation2 + $0xe1] sm:$0xff]  ;;  %4145 = vst.msk [vmem:[#allocation4 + $0x10] sm:$0xff] %vm4142_vm7, %v9963_v44 }
 0x1f4   : > { %v1818_v45 = vadd.f32 %v1817_v8, %v1719_v59  ;;  %v8965_v8 = vld [vmem:[#allocation2 + $0xaa] sm:$0xff]  ;;  %v8970_v59 = vld [vmem:[#allocation2 + $0xba] sm:$0xff]  ;;  %v2299_v32 = vmax.f32 %v2227_v21, %v2263_v58  ;;  %4143 = vst.msk [vmem:[#allocation4] sm:$0xff] %vm4142_vm7, %v9963_v44 }
 0x1f5   : > { %v8978_v35 = vld [vmem:[#allocation2 + $0xc0] sm:$0xff]  ;;  %v9964_v21 = vld [vmem:[#allocation46_spill] sm:$0xff]  ;;  %4146 = vst.msk [vmem:[#allocation4 + $0x18] sm:$0xff] %vm4142_vm7, %v9963_v44 }
 0x1f6   : > { %v1862_v16 = vmax.f32 %v1818_v45, 0.0  ;;  %4147 = vst.msk [vmem:[#allocation4 + $0x20] sm:$0xff] %vm4142_vm7, %v9963_v44 }
 0x1f7   : > { %4148 = vst.msk [vmem:[#allocation4 + $0x28] sm:$0xff] %vm4142_vm7, %v9963_v44 }
 0x1f8   : > { %v2114_v48 = vmul.f32 %v9958_v63, %v1862_v16  ;;  %v1824_v38 = vpop.f32.mrf.mxu1  ;;  %v9962_v16 = vld [vmem:[#allocation47_spill] sm:$0xff]  ;;  %4149 = vst.msk [vmem:[#allocation4 + $0x30] sm:$0xff] %vm4142_vm7, %v9963_v44 }
 0x1f9   : > { %v1720_v28 = vpop.f32.mrf.mxu0  ;;  %v8976_v63 = vmax.f32 %v2290_v14, %v9962_v16  ;;  %v2266_v9 = vld [vmem:[#allocation2 + $0xf9] sm:$0xff]  ;;  %4150 = vst.msk [vmem:[#allocation4 + $0x38] sm:$0xff] %vm4142_vm7, %v9963_v44 }
 0x1fa   : > { %2193 = vst.msk [vmem:[#allocation2 + $0x103] sm:$0xff] %vm2120_vm3, %v2114_v48  ;;  %v1721_v54 = vadd.f32 %v8899_v41, %v1720_v28  ;;  %v2338_v10 = vld [vmem:[#allocation2 + $0xfa] sm:$0xff] }
 0x1fb   : > { %v2400_v36 = vmax.f32 %v8976_v63, %v8965_v8  ;;  %v9026_v16 = vld [vmem:[#allocation2 + $0xda] sm:$0xff]  ;;  %4151 = vst.msk [vmem:[#allocation4 + $0x40] sm:$0xff] %vm4142_vm7, %v9963_v44 }
 0x1fc   : > { %v1820_v17 = vadd.f32 %v1819_v42, %v1721_v54  ;;  %v9961_v42 = vld [vmem:[#allocation44_spill] sm:$0xff]  ;;  %v2230_v54 = vld [vmem:[#allocation2 + $0xf8] sm:$0xff]  ;;  %4152 = vst.msk [vmem:[#allocation4 + $0x48] sm:$0xff] %vm4142_vm7, %v9963_v44 }
 0x1fd   : > { %v8973_v45 = vmax.f32 %v2289_v57, %v9961_v42  ;;  %v2332_v57 = vld [vmem:[#allocation2 + $0xca] sm:$0xff]  ;;  %4153 = vst.msk [vmem:[#allocation4 + $0x50] sm:$0xff] %vm4142_vm7, %v9963_v44 }
 0x1fe   : > { %v1863_v55 = vmax.f32 %v1820_v17, 0.0  ;;  %v8980_v17 = vld [vmem:[#allocation2 + $0xc1] sm:$0xff]  ;;  %4154 = vst.msk [vmem:[#allocation4 + $0x58] sm:$0xff] %vm4142_vm7, %v9963_v44 }
 0x1ff   : > { %4156 = vst.msk [vmem:[#allocation4 + $0x60] sm:$0x3f] %vm4155_vm8, %v9963_v44 }
 0x200   : > { %v2115_v60 = vmul.f32 %v9959_v56, %v1863_v55  ;;  %v1827_v48 = vpop.f32.mrf.mxu1  ;;  %v2226_v55 = vld [vmem:[#allocation2 + $0xd8] sm:$0xff]  ;;  %5870 = vst.msk [vmem:[#allocation6] sm:$0xff] %vm5146_vm10, %v9963_v44 }
 0x201   : > { %v1723_v1 = vpop.f32.mrf.mxu0  ;;  %v2262_v56 = vld [vmem:[#allocation2 + $0xd9] sm:$0xff]  ;;  %v8993_v18 = vld [vmem:[#allocation2 + $0x102] sm:$0xff]  ;;  %5871 = vst.msk [vmem:[#allocation6 + $0x8] sm:$0xff] %vm5146_vm10, %v9963_v44 }
 0x202   : > { %2194 = vst.msk [vmem:[#allocation2 + $0x10b] sm:$0xff] %vm2120_vm3, %v2115_v60  ;;  %v1724_v52 = vadd.f32 %v8899_v41, %v1723_v1  ;;  %2895 = vmatmul.bf16.gmra.mxu2 %v6927_v34  ;;  %v8984_v60 = vld [vmem:[#allocation2 + $0xc8] sm:$0xff]  ;;  %v2302_v34 = vmax.f32 %v2230_v54, %v2266_v9  ;;  %v2298_v23 = vmax.f32 %v2226_v55, %v2262_v56  ;;  %v2438_v54 = vld [vmem:[#allocation2 + $0xbb] sm:$0xff] }
 0x203   : > { %v8986_v1 = vld [vmem:[#allocation2 + $0xc9] sm:$0xff]  ;;  %5200 = vst.msk [vmem:[#allocation5 + $0x20] sm:$0x3f] %vm5199_vm11, %v9963_v44 }
 0x204   : > { %v1823_v31 = vadd.f32 %v1822_v61, %v1724_v52  ;;  %v2294_v52 = vmax.f32 %v2222_v19, %v2258_v39  ;;  %v2374_v42 = vmax.f32 %v2302_v34, %v2338_v10  ;;  %v2439_v55 = vld [vmem:[#allocation2 + $0xc3] sm:$0xff]  ;;  %v2440_v56 = vld [vmem:[#allocation2 + $0xcb] sm:$0xff]  ;;  %5873 = vst.msk [vmem:[#allocation6 + $0x10] sm:$0x3] %vm5872_vm13, %v9963_v44 }
 0x206   : > { %v1864_v5 = vmax.f32 %v1823_v31, 0.0  ;;  %v8989_v31 = vmax.f32 %v2291_v50, %v8963_v49  ;;  %v2366_v50 = vmax.f32 %v2294_v52, %v8970_v59 }
 0x208   : > { %v2116_v51 = vmul.f32 %v9960_v2, %v1864_v5  ;;  %v8991_v5 = vld [vmem:[#allocation2 + $0xf2] sm:$0xff]  ;;  %v2364_v2 = vmax.f32 %v2292_v37, %v8965_v8  ;;  %v2401_v26 = vmax.f32 %v8989_v31, %v8967_v53 }
 0x209   : > { %v1725_v22 = vpop.f32.mrf.mxu0  ;;  %v2373_v40 = vmax.f32 %v2301_v13, %v8991_v5  ;;  %v9020_v19 = vld [vmem:[#allocation2 + $0x10a] sm:$0xff]  ;;  %v2296_v13 = vmax.f32 %v8984_v60, %v8986_v1 }
 0x20a   : > { %2195 = vst.msk [vmem:[#allocation2 + $0x113] sm:$0xff] %vm2120_vm3, %v2116_v51  ;;  %v1726_v33 = vadd.f32 %v8899_v41, %v1725_v22  ;;  %v2399_v51 = vmax.f32 %v8973_v45, %v8963_v49  ;;  %v2402_v0 = vmax.f32 %v2364_v2, %v8970_v59  ;;  %v9028_v59 = vld [vmem:[#allocation2 + $0x104] sm:$0xff]  ;;  %v2412_v52 = vmax.f32 %v2374_v42, %v9020_v19  ;;  %v2446_v2 = vld [vmem:[#allocation2 + $0xfb] sm:$0xff] }
 0x20b   : > { %v2693_v49 = vld [vmem:[#allocation2 + $0xd6] sm:$0xff] }
 0x20c   : > { %v1825_v43 = vadd.f32 %v1824_v38, %v1726_v33  ;;  %v2225_v38 = vld [vmem:[#allocation2 + $0xd0] sm:$0xff]  ;;  %v9034_v60 = vmax.f32 %v2402_v0, %v2438_v54  ;;  %v2368_v0 = vmax.f32 %v2296_v13, %v2332_v57 }
 0x20d   : > { %v2261_v33 = vld [vmem:[#allocation2 + $0xd1] sm:$0xff] }
 0x20e   : > { %v1865_v12 = vmax.f32 %v1825_v43, 0.0  ;;  %v2372_v43 = vmax.f32 %v2300_v7, %v9001_v25  ;;  %v2447_v7 = vld [vmem:[#allocation2 + $0x103] sm:$0xff] }
 0x210   : > { %v2117_v4 = vmul.f32 %v8882_v11, %v1865_v12  ;;  %v2293_v11 = vmax.f32 %v2221_v20, %v2257_v46  ;;  %v2411_v20 = vmax.f32 %v2373_v40, %v8993_v18  ;;  %v9013_v12 = vld [vmem:[#allocation2 + $0xe2] sm:$0xff]  ;;  %v2295_v46 = vmax.f32 %v8978_v35, %v8980_v17  ;;  %v9031_v17 = vld [vmem:[#allocation2 + $0xd2] sm:$0xff] }
 0x211   : > { %v1728_v28 = vpop.f32.mrf.mxu0  ;;  %v2371_v39 = vmax.f32 %v2299_v32, %v9013_v12  ;;  %v2410_v37 = vmax.f32 %v2372_v43, %v2338_v10  ;;  %v1829_v10 = vpop.f32.mrf.mxu1  ;;  %v2233_v40 = vld [vmem:[#allocation2 + $0x110] sm:$0xff] }
 0x212   : > { %2196 = vst.msk [vmem:[#allocation2 + $0x11b] sm:$0xff] %vm2120_vm3, %v2117_v4  ;;  %v1729_v61 = vadd.f32 %v8899_v41, %v1728_v28  ;;  %v2365_v14 = vmax.f32 %v2293_v11, %v8967_v53  ;;  %v2297_v4 = vmax.f32 %v2225_v38, %v2261_v33  ;;  %v2404_v28 = vmax.f32 %v2366_v50, %v2332_v57  ;;  %v2445_v38 = vld [vmem:[#allocation2 + $0xf3] sm:$0xff] }
 0x213   : > { %v2409_v35 = vmax.f32 %v2371_v39, %v8991_v5  ;;  %v2370_v11 = vmax.f32 %v2298_v23, %v9026_v16  ;;  %v2483_v32 = vmax.f32 %v2411_v20, %v2447_v7  ;;  %v9041_v5 = vld [vmem:[#allocation2 + $0xfc] sm:$0xff]  ;;  %v9043_v34 = vmax.f32 %v2295_v46, %v2331_v15  ;;  %v2269_v33 = vld [vmem:[#allocation2 + $0x111] sm:$0xff]  ;;  %v2232_v46 = vld [vmem:[#allocation2 + $0x108] sm:$0xff] }
 0x214   : > { %v1828_v22 = vadd.f32 %v1827_v48, %v1729_v61  ;;  %v2403_v48 = vmax.f32 %v2365_v14, %v2331_v15  ;;  %v6939_v61 = vor.u32 %v7738_v62, %v6938_v29  ;;  %v2482_v23 = vmax.f32 %v2410_v37, %v2446_v2  ;;  %v2231_v20 = vld [vmem:[#allocation2 + $0x100] sm:$0xff]  ;;  %v2520_v62 = vld [vmem:[#allocation2 + $0x10c] sm:$0xff] }
 0x215   : > { %v2369_v14 = vmax.f32 %v2297_v4, %v9031_v17  ;;  %v2267_v29 = vld [vmem:[#allocation2 + $0x101] sm:$0xff]  ;;  %v2555_v50 = vmax.f32 %v2483_v32, %v9028_v59  ;;  %v9052_v15 = vmax.f32 %v2404_v28, %v2440_v56  ;;  %v2481_v42 = vmax.f32 %v2409_v35, %v2445_v38  ;;  %v9058_v7 = vld [vmem:[#allocation2 + $0xec] sm:$0xff]  ;;  %v2082_v28 = vpop.permute.xlu2 %2081 }
 0x216   : > { %v1866_v27 = vmax.f32 %v1828_v22, 0.0  ;;  %v9039_v22 = vld [vmem:[#allocation2 + $0xf4] sm:$0xff]  ;;  %v9050_v39 = vmax.f32 %v2403_v48, %v2439_v55  ;;  %v2554_v37 = vmax.f32 %v2482_v23, %v9041_v5  ;;  %2900 = vmatmul.bf16.gmra.mxu2 %v6939_v61  ;;  %v2305_v13 = vmax.f32 %v2233_v40, %v2269_v33  ;;  %v2444_v48 = vld [vmem:[#allocation2 + $0xeb] sm:$0xff]  ;;  %v2443_v56 = vld [vmem:[#allocation2 + $0xe3] sm:$0xff] }
 0x217   : > { %v2407_v4 = vmax.f32 %v2369_v14, %v9013_v12  ;;  %v2553_v55 = vmax.f32 %v2481_v42, %v9039_v22  ;;  %v2442_v32 = vld [vmem:[#allocation2 + $0xdb] sm:$0xff] }
 0x218   : > { %v2118_v58 = vmul.f32 %v9964_v21, %v1866_v27  ;;  %v2268_v21 = vld [vmem:[#allocation2 + $0x109] sm:$0xff]  ;;  %v2592_v35 = vmax.f32 %v2554_v37, %v2520_v62 }
 0x219   : > { %v1730_v9 = vpop.f32.mrf.mxu0  ;;  %v9045_v43 = vld [vmem:[#allocation2 + $0x114] sm:$0xff]  ;;  %v2304_v38 = vmax.f32 %v2232_v46, %v2268_v21  ;;  %v2591_v14 = vmax.f32 %v2553_v55, %v9028_v59  ;;  %v9074_v46 = vld [vmem:[#allocation2 + $0xdc] sm:$0xff] }
 0x21a   : > { %2197 = vst.msk [vmem:[#allocation2 + $0x123] sm:$0xff] %vm2120_vm3, %v2118_v58  ;;  %v1731_v1 = vadd.f32 %v8899_v41, %v1730_v9  ;;  %v2408_v41 = vmax.f32 %v2370_v11, %v9001_v25  ;;  %v2448_v58 = vld [vmem:[#allocation2 + $0x10b] sm:$0xff]  ;;  %v2406_v25 = vmax.f32 %v2368_v0, %v9026_v16  ;;  %v2593_v9 = vmax.f32 %v2555_v50, %v9045_v43  ;;  %v2234_v61 = vld [vmem:[#allocation2 + $0x118] sm:$0xff] }
 0x21b   : > { %v2484_v54 = vmax.f32 %v2412_v52, %v2448_v58  ;;  %v2303_v11 = vmax.f32 %v2231_v20, %v2267_v29  ;;  %v9061_v16 = vld [vmem:[#allocation2 + $0x112] sm:$0xff]  ;;  %v9063_v52 = vld [vmem:[#allocation2 + $0xe4] sm:$0xff]  ;;  %v2479_v0 = vmax.f32 %v2407_v4, %v2443_v56 }
 0x21c   : > { %v1830_v27 = vadd.f32 %v1829_v10, %v1731_v1  ;;  %v2480_v1 = vmax.f32 %v2408_v41, %v2444_v48  ;;  %v2405_v10 = vmax.f32 %v9043_v34, %v9031_v17  ;;  %v2270_v40 = vld [vmem:[#allocation2 + $0x119] sm:$0xff]  ;;  %v2377_v20 = vmax.f32 %v2305_v13, %v9061_v16  ;;  %v2628_v50 = vld [vmem:[#allocation2 + $0x10d] sm:$0xff]  ;;  %v2627_v13 = vld [vmem:[#allocation2 + $0x105] sm:$0xff] }
 0x21d   : > { %v2556_v2 = vmax.f32 %v2484_v54, %v2520_v62  ;;  %v2629_v23 = vld [vmem:[#allocation2 + $0x115] sm:$0xff]  ;;  %v2375_v21 = vmax.f32 %v2303_v11, %v8993_v18  ;;  %v2664_v58 = vmax.f32 %v2592_v35, %v2628_v50  ;;  %v2551_v42 = vmax.f32 %v2479_v0, %v9063_v52  ;;  %v9090_v56 = vld [vmem:[#allocation2 + $0xc4] sm:$0xff] }
 0x21e   : > { %v1867_v57 = vmax.f32 %v1830_v27, 0.0  ;;  %v2552_v41 = vmax.f32 %v2480_v1, %v9058_v7  ;;  %v2478_v27 = vmax.f32 %v2406_v25, %v2442_v32  ;;  %v2665_v62 = vmax.f32 %v2593_v9, %v2629_v23  ;;  %v2342_v34 = vld [vmem:[#allocation2 + $0x11a] sm:$0xff] }
 0x21f   : > { %v2306_v4 = vmax.f32 %v2234_v61, %v2270_v40  ;;  %v2376_v25 = vmax.f32 %v2304_v38, %v9020_v19  ;;  %v2441_v54 = vld [vmem:[#allocation2 + $0xd3] sm:$0xff]  ;;  %v2663_v11 = vmax.f32 %v2591_v14, %v2627_v13  ;;  %v2413_v19 = vmax.f32 %v2375_v21, %v9061_v16  ;;  %v2626_v38 = vld [vmem:[#allocation2 + $0xfd] sm:$0xff] }
 0x220   : > { %v2119_v12 = vmul.f32 %v2082_v28, %v1867_v57  ;;  %v2590_v37 = vmax.f32 %v2552_v41, %v9041_v5  ;;  %v9082_v9 = vld [vmem:[#allocation2 + $0xd4] sm:$0xff]  ;;  %v9087_v5 = vmax.f32 %v2551_v42, %v9039_v22  ;;  %v2477_v55 = vmax.f32 %v2405_v10, %v2441_v54 }
 0x221   : > { %v9067_v33 = vld [vmem:[#allocation2 + $0x11c] sm:$0xff]  ;;  %v2550_v35 = vmax.f32 %v2478_v27, %v9074_v46  ;;  %v2414_v1 = vmax.f32 %v2376_v25, %v2342_v34  ;;  %v2700_v61 = vld [vmem:[#allocation2 + $0x10e] sm:$0xff]  ;;  %v2378_v41 = vmax.f32 %v2306_v4, %v2342_v34  ;;  %v2547_v50 = vmax.f32 %v9050_v39, %v9090_v56 }
 0x222   : > { %2198 = vst.msk [vmem:[#allocation2 + $0x12b] sm:$0xff] %vm2120_vm3, %v2119_v12  ;;  %v2594_v29 = vmax.f32 %v2556_v2, %v9067_v33  ;;  %v2379_v17 = vld [vmem:[#allocation2 + $0x122] sm:$0xff]  ;;  %v2701_v18 = vld [vmem:[#allocation2 + $0x116] sm:$0xff]  ;;  %v2512_v2 = vld [vmem:[#allocation2 + $0xcc] sm:$0xff]  ;;  %v2736_v22 = vmax.f32 %v2664_v58, %v2700_v61  ;;  %v2662_v40 = vmax.f32 %v2590_v37, %v2626_v38  ;;  %v2549_v23 = vmax.f32 %v2477_v55, %v9082_v9 }
 0x223   : > { %v2630_v59 = vld [vmem:[#allocation2 + $0x11d] sm:$0xff]  ;;  %v2415_v48 = vmax.f32 %v2377_v20, %v2379_v17  ;;  %v2737_v32 = vmax.f32 %v2665_v62, %v2701_v18  ;;  %v2625_v10 = vld [vmem:[#allocation2 + $0xf5] sm:$0xff]  ;;  %v2588_v14 = vmax.f32 %v2550_v35, %v9058_v7  ;;  %v2699_v20 = vld [vmem:[#allocation2 + $0x106] sm:$0xff]  ;;  %v2548_v7 = vmax.f32 %v9052_v15, %v2512_v2 }
 0x224   : > { %v2666_v57 = vmax.f32 %v2594_v29, %v2630_v59  ;;  %v2702_v28 = vld [vmem:[#allocation2 + $0x11e] sm:$0xff]  ;;  %v2449_v27 = vld [vmem:[#allocation2 + $0x113] sm:$0xff]  ;;  %v2735_v21 = vmax.f32 %v2663_v11, %v2699_v20  ;;  %v2661_v59 = vmax.f32 %v9087_v5, %v2625_v10  ;;  %v2587_v58 = vmax.f32 %v2549_v23, %v9063_v52 }
 0x225   : > { %v2451_v0 = vld [vmem:[#allocation2 + $0x123] sm:$0xff]  ;;  %v2561_v62 = vld [vmem:[#allocation2 + $0x134] sm:$0xff]  ;;  %v2485_v25 = vmax.f32 %v2413_v19, %v2449_v27  ;;  %v2586_v5 = vmax.f32 %v2548_v7, %v9074_v46  ;;  %v2436_v27 = vld [vmem:[#allocation2 + $0xab] sm:$0xff] }
 0x226   : > { %v2738_v12 = vmax.f32 %v2666_v57, %v2702_v28  ;;  %v2487_v29 = vmax.f32 %v2415_v48, %v2451_v0  ;;  %v2450_v17 = vld [vmem:[#allocation2 + $0x11b] sm:$0xff]  ;;  %v2624_v57 = vld [vmem:[#allocation2 + $0xed] sm:$0xff]  ;;  %v2777_v18 = vpack.c.bf16 %v2736_v22, %v2735_v21  ;;  %v2623_v15 = vld [vmem:[#allocation2 + $0xe5] sm:$0xff]  ;;  %v2585_v22 = vmax.f32 %v2547_v50, %v9082_v9 }
 0x227   : > { %v2486_v34 = vmax.f32 %v2414_v1, %v2450_v17  ;;  %v2698_v4 = vld [vmem:[#allocation2 + $0xfe] sm:$0xff]  ;;  %v2660_v28 = vmax.f32 %v2588_v14, %v2624_v57  ;;  %v2557_v52 = vmax.f32 %v2485_v25, %v9045_v43  ;;  %v2697_v61 = vld [vmem:[#allocation2 + $0xf6] sm:$0xff]  ;;  %v2659_v38 = vmax.f32 %v2587_v58, %v2623_v15 }
 0x228   : > { %v2778_v16 = vpack.c.bf16 %v2738_v12, %v2737_v32  ;;  %v2510_v48 = vld [vmem:[#allocation2 + $0xbc] sm:$0xff]  ;;  %v2734_v39 = vmax.f32 %v2662_v40, %v2698_v4  ;;  %v2437_v32 = vld [vmem:[#allocation2 + $0xb3] sm:$0xff]  ;;  %v2733_v43 = vmax.f32 %v2661_v59, %v2697_v61  ;;  %v2472_v53 = vmax.f32 %v2400_v36, %v2436_v27 }
 0x229   : > { %v2380_v42 = vld [vmem:[#allocation2 + $0x12a] sm:$0xff]  ;;  %v2558_v35 = vmax.f32 %v2486_v34, %v9067_v33  ;;  %v2509_v12 = vld [vmem:[#allocation2 + $0xb4] sm:$0xff]  ;;  %v2562_v10 = vld [vmem:[#allocation2 + $0x13c] sm:$0xff]  ;;  %v2473_v40 = vmax.f32 %v2401_v26, %v2437_v32  ;;  %v2546_v46 = vmax.f32 %v9034_v60, %v2510_v48 }
 0x22a   : > { %v2523_v37 = vld [vmem:[#allocation2 + $0x124] sm:$0xff]  ;;  %2906 = vmatpush.bf16.msra.mxu3 %v2778_v16  ;;  %v2416_v13 = vmax.f32 %v2378_v41, %v2380_v42  ;;  %v2524_v55 = vld [vmem:[#allocation2 + $0x12c] sm:$0xff]  ;;  %v2633_v23 = vld [vmem:[#allocation2 + $0x135] sm:$0xff]  ;;  %v2776_v31 = vpack.c.bf16 %v2734_v39, %v2733_v43  ;;  %v2544_v8 = vmax.f32 %v2472_v53, %v8902_v24 }
 0x22b   : > { %v2559_v54 = vmax.f32 %v2487_v29, %v2523_v37  ;;  %v2452_v11 = vld [vmem:[#allocation2 + $0x12b] sm:$0xff]  ;;  %v2622_v14 = vld [vmem:[#allocation2 + $0xdd] sm:$0xff]  ;;  %v2595_v0 = vmax.f32 %v2557_v52, %v2523_v37  ;;  %v2596_v41 = vmax.f32 %v2558_v35, %v2524_v55  ;;  %v2584_v17 = vmax.f32 %v2546_v46, %v2512_v2  ;;  %v2621_v58 = vld [vmem:[#allocation2 + $0xd5] sm:$0xff] }
 0x22c   : > { %v2488_v19 = vmax.f32 %v2416_v13, %v2452_v11  ;;  %v2696_v16 = vld [vmem:[#allocation2 + $0xee] sm:$0xff]  ;;  %v2634_v20 = vld [vmem:[#allocation2 + $0x13d] sm:$0xff]  ;;  %v2658_v29 = vmax.f32 %v2586_v5, %v2622_v14  ;;  %v2695_v26 = vld [vmem:[#allocation2 + $0xe6] sm:$0xff]  ;;  %v2657_v37 = vmax.f32 %v2585_v22, %v2621_v58 }
 0x22d   : > { %v2597_v1 = vmax.f32 %v2559_v54, %v2561_v62  ;;  %v2545_v62 = vmax.f32 %v2473_v40, %v2509_v12  ;;  %v2435_v21 = vld [vmem:[#allocation2 + $0xa3] sm:$0xff]  ;;  %v2732_v60 = vmax.f32 %v2660_v28, %v2696_v16  ;;  %v2705_v59 = vld [vmem:[#allocation2 + $0x136] sm:$0xff]  ;;  %v2632_v25 = vld [vmem:[#allocation2 + $0x12d] sm:$0xff]  ;;  %v2731_v63 = vmax.f32 %v2659_v38, %v2695_v26 }
 0x22e   : > { %2907 = vmatpush.bf16.msra.mxu3 %v2777_v18  ;;  %v2560_v33 = vmax.f32 %v2488_v19, %v2524_v55  ;;  %v2706_v42 = vld [vmem:[#allocation2 + $0x13e] sm:$0xff]  ;;  %v2471_v2 = vmax.f32 %v2399_v51, %v2435_v21  ;;  %v2668_v57 = vmax.f32 %v2596_v41, %v2632_v25  ;;  %v2620_v13 = vld [vmem:[#allocation2 + $0xcd] sm:$0xff]  ;;  %v2582_v28 = vmax.f32 %v2544_v8, %v2510_v48  ;;  %v2617_v46 = vld [vmem:[#allocation2 + $0xb5] sm:$0xff] }
 0x22f   : > { %v2669_v50 = vmax.f32 %v2597_v1, %v2633_v23  ;;  %v2631_v7 = vld [vmem:[#allocation2 + $0x125] sm:$0xff]  ;;  %v2583_v34 = vmax.f32 %v2545_v62, %v9090_v56  ;;  %v2656_v18 = vmax.f32 %v2584_v17, %v2620_v13  ;;  %v2775_v11 = vpack.c.bf16 %v2732_v60, %v2731_v63  ;;  %v2704_v24 = vld [vmem:[#allocation2 + $0x12e] sm:$0xff]  ;;  %v2689_v16 = vld [vmem:[#allocation2 + $0xb6] sm:$0xff] }
 0x230   : > { %v2598_v9 = vmax.f32 %v2560_v33, %v2562_v10  ;;  %v2667_v4 = vmax.f32 %v2595_v0, %v2631_v7  ;;  %v2694_v54 = vld [vmem:[#allocation2 + $0xde] sm:$0xff]  ;;  %v2543_v39 = vmax.f32 %v2471_v2, %v8880_v47  ;;  %v2703_v45 = vld [vmem:[#allocation2 + $0x126] sm:$0xff]  ;;  %v2729_v19 = vmax.f32 %v2657_v37, %v2693_v49  ;;  %v2692_v61 = vld [vmem:[#allocation2 + $0xce] sm:$0xff] }
 0x231   : > { %v2741_v55 = vmax.f32 %v2669_v50, %v2705_v59  ;;  %v2730_v5 = vmax.f32 %v2658_v29, %v2694_v54  ;;  %v2619_v52 = vld [vmem:[#allocation2 + $0xc5] sm:$0xff]  ;;  %v2740_v32 = vmax.f32 %v2668_v57, %v2704_v24  ;;  %v2618_v47 = vld [vmem:[#allocation2 + $0xbd] sm:$0xff]  ;;  %v2728_v38 = vmax.f32 %v2656_v18, %v2692_v61  ;;  %v7727_v22 = vld [vmem:[%s8099_s21 + $0x10] sm:$0xf0] }
 0x232   : > { %2908 = vmatpush.bf16.msra.mxu3 %v2776_v31  ;;  %v2670_v36 = vmax.f32 %v2598_v9, %v2634_v20  ;;  %v2655_v51 = vmax.f32 %v2583_v34, %v2619_v52  ;;  %v2581_v35 = vmax.f32 %v2543_v39, %v2509_v12  ;;  %v2739_v1 = vmax.f32 %v2667_v4, %v2703_v45  ;;  %v6898_v23 = vld [vmem:[%s8099_s21 + $0x8] sm:$0xf]  ;;  %v2690_v14 = vld [vmem:[#allocation2 + $0xbe] sm:$0xff]  ;;  %v6892_v17 = vld [vmem:[%s8099_s21 + $0xc] sm:$0xf0] }
 0x233   : > { %v2774_v48 = vpack.c.bf16 %v2730_v5, %v2729_v19  ;;  %v2654_v10 = vmax.f32 %v2582_v28, %v2618_v47  ;;  %v2691_v40 = vld [vmem:[#allocation2 + $0xc6] sm:$0xff]  ;;  %v6899_v0 = vor.u32 %v7727_v22, %v6898_v23  ;;  %v6910_v53 = vld [vmem:[%s8099_s21 + $0x20] sm:$0xf]  ;;  %v7728_v60 = vld [vmem:[%s8099_s21 + $0x1c] sm:$0xf] }
 0x234   : > { %v2742_v56 = vmax.f32 %v2670_v36, %v2706_v42  ;;  %v2779_v43 = vpack.c.bf16 %v2740_v32, %v2739_v1  ;;  %v2727_v12 = vmax.f32 %v2655_v51, %v2691_v40  ;;  %v2653_v33 = vmax.f32 %v2581_v35, %v2617_v46  ;;  %v7725_v62 = vld [vmem:[%s8099_s21 + $0x4] sm:$0xf]  ;;  %v7730_v31 = vld [vmem:[%s8099_s21 + $0x28] sm:$0xf0]  ;;  %v6904_v9 = vld [vmem:[%s8099_s21 + $0x24] sm:$0xf0] }
 0x235   : > { %v2726_v27 = vmax.f32 %v2654_v10, %v2690_v14  ;;  %v6895_v21 = vor.u32 %v7725_v62, %v6892_v17  ;;  %v6911_v26 = vor.u32 %v7730_v31, %v6910_v53  ;;  %v6907_v50 = vor.u32 %v7728_v60, %v6904_v9  ;;  %v6922_v59 = vld [vmem:[%s8099_s21 + $0x38] sm:$0xf]  ;;  %v7733_v58 = vld [vmem:[%s8099_s21 + $0x40] sm:$0xf0]  ;;  %v6916_v42 = vld [vmem:[%s8099_s21 + $0x3c] sm:$0xf0] }
 0x236   : > { %2909 = vmatpush.bf16.msra.mxu3 %v2775_v11  ;;  %v2780_v15 = vpack.c.bf16 %v2742_v56, %v2741_v55  ;;  %v2773_v41 = vpack.c.bf16 %v2728_v38, %v2727_v12  ;;  %v2725_v20 = vmax.f32 %v2653_v33, %v2689_v16  ;;  %v6923_v30 = vor.u32 %v7733_v58, %v6922_v59  ;;  %v6934_v7 = vld [vmem:[%s8099_s21 + $0x50] sm:$0xf]  ;;  %v7736_v25 = vld [vmem:[%s8099_s21 + $0x58] sm:$0xf0]  ;;  %v7734_v8 = vld [vmem:[%s8099_s21 + $0x4c] sm:$0xf] }
 0x237   : > { %v6935_v2 = vor.u32 %v7736_v25, %v6934_v7  ;;  %v6928_v63 = vld [vmem:[%s8099_s21 + $0x54] sm:$0xf0]  ;;  %v6946_v57 = vld [vmem:[%s8099_s21 + $0x68] sm:$0xf]  ;;  %v7739_v13 = vld [vmem:[%s8099_s21 + $0x70] sm:$0xf0] }
 0x238   : > { %2946 = vmatpush.bf16.msrb.mxu2 %v2780_v15  ;;  %v2772_v29 = vpack.c.bf16 %v2726_v27, %v2725_v20  ;;  %v6931_v4 = vor.u32 %v7734_v8, %v6928_v63  ;;  %v6947_v54 = vor.u32 %v7739_v13, %v6946_v57  ;;  %v7737_v39 = vld [vmem:[%s8099_s21 + $0x64] sm:$0xf]  ;;  %v6940_v28 = vld [vmem:[%s8099_s21 + $0x6c] sm:$0xf0]  ;;  %v2979_v52 = vld [vmem:[%s8104_s25] sm:$0xf] }
 0x239   : > { %v6943_v11 = vor.u32 %v7737_v39, %v6940_v28  ;;  %v3001_v49 = vsel %vm2999_vm6, %v2979_v52, 0  ;;  %v6981_v15 = vld [vmem:[%s9944_s3 + $0x10] sm:$0xf]  ;;  %v6987_v60 = vld [vmem:[%s9944_s3 + $0x14] sm:$0xf] }
 0x23a   : > { %2910 = vmatpush.bf16.msra.mxu3 %v2774_v48  ;;  %v3492_v19 = vsel %vm2999_vm6, %v6981_v15, 0  ;;  %v3151_v9 = vld [vmem:[%s9944_s3] sm:$0xf]  ;;  %v3571_v59 = vsel %vm2999_vm6, %v6987_v60, 0  ;;  %v3222_v15 = vld [vmem:[#allocation3 + $0x1] sm:$0xff] }
 0x23b   : > { %3501 = vmatpush.bf16.msrb.mxu1 %v3492_v19  ;;  %v3173_v58 = vsel %vm2999_vm6, %v3151_v9, 0  ;;  %3580 = vmatpush.bf16.msrb.mxu0 %v3571_v59  ;;  %v9180_v28 = vld [vmem:[%s8109_s29] ss:$0 sm:$0xff] }
 0x23c   : > { %2947 = vmatpush.bf16.msrb.mxu2 %v2779_v43 }
 0x23e   : > { %2911 = vmatpush.bf16.msra.mxu3 %v2773_v41 }
 0x23f   : > { %6948 = vmatmul.msk.bf16.vlgmr.msrb.gmra.mxu2 %vm2856_vm5, %v6899_v0 }
 0x240   : > { %3182 = vmatpush.bf16.msra.mxu2 %v3173_v58 }
 0x242   : > { %2912 = vmatpush.bf16.msra.mxu3 %v2772_v29 }
 0x246   : > { %2913 = vmatpush.bf16.msra.mxu3 %v2771_v6  ;;  %v7731_v6 = vld [vmem:[%s8099_s21 + $0x34] sm:$0xf] }
 0x247   : > { %v6919_v37 = vor.u32 %v7731_v6, %v6916_v42 }
 0x249   : > { %2914 = vmatmul.bf16.vlgmr.msra.gmra.mxu3 %v6895_v21 }
 0x24a   : > { %3010 = vmatpush.bf16.msrb.mxu3 %v3001_v49 }
 0x24d   : > { %v2881_v3 = vpop.f32.mrf.mxu2 }
 0x24f   : > { %6949 = vmatmul.msk.bf16.gmra.mxu2 %vm2856_vm5, %v6911_v26 }
 0x255   : > { %v2883_v34 = vpop.f32.mrf.mxu2 }
 0x259   : > { %2919 = vmatmul.bf16.gmra.mxu3 %v6907_v50 }
 0x25d   : > { %v2886_v36 = vpop.f32.mrf.mxu2 }
 0x25f   : > { %6950 = vmatmul.msk.bf16.gmra.mxu2 %vm2856_vm5, %v6923_v30 }
 0x265   : > { %v2888_v18 = vpop.f32.mrf.mxu2 }
 0x269   : > { %2924 = vmatmul.bf16.gmra.mxu3 %v6919_v37 }
 0x26f   : > { %6951 = vmatmul.msk.bf16.gmra.mxu2 %vm2856_vm5, %v6935_v2 }
 0x275   : > { %v2891_v55 = vpop.f32.mrf.mxu2 }
 0x279   : > { %2929 = vmatmul.bf16.gmra.mxu3 %v6931_v4 }
 0x27d   : > { %v2893_v56 = vpop.f32.mrf.mxu2 }
 0x27f   : > { %6952 = vmatmul.msk.bf16.gmra.mxu2 %vm2856_vm5, %v6947_v54 }
 0x285   : > { %v2896_v5 = vpop.f32.mrf.mxu2 }
 0x289   : > { %2934 = vmatmul.bf16.gmra.mxu3 %v6943_v11 }
 0x28d   : > { %v2898_v45 = vpop.f32.mrf.mxu2 }
 0x299   : > { %v2901_v24 = vpop.f32.mrf.mxu2 }
 0x2a1   : > { %v2903_v51 = vpop.f32.mrf.mxu2 }
 0x2c2   : > { %v2949_v35 = vpop.f32.mrf.mxu2 }
 0x2ca   : > { %v2951_v1 = vpop.f32.mrf.mxu2 }
 0x2cc   : > { %v2915_v32 = vpop.f32.mrf.mxu3 }
 0x2cd   : > { %v2916_v47 = vadd.f32 %v2915_v32, %v2881_v3 }
 0x2cf   : > { %v2950_v10 = vadd.f32 %v2949_v35, %v2916_v47  ;;  %v3141_v35 = vld [vmem:[#allocation3] sm:$0xff] }
 0x2d2   : > { %v2954_v61 = vpop.f32.mrf.mxu2 }
 0x2d4   : > { %v2917_v48 = vpop.f32.mrf.mxu3 }
 0x2d5   : > { %v2918_v38 = vadd.f32 %v2917_v48, %v2883_v34 }
 0x2d7   : > { %v2952_v23 = vadd.f32 %v2951_v1, %v2918_v38 }
 0x2d9   : > { %v9153_v22 = vpack.c.bf16 %v2952_v23, %v2950_v10  ;;  %v3070_v23 = vpop.permute.xlu2 %3069 }
 0x2da   : > { %v2956_v40 = vpop.f32.mrf.mxu2 }
 0x2db   : > { %6953 = vmatmul.msk.bf16.vlgmr.msrb.gmra.mxu3 %vm2120_vm3, %v9153_v22 }
 0x2dc   : > { %v2920_v46 = vpop.f32.mrf.mxu3 }
 0x2dd   : > { %v2921_v43 = vadd.f32 %v2920_v46, %v2886_v36 }
 0x2df   : > { %v2955_v0 = vadd.f32 %v2954_v61, %v2921_v43 }
 0x2e2   : > { %v2959_v33 = vpop.f32.mrf.mxu2 }
 0x2e4   : > { %v2922_v12 = vpop.f32.mrf.mxu3 }
 0x2e5   : > { %v2923_v14 = vadd.f32 %v2922_v12, %v2888_v18  ;;  %v6963_v18 = vld [vmem:[%s9944_s3 + $0x4] sm:$0xf] }
 0x2e6   : > { %v3255_v39 = vsel %vm2999_vm6, %v6963_v18, 0 }
 0x2e7   : > { %v2957_v41 = vadd.f32 %v2956_v40, %v2923_v14  ;;  %3264 = vmatpush.bf16.msra.mxu3 %v3255_v39 }
 0x2e9   : > { %v9157_v27 = vpack.c.bf16 %v2957_v41, %v2955_v0 }
 0x2ea   : > { %v2961_v20 = vpop.f32.mrf.mxu2 }
 0x2eb   : > { %6954 = vmatmul.msk.bf16.gmra.mxu3 %vm2120_vm3, %v9157_v27 }
 0x2ec   : > { %v2925_v16 = vpop.f32.mrf.mxu3 }
 0x2ed   : > { %v2926_v29 = vadd.f32 %v2925_v16, %v2891_v55 }
 0x2ef   : > { %v2960_v21 = vadd.f32 %v2959_v33, %v2926_v29 }
 0x2f2   : > { %v2964_v31 = vpop.f32.mrf.mxu2 }
 0x2f4   : > { %v2927_v62 = vpop.f32.mrf.mxu3 }
 0x2f5   : > { %v2928_v17 = vadd.f32 %v2927_v62, %v2893_v56 }
 0x2f7   : > { %v2962_v53 = vadd.f32 %v2961_v20, %v2928_v17 }
 0x2f9   : > { %v9161_v26 = vpack.c.bf16 %v2962_v53, %v2960_v21 }
 0x2fa   : > { %v2966_v30 = vpop.f32.mrf.mxu2 }
 0x2fb   : > { %6955 = vmatmul.msk.bf16.gmra.mxu3 %vm2120_vm3, %v9161_v26 }
 0x2fc   : > { %v2930_v50 = vpop.f32.mrf.mxu3 }
 0x2fd   : > { %v2931_v3 = vadd.f32 %v2930_v50, %v2896_v5  ;;  %v3060_v5 = vpop.permute.xlu0 %3059 }
 0x2ff   : > { %v2965_v37 = vadd.f32 %v2964_v31, %v2931_v3 }
 0x302   : > { %v2969_v34 = vpop.f32.mrf.mxu2 }
 0x304   : > { %v2932_v6 = vpop.f32.mrf.mxu3 }
 0x305   : > { %v2933_v42 = vadd.f32 %v2932_v6, %v2898_v45  ;;  %v3075_v41 = vpop.permute.xlu0 %3074 }
 0x307   : > { %v2967_v7 = vadd.f32 %v2966_v30, %v2933_v42 }
 0x309   : > { %v9169_v25 = vpack.c.bf16 %v2967_v7, %v2965_v37 }
 0x30a   : > { %v2971_v4 = vpop.f32.mrf.mxu2 }
 0x30b   : > { %6956 = vmatmul.msk.bf16.gmra.mxu3 %vm2120_vm3, %v9169_v25 }
 0x30c   : > { %v2935_v2 = vpop.f32.mrf.mxu3 }
 0x30d   : > { %v2936_v8 = vadd.f32 %v2935_v2, %v2901_v24 }
 0x30f   : > { %v2970_v57 = vadd.f32 %v2969_v34, %v2936_v8 }
 0x314   : > { %v2937_v63 = vpop.f32.mrf.mxu3 }
 0x315   : > { %v2938_v36 = vadd.f32 %v2937_v63, %v2903_v51  ;;  %v3065_v51 = vpop.permute.xlu1 %3064 }
 0x317   : > { %v2972_v13 = vadd.f32 %v2971_v4, %v2938_v36  ;;  %v3085_v36 = vpop.permute.xlu2 %3084 }
 0x319   : > { %v9173_v54 = vpack.c.bf16 %v2972_v13, %v2970_v57 }
 0x31b   : > { %6957 = vmatmul.msk.bf16.gmra.mxu3 %vm2120_vm3, %v9173_v54 }
 0x31d   : > { %v3080_v30 = vpop.permute.xlu1 %3079 }
 0x35e   : > { %v3012_v11 = vpop.f32.mrf.mxu3 }
 0x35f   : > { %v3013_v55 = vadd.f32 %v9180_v28, %v3012_v11 }
 0x361   : > { %v3037_v56 = vmax.f32 %v3013_v55, 0.0 }
 0x363   : > { %v3107_v52 = vmul.f32 %v3060_v5, %v3037_v56 }
 0x365   : > { %3130 = vst.msk [vmem:[#allocation3 + $0xb] sm:$0xff] %vm2120_vm3, %v3107_v52  ;;  %v6969_v52 = vld [vmem:[%s9944_s3 + $0x8] sm:$0xf] }
 0x366   : > { %v3014_v49 = vpop.f32.mrf.mxu3 }
 0x367   : > { %v3015_v45 = vadd.f32 %v9180_v28, %v3014_v49  ;;  %v6975_v49 = vld [vmem:[%s9944_s3 + $0xc] sm:$0xf] }
 0x369   : > { %v3038_v24 = vmax.f32 %v3015_v45, 0.0 }
 0x36b   : > { %v3108_v19 = vmul.f32 %v3065_v51, %v3038_v24  ;;  %v3334_v24 = vsel %vm2999_vm6, %v6969_v52, 0  ;;  %v3413_v51 = vsel %vm2999_vm6, %v6975_v49, 0 }
 0x36c   : > { %v3142_v1 = vld [vmem:[#allocation3 + $0x8] sm:$0xff]  ;;  %3343 = vmatpush.bf16.msrb.mxu2 %v3334_v24  ;;  %3422 = vmatpush.bf16.msrb.mxu3 %v3413_v51 }
 0x36d   : > { %v3223_v32 = vld [vmem:[#allocation3 + $0x9] sm:$0xff]  ;;  %3131 = vst.msk [vmem:[#allocation3 + $0x13] sm:$0xff] %vm2120_vm3, %v3108_v19  ;;  %v3152_v61 = vpack.c.bf16 %v3142_v1, %v3141_v35  ;;  %v3090_v19 = vpop.permute.xlu0 %3089 }
 0x36e   : > { %v3234_v47 = vpack.c.bf16 %v3223_v32, %v3222_v15  ;;  %v3017_v48 = vpop.f32.mrf.mxu3  ;;  %v3459_v46 = vld [vmem:[#allocation3 + $0xb] sm:$0xff]  ;;  %v3301_v24 = vld [vmem:[#allocation3 + $0x2] sm:$0xff] }
 0x36f   : > { %v3018_v38 = vadd.f32 %v9180_v28, %v3017_v48  ;;  %6958 = vmatmul.msk.bf16.vlgmr.msra.gmra.mxu2 %vm2120_vm3, %v3152_v61  ;;  %v3302_v51 = vld [vmem:[#allocation3 + $0xa] sm:$0xff] }
 0x370   : > { %6964 = vmatmul.msk.bf16.vlgmr.msra.gmra.mxu3 %vm2120_vm3, %v3234_v47 }
 0x371   : > { %v3039_v10 = vmax.f32 %v3018_v38, 0.0 }
 0x373   : > { %v3109_v40 = vmul.f32 %v3070_v23, %v3039_v10 }
 0x374   : > { %v3460_v43 = vld [vmem:[#allocation3 + $0x13] sm:$0xff] }
 0x375   : > { %3132 = vst.msk [vmem:[#allocation3 + $0x1b] sm:$0xff] %vm2120_vm3, %v3109_v40  ;;  %v3471_v12 = vpack.c.bf16 %v3460_v43, %v3459_v46  ;;  %v3143_v20 = vld [vmem:[#allocation3 + $0x10] sm:$0xff]  ;;  %v3095_v46 = vpop.permute.xlu1 %3094 }
 0x376   : > { %v3019_v33 = vpop.f32.mrf.mxu3  ;;  %v3224_v29 = vld [vmem:[#allocation3 + $0x11] sm:$0xff] }
 0x377   : > { %v3020_v14 = vadd.f32 %v9180_v28, %v3019_v33  ;;  %6982 = vmatmul.msk.bf16.vlgmr.msrb.gmra.mxu1 %vm2120_vm3, %v3471_v12  ;;  %v3538_v62 = vld [vmem:[#allocation3 + $0xc] sm:$0xff] }
 0x379   : > { %v3040_v0 = vmax.f32 %v3020_v14, 0.0 }
 0x37b   : > { %v3110_v16 = vmul.f32 %v3075_v41, %v3040_v0 }
 0x37c   : > { %v3144_v17 = vld [vmem:[#allocation3 + $0x18] sm:$0xff] }
 0x37d   : > { %v3225_v21 = vld [vmem:[#allocation3 + $0x19] sm:$0xff]  ;;  %3133 = vst.msk [vmem:[#allocation3 + $0x23] sm:$0xff] %vm2120_vm3, %v3110_v16  ;;  %v3153_v31 = vpack.c.bf16 %v3144_v17, %v3143_v20 }
 0x37e   : > { %v9192_v53 = vld [vmem:[#allocation3 + $0x14] sm:$0xff]  ;;  %v3235_v60 = vpack.c.bf16 %v3225_v21, %v3224_v29  ;;  %v3022_v50 = vpop.f32.mrf.mxu3 }
 0x37f   : > { %v3550_v9 = vpack.c.bf16 %v9192_v53, %v3538_v62  ;;  %v3023_v59 = vadd.f32 %v9180_v28, %v3022_v50  ;;  %6959 = vmatmul.msk.bf16.gmra.mxu2 %vm2120_vm3, %v3153_v31  ;;  %v3461_v6 = vld [vmem:[#allocation3 + $0x1b] sm:$0xff] }
 0x380   : > { %6965 = vmatmul.msk.bf16.gmra.mxu3 %vm2120_vm3, %v3235_v60  ;;  %v7005_v21 = vld [vmem:[%s9944_s3 + $0x20] sm:$0xf] }
 0x381   : > { %6988 = vmatmul.msk.bf16.vlgmr.msrb.gmra.mxu0 %vm2120_vm3, %v3550_v9  ;;  %v3041_v58 = vmax.f32 %v3023_v59, 0.0  ;;  %v3808_v60 = vsel %vm2999_vm6, %v7005_v21, 0  ;;  %v3100_v9 = vpop.permute.xlu2 %3099 }
 0x382   : > { %3817 = vmatpush.bf16.msra.mxu1 %v3808_v60 }
 0x383   : > { %v3111_v3 = vmul.f32 %v3080_v30, %v3041_v58 }
 0x384   : > { %v3462_v42 = vld [vmem:[#allocation3 + $0x23] sm:$0xff] }
 0x385   : > { %3134 = vst.msk [vmem:[#allocation3 + $0x2b] sm:$0xff] %vm2120_vm3, %v3111_v3  ;;  %v3472_v37 = vpack.c.bf16 %v3462_v42, %v3461_v6  ;;  %v9201_v7 = vld [vmem:[#allocation3 + $0x1c] sm:$0xff] }
 0x386   : > { %v3024_v34 = vpop.f32.mrf.mxu3  ;;  %v3629_v2 = vpack.c.bf16 %v9201_v7, %v9192_v53  ;;  %v3145_v57 = vld [vmem:[#allocation3 + $0x20] sm:$0xff] }
 0x387   : > { %v3025_v8 = vadd.f32 %v9180_v28, %v3024_v34  ;;  %6983 = vmatmul.msk.bf16.gmra.mxu1 %vm2120_vm3, %v3472_v37  ;;  %v3226_v13 = vld [vmem:[#allocation3 + $0x21] sm:$0xff] }
 0x389   : > { %v3042_v63 = vmax.f32 %v3025_v8, 0.0  ;;  %v3105_v8 = vpop.permute.xlu0 %3104 }
 0x38b   : > { %v3112_v4 = vmul.f32 %v3085_v36, %v3042_v63 }
 0x38c   : > { %v3146_v18 = vld [vmem:[#allocation3 + $0x28] sm:$0xff] }
 0x38d   : > { %v3227_v39 = vld [vmem:[#allocation3 + $0x29] sm:$0xff]  ;;  %3135 = vst.msk [vmem:[#allocation3 + $0x33] sm:$0xff] %vm2120_vm3, %v3112_v4  ;;  %v3154_v55 = vpack.c.bf16 %v3146_v18, %v3145_v57 }
 0x38e   : > { %v9207_v11 = vld [vmem:[#allocation3 + $0x24] sm:$0xff]  ;;  %v3236_v56 = vpack.c.bf16 %v3227_v39, %v3226_v13  ;;  %v3027_v45 = vpop.f32.mrf.mxu3 }
 0x38f   : > { %v3551_v5 = vpack.c.bf16 %v9207_v11, %v9201_v7  ;;  %v3028_v35 = vadd.f32 %v9180_v28, %v3027_v45  ;;  %6960 = vmatmul.msk.bf16.gmra.mxu2 %vm2120_vm3, %v3154_v55  ;;  %v3463_v32 = vld [vmem:[#allocation3 + $0x2b] sm:$0xff] }
 0x390   : > { %6966 = vmatmul.msk.bf16.gmra.mxu3 %vm2120_vm3, %v3236_v56 }
 0x391   : > { %6989 = vmatmul.msk.bf16.gmra.mxu0 %vm2120_vm3, %v3551_v5  ;;  %v3043_v15 = vmax.f32 %v3028_v35, 0.0  ;;  %v3381_v35 = vld [vmem:[#allocation3 + $0x12] sm:$0xff] }
 0x393   : > { %v3113_v1 = vmul.f32 %v3090_v19, %v3043_v15  ;;  %v3313_v19 = vpack.c.bf16 %v3302_v51, %v3301_v24 }
 0x394   : > { %v3464_v61 = vld [vmem:[#allocation3 + $0x33] sm:$0xff] }
 0x395   : > { %3136 = vst.msk [vmem:[#allocation3 + $0x3b] sm:$0xff] %vm2120_vm3, %v3113_v1  ;;  %v3473_v47 = vpack.c.bf16 %v3464_v61, %v3463_v32  ;;  %v9221_v48 = vld [vmem:[#allocation3 + $0x2c] sm:$0xff]  ;;  %v3392_v1 = vpack.c.bf16 %v3381_v35, %v3302_v51  ;;  %v3776_v61 = vld [vmem:[#allocation3 + $0x1e] sm:$0xff] }
 0x396   : > { %v3029_v38 = vpop.f32.mrf.mxu3  ;;  %v3630_v10 = vpack.c.bf16 %v9221_v48, %v9207_v11  ;;  %v3147_v12 = vld [vmem:[#allocation3 + $0x30] sm:$0xff] }
 0x397   : > { %v3030_v23 = vadd.f32 %v9180_v28, %v3029_v38  ;;  %6984 = vmatmul.msk.bf16.gmra.mxu1 %vm2120_vm3, %v3473_v47  ;;  %v3228_v33 = vld [vmem:[#allocation3 + $0x31] sm:$0xff] }
 0x398   : > { %v3775_v47 = vld [vmem:[#allocation3 + $0x16] sm:$0xff] }
 0x399   : > { %v3044_v40 = vmax.f32 %v3030_v23, 0.0  ;;  %v3787_v38 = vpack.c.bf16 %v3776_v61, %v3775_v47  ;;  %v3304_v23 = vld [vmem:[#allocation3 + $0x1a] sm:$0xff] }
 0x39b   : > { %v3114_v43 = vmul.f32 %v3095_v46, %v3044_v40  ;;  %v3383_v40 = vld [vmem:[#allocation3 + $0x22] sm:$0xff]  ;;  %v3314_v46 = vpack.c.bf16 %v3304_v23, %v3381_v35 }
 0x39c   : > { %v3148_v14 = vld [vmem:[#allocation3 + $0x38] sm:$0xff] }
 0x39d   : > { %v3229_v0 = vld [vmem:[#allocation3 + $0x39] sm:$0xff]  ;;  %3137 = vst.msk [vmem:[#allocation3 + $0x43] sm:$0xff] %vm2120_vm3, %v3114_v43  ;;  %v3155_v16 = vpack.c.bf16 %v3148_v14, %v3147_v12  ;;  %v3393_v43 = vpack.c.bf16 %v3383_v40, %v3304_v23  ;;  %v3778_v12 = vld [vmem:[#allocation3 + $0x2e] sm:$0xff] }
 0x39e   : > { %v9227_v41 = vld [vmem:[#allocation3 + $0x34] sm:$0xff]  ;;  %v3237_v20 = vpack.c.bf16 %v3229_v0, %v3228_v33  ;;  %v3032_v62 = vpop.f32.mrf.mxu3  ;;  %v3777_v33 = vld [vmem:[#allocation3 + $0x26] sm:$0xff] }
 0x39f   : > { %v3552_v29 = vpack.c.bf16 %v9227_v41, %v9221_v48  ;;  %v3033_v17 = vadd.f32 %v9180_v28, %v3032_v62  ;;  %6961 = vmatmul.msk.bf16.gmra.mxu2 %vm2120_vm3, %v3155_v16  ;;  %v3465_v59 = vld [vmem:[#allocation3 + $0x3b] sm:$0xff]  ;;  %v3788_v14 = vpack.c.bf16 %v3778_v12, %v3777_v33  ;;  %v3306_v0 = vld [vmem:[#allocation3 + $0x2a] sm:$0xff]  ;;  %v3385_v16 = vld [vmem:[#allocation3 + $0x32] sm:$0xff] }
 0x3a0   : > { %6967 = vmatmul.msk.bf16.gmra.mxu3 %vm2120_vm3, %v3237_v20  ;;  %v3315_v20 = vpack.c.bf16 %v3306_v0, %v3383_v40  ;;  %v6993_v62 = vld [vmem:[%s9944_s3 + $0x18] sm:$0xf]  ;;  %v3696_v12 = vld [vmem:[#allocation3 + $0x15] sm:$0xff] }
 0x3a1   : > { %6990 = vmatmul.msk.bf16.gmra.mxu0 %vm2120_vm3, %v3552_v29  ;;  %v3045_v31 = vmax.f32 %v3033_v17, 0.0  ;;  %v3394_v29 = vpack.c.bf16 %v3385_v16, %v3306_v0  ;;  %v6999_v17 = vld [vmem:[%s9944_s3 + $0x1c] sm:$0xf]  ;;  %v3650_v21 = vsel %vm2999_vm6, %v6993_v62, 0  ;;  %s9980_s3 = sld [smem:[#allocation28_spill]] }
 0x3a2   : > { %3659 = vmatpush.bf16.msra.mxu2 %v3650_v21  ;;  %v3699_v21 = vld [vmem:[#allocation3 + $0x2d] sm:$0xff] }
 0x3a3   : > { %v3115_v50 = vmul.f32 %v3100_v9, %v3045_v31  ;;  %v3729_v31 = vsel %vm2999_vm6, %v6999_v17, 0  ;;  %v3779_v9 = vld [vmem:[#allocation3 + $0x36] sm:$0xff] }
 0x3a4   : > { %v3466_v58 = vld [vmem:[#allocation3 + $0x43] sm:$0xff]  ;;  %3738 = vmatpush.bf16.msra.mxu3 %v3729_v31 }
 0x3a5   : > { %3138 = vst.msk [vmem:[#allocation3 + $0x4b] sm:$0xff] %vm2120_vm3, %v3115_v50  ;;  %v3474_v30 = vpack.c.bf16 %v3466_v58, %v3465_v59  ;;  %v9239_v3 = vld [vmem:[#allocation3 + $0x3c] sm:$0xff] }
 0x3a6   : > { %v3034_v6 = vpop.f32.mrf.mxu3  ;;  %v3631_v42 = vpack.c.bf16 %v9239_v3, %v9227_v41  ;;  %v3149_v36 = vld [vmem:[#allocation3 + $0x40] sm:$0xff] }
 0x3a7   : > { %v3035_v37 = vadd.f32 %v9180_v28, %v3034_v6  ;;  %6985 = vmatmul.msk.bf16.gmra.mxu1 %vm2120_vm3, %v3474_v30  ;;  %v3230_v4 = vld [vmem:[#allocation3 + $0x41] sm:$0xff] }
 0x3a8   : > { %v3780_v60 = vld [vmem:[#allocation3 + $0x3e] sm:$0xff] }
 0x3a9   : > { %v3046_v34 = vmax.f32 %v3035_v37, 0.0  ;;  %v3789_v50 = vpack.c.bf16 %v3780_v60, %v3779_v9  ;;  %v3308_v59 = vld [vmem:[#allocation3 + $0x3a] sm:$0xff]  ;;  %v3387_v58 = vld [vmem:[#allocation3 + $0x42] sm:$0xff]  ;;  %v9279_v37 = vld [vmem:[%s9965_s8] ss:$0 sm:$0xff] }
 0x3aa   : > { %v3316_v30 = vpack.c.bf16 %v3308_v59, %v3385_v16  ;;  %v3395_v6 = vpack.c.bf16 %v3387_v58, %v3308_v59  ;;  %v3698_v60 = vld [vmem:[#allocation3 + $0x25] sm:$0xff] }
 0x3ab   : > { %v3116_v63 = vmul.f32 %v3105_v8, %v3046_v34 }
 0x3ac   : > { %v3150_v57 = vld [vmem:[#allocation3 + $0x48] sm:$0xff] }
 0x3ad   : > { %v3231_v13 = vld [vmem:[#allocation3 + $0x49] sm:$0xff]  ;;  %3139 = vst.msk [vmem:[#allocation3 + $0x53] sm:$0xff] %vm2120_vm3, %v3116_v63  ;;  %v3156_v39 = vpack.c.bf16 %v3150_v57, %v3149_v36 }
 0x3ae   : > { %v9245_v18 = vld [vmem:[#allocation3 + $0x44] sm:$0xff]  ;;  %v3238_v55 = vpack.c.bf16 %v3231_v13, %v3230_v4 }
 0x3af   : > { %v3553_v56 = vpack.c.bf16 %v9245_v18, %v9239_v3  ;;  %6962 = vmatmul.msk.bf16.gmra.mxu2 %vm2120_vm3, %v3156_v39  ;;  %v3467_v28 = vld [vmem:[#allocation3 + $0x4b] sm:$0xff] }
 0x3b0   : > { %6968 = vmatmul.msk.bf16.gmra.mxu3 %vm2120_vm3, %v3238_v55  ;;  %v3781_v4 = vld [vmem:[#allocation3 + $0x46] sm:$0xff] }
 0x3b1   : > { %6991 = vmatmul.msk.bf16.gmra.mxu0 %vm2120_vm3, %v3553_v56  ;;  %v3310_v56 = vld [vmem:[#allocation3 + $0x4a] sm:$0xff] }
 0x3b2   : > { %v3317_v24 = vpack.c.bf16 %v3310_v56, %v3387_v58  ;;  %v3702_v41 = vld [vmem:[#allocation3 + $0x45] sm:$0xff] }
 0x3b4   : > { %v3468_v5 = vld [vmem:[#allocation3 + $0x53] sm:$0xff] }
 0x3b5   : > { %v9253_v52 = vld [vmem:[#allocation3 + $0x4c] sm:$0xff]  ;;  %v3475_v49 = vpack.c.bf16 %v3468_v5, %v3467_v28  ;;  %v9258_v15 = vld [vmem:[#allocation3 + $0x54] sm:$0xff] }
 0x3b6   : > { %v3632_v45 = vpack.c.bf16 %v9253_v52, %v9245_v18  ;;  %v3554_v32 = vpack.c.bf16 %v9258_v15, %v9253_v52  ;;  %v3782_v63 = vld [vmem:[#allocation3 + $0x4e] sm:$0xff]  ;;  %v3705_v18 = vld [vmem:[#allocation3 + $0x5d] sm:$0xff] }
 0x3b7   : > { %6986 = vmatmul.msk.bf16.gmra.mxu1 %vm2120_vm3, %v3475_v49  ;;  %v3790_v13 = vpack.c.bf16 %v3782_v63, %v3781_v4  ;;  %v3389_v28 = vld [vmem:[#allocation3 + $0x52] sm:$0xff] }
 0x3b8   : > { %v3396_v51 = vpack.c.bf16 %v3389_v28, %v3310_v56  ;;  %v3700_v63 = vld [vmem:[#allocation3 + $0x35] sm:$0xff]  ;;  %v3703_v56 = vld [vmem:[#allocation3 + $0x4d] sm:$0xff] }
 0x3bf   : > { %6970 = vmatmul.msk.bf16.vlgmr.msrb.gmra.mxu2 %vm2120_vm3, %v3313_v19 }
 0x3c0   : > { %6976 = vmatmul.msk.bf16.vlgmr.msrb.gmra.mxu3 %vm2120_vm3, %v3392_v1  ;;  %v3783_v1 = vld [vmem:[#allocation3 + $0x56] sm:$0xff] }
 0x3c1   : > { %6992 = vmatmul.msk.bf16.gmra.mxu0 %vm2120_vm3, %v3554_v32  ;;  %v3784_v32 = vld [vmem:[#allocation3 + $0x5e] sm:$0xff] }
 0x3c7   : > { %7006 = vmatmul.msk.bf16.vlgmr.msra.gmra.mxu1 %vm2120_vm3, %v3787_v38  ;;  %v3791_v38 = vpack.c.bf16 %v3784_v32, %v3783_v1 }
 0x3cf   : > { %6971 = vmatmul.msk.bf16.gmra.mxu2 %vm2120_vm3, %v3314_v46  ;;  %v3697_v46 = vld [vmem:[#allocation3 + $0x1d] sm:$0xff] }
 0x3d0   : > { %6977 = vmatmul.msk.bf16.gmra.mxu3 %vm2120_vm3, %v3393_v43 }
 0x3d7   : > { %7007 = vmatmul.msk.bf16.gmra.mxu1 %vm2120_vm3, %v3788_v14  ;;  %v3708_v14 = vpack.c.bf16 %v3697_v46, %v3696_v12 }
 0x3df   : > { %6972 = vmatmul.msk.bf16.gmra.mxu2 %vm2120_vm3, %v3315_v20 }
 0x3e0   : > { %6978 = vmatmul.msk.bf16.gmra.mxu3 %vm2120_vm3, %v3394_v29 }
 0x3e7   : > { %7008 = vmatmul.msk.bf16.gmra.mxu1 %vm2120_vm3, %v3789_v50  ;;  %v3709_v50 = vpack.c.bf16 %v3699_v21, %v3698_v60 }
 0x3ef   : > { %6973 = vmatmul.msk.bf16.gmra.mxu2 %vm2120_vm3, %v3316_v30 }
 0x3f0   : > { %6979 = vmatmul.msk.bf16.gmra.mxu3 %vm2120_vm3, %v3395_v6 }
 0x3f2   : > { %v3184_v34 = vpop.f32.mrf.mxu2 }
 0x3f3   : > { %v3266_v8 = vpop.f32.mrf.mxu3  ;;  %v3212_v36 = vadd.f32 %v9279_v37, %v3184_v34 }
 0x3f4   : > { %v9308_v53 = vpop.f32.mrf.mxu1 }
 0x3f5   : > { %v9282_v57 = vadd.f32 %v3266_v8, %v3212_v36  ;;  %v3701_v8 = vld [vmem:[#allocation3 + $0x3d] sm:$0xff] }
 0x3f6   : > { %v3710_v36 = vpack.c.bf16 %v3701_v8, %v3700_v63  ;;  %v3864_v63 = vld [vmem:[%s8124_s14] sm:$0xf] }
 0x3f7   : > { %7009 = vmatmul.msk.bf16.gmra.mxu1 %vm2120_vm3, %v3790_v13 }
 0x3fa   : > { %v3186_v39 = vpop.f32.mrf.mxu2 }
 0x3fb   : > { %v3268_v55 = vpop.f32.mrf.mxu3  ;;  %v3213_v5 = vadd.f32 %v9279_v37, %v3186_v39 }
 0x3fc   : > { %v9318_v30 = vpop.f32.mrf.mxu1 }
 0x3fd   : > { %v9286_v49 = vadd.f32 %v3268_v55, %v3213_v5  ;;  %v3926_v5 = vld [vmem:[%s8134_s24] sm:$0xf] }
 0x3ff   : > { %6974 = vmatmul.msk.bf16.gmra.mxu2 %vm2120_vm3, %v3317_v24  ;;  %v3932_v24 = vsel %vm2999_vm6, %v3926_v5, 0 }
 0x400   : > { %6980 = vmatmul.msk.bf16.gmra.mxu3 %vm2120_vm3, %v3396_v51  ;;  %3941 = vmatpush.bf16.msrb.mxu2 %v3932_v24 }
 0x402   : > { %v3189_v35 = vpop.f32.mrf.mxu2 }
 0x403   : > { %v3271_v19 = vpop.f32.mrf.mxu3  ;;  %v3214_v61 = vadd.f32 %v9279_v37, %v3189_v35 }
 0x405   : > { %v9291_v47 = vadd.f32 %v3271_v19, %v3214_v61 }
 0x407   : > { %7010 = vmatmul.msk.bf16.gmra.mxu1 %vm2120_vm3, %v3791_v38 }
 0x40a   : > { %v3191_v23 = vpop.f32.mrf.mxu2 }
 0x40b   : > { %v3273_v40 = vpop.f32.mrf.mxu3  ;;  %v3215_v43 = vadd.f32 %v9279_v37, %v3191_v23  ;;  %v3626_v23 = vld [vmem:[#allocation3 + $0x5c] sm:$0xff] }
 0x40d   : > { %v9295_v33 = vadd.f32 %v3273_v40, %v3215_v43  ;;  %v3704_v40 = vld [vmem:[#allocation3 + $0x55] sm:$0xff] }
 0x40e   : > { %v3712_v46 = vpack.c.bf16 %v3705_v18, %v3704_v40 }
 0x40f   : > { %6994 = vmatmul.msk.bf16.vlgmr.msra.gmra.mxu2 %vm2120_vm3, %v3629_v2 }
 0x410   : > { %7000 = vmatmul.msk.bf16.vlgmr.msra.gmra.mxu3 %vm2120_vm3, %v3708_v14 }
 0x412   : > { %v3194_v0 = vpop.f32.mrf.mxu2 }
 0x413   : > { %v3276_v16 = vpop.f32.mrf.mxu3  ;;  %v3216_v20 = vadd.f32 %v9279_v37, %v3194_v0 }
 0x415   : > { %v9303_v29 = vadd.f32 %v3276_v16, %v3216_v20 }
 0x41a   : > { %v3196_v62 = vpop.f32.mrf.mxu2 }
 0x41b   : > { %v3278_v17 = vpop.f32.mrf.mxu3  ;;  %v3217_v31 = vadd.f32 %v9279_v37, %v3196_v62 }
 0x41d   : > { %v9306_v9 = vadd.f32 %v3278_v17, %v3217_v31 }
 0x41f   : > { %6995 = vmatmul.msk.bf16.gmra.mxu2 %vm2120_vm3, %v3630_v10  ;;  %v9329_v10 = vpop.f32.mrf.mxu1 }
 0x420   : > { %7001 = vmatmul.msk.bf16.gmra.mxu3 %vm2120_vm3, %v3709_v50 }
 0x422   : > { %v3199_v7 = vpop.f32.mrf.mxu2 }
 0x423   : > { %v3281_v2 = vpop.f32.mrf.mxu3  ;;  %v3218_v59 = vadd.f32 %v9279_v37, %v3199_v7 }
 0x425   : > { %v9316_v58 = vadd.f32 %v3281_v2, %v3218_v59 }
 0x427   : > { %v9339_v3 = vpop.f32.mrf.mxu1 }
 0x42a   : > { %v9320_v6 = vpop.f32.mrf.mxu2 }
 0x42b   : > { %v9322_v34 = vpop.f32.mrf.mxu3 }
 0x42f   : > { %6996 = vmatmul.msk.bf16.gmra.mxu2 %vm2120_vm3, %v3631_v42  ;;  %v3711_v42 = vpack.c.bf16 %v3703_v56, %v3702_v41  ;;  %v9349_v32 = vpop.f32.mrf.mxu1 }
 0x430   : > { %7002 = vmatmul.msk.bf16.gmra.mxu3 %vm2120_vm3, %v3710_v36 }
 0x432   : > { %v3204_v11 = vpop.f32.mrf.mxu2 }
 0x433   : > { %v3286_v48 = vpop.f32.mrf.mxu3  ;;  %v3220_v4 = vadd.f32 %v9279_v37, %v3204_v11 }
 0x435   : > { %v9332_v13 = vadd.f32 %v3286_v48, %v3220_v4  ;;  %v3582_v48 = vpop.f32.mrf.mxu0 }
 0x437   : > { %v9355_v43 = vpop.f32.mrf.mxu1 }
 0x43a   : > { %v3206_v39 = vpop.f32.mrf.mxu2 }
 0x43b   : > { %v9334_v55 = vpop.f32.mrf.mxu3  ;;  %v9337_v28 = vadd.f32 %v9279_v37, %v3206_v39 }
 0x43d   : > { %v3584_v41 = vpop.f32.mrf.mxu0 }
 0x43f   : > { %6997 = vmatmul.msk.bf16.gmra.mxu2 %vm2120_vm3, %v3632_v45  ;;  %v3633_v45 = vpack.c.bf16 %v3626_v23, %v9258_v15  ;;  %v9358_v62 = vpop.f32.mrf.mxu1 }
 0x440   : > { %7003 = vmatmul.msk.bf16.gmra.mxu3 %vm2120_vm3, %v3711_v42 }
 0x442   : > { %v3345_v51 = vpop.f32.mrf.mxu2 }
 0x443   : > { %v3424_v35 = vpop.f32.mrf.mxu3  ;;  %v3370_v19 = vadd.f32 %v3345_v51, %v9282_v57 }
 0x445   : > { %v3449_v1 = vadd.f32 %v3424_v35, %v3370_v19  ;;  %v3587_v35 = vpop.f32.mrf.mxu0 }
 0x447   : > { %v9364_v31 = vpop.f32.mrf.mxu1  ;;  %v3528_v51 = vadd.f32 %v9308_v53, %v3449_v1 }
 0x449   : > { %v3607_v23 = vadd.f32 %v3582_v48, %v3528_v51 }
 0x44a   : > { %v3347_v61 = vpop.f32.mrf.mxu2 }
 0x44b   : > { %v3426_v38 = vpop.f32.mrf.mxu3  ;;  %v3371_v52 = vadd.f32 %v3347_v61, %v9286_v49 }
 0x44f   : > { %6998 = vmatmul.msk.bf16.gmra.mxu2 %vm2120_vm3, %v3633_v45  ;;  %v9373_v2 = vpop.f32.mrf.mxu1 }
 0x450   : > { %7004 = vmatmul.msk.bf16.gmra.mxu3 %vm2120_vm3, %v3712_v46 }
 0x452   : > { %v3350_v57 = vpop.f32.mrf.mxu2 }
 0x453   : > { %v3429_v12 = vpop.f32.mrf.mxu3  ;;  %v3372_v14 = vadd.f32 %v3350_v57, %v9291_v47 }
 0x455   : > { %v3451_v0 = vadd.f32 %v3429_v12, %v3372_v14  ;;  %v3589_v14 = vpop.f32.mrf.mxu0 }
 0x457   : > { %v9380_v8 = vpop.f32.mrf.mxu1  ;;  %v3530_v1 = vadd.f32 %v9329_v10, %v3451_v0 }
 0x45a   : > { %v3352_v16 = vpop.f32.mrf.mxu2 }
 0x45b   : > { %v3431_v20 = vpop.f32.mrf.mxu3  ;;  %v3373_v49 = vadd.f32 %v3352_v16, %v9295_v33 }
 0x45f   : > { %7016 = vmatmul.msk.bf16.vlgmr.msrb.gmra.mxu2 %vm2120_vm3, %v9153_v22  ;;  %v3819_v39 = vpop.f32.mrf.mxu1 }
 0x462   : > { %v3355_v15 = vpop.f32.mrf.mxu2 }
 0x463   : > { %v3434_v17 = vpop.f32.mrf.mxu3  ;;  %v3374_v21 = vadd.f32 %v3355_v15, %v9303_v29 }
 0x465   : > { %v9366_v60 = vadd.f32 %v3434_v17, %v3374_v21 }
 0x467   : > { %v3821_v24 = vpop.f32.mrf.mxu1 }
 0x46a   : > { %v3357_v47 = vpop.f32.mrf.mxu2 }
 0x46b   : > { %v9368_v50 = vpop.f32.mrf.mxu3  ;;  %v9371_v7 = vadd.f32 %v3357_v47, %v9306_v9  ;;  %v3890_v9 = vsel %vm2999_vm6, %v3864_v63, 0 }
 0x46c   : > { %3899 = vmatpush.bf16.msra.mxu0 %v3890_v9 }
 0x46f   : > { %7017 = vmatmul.msk.bf16.gmra.mxu2 %vm2120_vm3, %v9157_v27  ;;  %v3824_v18 = vpop.f32.mrf.mxu1 }
 0x472   : > { %v3360_v22 = vpop.f32.mrf.mxu2 }
 0x473   : > { %v3439_v33 = vpop.f32.mrf.mxu3  ;;  %v3376_v59 = vadd.f32 %v3360_v22, %v9316_v58 }
 0x475   : > { %v9378_v29 = vadd.f32 %v3439_v33, %v3376_v59  ;;  %v3609_v33 = vadd.f32 %v3587_v35, %v3530_v1  ;;  %v3592_v59 = vpop.f32.mrf.mxu0 }
 0x47a   : > { %v9383_v36 = vpop.f32.mrf.mxu2 }
 0x47b   : > { %v9385_v11 = vpop.f32.mrf.mxu3 }
 0x47f   : > { %7018 = vmatmul.msk.bf16.gmra.mxu2 %vm2120_vm3, %v9161_v26  ;;  %v3450_v26 = vadd.f32 %v3426_v38, %v3371_v52  ;;  %v3452_v38 = vadd.f32 %v3431_v20, %v3373_v49  ;;  %v3826_v52 = vpop.f32.mrf.mxu1 }
 0x481   : > { %v3531_v63 = vadd.f32 %v9339_v3, %v3452_v38 }
 0x482   : > { %v3365_v27 = vpop.f32.mrf.mxu2 }
 0x483   : > { %v3444_v4 = vpop.f32.mrf.mxu3  ;;  %v3378_v58 = vadd.f32 %v3365_v27, %v9332_v13  ;;  %v3529_v13 = vadd.f32 %v9318_v30, %v3450_v26  ;;  %v3610_v10 = vadd.f32 %v3589_v14, %v3531_v63 }
 0x485   : > { %v9391_v56 = vadd.f32 %v3444_v4, %v3378_v58  ;;  %v3608_v46 = vadd.f32 %v3584_v41, %v3529_v13  ;;  %v3532_v58 = vadd.f32 %v9349_v32, %v9366_v60 }
 0x487   : > { %v3829_v4 = vpop.f32.mrf.mxu1 }
 0x48a   : > { %v9393_v42 = vpop.f32.mrf.mxu2 }
 0x48b   : > { %v9395_v5 = vpop.f32.mrf.mxu3 }
 0x48f   : > { %7019 = vmatmul.msk.bf16.gmra.mxu2 %vm2120_vm3, %v9169_v25  ;;  %v3831_v13 = vpop.f32.mrf.mxu1 }
 0x492   : > { %v3661_v19 = vpop.f32.mrf.mxu2 }
 0x493   : > { %v3740_v61 = vpop.f32.mrf.mxu3  ;;  %v3686_v40 = vadd.f32 %v3661_v19, %v3607_v23 }
 0x495   : > { %v3765_v45 = vadd.f32 %v3740_v61, %v3686_v40  ;;  %v3611_v61 = vadd.f32 %v3592_v59, %v3532_v58 }
 0x497   : > { %v3844_v15 = vadd.f32 %v3819_v39, %v3765_v45  ;;  %v3594_v39 = vpop.f32.mrf.mxu0 }
 0x499   : > { %v3854_v17 = vmax.f32 %v3844_v15, 0.0  ;;  %v3834_v15 = vpop.f32.mrf.mxu1 }
 0x49a   : > { %v3663_v57 = vpop.f32.mrf.mxu2 }
 0x49b   : > { %v3742_v12 = vpop.f32.mrf.mxu3  ;;  %v3687_v16 = vadd.f32 %v3663_v57, %v3608_v46 }
 0x49d   : > { %v3766_v53 = vadd.f32 %v3742_v12, %v3687_v16 }
 0x49f   : > { %v3845_v25 = vadd.f32 %v3821_v24, %v3766_v53  ;;  %7020 = vmatmul.msk.bf16.gmra.mxu2 %vm2120_vm3, %v9173_v54  ;;  %v3454_v24 = vadd.f32 %v9368_v50, %v9371_v7  ;;  %v3597_v32 = vpop.f32.mrf.mxu0 }
 0x4a1   : > { %v3855_v30 = vmax.f32 %v3845_v25, 0.0  ;;  %v3533_v23 = vadd.f32 %v9355_v43, %v3454_v24  ;;  %v3534_v43 = vadd.f32 %v9358_v62, %v9378_v29 }
 0x4a2   : > { %v3666_v21 = vpop.f32.mrf.mxu2 }
 0x4a3   : > { %v3745_v47 = vpop.f32.mrf.mxu3  ;;  %v3865_v22 = vpack.c.bf16 %v3855_v30, %v3854_v17  ;;  %v3688_v9 = vadd.f32 %v3666_v21, %v3609_v33  ;;  %v3612_v45 = vadd.f32 %v3594_v39, %v3533_v23  ;;  %v3613_v17 = vadd.f32 %v3597_v32, %v3534_v43  ;;  %v7741_v23 = vld [vmem:[%s9966_s10 + $0x8] sm:$0xff] }
 0x4a4   : > { %4034 = vmatpush.bf16.msrb.mxu3 %v7741_v23 }
 0x4a5   : > { %7011 = vmatmul.msk.bf16.vlgmr.msra.gmra.mxu0 %vm2120_vm3, %v3865_v22  ;;  %v3767_v48 = vadd.f32 %v3745_v47, %v3688_v9 }
 0x4a7   : > { %v3846_v20 = vadd.f32 %v3824_v18, %v3767_v48  ;;  %v3219_v18 = vadd.f32 %v9279_v37, %v9320_v6  ;;  %v3599_v30 = vpop.f32.mrf.mxu0 }
 0x4a9   : > { %v3856_v3 = vmax.f32 %v3846_v20, 0.0  ;;  %v3298_v7 = vadd.f32 %v9322_v34, %v3219_v18 }
 0x4aa   : > { %v3668_v0 = vpop.f32.mrf.mxu2 }
 0x4ab   : > { %v3747_v27 = vpop.f32.mrf.mxu3  ;;  %v3689_v54 = vadd.f32 %v3668_v0, %v3610_v10  ;;  %v3377_v12 = vadd.f32 %v9383_v36, %v3298_v7  ;;  %v3836_v36 = vpop.f32.mrf.mxu1 }
 0x4ad   : > { %v3768_v49 = vadd.f32 %v3747_v27, %v3689_v54  ;;  %v3456_v1 = vadd.f32 %v9385_v11, %v3377_v12  ;;  %v3300_v11 = vadd.f32 %v9334_v55, %v9337_v28 }
 0x4af   : > { %v3847_v41 = vadd.f32 %v3826_v52, %v3768_v49  ;;  %v3535_v34 = vadd.f32 %v9364_v31, %v3456_v1  ;;  %v3379_v59 = vadd.f32 %v9393_v42, %v3300_v11  ;;  %v3602_v48 = vpop.f32.mrf.mxu0  ;;  %v3536_v31 = vadd.f32 %v9373_v2, %v9391_v56 }
 0x4b1   : > { %v3857_v51 = vmax.f32 %v3847_v41, 0.0  ;;  %v3614_v22 = vadd.f32 %v3599_v30, %v3535_v34  ;;  %v3458_v0 = vadd.f32 %v9395_v5, %v3379_v59  ;;  %v3615_v39 = vadd.f32 %v3602_v48, %v3536_v31 }
 0x4b2   : > { %v3671_v35 = vpop.f32.mrf.mxu2 }
 0x4b3   : > { %v3750_v26 = vpop.f32.mrf.mxu3  ;;  %v3866_v19 = vpack.c.bf16 %v3857_v51, %v3856_v3  ;;  %v3690_v40 = vadd.f32 %v3671_v35, %v3611_v61  ;;  %v3839_v58 = vpop.f32.mrf.mxu1  ;;  %v3537_v55 = vadd.f32 %v9380_v8, %v3458_v0 }
 0x4b5   : > { %7012 = vmatmul.msk.bf16.gmra.mxu0 %vm2120_vm3, %v3866_v19  ;;  %v3769_v60 = vadd.f32 %v3750_v26, %v3690_v40  ;;  %v7740_v40 = vld [vmem:[%s9966_s10] sm:$0xff] }
 0x4b6   : > { %4035 = vmatpush.bf16.msrb.mxu3 %v7740_v40 }
 0x4b7   : > { %v3848_v14 = vadd.f32 %v3829_v4, %v3769_v60  ;;  %v3604_v42 = vpop.f32.mrf.mxu0 }
 0x4b8   : > { %v3616_v2 = vadd.f32 %v3604_v42, %v3537_v55 }
 0x4b9   : > { %v3858_v37 = vmax.f32 %v3848_v14, 0.0 }
 0x4ba   : > { %v3673_v46 = vpop.f32.mrf.mxu2 }
 0x4bb   : > { %v3752_v50 = vpop.f32.mrf.mxu3  ;;  %v3691_v57 = vadd.f32 %v3673_v46, %v3612_v45  ;;  %v3841_v35 = vpop.f32.mrf.mxu1  ;;  %v9433_v45 = vld [vmem:[%s9967_s18] ss:$0 sm:$0xff]  ;;  %s9970_s18 = sld [smem:[#allocation18_spill]] }
 0x4bc   : > { %v7948_v46 = vld [vmem:[%s9968_s1] ss:$0 sm:$0xff]  ;;  %s9971_s1 = sld [smem:[#allocation23_spill]] }
 0x4bd   : > { %v3770_v16 = vadd.f32 %v3752_v50, %v3691_v57 }
 0x4bf   : > { %v3849_v53 = vadd.f32 %v3831_v13, %v3770_v16 }
 0x4c1   : > { %v3859_v6 = vmax.f32 %v3849_v53, 0.0 }
 0x4c2   : > { %v3676_v25 = vpop.f32.mrf.mxu2 }
 0x4c3   : > { %v3755_v38 = vpop.f32.mrf.mxu3  ;;  %v3867_v52 = vpack.c.bf16 %v3859_v6, %v3858_v37  ;;  %v3692_v21 = vadd.f32 %v3676_v25, %v3613_v17 }
 0x4c5   : > { %7013 = vmatmul.msk.bf16.gmra.mxu0 %vm2120_vm3, %v3867_v52  ;;  %v3771_v47 = vadd.f32 %v3755_v38, %v3692_v21 }
 0x4c7   : > { %v3850_v63 = vadd.f32 %v3834_v15, %v3771_v47 }
 0x4c9   : > { %v3860_v27 = vmax.f32 %v3850_v63, 0.0 }
 0x4ca   : > { %v3678_v62 = vpop.f32.mrf.mxu2 }
 0x4cb   : > { %v3757_v29 = vpop.f32.mrf.mxu3  ;;  %v3693_v33 = vadd.f32 %v3678_v62, %v3614_v22 }
 0x4cd   : > { %v3772_v9 = vadd.f32 %v3757_v29, %v3693_v33 }
 0x4cf   : > { %v3851_v10 = vadd.f32 %v3836_v36, %v3772_v9 }
 0x4d1   : > { %v3861_v4 = vmax.f32 %v3851_v10, 0.0 }
 0x4d2   : > { %v3681_v54 = vpop.f32.mrf.mxu2 }
 0x4d3   : > { %v3760_v20 = vpop.f32.mrf.mxu3  ;;  %v3868_v49 = vpack.c.bf16 %v3861_v4, %v3860_v27  ;;  %v3694_v28 = vadd.f32 %v3681_v54, %v3615_v39 }
 0x4d5   : > { %7014 = vmatmul.msk.bf16.gmra.mxu0 %vm2120_vm3, %v3868_v49  ;;  %v3773_v41 = vadd.f32 %v3760_v20, %v3694_v28  ;;  %v7742_v49 = vld [vmem:[%s9969_s7] sm:$0xff] }
 0x4d6   : > { %4213 = vmatpush.bf16.msrb.mxu1 %v7742_v49 }
 0x4d7   : > { %v3852_v3 = vadd.f32 %v3839_v58, %v3773_v41 }
 0x4d9   : > { %v3862_v19 = vmax.f32 %v3852_v3, 0.0 }
 0x4da   : > { %v3683_v56 = vpop.f32.mrf.mxu2 }
 0x4db   : > { %v3695_v24 = vadd.f32 %v3683_v56, %v3616_v2  ;;  %v3762_v5 = vpop.f32.mrf.mxu3 }
 0x4dd   : > { %v3774_v51 = vadd.f32 %v3762_v5, %v3695_v24 }
 0x4df   : > { %v3853_v26 = vadd.f32 %v3841_v35, %v3774_v51 }
 0x4e1   : > { %v3863_v61 = vmax.f32 %v3853_v26, 0.0 }
 0x4e2   : > { %v3943_v13 = vpop.f32.mrf.mxu2 }
 0x4e3   : > { %v3869_v8 = vpack.c.bf16 %v3863_v61, %v3862_v19  ;;  %v3944_v7 = vadd.f32 %v7948_v46, %v3943_v13 }
 0x4e5   : > { %7015 = vmatmul.msk.bf16.gmra.mxu0 %vm2120_vm3, %v3869_v8 }
 0x4ea   : > { %v3945_v18 = vpop.f32.mrf.mxu2 }
 0x4eb   : > { %v3946_v12 = vadd.f32 %v7948_v46, %v3945_v18 }
 0x4f2   : > { %v3948_v32 = vpop.f32.mrf.mxu2 }
 0x4f3   : > { %v3949_v52 = vadd.f32 %v7948_v46, %v3948_v32 }
 0x4fa   : > { %v3950_v43 = vpop.f32.mrf.mxu2 }
 0x4fb   : > { %v3951_v30 = vadd.f32 %v7948_v46, %v3950_v43  ;;  %v4085_v43 = vpop.permute.xlu1 %4084 }
 0x502   : > { %v3953_v25 = vpop.f32.mrf.mxu2 }
 0x503   : > { %v3954_v59 = vadd.f32 %v7948_v46, %v3953_v25  ;;  %v4090_v25 = vpop.permute.xlu2 %4089 }
 0x50a   : > { %v3955_v62 = vpop.f32.mrf.mxu2 }
 0x50b   : > { %v3956_v48 = vadd.f32 %v7948_v46, %v3955_v62 }
 0x512   : > { %v3958_v63 = vpop.f32.mrf.mxu2 }
 0x513   : > { %v3959_v55 = vadd.f32 %v7948_v46, %v3958_v63  ;;  %v4095_v63 = vpop.permute.xlu0 %4094 }
 0x51a   : > { %v3960_v39 = vpop.f32.mrf.mxu2 }
 0x51b   : > { %v3961_v42 = vadd.f32 %v7948_v46, %v3960_v39 }
 0x522   : > { %v3901_v60 = vpop.f32.mrf.mxu0  ;;  %v3963_v24 = vpop.f32.mrf.mxu2 }
 0x523   : > { %v3902_v50 = vadd.f32 %v9433_v45, %v3901_v60  ;;  %v3964_v26 = vadd.f32 %v7948_v46, %v3963_v24 }
 0x525   : > { %v3968_v14 = vadd.f32 %v3944_v7, %v3902_v50  ;;  %v7745_v7 = vld [vmem:[%s9969_s7 + $0x18] sm:$0xff] }
 0x526   : > { %4465 = vmatpush.bf16.msra.mxu3 %v7745_v7 }
 0x527   : > { %v3978_v53 = vmax.f32 %v3968_v14, 0.0 }
 0x52a   : > { %v3903_v57 = vpop.f32.mrf.mxu0  ;;  %v3965_v8 = vpop.f32.mrf.mxu2 }
 0x52b   : > { %v3904_v16 = vadd.f32 %v9433_v45, %v3903_v57  ;;  %v3966_v13 = vadd.f32 %v7948_v46, %v3965_v8  ;;  %v7744_v46 = vld [vmem:[%s9969_s7 + $0x10] sm:$0xff]  ;;  %v9495_v57 = vld [vmem:[%s9970_s18] ss:$0 sm:$0xff]  ;;  %s9972_s18 = sld [smem:[#allocation20_spill]] }
 0x52c   : > { %4382 = vmatpush.bf16.msra.mxu2 %v7744_v46 }
 0x52d   : > { %v3969_v15 = vadd.f32 %v3946_v12, %v3904_v16 }
 0x52f   : > { %v3979_v1 = vmax.f32 %v3969_v15, 0.0 }
 0x531   : > { %v9438_v37 = vpack.c.bf16 %v3979_v1, %v3978_v53 }
 0x532   : > { %v3906_v6 = vpop.f32.mrf.mxu0 }
 0x533   : > { %7029 = vmatmul.msk.bf16.vlgmr.msrb.gmra.mxu3 %vm2856_vm5, %v9438_v37  ;;  %v3907_v38 = vadd.f32 %v9433_v45, %v3906_v6 }
 0x535   : > { %v3970_v34 = vadd.f32 %v3949_v52, %v3907_v38  ;;  %v4168_v38 = vld [vmem:[#allocation4] sm:$0xff] }
 0x536   : > { %v4253_v52 = vld [vmem:[#allocation4 + $0x1] sm:$0xff] }
 0x537   : > { %v3980_v47 = vmax.f32 %v3970_v34, 0.0 }
 0x53a   : > { %v3908_v17 = vpop.f32.mrf.mxu0 }
 0x53b   : > { %v3909_v21 = vadd.f32 %v9433_v45, %v3908_v17  ;;  %v4336_v17 = vld [vmem:[#allocation4 + $0x2] sm:$0xff] }
 0x53d   : > { %v3971_v36 = vadd.f32 %v3951_v30, %v3909_v21 }
 0x53f   : > { %v3981_v22 = vmax.f32 %v3971_v36, 0.0 }
 0x541   : > { %v9444_v29 = vpack.c.bf16 %v3981_v22, %v3980_v47 }
 0x542   : > { %v3911_v11 = vpop.f32.mrf.mxu0 }
 0x543   : > { %7030 = vmatmul.msk.bf16.gmra.mxu3 %vm2856_vm5, %v9444_v29  ;;  %v3912_v33 = vadd.f32 %v9433_v45, %v3911_v11 }
 0x545   : > { %v3972_v31 = vadd.f32 %v3954_v59, %v3912_v33 }
 0x547   : > { %v3982_v27 = vmax.f32 %v3972_v31, 0.0 }
 0x54a   : > { %v3913_v9 = vpop.f32.mrf.mxu0 }
 0x54b   : > { %v3914_v10 = vadd.f32 %v9433_v45, %v3913_v9 }
 0x54d   : > { %v3973_v0 = vadd.f32 %v3956_v48, %v3914_v10 }
 0x54f   : > { %v3983_v4 = vmax.f32 %v3973_v0, 0.0 }
 0x551   : > { %v9450_v54 = vpack.c.bf16 %v3983_v4, %v3982_v27  ;;  %v4100_v4 = vpop.permute.xlu1 %4099 }
 0x552   : > { %v3916_v20 = vpop.f32.mrf.mxu0 }
 0x553   : > { %7031 = vmatmul.msk.bf16.gmra.mxu3 %vm2856_vm5, %v9450_v54  ;;  %v3917_v58 = vadd.f32 %v9433_v45, %v3916_v20 }
 0x555   : > { %v3974_v41 = vadd.f32 %v3959_v55, %v3917_v58 }
 0x557   : > { %v3984_v5 = vmax.f32 %v3974_v41, 0.0 }
 0x55a   : > { %v3918_v28 = vpop.f32.mrf.mxu0 }
 0x55b   : > { %v3919_v2 = vadd.f32 %v9433_v45, %v3918_v28 }
 0x55d   : > { %v3975_v56 = vadd.f32 %v3961_v42, %v3919_v2 }
 0x55f   : > { %v3985_v3 = vmax.f32 %v3975_v56, 0.0 }
 0x561   : > { %v9457_v51 = vpack.c.bf16 %v3985_v3, %v3984_v5  ;;  %v4105_v3 = vpop.permute.xlu2 %4104 }
 0x562   : > { %v3921_v35 = vpop.f32.mrf.mxu0 }
 0x563   : > { %v3922_v19 = vadd.f32 %v9433_v45, %v3921_v35  ;;  %7032 = vmatmul.msk.bf16.gmra.mxu3 %vm2856_vm5, %v9457_v51 }
 0x565   : > { %v3976_v61 = vadd.f32 %v3964_v26, %v3922_v19 }
 0x567   : > { %v3986_v32 = vmax.f32 %v3976_v61, 0.0 }
 0x56a   : > { %v3923_v23 = vpop.f32.mrf.mxu0 }
 0x56b   : > { %v3924_v40 = vadd.f32 %v9433_v45, %v3923_v23  ;;  %v7743_v45 = vld [vmem:[%s9969_s7 + $0x8] sm:$0xff] }
 0x56c   : > { %4299 = vmatpush.bf16.msrb.mxu0 %v7743_v45 }
 0x56d   : > { %v3977_v18 = vadd.f32 %v3966_v13, %v3924_v40  ;;  %v4110_v13 = vpop.permute.xlu0 %4109 }
 0x56f   : > { %v3987_v60 = vmax.f32 %v3977_v18, 0.0 }
 0x571   : > { %v9463_v50 = vpack.c.bf16 %v3987_v60, %v3986_v32 }
 0x573   : > { %7033 = vmatmul.msk.bf16.gmra.mxu3 %vm2856_vm5, %v9463_v50 }
 0x5b6   : > { %v4037_v12 = vpop.f32.mrf.mxu3 }
 0x5b7   : > { %v4038_v14 = vadd.f32 %v9495_v57, %v4037_v12 }
 0x5b9   : > { %v4062_v16 = vmax.f32 %v4038_v14, 0.0 }
 0x5bb   : > { %v4132_v15 = vmul.f32 %v4085_v43, %v4062_v16  ;;  %v7746_v16 = vld [vmem:[%s9969_s7 + $0x20] sm:$0xff] }
 0x5bc   : > { %4548 = vmatpush.bf16.msra.mxu1 %v7746_v16 }
 0x5bd   : > { %4157 = vst.msk [vmem:[#allocation4 + $0xb] sm:$0xff] %vm4142_vm7, %v4132_v15 }
 0x5be   : > { %v4039_v53 = vpop.f32.mrf.mxu3 }
 0x5bf   : > { %v4040_v1 = vadd.f32 %v9495_v57, %v4039_v53 }
 0x5c1   : > { %v4063_v6 = vmax.f32 %v4040_v1, 0.0  ;;  %v4115_v1 = vpop.permute.xlu1 %4114 }
 0x5c3   : > { %v4133_v30 = vmul.f32 %v4090_v25, %v4063_v6 }
 0x5c4   : > { %v4169_v34 = vld [vmem:[#allocation4 + $0x8] sm:$0xff] }
 0x5c5   : > { %v4254_v21 = vld [vmem:[#allocation4 + $0x9] sm:$0xff]  ;;  %4158 = vst.msk [vmem:[#allocation4 + $0x13] sm:$0xff] %vm4142_vm7, %v4133_v30  ;;  %v4180_v47 = vpack.c.bf16 %v4169_v34, %v4168_v38  ;;  %v7747_v30 = vld [vmem:[%s9969_s7 + $0x28] sm:$0xff]  ;;  %v7748_v34 = vld [vmem:[%s9969_s7 + $0x30] sm:$0xff] }
 0x5c6   : > { %v4337_v36 = vld [vmem:[#allocation4 + $0xa] sm:$0xff]  ;;  %v4266_v22 = vpack.c.bf16 %v4254_v21, %v4253_v52  ;;  %v4042_v11 = vpop.f32.mrf.mxu3  ;;  %4631 = vmatpush.bf16.msra.mxu0 %v7747_v30  ;;  %4714 = vmatpush.bf16.msrb.mxu2 %v7748_v34 }
 0x5c7   : > { %v4349_v62 = vpack.c.bf16 %v4337_v36, %v4336_v17  ;;  %v4043_v33 = vadd.f32 %v9495_v57, %v4042_v11  ;;  %7038 = vmatmul.msk.bf16.vlgmr.msrb.gmra.mxu1 %vm4142_vm7, %v4180_v47 }
 0x5c8   : > { %7049 = vmatmul.msk.bf16.vlgmr.msrb.gmra.mxu0 %vm4142_vm7, %v4266_v22 }
 0x5c9   : > { %7060 = vmatmul.msk.bf16.vlgmr.msra.gmra.mxu2 %vm4142_vm7, %v4349_v62  ;;  %v4064_v59 = vmax.f32 %v4043_v33, 0.0 }
 0x5cb   : > { %v4134_v9 = vmul.f32 %v4095_v63, %v4064_v59 }
 0x5cc   : > { %v4420_v48 = vld [vmem:[#allocation4 + $0x12] sm:$0xff] }
 0x5cd   : > { %4159 = vst.msk [vmem:[#allocation4 + $0x1b] sm:$0xff] %vm4142_vm7, %v4134_v9  ;;  %v4432_v31 = vpack.c.bf16 %v4420_v48, %v4337_v36  ;;  %v4170_v49 = vld [vmem:[#allocation4 + $0x10] sm:$0xff]  ;;  %v4120_v36 = vpop.permute.xlu2 %4119 }
 0x5ce   : > { %v4044_v10 = vpop.f32.mrf.mxu3  ;;  %v4255_v39 = vld [vmem:[#allocation4 + $0x11] sm:$0xff] }
 0x5cf   : > { %v4045_v0 = vadd.f32 %v9495_v57, %v4044_v10  ;;  %7071 = vmatmul.msk.bf16.vlgmr.msra.gmra.mxu3 %vm4142_vm7, %v4432_v31 }
 0x5d1   : > { %v4065_v27 = vmax.f32 %v4045_v0, 0.0  ;;  %v7749_v0 = vld [vmem:[%s9969_s7 + $0x38] sm:$0xff] }
 0x5d2   : > { %4797 = vmatpush.bf16.msrb.mxu3 %v7749_v0 }
 0x5d3   : > { %v4135_v20 = vmul.f32 %v4100_v4, %v4065_v27  ;;  %v4125_v4 = vpop.permute.xlu0 %4124 }
 0x5d4   : > { %v4171_v58 = vld [vmem:[#allocation4 + $0x18] sm:$0xff] }
 0x5d5   : > { %v4256_v55 = vld [vmem:[#allocation4 + $0x19] sm:$0xff]  ;;  %4160 = vst.msk [vmem:[#allocation4 + $0x23] sm:$0xff] %vm4142_vm7, %v4135_v20  ;;  %v4181_v42 = vpack.c.bf16 %v4171_v58, %v4170_v49 }
 0x5d6   : > { %v4339_v28 = vld [vmem:[#allocation4 + $0x1a] sm:$0xff]  ;;  %v4267_v41 = vpack.c.bf16 %v4256_v55, %v4255_v39  ;;  %v4047_v56 = vpop.f32.mrf.mxu3 }
 0x5d7   : > { %v4350_v2 = vpack.c.bf16 %v4339_v28, %v4420_v48  ;;  %v4048_v24 = vadd.f32 %v9495_v57, %v4047_v56  ;;  %7039 = vmatmul.msk.bf16.gmra.mxu1 %vm4142_vm7, %v4181_v42  ;;  %v4130_v42 = vpop.permute.xlu1 %4129 }
 0x5d8   : > { %7050 = vmatmul.msk.bf16.gmra.mxu0 %vm4142_vm7, %v4267_v41 }
 0x5d9   : > { %7061 = vmatmul.msk.bf16.gmra.mxu2 %vm4142_vm7, %v4350_v2  ;;  %v4066_v5 = vmax.f32 %v4048_v24, 0.0 }
 0x5db   : > { %v4136_v35 = vmul.f32 %v4105_v3, %v4066_v5 }
 0x5dc   : > { %v4422_v26 = vld [vmem:[#allocation4 + $0x22] sm:$0xff] }
 0x5dd   : > { %4161 = vst.msk [vmem:[#allocation4 + $0x2b] sm:$0xff] %vm4142_vm7, %v4136_v35  ;;  %v4433_v19 = vpack.c.bf16 %v4422_v26, %v4339_v28  ;;  %v4172_v18 = vld [vmem:[#allocation4 + $0x20] sm:$0xff] }
 0x5de   : > { %v4049_v61 = vpop.f32.mrf.mxu3  ;;  %v4257_v32 = vld [vmem:[#allocation4 + $0x21] sm:$0xff] }
 0x5df   : > { %v4050_v8 = vadd.f32 %v9495_v57, %v4049_v61  ;;  %7072 = vmatmul.msk.bf16.gmra.mxu3 %vm4142_vm7, %v4433_v19 }
 0x5e1   : > { %v4067_v23 = vmax.f32 %v4050_v8, 0.0  ;;  %v4503_v8 = vld [vmem:[#allocation4 + $0x13] sm:$0xff] }
 0x5e3   : > { %v4137_v40 = vmul.f32 %v4110_v13, %v4067_v23  ;;  %v4586_v23 = vld [vmem:[#allocation4 + $0x14] sm:$0xff]  ;;  %v4669_v13 = vld [vmem:[#allocation4 + $0x1c] sm:$0xff] }
 0x5e4   : > { %v4173_v60 = vld [vmem:[#allocation4 + $0x28] sm:$0xff] }
 0x5e5   : > { %v4258_v45 = vld [vmem:[#allocation4 + $0x29] sm:$0xff]  ;;  %4162 = vst.msk [vmem:[#allocation4 + $0x33] sm:$0xff] %vm4142_vm7, %v4137_v40  ;;  %v4182_v7 = vpack.c.bf16 %v4173_v60, %v4172_v18 }
 0x5e6   : > { %v4341_v46 = vld [vmem:[#allocation4 + $0x2a] sm:$0xff]  ;;  %v4268_v12 = vpack.c.bf16 %v4258_v45, %v4257_v32  ;;  %v4052_v43 = vpop.f32.mrf.mxu3  ;;  %v4681_v45 = vpack.c.bf16 %v4669_v13, %v4586_v23 }
 0x5e7   : > { %v4351_v14 = vpack.c.bf16 %v4341_v46, %v4422_v26  ;;  %v4053_v15 = vadd.f32 %v9495_v57, %v4052_v43  ;;  %7040 = vmatmul.msk.bf16.gmra.mxu1 %vm4142_vm7, %v4182_v7  ;;  %v4502_v40 = vld [vmem:[#allocation4 + $0xb] sm:$0xff]  ;;  %v4751_v7 = vld [vmem:[#allocation4 + $0x15] sm:$0xff] }
 0x5e8   : > { %7051 = vmatmul.msk.bf16.gmra.mxu0 %vm4142_vm7, %v4268_v12  ;;  %v4585_v18 = vld [vmem:[#allocation4 + $0xc] sm:$0xff]  ;;  %v4515_v32 = vpack.c.bf16 %v4503_v8, %v4502_v40  ;;  %v4588_v16 = vld [vmem:[#allocation4 + $0x24] sm:$0xff] }
 0x5e9   : > { %7062 = vmatmul.msk.bf16.gmra.mxu2 %vm4142_vm7, %v4351_v14  ;;  %v4068_v53 = vmax.f32 %v4053_v15, 0.0  ;;  %v4598_v60 = vpack.c.bf16 %v4586_v23, %v4585_v18  ;;  %v4505_v14 = vld [vmem:[#allocation4 + $0x23] sm:$0xff]  ;;  %v4504_v15 = vld [vmem:[#allocation4 + $0x1b] sm:$0xff] }
 0x5eb   : > { %v4138_v6 = vmul.f32 %v4115_v1, %v4068_v53  ;;  %v4516_v53 = vpack.c.bf16 %v4505_v14, %v4504_v15  ;;  %v4599_v1 = vpack.c.bf16 %v4588_v16, %v4669_v13  ;;  %v4677_v13 = vld [vmem:[#allocation4 + $0x5c] sm:$0xff] }
 0x5ec   : > { %v4424_v25 = vld [vmem:[#allocation4 + $0x32] sm:$0xff]  ;;  %v4760_v15 = vld [vmem:[#allocation4 + $0x5d] sm:$0xff] }
 0x5ed   : > { %4163 = vst.msk [vmem:[#allocation4 + $0x3b] sm:$0xff] %vm4142_vm7, %v4138_v6  ;;  %v4434_v38 = vpack.c.bf16 %v4424_v25, %v4341_v46  ;;  %v4174_v22 = vld [vmem:[#allocation4 + $0x30] sm:$0xff]  ;;  %v4752_v46 = vld [vmem:[#allocation4 + $0x1d] sm:$0xff] }
 0x5ee   : > { %v4054_v52 = vpop.f32.mrf.mxu3  ;;  %v4259_v62 = vld [vmem:[#allocation4 + $0x31] sm:$0xff]  ;;  %v4764_v12 = vpack.c.bf16 %v4752_v46, %v4751_v7 }
 0x5ef   : > { %v4055_v17 = vadd.f32 %v9495_v57, %v4054_v52  ;;  %7073 = vmatmul.msk.bf16.gmra.mxu3 %vm4142_vm7, %v4434_v38  ;;  %v4671_v43 = vld [vmem:[#allocation4 + $0x2c] sm:$0xff] }
 0x5f0   : > { %v4682_v6 = vpack.c.bf16 %v4671_v43, %v4588_v16  ;;  %v4753_v38 = vld [vmem:[#allocation4 + $0x25] sm:$0xff] }
 0x5f1   : > { %v4069_v21 = vmax.f32 %v4055_v17, 0.0  ;;  %v4507_v17 = vld [vmem:[#allocation4 + $0x33] sm:$0xff] }
 0x5f3   : > { %v4139_v47 = vmul.f32 %v4120_v36, %v4069_v21  ;;  %v4506_v21 = vld [vmem:[#allocation4 + $0x2b] sm:$0xff] }
 0x5f4   : > { %v4175_v11 = vld [vmem:[#allocation4 + $0x38] sm:$0xff]  ;;  %v4517_v36 = vpack.c.bf16 %v4507_v17, %v4506_v21 }
 0x5f5   : > { %v4260_v33 = vld [vmem:[#allocation4 + $0x39] sm:$0xff]  ;;  %4164 = vst.msk [vmem:[#allocation4 + $0x43] sm:$0xff] %vm4142_vm7, %v4139_v47  ;;  %v4183_v63 = vpack.c.bf16 %v4175_v11, %v4174_v22 }
 0x5f6   : > { %v4343_v59 = vld [vmem:[#allocation4 + $0x3a] sm:$0xff]  ;;  %v4269_v9 = vpack.c.bf16 %v4260_v33, %v4259_v62  ;;  %v4057_v31 = vpop.f32.mrf.mxu3  ;;  %v7750_v62 = vld [vmem:[%s9969_s7 + $0x40] sm:$0xff]  ;;  %s6577_s7 = scalar_lea.hbm %s8294_s12, %s7851_s6 }
 0x5f7   : > { %v4352_v48 = vpack.c.bf16 %v4343_v59, %v4424_v25  ;;  %v4058_v10 = vadd.f32 %v9495_v57, %v4057_v31  ;;  %7041 = vmatmul.msk.bf16.gmra.mxu1 %vm4142_vm7, %v4183_v63  ;;  %v4754_v25 = vld [vmem:[#allocation4 + $0x2d] sm:$0xff]  ;;  %v4755_v33 = vld [vmem:[#allocation4 + $0x35] sm:$0xff] }
 0x5f8   : > { %7052 = vmatmul.msk.bf16.gmra.mxu0 %vm4142_vm7, %v4269_v9  ;;  %v4765_v52 = vpack.c.bf16 %v4754_v25, %v4753_v38  ;;  %v4590_v30 = vld [vmem:[#allocation4 + $0x34] sm:$0xff]  ;;  %4880 = vmatpush.bf16.msrb.mxu1 %v7750_v62  ;;  %v9557_v9 = vld [vmem:[%s9972_s18] ss:$0 sm:$0xff]  ;;  %s9973_s18 = sld [smem:[#allocation21_spill]] }
 0x5f9   : > { %7063 = vmatmul.msk.bf16.gmra.mxu2 %vm4142_vm7, %v4352_v48  ;;  %v4070_v27 = vmax.f32 %v4058_v10, 0.0  ;;  %v4600_v47 = vpack.c.bf16 %v4590_v30, %v4671_v43  ;;  %v7753_v63 = vld [vmem:[%s9971_s1 + $0x8] sm:$0xff] }
 0x5fa   : > { %5019 = vmatpush.bf16.msra.mxu2 %v7753_v63 }
 0x5fb   : > { %v4140_v20 = vmul.f32 %v4125_v4, %v4070_v27  ;;  %v4508_v4 = vld [vmem:[#allocation4 + $0x3b] sm:$0xff] }
 0x5fc   : > { %v4426_v49 = vld [vmem:[#allocation4 + $0x42] sm:$0xff] }
 0x5fd   : > { %4165 = vst.msk [vmem:[#allocation4 + $0x4b] sm:$0xff] %vm4142_vm7, %v4140_v20  ;;  %v4435_v39 = vpack.c.bf16 %v4426_v49, %v4343_v59  ;;  %v4176_v2 = vld [vmem:[#allocation4 + $0x40] sm:$0xff] }
 0x5fe   : > { %v4059_v58 = vpop.f32.mrf.mxu3  ;;  %v4261_v56 = vld [vmem:[#allocation4 + $0x41] sm:$0xff] }
 0x5ff   : > { %v4060_v55 = vadd.f32 %v9495_v57, %v4059_v58  ;;  %7074 = vmatmul.msk.bf16.gmra.mxu3 %vm4142_vm7, %v4435_v39  ;;  %v4673_v34 = vld [vmem:[#allocation4 + $0x3c] sm:$0xff] }
 0x600   : > { %v4683_v22 = vpack.c.bf16 %v4673_v34, %v4590_v30  ;;  %v4756_v11 = vld [vmem:[#allocation4 + $0x3d] sm:$0xff] }
 0x601   : > { %v4071_v28 = vmax.f32 %v4060_v55, 0.0  ;;  %v4766_v59 = vpack.c.bf16 %v4756_v11, %v4755_v33  ;;  %v4509_v48 = vld [vmem:[#allocation4 + $0x43] sm:$0xff]  ;;  %v4834_v11 = vld [vmem:[#allocation4 + $0x16] sm:$0xff] }
 0x603   : > { %v4141_v41 = vmul.f32 %v4130_v42, %v4071_v28  ;;  %v7752_v28 = vld [vmem:[%s9971_s1] sm:$0xff]  ;;  %s9975_s1 = sld [smem:[#allocation22_spill]] }
 0x604   : > { %v4177_v24 = vld [vmem:[#allocation4 + $0x48] sm:$0xff]  ;;  %5020 = vmatpush.bf16.msra.mxu2 %v7752_v28 }
 0x605   : > { %v4262_v5 = vld [vmem:[#allocation4 + $0x49] sm:$0xff]  ;;  %4166 = vst.msk [vmem:[#allocation4 + $0x53] sm:$0xff] %vm4142_vm7, %v4141_v41  ;;  %v4184_v35 = vpack.c.bf16 %v4177_v24, %v4176_v2 }
 0x606   : > { %v4345_v3 = vld [vmem:[#allocation4 + $0x4a] sm:$0xff]  ;;  %v4270_v26 = vpack.c.bf16 %v4262_v5, %v4261_v56 }
 0x607   : > { %v4353_v19 = vpack.c.bf16 %v4345_v3, %v4426_v49  ;;  %7042 = vmatmul.msk.bf16.gmra.mxu1 %vm4142_vm7, %v4184_v35  ;;  %v4592_v31 = vld [vmem:[#allocation4 + $0x44] sm:$0xff]  ;;  %v4518_v49 = vpack.c.bf16 %v4509_v48, %v4508_v4 }
 0x608   : > { %7053 = vmatmul.msk.bf16.gmra.mxu0 %vm4142_vm7, %v4270_v26  ;;  %v4601_v39 = vpack.c.bf16 %v4592_v31, %v4673_v34  ;;  %v4757_v5 = vld [vmem:[#allocation4 + $0x45] sm:$0xff] }
 0x609   : > { %7064 = vmatmul.msk.bf16.gmra.mxu2 %vm4142_vm7, %v4353_v19  ;;  %v4835_v34 = vld [vmem:[#allocation4 + $0x1e] sm:$0xff] }
 0x60c   : > { %v4428_v57 = vld [vmem:[#allocation4 + $0x52] sm:$0xff] }
 0x60d   : > { %v4436_v61 = vpack.c.bf16 %v4428_v57, %v4345_v3  ;;  %v4675_v10 = vld [vmem:[#allocation4 + $0x4c] sm:$0xff]  ;;  %v4759_v43 = vld [vmem:[#allocation4 + $0x55] sm:$0xff] }
 0x60e   : > { %v4684_v58 = vpack.c.bf16 %v4675_v10, %v4592_v31  ;;  %v4758_v42 = vld [vmem:[#allocation4 + $0x4d] sm:$0xff]  ;;  %v4768_v38 = vpack.c.bf16 %v4760_v15, %v4759_v43 }
 0x60f   : > { %7075 = vmatmul.msk.bf16.gmra.mxu3 %vm4142_vm7, %v4436_v61  ;;  %v4767_v3 = vpack.c.bf16 %v4758_v42, %v4757_v5  ;;  %v4511_v57 = vld [vmem:[#allocation4 + $0x53] sm:$0xff] }
 0x610   : > { %v4594_v61 = vld [vmem:[#allocation4 + $0x54] sm:$0xff] }
 0x611   : > { %v4602_v7 = vpack.c.bf16 %v4594_v61, %v4675_v10 }
 0x617   : > { %7082 = vmatmul.msk.bf16.vlgmr.msra.gmra.mxu1 %vm4142_vm7, %v4515_v32 }
 0x618   : > { %7093 = vmatmul.msk.bf16.vlgmr.msra.gmra.mxu0 %vm4142_vm7, %v4598_v60  ;;  %v4510_v60 = vld [vmem:[#allocation4 + $0x4b] sm:$0xff] }
 0x619   : > { %7104 = vmatmul.msk.bf16.vlgmr.msrb.gmra.mxu2 %vm4142_vm7, %v4681_v45  ;;  %v4519_v46 = vpack.c.bf16 %v4511_v57, %v4510_v60 }
 0x61f   : > { %7115 = vmatmul.msk.bf16.vlgmr.msrb.gmra.mxu3 %vm4142_vm7, %v4764_v12  ;;  %v4685_v12 = vpack.c.bf16 %v4677_v13, %v4594_v61  ;;  %v4839_v61 = vld [vmem:[#allocation4 + $0x3e] sm:$0xff] }
 0x627   : > { %7083 = vmatmul.msk.bf16.gmra.mxu1 %vm4142_vm7, %v4516_v53 }
 0x628   : > { %7094 = vmatmul.msk.bf16.gmra.mxu0 %vm4142_vm7, %v4599_v1 }
 0x629   : > { %7105 = vmatmul.msk.bf16.gmra.mxu2 %vm4142_vm7, %v4682_v6 }
 0x62f   : > { %7116 = vmatmul.msk.bf16.gmra.mxu3 %vm4142_vm7, %v4765_v52 }
 0x637   : > { %7084 = vmatmul.msk.bf16.gmra.mxu1 %vm4142_vm7, %v4517_v36 }
 0x638   : > { %7095 = vmatmul.msk.bf16.gmra.mxu0 %vm4142_vm7, %v4600_v47 }
 0x639   : > { %7106 = vmatmul.msk.bf16.gmra.mxu2 %vm4142_vm7, %v4683_v22 }
 0x63f   : > { %7117 = vmatmul.msk.bf16.gmra.mxu3 %vm4142_vm7, %v4766_v59  ;;  %v4847_v59 = vpack.c.bf16 %v4835_v34, %v4834_v11 }
 0x644   : > { %v4215_v0 = vpop.f32.mrf.mxu1 }
 0x645   : > { %v4301_v27 = vpop.f32.mrf.mxu0  ;;  %v4243_v20 = vadd.f32 %v9557_v9, %v4215_v0 }
 0x647   : > { %v4326_v55 = vadd.f32 %v4301_v27, %v4243_v20  ;;  %7085 = vmatmul.msk.bf16.gmra.mxu1 %vm4142_vm7, %v4518_v49 }
 0x648   : > { %7096 = vmatmul.msk.bf16.gmra.mxu0 %vm4142_vm7, %v4601_v39  ;;  %v4837_v39 = vld [vmem:[#allocation4 + $0x2e] sm:$0xff] }
 0x649   : > { %7107 = vmatmul.msk.bf16.gmra.mxu2 %vm4142_vm7, %v4684_v58 }
 0x64c   : > { %v4384_v41 = vpop.f32.mrf.mxu2  ;;  %v4217_v56 = vpop.f32.mrf.mxu1 }
 0x64d   : > { %v4409_v2 = vadd.f32 %v4384_v41, %v4326_v55  ;;  %v4303_v24 = vpop.f32.mrf.mxu0  ;;  %v4244_v35 = vadd.f32 %v9557_v9, %v4217_v56 }
 0x64f   : > { %7118 = vmatmul.msk.bf16.gmra.mxu3 %vm4142_vm7, %v4767_v3  ;;  %v4327_v26 = vadd.f32 %v4303_v24, %v4244_v35 }
 0x652   : > { %v4467_v19 = vpop.f32.mrf.mxu3 }
 0x653   : > { %v9566_v23 = vadd.f32 %v4467_v19, %v4409_v2  ;;  %v4836_v2 = vld [vmem:[#allocation4 + $0x26] sm:$0xff] }
 0x654   : > { %v4386_v8 = vpop.f32.mrf.mxu2  ;;  %v4220_v18 = vpop.f32.mrf.mxu1  ;;  %v4848_v56 = vpack.c.bf16 %v4837_v39, %v4836_v2 }
 0x655   : > { %v9568_v40 = vadd.f32 %v4386_v8, %v4327_v26  ;;  %v4306_v32 = vpop.f32.mrf.mxu0  ;;  %v4245_v45 = vadd.f32 %v9557_v9, %v4220_v18 }
 0x657   : > { %v4328_v14 = vadd.f32 %v4306_v32, %v4245_v45  ;;  %7086 = vmatmul.msk.bf16.gmra.mxu1 %vm4142_vm7, %v4519_v46  ;;  %v4838_v32 = vld [vmem:[#allocation4 + $0x36] sm:$0xff] }
 0x658   : > { %7097 = vmatmul.msk.bf16.gmra.mxu0 %vm4142_vm7, %v4602_v7  ;;  %v4849_v45 = vpack.c.bf16 %v4839_v61, %v4838_v32 }
 0x659   : > { %7108 = vmatmul.msk.bf16.gmra.mxu2 %vm4142_vm7, %v4685_v12 }
 0x65a   : > { %v9574_v16 = vpop.f32.mrf.mxu3 }
 0x65c   : > { %v4389_v53 = vpop.f32.mrf.mxu2  ;;  %v4222_v6 = vpop.f32.mrf.mxu1 }
 0x65d   : > { %v4411_v1 = vadd.f32 %v4389_v53, %v4328_v14  ;;  %v4308_v25 = vpop.f32.mrf.mxu0  ;;  %v4246_v52 = vadd.f32 %v9557_v9, %v4222_v6  ;;  %v4841_v53 = vld [vmem:[#allocation4 + $0x4e] sm:$0xff] }
 0x65f   : > { %7119 = vmatmul.msk.bf16.gmra.mxu3 %vm4142_vm7, %v4768_v38  ;;  %v4329_v17 = vadd.f32 %v4308_v25, %v4246_v52  ;;  %v4840_v25 = vld [vmem:[#allocation4 + $0x46] sm:$0xff] }
 0x660   : > { %v4850_v52 = vpack.c.bf16 %v4841_v53, %v4840_v25 }
 0x662   : > { %v4472_v30 = vpop.f32.mrf.mxu3 }
 0x663   : > { %v9578_v36 = vadd.f32 %v4472_v30, %v4411_v1  ;;  %v4843_v30 = vld [vmem:[#allocation4 + $0x5e] sm:$0xff] }
 0x664   : > { %v4391_v21 = vpop.f32.mrf.mxu2  ;;  %v4225_v22 = vpop.f32.mrf.mxu1 }
 0x665   : > { %v9580_v47 = vadd.f32 %v4391_v21, %v4329_v17  ;;  %v4311_v62 = vpop.f32.mrf.mxu0  ;;  %v4247_v33 = vadd.f32 %v9557_v9, %v4225_v22  ;;  %v4842_v17 = vld [vmem:[#allocation4 + $0x56] sm:$0xff] }
 0x666   : > { %v4851_v22 = vpack.c.bf16 %v4843_v30, %v4842_v17 }
 0x667   : > { %v4330_v63 = vadd.f32 %v4311_v62, %v4247_v33  ;;  %7126 = vmatmul.msk.bf16.vlgmr.msrb.gmra.mxu1 %vm4142_vm7, %v4847_v59  ;;  %v7751_v59 = vld [vmem:[%s9973_s18] sm:$0xff]  ;;  %s9974_s18 = sld [smem:[#allocation24_spill]] }
 0x668   : > { %4966 = vmatpush.bf16.msrb.mxu0 %v7751_v59 }
 0x669   : > { %7148 = vmatmul.msk.bf16.vlgmr.msra.gmra.mxu2 %vm2856_vm5, %v9438_v37 }
 0x66a   : > { %v9586_v48 = vpop.f32.mrf.mxu3 }
 0x66c   : > { %v4394_v31 = vpop.f32.mrf.mxu2  ;;  %v4227_v0 = vpop.f32.mrf.mxu1 }
 0x66d   : > { %v4413_v10 = vadd.f32 %v4394_v31, %v4330_v63  ;;  %v4313_v27 = vpop.f32.mrf.mxu0  ;;  %v4248_v4 = vadd.f32 %v9557_v9, %v4227_v0 }
 0x66f   : > { %v4331_v20 = vadd.f32 %v4313_v27, %v4248_v4 }
 0x672   : > { %v4477_v49 = vpop.f32.mrf.mxu3 }
 0x673   : > { %v4496_v55 = vadd.f32 %v4477_v49, %v4413_v10 }
 0x674   : > { %v4396_v58 = vpop.f32.mrf.mxu2  ;;  %v4230_v42 = vpop.f32.mrf.mxu1 }
 0x675   : > { %v9589_v28 = vadd.f32 %v4396_v58, %v4331_v20  ;;  %v4316_v41 = vpop.f32.mrf.mxu0  ;;  %v4249_v37 = vadd.f32 %v9557_v9, %v4230_v42 }
 0x677   : > { %v4332_v24 = vadd.f32 %v4316_v41, %v4249_v37  ;;  %7127 = vmatmul.msk.bf16.gmra.mxu1 %vm4142_vm7, %v4848_v56  ;;  %v4493_v37 = vadd.f32 %v9574_v16, %v9568_v40  ;;  %v4495_v40 = vadd.f32 %v9586_v48, %v9580_v47 }
 0x679   : > { %7149 = vmatmul.msk.bf16.gmra.mxu2 %vm2856_vm5, %v9444_v29 }
 0x67a   : > { %v9595_v5 = vpop.f32.mrf.mxu3 }
 0x67c   : > { %v4399_v3 = vpop.f32.mrf.mxu2  ;;  %v9597_v26 = vpop.f32.mrf.mxu1 }
 0x67d   : > { %v4415_v35 = vadd.f32 %v4399_v3, %v4332_v24  ;;  %v9599_v19 = vpop.f32.mrf.mxu0 }
 0x682   : > { %v4482_v57 = vpop.f32.mrf.mxu3 }
 0x683   : > { %v4498_v13 = vadd.f32 %v4482_v57, %v4415_v35 }
 0x684   : > { %v9601_v8 = vpop.f32.mrf.mxu2  ;;  %v4235_v18 = vpop.f32.mrf.mxu1 }
 0x685   : > { %v4251_v60 = vadd.f32 %v9557_v9, %v4235_v18  ;;  %v4321_v46 = vpop.f32.mrf.mxu0 }
 0x687   : > { %v4334_v29 = vadd.f32 %v4321_v46, %v4251_v60  ;;  %7128 = vmatmul.msk.bf16.gmra.mxu1 %vm4142_vm7, %v4849_v45 }
 0x689   : > { %7150 = vmatmul.msk.bf16.gmra.mxu2 %vm2856_vm5, %v9450_v54 }
 0x68a   : > { %v9607_v7 = vpop.f32.mrf.mxu3 }
 0x68c   : > { %v4404_v12 = vpop.f32.mrf.mxu2  ;;  %v9609_v43 = vpop.f32.mrf.mxu1 }
 0x68d   : > { %v4417_v14 = vadd.f32 %v4404_v12, %v4334_v29  ;;  %v9622_v63 = vpop.f32.mrf.mxu0 }
 0x692   : > { %v4487_v15 = vpop.f32.mrf.mxu3 }
 0x693   : > { %v4500_v1 = vadd.f32 %v4487_v15, %v4417_v14 }
 0x694   : > { %v4550_v6 = vpop.f32.mrf.mxu1 }
 0x695   : > { %v4575_v38 = vadd.f32 %v4550_v6, %v9566_v23  ;;  %v4633_v0 = vpop.f32.mrf.mxu0 }
 0x697   : > { %7129 = vmatmul.msk.bf16.gmra.mxu1 %vm4142_vm7, %v4850_v52  ;;  %v4658_v35 = vadd.f32 %v4633_v0, %v4575_v38 }
 0x699   : > { %7151 = vmatmul.msk.bf16.gmra.mxu2 %vm2856_vm5, %v9457_v51  ;;  %v9624_v51 = vpop.f32.mrf.mxu2 }
 0x69a   : > { %v9626_v31 = vpop.f32.mrf.mxu3 }
 0x69c   : > { %v4552_v54 = vpop.f32.mrf.mxu1 }
 0x69d   : > { %v4635_v49 = vpop.f32.mrf.mxu0  ;;  %v4576_v24 = vadd.f32 %v4552_v54, %v4493_v37 }
 0x69f   : > { %v4659_v61 = vadd.f32 %v4635_v49, %v4576_v24  ;;  %v4250_v24 = vadd.f32 %v9557_v9, %v9597_v26 }
 0x6a1   : > { %v4716_v27 = vpop.f32.mrf.mxu2 }
 0x6a2   : > { %v4741_v57 = vadd.f32 %v4716_v27, %v4658_v35 }
 0x6a4   : > { %v4555_v34 = vpop.f32.mrf.mxu1 }
 0x6a5   : > { %v4577_v21 = vadd.f32 %v4555_v34, %v9578_v36  ;;  %v4638_v41 = vpop.f32.mrf.mxu0 }
 0x6a7   : > { %7130 = vmatmul.msk.bf16.gmra.mxu1 %vm4142_vm7, %v4851_v22  ;;  %v4660_v52 = vadd.f32 %v4638_v41, %v4577_v21 }
 0x6a9   : > { %7152 = vmatmul.msk.bf16.gmra.mxu2 %vm2856_vm5, %v9463_v50  ;;  %v4799_v50 = vpop.f32.mrf.mxu3  ;;  %v4718_v58 = vpop.f32.mrf.mxu2 }
 0x6aa   : > { %v4824_v18 = vadd.f32 %v4799_v50, %v4741_v57 }
 0x6ac   : > { %v4557_v23 = vpop.f32.mrf.mxu1 }
 0x6ad   : > { %v4640_v32 = vpop.f32.mrf.mxu0 }
 0x6b1   : > { %v4721_v2 = vpop.f32.mrf.mxu2 }
 0x6b2   : > { %v4743_v17 = vadd.f32 %v4721_v2, %v4660_v52 }
 0x6b4   : > { %v4560_v62 = vpop.f32.mrf.mxu1 }
 0x6b5   : > { %v9619_v11 = vadd.f32 %v4560_v62, %v4496_v55  ;;  %v4801_v55 = vpop.f32.mrf.mxu3  ;;  %v4643_v6 = vpop.f32.mrf.mxu0 }
 0x6b9   : > { %v4723_v60 = vpop.f32.mrf.mxu2 }
 0x6bc   : > { %v4562_v33 = vpop.f32.mrf.mxu1 }
 0x6bd   : > { %v4804_v56 = vpop.f32.mrf.mxu3  ;;  %v4645_v0 = vpop.f32.mrf.mxu0 }
 0x6be   : > { %v4826_v22 = vadd.f32 %v4804_v56, %v4743_v17 }
 0x6c1   : > { %v4726_v25 = vpop.f32.mrf.mxu2 }
 0x6c4   : > { %v4565_v36 = vpop.f32.mrf.mxu1 }
 0x6c5   : > { %v9628_v10 = vadd.f32 %v4565_v36, %v4498_v13  ;;  %v4742_v13 = vadd.f32 %v4718_v58, %v4659_v61  ;;  %v4806_v29 = vpop.f32.mrf.mxu3  ;;  %v4648_v37 = vpop.f32.mrf.mxu0 }
 0x6c7   : > { %v4825_v45 = vadd.f32 %v4801_v55, %v4742_v13  ;;  %v4662_v55 = vadd.f32 %v4643_v6, %v9619_v11 }
 0x6c9   : > { %v4728_v50 = vpop.f32.mrf.mxu2  ;;  %v4745_v41 = vadd.f32 %v4726_v25, %v4662_v55  ;;  %v7953_v55 = vld [vmem:[%s9975_s1] ss:$0 sm:$0xff]  ;;  %s9976_s1 = sld [smem:[#allocation25_spill]] }
 0x6cc   : > { %v9630_v4 = vpop.f32.mrf.mxu1 }
 0x6cd   : > { %v4809_v54 = vpop.f32.mrf.mxu3 }
 0x6ce   : > { %v4828_v35 = vadd.f32 %v4809_v54, %v4745_v41 }
 0x6d1   : > { %v4731_v56 = vpop.f32.mrf.mxu2 }
 0x6d4   : > { %v4570_v20 = vpop.f32.mrf.mxu1 }
 0x6d5   : > { %v9632_v39 = vadd.f32 %v4570_v20, %v4500_v1  ;;  %v4578_v1 = vadd.f32 %v4557_v23, %v4495_v40  ;;  %v4811_v23 = vpop.f32.mrf.mxu3  ;;  %v4497_v20 = vadd.f32 %v9595_v5, %v9589_v28  ;;  %v4333_v5 = vadd.f32 %v9599_v19, %v4250_v24 }
 0x6d7   : > { %v4661_v30 = vadd.f32 %v4640_v32, %v4578_v1  ;;  %v4580_v58 = vadd.f32 %v4562_v33, %v4497_v20 }
 0x6d9   : > { %v4744_v34 = vadd.f32 %v4723_v60, %v4661_v30  ;;  %v4663_v2 = vadd.f32 %v4645_v0, %v4580_v58 }
 0x6db   : > { %v4827_v62 = vadd.f32 %v4806_v29, %v4744_v34  ;;  %v4733_v29 = vpop.f32.mrf.mxu2 }
 0x6dc   : > { %v9634_v42 = vpop.f32.mrf.mxu1 }
 0x6dd   : > { %v4814_v57 = vpop.f32.mrf.mxu3 }
 0x6e3   : > { %v4736_v25 = vpop.f32.mrf.mxu2 }
 0x6e4   : > { %v4882_v3 = vpop.f32.mrf.mxu1 }
 0x6e5   : > { %v4907_v46 = vadd.f32 %v4882_v3, %v4824_v18  ;;  %v4746_v3 = vadd.f32 %v4728_v50, %v4663_v2  ;;  %v4416_v18 = vadd.f32 %v9601_v8, %v4333_v5  ;;  %v4252_v8 = vadd.f32 %v9557_v9, %v9609_v43 }
 0x6e7   : > { %v4917_v15 = vmax.f32 %v4907_v46, 0.0  ;;  %v4829_v61 = vadd.f32 %v4811_v23, %v4746_v3  ;;  %v4499_v60 = vadd.f32 %v9607_v7, %v4416_v18 }
 0x6e9   : > { %v4582_v26 = vadd.f32 %v9630_v4, %v4499_v60  ;;  %v4335_v4 = vadd.f32 %v9622_v63, %v4252_v8 }
 0x6eb   : > { %v4418_v17 = vadd.f32 %v9624_v51, %v4335_v4 }
 0x6ec   : > { %v4884_v12 = vpop.f32.mrf.mxu1 }
 0x6ed   : > { %v4908_v14 = vadd.f32 %v4884_v12, %v4825_v45  ;;  %v4650_v45 = vpop.f32.mrf.mxu0  ;;  %v4816_v12 = vpop.f32.mrf.mxu3  ;;  %v4501_v34 = vadd.f32 %v9626_v31, %v4418_v17 }
 0x6ee   : > { %v4665_v19 = vadd.f32 %v4650_v45, %v4582_v26 }
 0x6ef   : > { %v4918_v53 = vmax.f32 %v4908_v14, 0.0  ;;  %v4584_v9 = vadd.f32 %v9634_v42, %v4501_v34 }
 0x6f0   : > { %v4748_v40 = vadd.f32 %v4733_v29, %v4665_v19 }
 0x6f1   : > { %v4929_v16 = vpack.c.bf16 %v4918_v53, %v4917_v15  ;;  %v4664_v15 = vadd.f32 %v4648_v37, %v9628_v10 }
 0x6f2   : > { %v4831_v7 = vadd.f32 %v4816_v12, %v4748_v40 }
 0x6f3   : > { %7135 = vmatmul.msk.bf16.vlgmr.msrb.gmra.mxu0 %vm4142_vm7, %v4929_v16  ;;  %v4747_v53 = vadd.f32 %v4731_v56, %v4664_v15 }
 0x6f4   : > { %v4887_v38 = vpop.f32.mrf.mxu1 }
 0x6f5   : > { %v4909_v59 = vadd.f32 %v4887_v38, %v4826_v22  ;;  %v4830_v16 = vadd.f32 %v4814_v57, %v4747_v53  ;;  %v4653_v1 = vpop.f32.mrf.mxu0  ;;  %v4819_v54 = vpop.f32.mrf.mxu3 }
 0x6f7   : > { %v4919_v47 = vmax.f32 %v4909_v59, 0.0 }
 0x6fc   : > { %v4889_v36 = vpop.f32.mrf.mxu1 }
 0x6fd   : > { %v4910_v27 = vadd.f32 %v4889_v36, %v4827_v62  ;;  %v4666_v62 = vadd.f32 %v4653_v1, %v9632_v39  ;;  %v4655_v59 = vpop.f32.mrf.mxu0  ;;  %v4738_v36 = vpop.f32.mrf.mxu2 }
 0x6fe   : > { %v4667_v0 = vadd.f32 %v4655_v59, %v4584_v9 }
 0x6ff   : > { %v4920_v48 = vmax.f32 %v4910_v27, 0.0  ;;  %v4749_v63 = vadd.f32 %v4736_v25, %v4666_v62  ;;  %v4821_v27 = vpop.f32.mrf.mxu3 }
 0x700   : > { %v4750_v51 = vadd.f32 %v4738_v36, %v4667_v0 }
 0x701   : > { %v4930_v49 = vpack.c.bf16 %v4920_v48, %v4919_v47  ;;  %v4832_v50 = vadd.f32 %v4819_v54, %v4749_v63 }
 0x702   : > { %v4833_v47 = vadd.f32 %v4821_v27, %v4750_v51 }
 0x703   : > { %7136 = vmatmul.msk.bf16.gmra.mxu0 %vm4142_vm7, %v4930_v49 }
 0x704   : > { %v4892_v21 = vpop.f32.mrf.mxu1 }
 0x705   : > { %v4911_v13 = vadd.f32 %v4892_v21, %v4828_v35  ;;  %v5022_v58 = vpop.f32.mrf.mxu2  ;;  %v7952_v21 = vld [vmem:[%s9974_s18] ss:$0 sm:$0xff]  ;;  %s9977_s18 = sld [smem:[#allocation27_spill]] }
 0x706   : > { %v5023_v37 = vadd.f32 %v7952_v21, %v5022_v58 }
 0x707   : > { %v4921_v32 = vmax.f32 %v4911_v13, 0.0 }
 0x70c   : > { %v4894_v28 = vpop.f32.mrf.mxu1 }
 0x70d   : > { %v4912_v33 = vadd.f32 %v4894_v28, %v4829_v61  ;;  %v5024_v39 = vpop.f32.mrf.mxu2 }
 0x70e   : > { %v5025_v35 = vadd.f32 %v7952_v21, %v5024_v39 }
 0x70f   : > { %v4922_v11 = vmax.f32 %v4912_v33, 0.0 }
 0x711   : > { %v4931_v46 = vpack.c.bf16 %v4922_v11, %v4921_v32 }
 0x713   : > { %7137 = vmatmul.msk.bf16.gmra.mxu0 %vm4142_vm7, %v4931_v46 }
 0x714   : > { %v4897_v14 = vpop.f32.mrf.mxu1 }
 0x715   : > { %v4913_v6 = vadd.f32 %v4897_v14, %v4830_v16  ;;  %v5027_v41 = vpop.f32.mrf.mxu2 }
 0x716   : > { %v5028_v32 = vadd.f32 %v7952_v21, %v5027_v41 }
 0x717   : > { %v4923_v30 = vmax.f32 %v4913_v6, 0.0 }
 0x71c   : > { %v4899_v38 = vpop.f32.mrf.mxu1 }
 0x71d   : > { %v4914_v52 = vadd.f32 %v4899_v38, %v4831_v7  ;;  %v5029_v61 = vpop.f32.mrf.mxu2 }
 0x71f   : > { %v4924_v10 = vmax.f32 %v4914_v52, 0.0 }
 0x721   : > { %v4932_v22 = vpack.c.bf16 %v4924_v10, %v4923_v30 }
 0x723   : > { %7138 = vmatmul.msk.bf16.gmra.mxu0 %vm4142_vm7, %v4932_v22 }
 0x724   : > { %v4902_v43 = vpop.f32.mrf.mxu1 }
 0x725   : > { %v4915_v48 = vadd.f32 %v4902_v43, %v4832_v50  ;;  %v5032_v45 = vpop.f32.mrf.mxu2 }
 0x726   : > { %v5033_v63 = vadd.f32 %v7952_v21, %v5032_v45  ;;  %v7759_v45 = vld [vmem:[%s9977_s18] sm:$0xff] }
 0x727   : > { %v4925_v20 = vmax.f32 %v4915_v48, 0.0 }
 0x72c   : > { %v4904_v31 = vpop.f32.mrf.mxu1 }
 0x72d   : > { %v4916_v23 = vadd.f32 %v4904_v31, %v4833_v47  ;;  %v5034_v29 = vpop.f32.mrf.mxu2  ;;  %v5030_v47 = vadd.f32 %v7952_v21, %v5029_v61 }
 0x72e   : > { %v5035_v9 = vadd.f32 %v7952_v21, %v5034_v29  ;;  %v7763_v29 = vld [vmem:[%s9977_s18 + $0x20] sm:$0xff] }
 0x72f   : > { %v4926_v42 = vmax.f32 %v4916_v23, 0.0 }
 0x731   : > { %v4933_v49 = vpack.c.bf16 %v4926_v42, %v4925_v20 }
 0x733   : > { %7139 = vmatmul.msk.bf16.gmra.mxu0 %vm4142_vm7, %v4933_v49  ;;  %v7758_v49 = vld [vmem:[%s9976_s1 + $0x18] sm:$0xff] }
 0x734   : > { %5157 = vmatpush.bf16.msra.mxu1 %v7758_v49 }
 0x735   : > { %v5037_v12 = vpop.f32.mrf.mxu2 }
 0x736   : > { %v5038_v30 = vadd.f32 %v7952_v21, %v5037_v12  ;;  %v7769_v12 = vld [vmem:[%s9977_s18 + $0x50] sm:$0xff] }
 0x73d   : > { %v5039_v53 = vpop.f32.mrf.mxu2 }
 0x73e   : > { %v5040_v25 = vadd.f32 %v7952_v21, %v5039_v53 }
 0x745   : > { %v5042_v8 = vpop.f32.mrf.mxu2 }
 0x746   : > { %v5043_v7 = vadd.f32 %v7952_v21, %v5042_v8 }
 0x74d   : > { %v5044_v1 = vpop.f32.mrf.mxu2 }
 0x74e   : > { %v5045_v4 = vadd.f32 %v7952_v21, %v5044_v1 }
 0x770   : > { %v4968_v2 = vpop.f32.mrf.mxu0 }
 0x771   : > { %v4969_v56 = vadd.f32 %v7953_v55, %v4968_v2  ;;  %v7754_v2 = vld [vmem:[%s9943_s4] sm:$0xff] }
 0x773   : > { %v5047_v24 = vadd.f32 %v5023_v37, %v4969_v56  ;;  %v5069_v37 = vld [vmem:[%s9943_s4 + $0x8] sm:$0xf]  ;;  %s9984_s4 = sld [smem:[#allocation32_spill]] }
 0x774   : > { %v5080_v56 = vunpack.c.l.b16 %v5069_v37 }
 0x775   : > { %v5057_v28 = vmax.f32 %v5047_v24, 0.0 }
 0x776   : > { %v5082_v24 = vpack.c.b16 %v5080_v56, %v5080_v56 }
 0x778   : > { %v4970_v3 = vpop.f32.mrf.mxu0 }
 0x779   : > { %v4971_v57 = vadd.f32 %v7953_v55, %v4970_v3  ;;  %v7757_v3 = vld [vmem:[%s9976_s1 + $0x10] sm:$0xff] }
 0x77a   : > { %5158 = vmatpush.bf16.msra.mxu1 %v7757_v3 }
 0x77b   : > { %v5048_v13 = vadd.f32 %v5025_v35, %v4971_v57  ;;  %v7756_v35 = vld [vmem:[%s9976_s1 + $0x8] sm:$0xff]  ;;  %v7755_v57 = vld [vmem:[%s9976_s1] sm:$0xff]  ;;  %s9978_s1 = sld [smem:[#allocation26_spill]] }
 0x77d   : > { %v5058_v5 = vmax.f32 %v5048_v13, 0.0 }
 0x77e   : > { %5159 = vmatpush.bf16.msra.mxu1 %v7756_v35 }
 0x77f   : > { %v5070_v33 = vpack.c.bf16 %v5058_v5, %v5057_v28 }
 0x780   : > { %v4973_v18 = vpop.f32.mrf.mxu0 }
 0x781   : > { %v4974_v11 = vadd.f32 %v7953_v55, %v4973_v18 }
 0x782   : > { %5160 = vmatpush.bf16.msra.mxu1 %v7755_v57 }
 0x783   : > { %v5049_v60 = vadd.f32 %v5028_v32, %v4974_v11  ;;  %v7760_v32 = vld [vmem:[%s9977_s18 + $0x8] sm:$0xff]  ;;  %v7762_v11 = vld [vmem:[%s9977_s18 + $0x18] sm:$0xff] }
 0x784   : > { %5290 = vmatpush.bf16.msra.mxu0 %v7762_v11 }
 0x785   : > { %v5059_v41 = vmax.f32 %v5049_v60, 0.0  ;;  %v7764_v60 = vld [vmem:[%s9977_s18 + $0x28] sm:$0xff] }
 0x786   : > { %5339 = vmatpush.bf16.msrb.mxu1 %v7764_v60 }
 0x788   : > { %v4975_v46 = vpop.f32.mrf.mxu0 }
 0x789   : > { %v4976_v0 = vadd.f32 %v7953_v55, %v4975_v46  ;;  %v7761_v46 = vld [vmem:[%s9977_s18 + $0x10] sm:$0xff] }
 0x78a   : > { %5291 = vmatpush.bf16.msra.mxu0 %v7761_v46  ;;  %5340 = vmatpush.bf16.msrb.mxu1 %v7763_v29 }
 0x78b   : > { %v5050_v23 = vadd.f32 %v5030_v47, %v4976_v0  ;;  %v7776_v47 = vld [vmem:[%s9977_s18 + $0x88] sm:$0xff] }
 0x78d   : > { %v5060_v39 = vmax.f32 %v5050_v23, 0.0  ;;  %v7775_v23 = vld [vmem:[%s9977_s18 + $0x80] sm:$0xff] }
 0x78f   : > { %v5071_v21 = vpack.c.bf16 %v5060_v39, %v5059_v41 }
 0x790   : > { %v4978_v26 = vpop.f32.mrf.mxu0 }
 0x791   : > { %v4979_v43 = vadd.f32 %v7953_v55, %v4978_v26  ;;  %v7770_v26 = vld [vmem:[%s9977_s18 + $0x58] sm:$0xff] }
 0x792   : > { %7854 = vmatpush.bf16.msrb.mxu2 %v7770_v26 }
 0x793   : > { %v5051_v48 = vadd.f32 %v5033_v63, %v4979_v43 }
 0x795   : > { %v5061_v58 = vmax.f32 %v5051_v48, 0.0  ;;  %v7765_v48 = vld [vmem:[%s9977_s18 + $0x30] sm:$0xff] }
 0x796   : > { %7855 = vmatpush.bf16.msrb.mxu2 %v7769_v12 }
 0x798   : > { %v4980_v14 = vpop.f32.mrf.mxu0 }
 0x799   : > { %v4981_v10 = vadd.f32 %v7953_v55, %v4980_v14  ;;  %v7954_v14 = vld [vmem:[%s9978_s1] ss:$0 sm:$0xff]  ;;  %s9979_s1 = sld [smem:[#allocation31_spill]] }
 0x79b   : > { %v5052_v27 = vadd.f32 %v5035_v9, %v4981_v10 }
 0x79d   : > { %v5062_v20 = vmax.f32 %v5052_v27, 0.0 }
 0x79f   : > { %v7782_v57 = vld [vmem:[%s9979_s1 + $0x18] sm:$0xff]  ;;  %v7779_v60 = vld [vmem:[%s9979_s1] sm:$0xff] }
 0x7a0   : > { %v4983_v15 = vpop.f32.mrf.mxu0 }
 0x7a1   : > { %v4984_v52 = vadd.f32 %v7953_v55, %v4983_v15 }
 0x7a3   : > { %v5053_v62 = vadd.f32 %v5038_v30, %v4984_v52  ;;  %v5190_v30 = vpop.permute.xlu1 %5189 }
 0x7a5   : > { %v5063_v31 = vmax.f32 %v5053_v62, 0.0 }
 0x7a8   : > { %v4985_v19 = vpop.f32.mrf.mxu0 }
 0x7a9   : > { %v4986_v6 = vadd.f32 %v7953_v55, %v4985_v19  ;;  %v7768_v19 = vld [vmem:[%s9977_s18 + $0x48] sm:$0xff] }
 0x7aa   : > { %5437 = vmatpush.bf16.msrb.mxu0 %v7768_v19 }
 0x7ab   : > { %v5054_v34 = vadd.f32 %v5040_v25, %v4986_v6 }
 0x7ad   : > { %v5064_v51 = vmax.f32 %v5054_v34, 0.0 }
 0x7af   : > { %v5073_v42 = vpack.c.bf16 %v5064_v51, %v5063_v31  ;;  %v7766_v51 = vld [vmem:[%s9977_s18 + $0x38] sm:$0xff]  ;;  %v7771_v31 = vld [vmem:[%s9977_s18 + $0x60] sm:$0xff] }
 0x7b0   : > { %v4988_v40 = vpop.f32.mrf.mxu0 }
 0x7b1   : > { %v4989_v16 = vadd.f32 %v7953_v55, %v4988_v40  ;;  %v7767_v40 = vld [vmem:[%s9977_s18 + $0x40] sm:$0xff] }
 0x7b2   : > { %5438 = vmatpush.bf16.msrb.mxu0 %v7767_v40 }
 0x7b3   : > { %v5055_v54 = vadd.f32 %v5043_v7, %v4989_v16  ;;  %v5180_v16 = vpop.permute.xlu2 %5179 }
 0x7b5   : > { %v5065_v59 = vmax.f32 %v5055_v54, 0.0 }
 0x7b8   : > { %v4990_v38 = vpop.f32.mrf.mxu0 }
 0x7b9   : > { %v4991_v17 = vadd.f32 %v7953_v55, %v4990_v38  ;;  %v5072_v55 = vpack.c.bf16 %v5062_v20, %v5061_v58  ;;  %v5185_v38 = vpop.permute.xlu0 %5184 }
 0x7bb   : > { %v5056_v22 = vadd.f32 %v5045_v4, %v4991_v17 }
 0x7bd   : > { %v5066_v36 = vmax.f32 %v5056_v22, 0.0 }
 0x7bf   : > { %v5074_v50 = vpack.c.bf16 %v5066_v36, %v5065_v59 }
 0x7c1   : > { %5093 = vmatpush.bf16.msra.mxu3 %v5074_v50  ;;  %v7772_v50 = vld [vmem:[%s9977_s18 + $0x68] sm:$0xff] }
 0x7c5   : > { %5094 = vmatpush.bf16.msra.mxu3 %v5073_v42 }
 0x7c9   : > { %5095 = vmatpush.bf16.msra.mxu3 %v5072_v55 }
 0x7cd   : > { %5096 = vmatpush.bf16.msra.mxu3 %v5071_v21 }
 0x7d1   : > { %5097 = vmatpush.bf16.msra.mxu3 %v5070_v33 }
 0x7d4   : > { %7157 = vmatmul.msk.bf16.vlgmr.msra.gmra.mxu3 %vm5083_vm9, %v7754_v2 }
 0x7d5   : > { %5238 = vmatpush.bf16.msrb.mxu3 %v7760_v32 }
 0x7d9   : > { %5239 = vmatpush.bf16.msrb.mxu3 %v7759_v45 }
 0x7dd   : > { %7852 = vmatpush.bf16.msra.mxu3 %v7762_v11 }
 0x7e1   : > { %7853 = vmatpush.bf16.msra.mxu3 %v7761_v46 }
 0x7e4   : > { %7158 = vmatmul.msk.bf16.gmra.mxu3 %vm5083_vm9, %v5082_v24 }
 0x857   : > { %v5099_v61 = vpop.f32.mrf.mxu3 }
 0x85f   : > { %v5101_v13 = vpop.f32.mrf.mxu3 }
 0x860   : > { %v9674_v28 = vpack.c.bf16 %v5101_v13, %v5099_v61  ;;  %v7774_v61 = vld [vmem:[%s9977_s18 + $0x78] sm:$0xff]  ;;  %v7781_v13 = vld [vmem:[%s9979_s1 + $0x10] sm:$0xff] }
 0x862   : > { %7175 = vmatmul.msk.bf16.vlgmr.msra.gmra.mxu1 %vm5146_vm10, %v9674_v28 }
 0x863   : > { %5486 = vmatpush.bf16.msra.mxu1 %v7770_v26 }
 0x867   : > { %v5104_v5 = vpop.f32.mrf.mxu3  ;;  %5487 = vmatpush.bf16.msra.mxu1 %v7769_v12 }
 0x868   : > { %v9678_v33 = vpack.c.bf16 %v5104_v5, %v5104_v5  ;;  %v7773_v5 = vld [vmem:[%s9977_s18 + $0x70] sm:$0xff] }
 0x86f   : > { %v5106_v18 = vpop.f32.mrf.mxu3 }
 0x870   : > { %v7780_v18 = vld [vmem:[%s9979_s1 + $0x8] sm:$0xff]  ;;  %s9982_s1 = sld [smem:[#allocation30_spill]] }
 0x872   : > { %7176 = vmatmul.msk.bf16.gmra.mxu1 %vm5146_vm10, %v9678_v33 }
 0x8df   : > { %v5162_v15 = vpop.f32.mrf.mxu1 }
 0x8e0   : > { %v5163_v53 = vadd.f32 %v7954_v14, %v5162_v15 }
 0x8e2   : > { %v5171_v8 = vmax.f32 %v5163_v53, 0.0 }
 0x8e4   : > { %v5192_v1 = vmul.f32 %v5180_v16, %v5171_v8 }
 0x8e6   : > { %5201 = vst.msk [vmem:[#allocation5 + $0x7] sm:$0xff] %vm2856_vm5, %v5192_v1 }
 0x8e7   : > { %v5164_v7 = vpop.f32.mrf.mxu1 }
 0x8e8   : > { %v5165_v6 = vadd.f32 %v7954_v14, %v5164_v7 }
 0x8ea   : > { %v5172_v25 = vmax.f32 %v5165_v6, 0.0 }
 0x8ec   : > { %v5193_v4 = vmul.f32 %v5185_v38, %v5172_v25 }
 0x8ed   : > { %v5205_v34 = vld [vmem:[#allocation5] sm:$0xff] }
 0x8ee   : > { %5202 = vst.msk [vmem:[#allocation5 + $0xf] sm:$0xff] %vm2856_vm5, %v5193_v4  ;;  %v5256_v22 = vld [vmem:[#allocation5 + $0x1] sm:$0xff] }
 0x8ef   : > { %v5167_v52 = vpop.f32.mrf.mxu1  ;;  %v5305_v9 = vld [vmem:[#allocation5 + $0x2] sm:$0xff] }
 0x8f0   : > { %v5168_v54 = vadd.f32 %v7954_v14, %v5167_v52  ;;  %v5403_v55 = vld [vmem:[#allocation5 + $0x7] sm:$0xff] }
 0x8f1   : > { %v5354_v46 = vld [vmem:[#allocation5 + $0x6] sm:$0xff] }
 0x8f2   : > { %v5173_v17 = vmax.f32 %v5168_v54, 0.0  ;;  %v7955_v52 = vld [vmem:[%s9980_s3] ss:$0 sm:$0xff]  ;;  %s9981_s3 = sld [smem:[#allocation29_spill]] }
 0x8f4   : > { %v5194_v10 = vmul.f32 %v5190_v30, %v5173_v17 }
 0x8f5   : > { %v5206_v43 = vld [vmem:[#allocation5 + $0x8] sm:$0xff] }
 0x8f6   : > { %v5257_v62 = vld [vmem:[#allocation5 + $0x9] sm:$0xff]  ;;  %5203 = vst.msk [vmem:[#allocation5 + $0x17] sm:$0xff] %vm2856_vm5, %v5194_v10  ;;  %v5212_v36 = vpack.c.bf16 %v5206_v43, %v5205_v34 }
 0x8f7   : > { %v5306_v59 = vld [vmem:[#allocation5 + $0xa] sm:$0xff]  ;;  %v5264_v63 = vpack.c.bf16 %v5257_v62, %v5256_v22  ;;  %v5169_v27 = vpop.f32.mrf.mxu1 }
 0x8f8   : > { %v5313_v0 = vpack.c.bf16 %v5306_v59, %v5305_v9  ;;  %7185 = vmatmul.msk.bf16.vlgmr.msrb.gmra.mxu3 %vm2856_vm5, %v5212_v36  ;;  %v5404_v58 = vld [vmem:[#allocation5 + $0xf] sm:$0xff] }
 0x8f9   : > { %7199 = vmatmul.msk.bf16.vlgmr.msra.gmra.mxu0 %vm2856_vm5, %v5264_v63  ;;  %5388 = vmatpush.bf16.msrb.mxu3 %v7766_v51  ;;  %v5411_v21 = vpack.c.bf16 %v5404_v58, %v5403_v55  ;;  %v5355_v32 = vld [vmem:[#allocation5 + $0xe] sm:$0xff] }
 0x8fa   : > { %7213 = vmatmul.msk.bf16.vlgmr.msrb.gmra.mxu1 %vm2856_vm5, %v5313_v0  ;;  %5633 = vmatpush.bf16.msra.mxu0 %v7776_v47  ;;  %v5362_v29 = vpack.c.bf16 %v5355_v32, %v5354_v46  ;;  %v5501_v26 = vld [vmem:[#allocation5 + $0xc] sm:$0xff] }
 0x8fb   : > { %5535 = vmatpush.bf16.msrb.mxu1 %v7772_v50  ;;  %v5550_v1 = vld [vmem:[#allocation5 + $0xd] sm:$0xff] }
 0x8fd   : > { %v5454_v20 = vld [vmem:[#allocation5 + $0x18] sm:$0xff]  ;;  %5389 = vmatpush.bf16.msrb.mxu3 %v7765_v48  ;;  %v5207_v49 = vld [vmem:[#allocation5 + $0x10] sm:$0xff] }
 0x8fe   : > { %v5461_v42 = vpack.c.bf16 %v5454_v20, %v5454_v20  ;;  %5634 = vmatpush.bf16.msra.mxu0 %v7775_v23  ;;  %v5307_v39 = vld [vmem:[#allocation5 + $0x12] sm:$0xff]  ;;  %v5213_v41 = vpack.c.bf16 %v5207_v49, %v5207_v49  ;;  %v5460_v35 = vpack.c.bf16 %v5207_v49, %v5206_v43  ;;  %v5601_v15 = vld [vmem:[#allocation5 + $0x1e] sm:$0xff] }
 0x8ff   : > { %5536 = vmatpush.bf16.msrb.mxu1 %v7771_v31  ;;  %v5314_v2 = vpack.c.bf16 %v5307_v39, %v5307_v39  ;;  %v5258_v37 = vld [vmem:[#allocation5 + $0x11] sm:$0xff]  ;;  %v5503_v53 = vld [vmem:[#allocation5 + $0x1c] sm:$0xff]  ;;  %v5608_v8 = vpack.c.bf16 %v5601_v15, %v5601_v15 }
 0x900   : > { %7256 = vmatmul.msk.bf16.vlgmr.msrb.gmra.mxu2 %vm2856_vm5, %v5461_v42  ;;  %v5405_v56 = vld [vmem:[#allocation5 + $0x17] sm:$0xff]  ;;  %v5265_v24 = vpack.c.bf16 %v5258_v37, %v5258_v37  ;;  %v5510_v40 = vpack.c.bf16 %v5503_v53, %v5503_v53 }
 0x901   : > { %v5412_v3 = vpack.c.bf16 %v5405_v56, %v5405_v56  ;;  %v5600_v11 = vld [vmem:[#allocation5 + $0x16] sm:$0xff] }
 0x902   : > { %v5502_v45 = vld [vmem:[#allocation5 + $0x14] sm:$0xff]  ;;  %v5607_v12 = vpack.c.bf16 %v5600_v11, %v5355_v32  ;;  %v5363_v19 = vpack.c.bf16 %v5600_v11, %v5600_v11  ;;  %v5552_v6 = vld [vmem:[#allocation5 + $0x1d] sm:$0xff]  ;;  %v7777_v11 = vld [vmem:[%s9981_s3] sm:$0xff] }
 0x903   : > { %v5509_v14 = vpack.c.bf16 %v5502_v45, %v5501_v26  ;;  %v5551_v16 = vld [vmem:[#allocation5 + $0x15] sm:$0xff]  ;;  %v5559_v25 = vpack.c.bf16 %v5552_v6, %v5552_v6 }
 0x904   : > { %v5558_v7 = vpack.c.bf16 %v5551_v16, %v5550_v1 }
 0x908   : > { %7186 = vmatmul.msk.bf16.gmra.mxu3 %vm2856_vm5, %v5213_v41 }
 0x909   : > { %7241 = vmatmul.msk.bf16.vlgmr.msrb.gmra.mxu0 %vm2856_vm5, %v5411_v21 }
 0x90a   : > { %7214 = vmatmul.msk.bf16.gmra.mxu1 %vm2856_vm5, %v5314_v2 }
 0x918   : > { %7200 = vmatmul.msk.bf16.vlgmr.msra.gmra.mxu3 %vm2856_vm5, %v5265_v24 }
 0x919   : > { %7242 = vmatmul.msk.bf16.gmra.mxu0 %vm2856_vm5, %v5412_v3  ;;  %5584 = vmatpush.bf16.msra.mxu3 %v7774_v61 }
 0x91a   : > { %7255 = vmatmul.msk.bf16.vlgmr.msra.gmra.mxu1 %vm2856_vm5, %v5460_v35 }
 0x91b   : > { %5737 = vmatpush.bf16.msra.mxu1 %v7782_v57 }
 0x91d   : > { %5585 = vmatpush.bf16.msra.mxu3 %v7773_v5  ;;  %v7778_v5 = vld [vmem:[%s9981_s3 + $0x8] sm:$0xff]  ;;  %s9983_s3 = sld [smem:[#allocation33_spill]] }
 0x91e   : > { %5685 = vmatpush.bf16.msra.mxu2 %v7778_v5 }
 0x91f   : > { %5738 = vmatpush.bf16.msra.mxu1 %v7781_v13 }
 0x922   : > { %5686 = vmatpush.bf16.msra.mxu2 %v7777_v11 }
 0x923   : > { %5739 = vmatpush.bf16.msra.mxu1 %v7780_v18 }
 0x927   : > { %5740 = vmatpush.bf16.msra.mxu1 %v7779_v60 }
 0x928   : > { %7227 = vmatmul.msk.bf16.vlgmr.msrb.gmra.mxu3 %vm2856_vm5, %v5362_v29 }
 0x929   : > { %7297 = vmatmul.msk.bf16.vlgmr.msra.gmra.mxu0 %vm2856_vm5, %v5607_v12 }
 0x92a   : > { %7269 = vmatmul.msk.bf16.vlgmr.msrb.gmra.mxu1 %vm2856_vm5, %v5509_v14 }
 0x938   : > { %7228 = vmatmul.msk.bf16.gmra.mxu3 %vm2856_vm5, %v5363_v19 }
 0x939   : > { %7298 = vmatmul.msk.bf16.gmra.mxu0 %vm2856_vm5, %v5608_v8 }
 0x93a   : > { %7270 = vmatmul.msk.bf16.gmra.mxu1 %vm2856_vm5, %v5510_v40 }
 0x948   : > { %7283 = vmatmul.msk.bf16.vlgmr.msra.gmra.mxu3 %vm2856_vm5, %v5558_v7 }
 0x94a   : > { %7325 = vmatmul.msk.bf16.vlgmr.msra.gmra.mxu1 %vm5146_vm10, %v9674_v28 }
 0x958   : > { %7284 = vmatmul.msk.bf16.gmra.mxu3 %vm2856_vm5, %v5559_v25 }
 0x95a   : > { %7326 = vmatmul.msk.bf16.gmra.mxu1 %vm5146_vm10, %v9678_v33 }
 0x976   : > { %v5293_v38 = vpop.f32.mrf.mxu0 }
 0x977   : > { %v5342_v4 = vpop.f32.mrf.mxu1 }
 0x97b   : > { %v5241_v54 = vpop.f32.mrf.mxu3 }
 0x97c   : > { %v5253_v17 = vadd.f32 %v7955_v52, %v5241_v54 }
 0x97e   : > { %v5295_v30 = vpop.f32.mrf.mxu0  ;;  %v5302_v10 = vadd.f32 %v5293_v38, %v5253_v17 }
 0x97f   : > { %v5344_v34 = vpop.f32.mrf.mxu1 }
 0x980   : > { %v5351_v22 = vadd.f32 %v5342_v4, %v5302_v10 }
 0x983   : > { %v5243_v9 = vpop.f32.mrf.mxu3  ;;  %v5494_v43 = vpop.f32.mrf.mxu2 }
 0x984   : > { %v5254_v62 = vadd.f32 %v7955_v52, %v5243_v9 }
 0x986   : > { %v5440_v28 = vpop.f32.mrf.mxu0  ;;  %v5303_v59 = vadd.f32 %v5295_v30, %v5254_v62 }
 0x987   : > { %v5347_v36 = vpop.f32.mrf.mxu1 }
 0x988   : > { %v5352_v63 = vadd.f32 %v5344_v34, %v5303_v59  ;;  %v7957_v59 = vld [vmem:[%s9982_s1] ss:$0 sm:$0xff]  ;;  %s9986_s1 = sld [smem:[#allocation34_spill]] }
 0x98b   : > { %v5246_v0 = vpop.f32.mrf.mxu3  ;;  %v5496_v27 = vpop.f32.mrf.mxu2 }
 0x98c   : > { %v5255_v31 = vadd.f32 %v7955_v52, %v5246_v0  ;;  %v7789_v0 = vld [vmem:[%s9983_s3 + $0x30] sm:$0xff] }
 0x98e   : > { %v5442_v51 = vpop.f32.mrf.mxu0 }
 0x98f   : > { %v5349_v33 = vpop.f32.mrf.mxu1 }
 0x990   : > { %v7788_v33 = vld [vmem:[%s9983_s3 + $0x28] sm:$0xff] }
 0x993   : > { %v5248_v50 = vpop.f32.mrf.mxu3 }
 0x996   : > { %v5445_v47 = vpop.f32.mrf.mxu0 }
 0x997   : > { %v5489_v48 = vpop.f32.mrf.mxu1 }
 0x99b   : > { %v5298_v23 = vpop.f32.mrf.mxu3 }
 0x99c   : > { %v5304_v20 = vadd.f32 %v5298_v23, %v5255_v31 }
 0x99e   : > { %v5447_v42 = vpop.f32.mrf.mxu0  ;;  %v5353_v58 = vadd.f32 %v5347_v36, %v5304_v20  ;;  %v7790_v36 = vld [vmem:[%s9983_s3 + $0x38] sm:$0xff]  ;;  %v7787_v20 = vld [vmem:[%s9983_s3 + $0x20] sm:$0xff] }
 0x99f   : > { %v5491_v49 = vpop.f32.mrf.mxu1  ;;  %5849 = vmatpush.bf16.msrb.mxu0 %v7790_v36 }
 0x9a3   : > { %v5300_v39 = vpop.f32.mrf.mxu3  ;;  %5850 = vmatpush.bf16.msrb.mxu0 %v7789_v0 }
 0x9a4   : > { %v7786_v39 = vld [vmem:[%s9983_s3 + $0x18] sm:$0xff] }
 0x9a6   : > { %v5636_v55 = vpop.f32.mrf.mxu0 }
 0x9a7   : > { %v5538_v41 = vpop.f32.mrf.mxu1  ;;  %5851 = vmatpush.bf16.msrb.mxu0 %v7788_v33 }
 0x9ab   : > { %v5391_v21 = vpop.f32.mrf.mxu3  ;;  %5852 = vmatpush.bf16.msrb.mxu0 %v7787_v20 }
 0x9ac   : > { %v5400_v2 = vadd.f32 %v5391_v21, %v5351_v22 }
 0x9ae   : > { %v5638_v37 = vpop.f32.mrf.mxu0  ;;  %v5449_v56 = vadd.f32 %v5440_v28, %v5400_v2 }
 0x9af   : > { %v5540_v24 = vpop.f32.mrf.mxu1  ;;  %5853 = vmatpush.bf16.msrb.mxu0 %v7786_v39 }
 0x9b0   : > { %v5498_v14 = vadd.f32 %v5489_v48, %v5449_v56 }
 0x9b2   : > { %v5547_v53 = vadd.f32 %v5538_v41, %v5498_v14 }
 0x9b3   : > { %v5393_v3 = vpop.f32.mrf.mxu3 }
 0x9b4   : > { %v5401_v35 = vadd.f32 %v5393_v3, %v5352_v63  ;;  %v7956_v63 = vld [vmem:[%s9984_s4] ss:$0 sm:$0xff]  ;;  %s9985_s4 = sld [smem:[#allocation35_spill]]  ;;  %v7784_v3 = vld [vmem:[%s9983_s3 + $0x8] sm:$0xff] }
 0x9b6   : > { %v5641_v57 = vpop.f32.mrf.mxu0  ;;  %v5450_v61 = vadd.f32 %v5442_v51, %v5401_v35 }
 0x9b7   : > { %v5543_v13 = vpop.f32.mrf.mxu1 }
 0x9b8   : > { %v5499_v8 = vadd.f32 %v5491_v49, %v5450_v61  ;;  %v5757_v61 = vld [vmem:[%s8289_s19] sm:$0xf] }
 0x9ba   : > { %v5548_v16 = vadd.f32 %v5540_v24, %v5499_v8  ;;  %v7806_v5 = vld [vmem:[%s9985_s4 + $0x78] sm:$0xff]  ;;  %v7793_v11 = vld [vmem:[%s9985_s4 + $0x10] sm:$0xff]  ;;  %v7792_v14 = vld [vmem:[%s9985_s4 + $0x8] sm:$0xff] }
 0x9bb   : > { %v5396_v18 = vpop.f32.mrf.mxu3  ;;  %v7801_v8 = vld [vmem:[%s9985_s4 + $0x50] sm:$0xff]  ;;  %v7812_v44 = vld [vmem:[%s9985_s4 + $0xa8] sm:$0xff] }
 0x9bc   : > { %v5402_v32 = vadd.f32 %v5396_v18, %v5353_v58  ;;  %v7794_v18 = vld [vmem:[%s9985_s4 + $0x18] sm:$0xff] }
 0x9bd   : > { %5917 = vmatpush.bf16.msrb.mxu2 %v7794_v18 }
 0x9be   : > { %v5643_v60 = vpop.f32.mrf.mxu0  ;;  %v5451_v45 = vadd.f32 %v5445_v47, %v5402_v32  ;;  %v7805_v32 = vld [vmem:[%s9985_s4 + $0x70] sm:$0xff] }
 0x9bf   : > { %v5545_v46 = vpop.f32.mrf.mxu1 }
 0x9c0   : > { %v5500_v29 = vadd.f32 %v5494_v43, %v5451_v45 }
 0x9c1   : > { %5918 = vmatpush.bf16.msrb.mxu2 %v7793_v11 }
 0x9c2   : > { %v5549_v30 = vadd.f32 %v5543_v13, %v5500_v29  ;;  %v7783_v13 = vld [vmem:[%s9983_s3] sm:$0xff]  ;;  %v7804_v29 = vld [vmem:[%s9985_s4 + $0x68] sm:$0xff] }
 0x9c3   : > { %v5398_v26 = vpop.f32.mrf.mxu3 }
 0x9c4   : > { %v7798_v26 = vld [vmem:[%s9985_s4 + $0x38] sm:$0xff] }
 0x9c5   : > { %5919 = vmatpush.bf16.msrb.mxu2 %v7792_v14 }
 0x9c7   : > { %v5742_v12 = vpop.f32.mrf.mxu1 }
 0x9c8   : > { %v5743_v51 = vadd.f32 %v7956_v63, %v5742_v12  ;;  %v7802_v12 = vld [vmem:[%s9985_s4 + $0x58] sm:$0xff] }
 0x9c9   : > { %6024 = vmatpush.bf16.msrb.mxu1 %v7802_v12 }
 0x9cb   : > { %v5587_v15 = vpop.f32.mrf.mxu3 }
 0x9cc   : > { %v5596_v40 = vadd.f32 %v5587_v15, %v5547_v53  ;;  %v7803_v15 = vld [vmem:[%s9985_s4 + $0x60] sm:$0xff]  ;;  %v7797_v53 = vld [vmem:[%s9985_s4 + $0x30] sm:$0xff] }
 0x9cd   : > { %6025 = vmatpush.bf16.msrb.mxu1 %v7801_v8 }
 0x9ce   : > { %v5645_v7 = vadd.f32 %v5636_v55, %v5596_v40  ;;  %v7791_v40 = vld [vmem:[%s9985_s4] sm:$0xff] }
 0x9cf   : > { %v5744_v19 = vpop.f32.mrf.mxu1  ;;  %5920 = vmatpush.bf16.msrb.mxu2 %v7791_v40 }
 0x9d0   : > { %v5648_v4 = vmax.f32 %v5645_v7, 0.0  ;;  %v5745_v47 = vadd.f32 %v7956_v63, %v5744_v19  ;;  %v7822_v19 = vld [vmem:[%s9985_s4 + $0xf8] sm:$0xff]  ;;  %v7821_v7 = vld [vmem:[%s9985_s4 + $0xf0] sm:$0xff] }
 0x9d3   : > { %v5589_v1 = vpop.f32.mrf.mxu3 }
 0x9d4   : > { %v5597_v6 = vadd.f32 %v5589_v1, %v5548_v16  ;;  %v7810_v16 = vld [vmem:[%s9985_s4 + $0x98] sm:$0xff]  ;;  %v7796_v1 = vld [vmem:[%s9985_s4 + $0x28] sm:$0xff] }
 0x9d6   : > { %v5646_v25 = vadd.f32 %v5638_v37, %v5597_v6  ;;  %v7785_v37 = vld [vmem:[%s9983_s3 + $0x10] sm:$0xff]  ;;  %v7800_v6 = vld [vmem:[%s9985_s4 + $0x48] sm:$0xff]  ;;  %s9987_s3 = sld [smem:[#allocation39_spill]] }
 0x9d7   : > { %v5747_v38 = vpop.f32.mrf.mxu1  ;;  %5854 = vmatpush.bf16.msrb.mxu0 %v7785_v37  ;;  %6026 = vmatpush.bf16.msrb.mxu1 %v7800_v6 }
 0x9d8   : > { %v5649_v52 = vmax.f32 %v5646_v25, 0.0  ;;  %v5748_v41 = vadd.f32 %v7956_v63, %v5747_v38  ;;  %v7809_v25 = vld [vmem:[%s9985_s4 + $0x90] sm:$0xff]  ;;  %v7795_v38 = vld [vmem:[%s9985_s4 + $0x20] sm:$0xff] }
 0x9da   : > { %v5655_v54 = vpack.c.bf16 %v5649_v52, %v5648_v4  ;;  %v7820_v4 = vld [vmem:[%s9985_s4 + $0xe8] sm:$0xff]  ;;  %v7799_v52 = vld [vmem:[%s9985_s4 + $0x40] sm:$0xff] }
 0x9db   : > { %v5592_v17 = vpop.f32.mrf.mxu3  ;;  %5855 = vmatpush.bf16.msrb.mxu0 %v7784_v3  ;;  %6027 = vmatpush.bf16.msrb.mxu1 %v7799_v52 }
 0x9dc   : > { %7307 = vmatmul.msk.bf16.vlgmr.msra.gmra.mxu2 %vm2856_vm5, %v5655_v54  ;;  %v5598_v10 = vadd.f32 %v5592_v17, %v5549_v30  ;;  %v7814_v54 = vld [vmem:[%s9985_s4 + $0xb8] sm:$0xff]  ;;  %v7808_v30 = vld [vmem:[%s9985_s4 + $0x88] sm:$0xff]  ;;  %v7629_v40 = vld [vmem:[%s9987_s3 + $0x20] sm:$0xf] }
 0x9dd   : > { %6128 = vmatpush.bf16.msra.mxu2 %v7810_v16  ;;  %v7818_v17 = vld [vmem:[%s9985_s4 + $0xd8] sm:$0xff]  ;;  %v7847_v6 = vld [vmem:[%s9987_s3 + $0x64] sm:$0xf]  ;;  %v7621_v52 = vld [vmem:[%s9987_s3 + $0x10] sm:$0xf] }
 0x9de   : > { %v5647_v22 = vadd.f32 %v5641_v57, %v5598_v10  ;;  %v7819_v10 = vld [vmem:[%s9985_s4 + $0xe0] sm:$0xff]  ;;  %v7846_v3 = vld [vmem:[%s9987_s3 + $0x54] sm:$0xf0] }
 0x9df   : > { %v5749_v34 = vpop.f32.mrf.mxu1  ;;  %5856 = vmatpush.bf16.msrb.mxu0 %v7783_v13  ;;  %6232 = vmatpush.bf16.msra.mxu1 %v7818_v17  ;;  %v7844_v13 = vld [vmem:[%s9987_s3 + $0x44] sm:$0xf0]  ;;  %v7842_v11 = vld [vmem:[%s9987_s3 + $0x34] sm:$0xf0]  ;;  %v7845_v17 = vld [vmem:[%s9987_s3 + $0x54] sm:$0xf] }
 0x9e0   : > { %v5650_v43 = vmax.f32 %v5647_v22, 0.0  ;;  %v7813_v34 = vld [vmem:[%s9985_s4 + $0xb0] sm:$0xff] }
 0x9e1   : > { %6129 = vmatpush.bf16.msra.mxu2 %v7809_v25  ;;  %v7817_v22 = vld [vmem:[%s9985_s4 + $0xd0] sm:$0xff]  ;;  %v7663_v25 = vld [vmem:[%s9987_s3 + $0x68] sm:$0xf0] }
 0x9e2   : > { %v5656_v62 = vpack.c.bf16 %v5650_v43, %v5650_v43  ;;  %v7816_v43 = vld [vmem:[%s9985_s4 + $0xc8] sm:$0xff] }
 0x9e3   : > { %v5594_v9 = vpop.f32.mrf.mxu3  ;;  %6076 = vmatpush.bf16.msra.mxu0 %v7806_v5  ;;  %6233 = vmatpush.bf16.msra.mxu1 %v7817_v22  ;;  %v7823_v5 = vld [vmem:[%s9985_s4 + $0x100] sm:$0xff] }
 0x9e4   : > { %v7807_v9 = vld [vmem:[%s9985_s4 + $0x80] sm:$0xff] }
 0x9e5   : > { %6130 = vmatpush.bf16.msra.mxu2 %v7808_v30  ;;  %v7655_v30 = vld [vmem:[%s9987_s3 + $0x58] sm:$0xf0]  ;;  %v7613_v22 = vld [vmem:[%s9987_s3] sm:$0xf] }
 0x9e7   : > { %6077 = vmatpush.bf16.msra.mxu0 %v7805_v32  ;;  %6234 = vmatpush.bf16.msra.mxu1 %v7816_v43  ;;  %v7637_v32 = vld [vmem:[%s9987_s3 + $0x30] sm:$0xf]  ;;  %v7647_v43 = vld [vmem:[%s9987_s3 + $0x48] sm:$0xf0] }
 0x9e9   : > { %6131 = vmatpush.bf16.msra.mxu2 %v7807_v9  ;;  %v7836_v9 = vld [vmem:[%s9987_s3 + $0x4] sm:$0xf0] }
 0x9eb   : > { %6078 = vmatpush.bf16.msra.mxu0 %v7804_v29 }
 0x9ec   : > { %7308 = vmatmul.msk.bf16.gmra.mxu2 %vm2856_vm5, %v5656_v62  ;;  %v7958_v62 = vld [vmem:[%s9986_s1] ss:$0 sm:$0xff]  ;;  %s9988_s1 = sld [smem:[#allocation37_spill]] }
 0x9ef   : > { %6079 = vmatpush.bf16.msra.mxu0 %v7803_v15  ;;  %v7638_v15 = vor.u32 %v7842_v11, %v7637_v32 }
 0xa5f   : > { %v5688_v28 = vpop.f32.mrf.mxu2 }
 0xa60   : > { %v5689_v27 = vadd.f32 %v7957_v59, %v5688_v28  ;;  %v7811_v28 = vld [vmem:[%s9985_s4 + $0xa0] sm:$0xff] }
 0xa62   : > { %v5751_v48 = vadd.f32 %v5743_v51, %v5689_v27  ;;  %v5867_v27 = vpop.permute.xlu2 %5866 }
 0xa64   : > { %v5754_v42 = vmax.f32 %v5751_v48, 0.0 }
 0xa67   : > { %v5690_v50 = vpop.f32.mrf.mxu2 }
 0xa68   : > { %v5691_v31 = vadd.f32 %v7957_v59, %v5690_v50  ;;  %v7669_v50 = vld [vmem:[%s9987_s3 + $0x70] sm:$0xf] }
 0xa6a   : > { %v5752_v23 = vadd.f32 %v5745_v47, %v5691_v31  ;;  %v7850_v47 = vld [vmem:[%s9987_s3 + $0x74] sm:$0xf0] }
 0xa6b   : > { %v7670_v39 = vor.u32 %v7850_v47, %v7669_v50  ;;  %v7837_v47 = vld [vmem:[%s9987_s3 + $0x14] sm:$0xf] }
 0xa6c   : > { %v5755_v49 = vmax.f32 %v5752_v23, 0.0 }
 0xa6e   : > { %v5758_v58 = vpack.c.bf16 %v5755_v49, %v5754_v42 }
 0xa6f   : > { %v5693_v55 = vpop.f32.mrf.mxu2 }
 0xa70   : > { %v5694_v21 = vadd.f32 %v7957_v59, %v5693_v55  ;;  %v7815_v59 = vld [vmem:[%s9985_s4 + $0xc0] sm:$0xff]  ;;  %v7826_v55 = vld [vmem:[%s9985_s4 + $0x118] sm:$0xff] }
 0xa71   : > { %6235 = vmatpush.bf16.msra.mxu1 %v7815_v59 }
 0xa72   : > { %v5753_v2 = vadd.f32 %v5748_v41, %v5694_v21  ;;  %v7661_v21 = vld [vmem:[%s9987_s3 + $0x60] sm:$0xf] }
 0xa74   : > { %v5756_v56 = vmax.f32 %v5753_v2, 0.0  ;;  %v7848_v2 = vld [vmem:[%s9987_s3 + $0x64] sm:$0xf0] }
 0xa75   : > { %v7662_v37 = vor.u32 %v7848_v2, %v7661_v21 }
 0xa76   : > { %v5759_v24 = vpack.c.bf16 %v5756_v56, %v5756_v56  ;;  %v7825_v56 = vld [vmem:[%s9985_s4 + $0x110] sm:$0xff] }
 0xa77   : > { %v5695_v35 = vpop.f32.mrf.mxu2 }
 0xa78   : > { %v5765_v57 = vsel %vm2999_vm6, %v5759_v24, 0  ;;  %v7653_v24 = vld [vmem:[%s9987_s3 + $0x50] sm:$0xf] }
 0xa79   : > { %5773 = vmatpush.bf16.msrb.mxu3 %v5765_v57  ;;  %v7654_v35 = vor.u32 %v7846_v3, %v7653_v24  ;;  %v7824_v57 = vld [vmem:[%s9985_s4 + $0x108] sm:$0xff]  ;;  %s9989_s4 = sld [smem:[#allocation36_spill]]  ;;  %v7831_v3 = vld [vmem:[%s9988_s1 + $0x24] sm:$0xf] }
 0xa7a   : > { %v7832_v24 = vld [vmem:[%s9988_s1 + $0x24] sm:$0xf0] }
 0xa7d   : > { %5774 = vmatpush.bf16.msrb.mxu3 %v5758_v58 }
 0xa80   : > { %7327 = vmatmul.msk.bf16.vlgmr.msrb.gmra.mxu3 %vm5760_vm12, %v5757_v61  ;;  %v7645_v61 = vld [vmem:[%s9987_s3 + $0x40] sm:$0xf] }
 0xa81   : > { %5972 = vmatpush.bf16.msra.mxu3 %v7798_v26  ;;  %v7646_v18 = vor.u32 %v7844_v13, %v7645_v61  ;;  %v7671_v26 = vld [vmem:[%s9987_s3 + $0x78] sm:$0xf0] }
 0xa85   : > { %5973 = vmatpush.bf16.msra.mxu3 %v7797_v53 }
 0xa89   : > { %5974 = vmatpush.bf16.msra.mxu3 %v7796_v1 }
 0xa8d   : > { %5975 = vmatpush.bf16.msra.mxu3 %v7795_v38 }
 0xa91   : > { %6180 = vmatpush.bf16.msrb.mxu3 %v7814_v54  ;;  %v7838_v54 = vld [vmem:[%s9987_s3 + $0x14] sm:$0xf0] }
 0xa95   : > { %6181 = vmatpush.bf16.msrb.mxu3 %v7813_v34  ;;  %v7658_v34 = vor.u32 %v7845_v17, %v7655_v30 }
 0xa99   : > { %6182 = vmatpush.bf16.msrb.mxu3 %v7812_v44  ;;  %v7843_v44 = vld [vmem:[%s9987_s3 + $0x44] sm:$0xf] }
 0xa9d   : > { %6183 = vmatpush.bf16.msrb.mxu3 %v7811_v28  ;;  %v7650_v28 = vor.u32 %v7843_v44, %v7647_v43 }
 0xb03   : > { %v5776_v60 = vpop.f32.mrf.mxu3 }
 0xb04   : > { %v9752_v45 = vpack.c.bf16 %v5776_v60, %v5776_v60  ;;  %v7849_v60 = vld [vmem:[%s9987_s3 + $0x74] sm:$0xf] }
 0xb05   : > { %v7674_v8 = vor.u32 %v7849_v60, %v7671_v26  ;;  %v7587_v60 = vld [vmem:[%s9988_s1 + $0x10] sm:$0xf] }
 0xb06   : > { %5857 = vmatmul.bf16.vlgmr.msrb.gmra.mxu0 %v9752_v45 }
 0xb07   : > { %6284 = vmatpush.bf16.msrb.mxu0 %v7822_v19 }
 0xb0b   : > { %v5778_v46 = vpop.f32.mrf.mxu3  ;;  %6285 = vmatpush.bf16.msrb.mxu0 %v7821_v7  ;;  %v7840_v7 = vld [vmem:[%s9987_s3 + $0x24] sm:$0xf0] }
 0xb0c   : > { %v7630_v38 = vor.u32 %v7840_v7, %v7629_v40 }
 0xb0f   : > { %6286 = vmatpush.bf16.msrb.mxu0 %v7820_v4  ;;  %v7666_v4 = vor.u32 %v7847_v6, %v7663_v25 }
 0xb13   : > { %6287 = vmatpush.bf16.msrb.mxu0 %v7819_v10  ;;  %v7622_v10 = vor.u32 %v7838_v54, %v7621_v52 }
 0xb83   : > { %v5858_v36 = vpop.f32.mrf.mxu0 }
 0xb84   : > { %v5859_v63 = vadd.f32 %v7958_v62, %v5858_v36  ;;  %v7614_v62 = vor.u32 %v7836_v9, %v7613_v22  ;;  %v7841_v36 = vld [vmem:[%s9987_s3 + $0x34] sm:$0xf] }
 0xb86   : > { %v5862_v0 = vmax.f32 %v5859_v63, 0.0  ;;  %v7639_v63 = vld [vmem:[%s9987_s3 + $0x38] sm:$0xf0] }
 0xb88   : > { %v5869_v51 = vmul.f32 %v5867_v27, %v5862_v0  ;;  %v7642_v27 = vor.u32 %v7841_v36, %v7639_v63 }
 0xb8a   : > { %5874 = vst.msk [vmem:[#allocation6 + $0x5] sm:$0xff] %vm5146_vm10, %v5869_v51  ;;  %v7839_v51 = vld [vmem:[%s9987_s3 + $0x24] sm:$0xf] }
 0xb8b   : > { %v5860_v33 = vpop.f32.mrf.mxu0 }
 0xb8c   : > { %v7631_v33 = vld [vmem:[%s9987_s3 + $0x28] sm:$0xf0] }
 0xb8d   : > { %v7634_v50 = vor.u32 %v7839_v51, %v7631_v33 }
 0xb91   : > { %v5876_v48 = vld [vmem:[#allocation6] sm:$0xff]  ;;  %v6190_v12 = vld [vmem:[#allocation6 + $0x8] sm:$0xff] }
 0xb92   : > { %v5930_v31 = vld [vmem:[#allocation6 + $0x1] sm:$0xff]  ;;  %v5885_v20 = vpack.c.bf16 %v5876_v48, %v5876_v48  ;;  %v6242_v14 = vld [vmem:[#allocation6 + $0x9] sm:$0xff]  ;;  %v6200_v16 = vpack.c.bf16 %v6190_v12, %v6190_v12  ;;  %v7623_v48 = vld [vmem:[%s9987_s3 + $0x18] sm:$0xf0] }
 0xb93   : > { %v5982_v23 = vld [vmem:[#allocation6 + $0x2] sm:$0xff]  ;;  %v5940_v42 = vpack.c.bf16 %v5930_v31, %v5930_v31  ;;  %v6252_v1 = vpack.c.bf16 %v6242_v14, %v6242_v14  ;;  %v6294_v59 = vld [vmem:[#allocation6 + $0xa] sm:$0xff]  ;;  %v7626_v31 = vor.u32 %v7837_v47, %v7623_v48  ;;  %v7589_v12 = vld [vmem:[%s9988_s1 + $0x18] sm:$0xf0] }
 0xb94   : > { %v5992_v49 = vpack.c.bf16 %v5982_v23, %v5982_v23  ;;  %v6034_v58 = vld [vmem:[#allocation6 + $0x4] sm:$0xff]  ;;  %7376 = vmatmul.msk.bf16.vlgmr.msrb.gmra.mxu2 %vm5146_vm10, %v5885_v20  ;;  %v6304_v0 = vpack.c.bf16 %v6294_v59, %v6294_v59  ;;  %v7615_v20 = vld [vmem:[%s9987_s3 + $0x8] sm:$0xf0]  ;;  %v7579_v14 = vld [vmem:[%s9988_s1] sm:$0xf] }
 0xb95   : > { %v6044_v41 = vpack.c.bf16 %v6034_v58, %v6034_v58  ;;  %7401 = vmatmul.msk.bf16.vlgmr.msra.gmra.mxu3 %vm5146_vm10, %v5940_v42  ;;  %6336 = vmatpush.bf16.msrb.mxu2 %v7826_v55  ;;  %v6086_v46 = vld [vmem:[#allocation6 + $0x5] sm:$0xff]  ;;  %v7834_v58 = vld [vmem:[%s9988_s1 + $0x34] sm:$0xf0] }
 0xb96   : > { %7426 = vmatmul.msk.bf16.vlgmr.msrb.gmra.mxu1 %vm5146_vm10, %v5992_v49  ;;  %v6138_v29 = vld [vmem:[#allocation6 + $0x6] sm:$0xff]  ;;  %v6096_v53 = vpack.c.bf16 %v6086_v46, %v6086_v46  ;;  %v7603_v49 = vld [vmem:[%s9988_s1 + $0x30] sm:$0xf]  ;;  %v7830_v46 = vld [vmem:[%s9988_s1 + $0x14] sm:$0xf0] }
 0xb97   : > { %7451 = vmatmul.msk.bf16.vlgmr.msra.gmra.mxu0 %vm5146_vm10, %v6044_v41  ;;  %v6148_v19 = vpack.c.bf16 %v6138_v29, %v6138_v29  ;;  %v7835_v23 = vld [vmem:[%s9987_s3 + $0x4] sm:$0xf]  ;;  %v7604_v55 = vor.u32 %v7834_v58, %v7603_v49  ;;  %v7605_v41 = vld [vmem:[%s9988_s1 + $0x38] sm:$0xf0]  ;;  %v7829_v29 = vld [vmem:[%s9988_s1 + $0x14] sm:$0xf]  ;;  %v7588_v26 = vor.u32 %v7830_v46, %v7587_v60 }
 0xb98   : > { %6533 = vmatpush.bf16.msra.mxu0 %v7670_v39  ;;  %v7618_v42 = vor.u32 %v7835_v23, %v7615_v20  ;;  %v7833_v39 = vld [vmem:[%s9988_s1 + $0x34] sm:$0xf]  ;;  %s1285_s3 = sand.u32 1, %s8015_s23  }
 0xb99   : > { %6337 = vmatpush.bf16.msrb.mxu2 %v7825_v56  ;;  %v7608_v21 = vor.u32 %v7833_v39, %v7605_v41  ;;  %6409 = vmatpush.bf16.msra.mxu3 %v7604_v55  ;;  %v7595_v56 = vld [vmem:[%s9988_s1 + $0x20] sm:$0xf]  ;;  %s6688_s5 = sshll.u32 %s1285_s3, 4  ;;  %s6566_s0 = scalar_lea.sflag [#allocation8], %s1285_s3 }
 0xb9a   : > { %s1287_s8 = scalar_lea.vmem [#allocation7], %s6688_s5  ;;  %s7981_s5 = scalar_lea.hbm %s8294_s12, 32 }
 0xb9b   : > { %6422 = vmatpush.bf16.msrb.mxu1 %v7608_v21 }
 0xb9c   : > { %6534 = vmatpush.bf16.msra.mxu0 %v7662_v37 }
 0xb9d   : > { %6338 = vmatpush.bf16.msrb.mxu2 %v7824_v57 }
 0xba0   : > { %6535 = vmatpush.bf16.msra.mxu0 %v7654_v35  ;;  %v7596_v35 = vor.u32 %v7832_v24, %v7595_v56 }
 0xba1   : > { %6339 = vmatpush.bf16.msrb.mxu2 %v7823_v5  ;;  %v7959_v5 = vld [vmem:[%s9989_s4] ss:$0 sm:$0xff]  ;;  %s9990_s4 = sld [smem:[#allocation38_spill]] }
 0xba2   : > { %6410 = vmatpush.bf16.msra.mxu3 %v7596_v35 }
 0xba4   : > { %6536 = vmatpush.bf16.msra.mxu0 %v7646_v18  ;;  %7476 = vmatmul.msk.bf16.vlgmr.msra.gmra.mxu2 %vm5146_vm10, %v6096_v53  ;;  %v7592_v53 = vor.u32 %v7829_v29, %v7589_v12 }
 0xba5   : > { %7501 = vmatmul.msk.bf16.vlgmr.msrb.gmra.mxu3 %vm5146_vm10, %v6148_v19  ;;  %6546 = vmatpush.bf16.msra.mxu2 %v7674_v8  ;;  %v7827_v19 = vld [vmem:[%s9988_s1 + $0x4] sm:$0xf]  ;;  %v7581_v8 = vld [vmem:[%s9988_s1 + $0x8] sm:$0xf0] }
 0xba6   : > { %7526 = vmatmul.msk.bf16.vlgmr.msra.gmra.mxu1 %vm5146_vm10, %v6200_v16  ;;  %6411 = vmatpush.bf16.msra.mxu3 %v7588_v26  ;;  %v7584_v6 = vor.u32 %v7827_v19, %v7581_v8 }
 0xba7   : > { %7551 = vmatmul.msk.bf16.vlgmr.msrb.gmra.mxu0 %vm5146_vm10, %v6252_v1  ;;  %v6356_v47 = vld [vmem:[%s9990_s4] sm:$0x3]  ;;  %s6581_s4 = sshll.u32 %s6577_s7, 4  ;;  %s6582_s4 = int_to_ptr.hbm [resolvable:$true] %s6581_s4 }
 0xba8   : > { %6537 = vmatpush.bf16.msra.mxu0 %v7638_v15  ;;  %v7828_v15 = vld [vmem:[%s9988_s1 + $0x4] sm:$0xf0]  ;;  %v6359_v23 = vperm.slane %v6356_v47, 1  ;;  %v6358_v55 = vperm.slane %v6356_v47, 0  ;;  %s7975_s9 = sshra.s32 %s6582_s4, 4  ;;  %s7976_s9 = int_to_ptr.hbm [resolvable:$true] %s7975_s9 }
 0xba9   : > { %6547 = vmatpush.bf16.msra.mxu2 %v7666_v4  ;;  %v7580_v1 = vor.u32 %v7828_v15, %v7579_v14  ;;  %s7977_s6 = scalar_lea.hbm %s7976_s9, 16  ;;  %p7982_p0 = scmp.lt.s32.totalorder %s7976_s9, %s8294_s12 }
 0xbaa   : > { %p7978_p11 = scmp.ne.s32.totalorder %s7976_s9, %s7977_s6  ;;  %p7983_p1 = scmp.lt.s32.totalorder %s7981_s5, %s7977_s6 }
 0xbab   : > { %6412 = vmatpush.bf16.msra.mxu3 %v7580_v1 }
 0xbac   : > { %6538 = vmatpush.bf16.msra.mxu0 %v7630_v38  ;;  %p7979_p12 = pnand %p7978_p11, %p8334_p5  ;;  %p7984_p2 = por %p7983_p1, %p7982_p0 }
 0xbad   : > { %6548 = vmatpush.bf16.msra.mxu2 %v7658_v34 }
 0xbae   : > { %p7980_p13 = pneg %p7979_p12 }
 0xbb0   : > { %6539 = vmatpush.bf16.msra.mxu0 %v7622_v10  ;;  %p7985_p3 = pnand %p7984_p2, %p7980_p13 }
 0xbb1   : > { %6549 = vmatpush.bf16.msra.mxu2 %v7650_v28 }
 0xbb4   : > { %6540 = vmatpush.bf16.msra.mxu0 %v7614_v62  ;;  %7576 = vmatmul.msk.bf16.vlgmr.msrb.gmra.mxu2 %vm5146_vm10, %v6304_v0 }
 0xbb5   : > { %6550 = vmatpush.bf16.msra.mxu2 %v7642_v27 }
 0xbb7   : > { %6541 = vmatmul.bf16.vlgmr.msra.gmra.mxu0 %v9752_v45 }
 0xbb9   : > { %6551 = vmatpush.bf16.msra.mxu2 %v7634_v50 }
 0xbbd   : > { %6552 = vmatpush.bf16.msra.mxu2 %v7626_v31 }
 0xbc1   : > { %6553 = vmatpush.bf16.msra.mxu2 %v7618_v42 }
 0xbc4   : > { %6554 = vmatmul.bf16.vlgmr.msra.gmra.mxu2 %v9752_v45  ;;  %v7597_v45 = vld [vmem:[%s9988_s1 + $0x28] sm:$0xf0]  ;;  %s9991_s1 = sld [smem:[#allocation40_spill]] }
 0xbc5   : > { %v7600_v57 = vor.u32 %v7831_v3, %v7597_v45 }
 0xbc7   : > { %6423 = vmatpush.bf16.msrb.mxu1 %v7600_v57 }
 0xbca   : > { %v6447_v48 = vld [vmem:[%s9991_s1] sm:$0x3]  ;;  %s6579_s1 = sshll.u32 %s1287_s8, 4  ;;  %s6580_s1 = int_to_ptr.vmem [resolvable:$true] %s6579_s1 }
 0xbcb   : > { %6424 = vmatpush.bf16.msrb.mxu1 %v7592_v53  ;;  %v6450_v31 = vperm.slane %v6447_v48, 1  ;;  %v6449_v58 = vperm.slane %v6447_v48, 0 }
 0xbcf   : > { %6425 = vmatpush.bf16.msrb.mxu1 %v7584_v6 }
 0xc13   : > { %v6029_v2 = vpop.f32.mrf.mxu1 }
 0xc14   : > { %v6081_v37 = vpop.f32.mrf.mxu0 }
 0xc17   : > { %v5922_v61 = vpop.f32.mrf.mxu2 }
 0xc18   : > { %v5977_v13 = vpop.f32.mrf.mxu3  ;;  %v5929_v11 = vadd.f32 %v7959_v5, %v5922_v61 }
 0xc1a   : > { %v5981_v7 = vadd.f32 %v5977_v13, %v5929_v11 }
 0xc1b   : > { %v6031_v18 = vpop.f32.mrf.mxu1 }
 0xc1c   : > { %v6083_v32 = vpop.f32.mrf.mxu0  ;;  %v6033_v4 = vadd.f32 %v6029_v2, %v5981_v7 }
 0xc1e   : > { %v6085_v17 = vadd.f32 %v6081_v37, %v6033_v4 }
 0xc1f   : > { %v5924_v40 = vpop.f32.mrf.mxu2 }
 0xc20   : > { %v5979_v16 = vpop.f32.mrf.mxu3 }
 0xc23   : > { %v6237_v25 = vpop.f32.mrf.mxu1 }
 0xc24   : > { %v6289_v38 = vpop.f32.mrf.mxu0 }
 0xc27   : > { %v6133_v52 = vpop.f32.mrf.mxu2 }
 0xc28   : > { %v6185_v54 = vpop.f32.mrf.mxu3  ;;  %v6137_v30 = vadd.f32 %v6133_v52, %v6085_v17 }
 0xc2a   : > { %v6189_v22 = vadd.f32 %v6185_v54, %v6137_v30 }
 0xc2b   : > { %v6239_v10 = vpop.f32.mrf.mxu1 }
 0xc2c   : > { %v6291_v34 = vpop.f32.mrf.mxu0  ;;  %v6241_v43 = vadd.f32 %v6237_v25, %v6189_v22 }
 0xc2e   : > { %v6293_v28 = vadd.f32 %v6289_v38, %v6241_v43 }
 0xc2f   : > { %v6135_v9 = vpop.f32.mrf.mxu2 }
 0xc30   : > { %v6187_v44 = vpop.f32.mrf.mxu3 }
 0xc34   : > { %v6542_v62 = vpop.f32.mrf.mxu0 }
 0xc35   : > { %v6543_v2 = vadd.f32 %v6542_v62, %v6449_v58 }
 0xc37   : > { %v6341_v59 = vpop.f32.mrf.mxu2 }
 0xc38   : > { %v6345_v36 = vadd.f32 %v6341_v59, %v6293_v28 }
 0xc3a   : > { %v6346_v63 = vmax.f32 %v6345_v36, 0.0 }
 0xc3c   : > { %v6544_v0 = vpop.f32.mrf.mxu0  ;;  %v6355_v27 = vpack.c.bf16 %v6346_v63, %v6346_v63 }
 0xc3e   : > { %7609 = vmatmul.msk.bf16.vlgmr.msra.gmra.mxu3 %vm5146_vm10, %v6355_v27  ;;  %7610 = vmatmul.msk.bf16.vlgmr.msrb.gmra.mxu1 %vm5146_vm10, %v6355_v27 }
 0xc3f   : > { %v6343_v51 = vpop.f32.mrf.mxu2 }
 0xc47   : > { %v6555_v33 = vpop.f32.mrf.mxu2 }
 0xc48   : > { %v6556_v42 = vadd.f32 %v6555_v33, %v6450_v31 }
 0xc4f   : > { %v6557_v50 = vpop.f32.mrf.mxu2 }
 0xcbb   : > { %v6427_v20 = vpop.f32.mrf.mxu1 }
 0xcbc   : > { %v6428_v49 = vadd.f32 %v6427_v20, %v6359_v23 }
 0xcbe   : > { %v6560_v39 = vadd.f32 %v6556_v42, %v6428_v49 }
 0xcc0   : > { %v6562_v41 = vmax.f32 %v6560_v39, 0.0 }
 0xcc1   : > { %v6414_v21 = vpop.f32.mrf.mxu3 }
 0xcc2   : > { %6564 = vst [vmem:[%s1287_s8 + $0x8] sm:$0xff] %v6562_v41  ;;  %v6415_v37 = vadd.f32 %v6414_v21, %v6358_v55 }
 0xcc3   : > { %v6429_v56 = vpop.f32.mrf.mxu1 }
 0xcc4   : > { %v6559_v24 = vadd.f32 %v6543_v2, %v6415_v37 }
 0xcc6   : > { %v6561_v3 = vmax.f32 %v6559_v24, 0.0 }
 0xcc8   : > { %6563 = vst [vmem:[%s1287_s8] sm:$0xff] %v6561_v3 }
 0xcc9   : > { %v6416_v35 = vpop.f32.mrf.mxu3 }
 0xcca   : > { %7988 = shalt.err (!%p7985_p3)
}
 0xccb   : > { %7857 = dma.vmem_to_hbm [thread:$0]  (%p8334_p5), %s6580_s1, 256, %s6582_s4, %s6566_s0  }
 0xccc PF: > { %p7863_p4 = scmp.ge.s32.totalorder %s8023_s28, 2  ;;  %s6593_s8 = sand.u32 1, %s8011_s22  }
 0xccd   : > { %s6594_s7 = scalar_lea.sflag [#allocation8], %s6593_s8 }
 0xcce   : > { %p7860_p7 = pnand %p7863_p4, %p8338_p6 }
 0xcd0   : > { %p7861_p8 = pneg %p7860_p7 }
 0xcd2   : > { %8006 = dma.done.wait (%p7861_p8), %s6594_s7, 256  }
 0xcd3   : > { %8008 = vsyncadd (%p7861_p8), %s6594_s7, 4294967040  ;;  %p97_p9 = scmp.ge.s32.totalorder %s8321_s2, 4   ;;  %s9992_s22 = smov %s8015_s23 }
 0xcd4   : > { %s9993_s23 = smov %s8019_s26  ;;  %s9994_s26 = smov %s8332_s11 }
 0xcd5   : > { %s9995_s28 = smov %s8321_s2  ;;  %99 = sbr.rel (!%p97_p9) target bundleno = 81 (0x51), region = 302 }
 0xcda   :  { %6600 = vsyncpa [#allocation8], 1 }
 0xcdb   :  { %6602 = vsyncpa [#allocation8 + $0x1], 1 }

</bundles_post_ra>
